<compile_context>
chip_gen: v7x
topology: tpu7x:2x2x1
jax: 0.10.0
libtpu: 0.0.40
codegen_flags: <defaults>
</compile_context>

<pallas_src>
import jax
import jax.numpy as jnp
from jax import lax
from jax.experimental import pallas as pl
from jax.experimental.pallas import tpu as pltpu

INPUT_SIZE = 1      # forward() does x.unsqueeze(-1), so per-step feature dim is 1
HIDDEN_SIZE = 192
OUTPUT_SIZE = 1
NUM_GATES = 4
GATE_PAD = 256      # each gate block padded 192 -> 256 columns (lane-aligned slices)


def lstm_kernel(x_ref, wih_ref, bias_ref, whh_ref, wfc_ref, bfc_ref, out_ref):
    T = x_ref.shape[0]
    B = x_ref.shape[1]
    H = whh_ref.shape[0]
    GT = whh_ref.shape[1]            # 4 * GATE_PAD

    whh = whh_ref[...]                                     # (H, GT) recurrent weights
    # Loop-invariant broadcasts hoisted out of the unrolled time loop.
    wih_b = jnp.broadcast_to(wih_ref[...], (B, GT))        # (B, GT)
    bias_b = jnp.broadcast_to(bias_ref[...], (B, GT))      # (B, GT)

    def sigmoid(v):
        # Single EUP tanh instead of exp + reciprocal (mul/add go to spare VALU slots).
        return 0.5 * (jnp.tanh(0.5 * v) + 1.0)

    def gate(g, k):
        # Gate blocks start at lane-aligned offsets 0 / 256 / 512 / 768.
        return g[:, k * GATE_PAD:k * GATE_PAD + H]

    # ---- peeled step 0: h0 = c0 = 0, so the recurrent matmul and f-gate vanish ----
    gates0 = x_ref[0] * wih_b + bias_b                     # (B, GT)
    c = sigmoid(gate(gates0, 0)) * jnp.tanh(gate(gates0, 2))
    h = sigmoid(gate(gates0, 3)) * jnp.tanh(c)

    def step(t, carry):
        h, c = carry
        # Only the recurrent matmul sits on the serial h->h critical path; the
        # x[t]*w_ih + bias VPU work has no h dependence and hides under it.
        gates = (x_ref[t] * wih_b + bias_b
                 + jnp.dot(h, whh, preferred_element_type=jnp.float32))
        i_g = sigmoid(gate(gates, 0))
        f_g = sigmoid(gate(gates, 1))
        g_g = jnp.tanh(gate(gates, 2))
        o_g = sigmoid(gate(gates, 3))
        c_new = f_g * c + i_g * g_g
        h_new = o_g * jnp.tanh(c_new)
        return (h_new, c_new)

    h_last, _ = lax.fori_loop(1, T, step, (h, c), unroll=True)

    # Final Linear (H -> 1) as VPU multiply + lane reduction (no N=1 MXU matvec).
    out_ref[...] = (jnp.sum(h_last * wfc_ref[...], axis=-1, keepdims=True)
                    + bfc_ref[0])


def lstm_forecast(x, params):
    """x: (B, T) float32 -> (B, 1) float32, matching LSTMModel.forward."""
    B, T = x.shape
    H = HIDDEN_SIZE
    GT = NUM_GATES * GATE_PAD

    # --- gate-padded parameter layouts (lane-aligned gate blocks of width 256) ---
    # W_ih: (4H, 1) -> (4, H) -> pad -> (1, 4*GATE_PAD)
    wih_vec = params["w_ih"][:, 0].reshape(NUM_GATES, H)
    wih_pad = jnp.pad(wih_vec, ((0, 0), (0, GATE_PAD - H))).reshape(1, GT)
    # bias: b_ih + b_hh, same padding
    bias_vec = (params["b_ih"] + params["b_hh"]).reshape(NUM_GATES, H)
    bias_pad = jnp.pad(bias_vec, ((0, 0), (0, GATE_PAD - H))).reshape(1, GT)
    # W_hh: (4H, H) -> (H, 4, H) -> pad -> (H, 4*GATE_PAD)  [col k*256+j = gate k, out j]
    whh_g = jnp.transpose(params["w_hh"].reshape(NUM_GATES, H, H), (2, 0, 1))
    whh_pad = jnp.pad(whh_g, ((0, 0), (0, 0), (0, GATE_PAD - H))).reshape(H, GT)

    # Raw input, time-major, as a (T, B, 1) column per step (a few KiB in VMEM);
    # the input contribution x[t]*w_ih + b is computed inside the kernel.
    x_tb1 = jnp.transpose(x, (1, 0))[:, :, None].astype(jnp.float32)

    wfc = params["w_fc"].astype(jnp.float32)               # (1, H) row, broadcast over B
    bfc = params["b_fc"].astype(jnp.float32)                # (1,) scalar -> SMEM

    return pl.pallas_call(
        lstm_kernel,
        out_shape=jax.ShapeDtypeStruct((B, OUTPUT_SIZE), jnp.float32),
        in_specs=[
            pl.BlockSpec(memory_space=pltpu.MemorySpace.VMEM),   # x       (T, B, 1)
            pl.BlockSpec(memory_space=pltpu.MemorySpace.VMEM),   # w_ih    (1, 1024)
            pl.BlockSpec(memory_space=pltpu.MemorySpace.VMEM),   # bias    (1, 1024)
            pl.BlockSpec(memory_space=pltpu.MemorySpace.VMEM),   # W_hh    (192, 1024)
            pl.BlockSpec(memory_space=pltpu.MemorySpace.VMEM),   # W_fc    (1, 192)
            pl.BlockSpec(memory_space=pltpu.MemorySpace.SMEM),   # b_fc    (1,)
        ],
        out_specs=pl.BlockSpec(memory_space=pltpu.MemorySpace.VMEM),
    )(x_tb1, wih_pad, bias_pad, whh_pad, wfc, bfc)


def init_params(key):
    """Deterministic synthetic params, PyTorch-style U(-1/sqrt(H), 1/sqrt(H)) init."""
    ks = jax.random.split(key, 6)
    bound = 1.0 / jnp.sqrt(jnp.float32(HIDDEN_SIZE))

    def u(k, shape):
        return jax.random.uniform(k, shape, jnp.float32, -bound, bound)

    return dict(
        w_ih=u(ks[0], (4 * HIDDEN_SIZE, INPUT_SIZE)),
        w_hh=u(ks[1], (4 * HIDDEN_SIZE, HIDDEN_SIZE)),
        b_ih=u(ks[2], (4 * HIDDEN_SIZE,)),
        b_hh=u(ks[3], (4 * HIDDEN_SIZE,)),
        w_fc=u(ks[4], (OUTPUT_SIZE, HIDDEN_SIZE)),
        b_fc=u(ks[5], (OUTPUT_SIZE,)),
    )


def lstm_ref(x, params):
    """Pure-JAX reference reproducing torch.nn.LSTM + Linear semantics."""
    B, _ = x.shape
    H = HIDDEN_SIZE
    w_ih, w_hh = params["w_ih"], params["w_hh"]
    b = params["b_ih"] + params["b_hh"]

    def step(carry, x_t):
        h, c = carry
        gates = x_t[:, None] @ w_ih.T + h @ w_hh.T + b
        i = jax.nn.sigmoid(gates[:, 0 * H:1 * H])
        f = jax.nn.sigmoid(gates[:, 1 * H:2 * H])
        g = jnp.tanh(gates[:, 2 * H:3 * H])
        o = jax.nn.sigmoid(gates[:, 3 * H:4 * H])
        c = f * c + i * g
        h = o * jnp.tanh(c)
        return (h, c), None

    h0 = jnp.zeros((B, H), jnp.float32)
    c0 = jnp.zeros((B, H), jnp.float32)
    (h_last, _), _ = jax.lax.scan(step, (h0, c0), jnp.transpose(x, (1, 0)))
    return h_last @ params["w_fc"].T + params["b_fc"]


if __name__ == "__main__":
    key = jax.random.PRNGKey(0)
    kx, kp = jax.random.split(key)

    B, T = 8, 16                       # batch=8, sequence length=16
    x = jax.random.normal(kx, (B, T), jnp.float32)
    params = init_params(kp)

    out = jax.block_until_ready(lstm_forecast(x, params))
    ref = lstm_ref(x, params)

    assert out.shape == (B, OUTPUT_SIZE)
    assert jnp.allclose(out, ref, atol=1e-4, rtol=1e-4), (
        f"max abs err {jnp.max(jnp.abs(out - ref))}")
    print("KERNEL_OK")
</pallas_src>

<mosaic_0001>
module attributes {stable_mosaic.version = 11 : i64} {
  func.func @lstm_kernel(%arg0: memref<16x8x1xf32, #tpu.memory_space<vmem>>, %arg1: memref<1x1024xf32, #tpu.memory_space<vmem>>, %arg2: memref<1x1024xf32, #tpu.memory_space<vmem>>, %arg3: memref<192x1024xf32, #tpu.memory_space<vmem>>, %arg4: memref<1x192xf32, #tpu.memory_space<vmem>>, %arg5: memref<1xf32, #tpu.memory_space<smem>>, %arg6: memref<8x1xf32, #tpu.memory_space<vmem>>) attributes {dimension_semantics = [], scalar_prefetch = 0 : i64, scratch_operands = 0 : i64, tpu.core_type = #tpu.core_type<tc>} {
    %c0 = arith.constant 0 : index
    %c0_0 = arith.constant 0 : index
    %0 = vector.load %arg3[%c0, %c0_0] : memref<192x1024xf32, #tpu.memory_space<vmem>>, vector<192x1024xf32>
    %c0_1 = arith.constant 0 : index
    %c0_2 = arith.constant 0 : index
    %1 = vector.load %arg1[%c0_1, %c0_2] : memref<1x1024xf32, #tpu.memory_space<vmem>>, vector<1x1024xf32>
    %2 = vector.shape_cast %1 : vector<1x1024xf32> to vector<1x1024xf32>
    %3 = vector.broadcast %2 : vector<1x1024xf32> to vector<8x1024xf32>
    %c0_3 = arith.constant 0 : index
    %c0_4 = arith.constant 0 : index
    %4 = vector.load %arg2[%c0_3, %c0_4] : memref<1x1024xf32, #tpu.memory_space<vmem>>, vector<1x1024xf32>
    %5 = vector.shape_cast %4 : vector<1x1024xf32> to vector<1x1024xf32>
    %6 = vector.broadcast %5 : vector<1x1024xf32> to vector<8x1024xf32>
    %c0_5 = arith.constant 0 : index
    %c0_6 = arith.constant 0 : index
    %c0_7 = arith.constant 0 : index
    %7 = vector.load %arg0[%c0_5, %c0_6, %c0_7] : memref<16x8x1xf32, #tpu.memory_space<vmem>>, vector<1x8x1xf32>
    %8 = vector.shape_cast %7 : vector<1x8x1xf32> to vector<8x1xf32>
    %9 = vector.broadcast %8 : vector<8x1xf32> to vector<8x1024xf32>
    %10 = arith.mulf %9, %3 : vector<8x1024xf32>
    %11 = arith.addf %10, %6 : vector<8x1024xf32>
    %12 = vector.extract_strided_slice %11 {offsets = [0, 0], sizes = [8, 192], strides = [1, 1]} : vector<8x1024xf32> to vector<8x192xf32>
    %cst = arith.constant 5.000000e-01 : f32
    %13 = vector.broadcast %cst : f32 to vector<8x192xf32>
    %14 = arith.mulf %13, %12 : vector<8x192xf32>
    %15 = math.tanh %14 : vector<8x192xf32>
    %cst_8 = arith.constant 1.000000e+00 : f32
    %16 = vector.broadcast %cst_8 : f32 to vector<8x192xf32>
    %17 = arith.addf %15, %16 : vector<8x192xf32>
    %cst_9 = arith.constant 5.000000e-01 : f32
    %18 = vector.broadcast %cst_9 : f32 to vector<8x192xf32>
    %19 = arith.mulf %18, %17 : vector<8x192xf32>
    %20 = vector.extract_strided_slice %11 {offsets = [0, 512], sizes = [8, 192], strides = [1, 1]} : vector<8x1024xf32> to vector<8x192xf32>
    %21 = math.tanh %20 : vector<8x192xf32>
    %22 = arith.mulf %19, %21 : vector<8x192xf32>
    %23 = vector.extract_strided_slice %11 {offsets = [0, 768], sizes = [8, 192], strides = [1, 1]} : vector<8x1024xf32> to vector<8x192xf32>
    %cst_10 = arith.constant 5.000000e-01 : f32
    %24 = vector.broadcast %cst_10 : f32 to vector<8x192xf32>
    %25 = arith.mulf %24, %23 : vector<8x192xf32>
    %26 = math.tanh %25 : vector<8x192xf32>
    %cst_11 = arith.constant 1.000000e+00 : f32
    %27 = vector.broadcast %cst_11 : f32 to vector<8x192xf32>
    %28 = arith.addf %26, %27 : vector<8x192xf32>
    %cst_12 = arith.constant 5.000000e-01 : f32
    %29 = vector.broadcast %cst_12 : f32 to vector<8x192xf32>
    %30 = arith.mulf %29, %28 : vector<8x192xf32>
    %31 = math.tanh %22 : vector<8x192xf32>
    %32 = arith.mulf %30, %31 : vector<8x192xf32>
    %c1_i32 = arith.constant 1 : i32
    %33 = arith.index_cast %c1_i32 : i32 to index
    %c0_13 = arith.constant 0 : index
    %c0_14 = arith.constant 0 : index
    %34 = vector.load %arg0[%33, %c0_13, %c0_14] : memref<16x8x1xf32, #tpu.memory_space<vmem>>, vector<1x8x1xf32>
    %35 = vector.shape_cast %34 : vector<1x8x1xf32> to vector<8x1xf32>
    %36 = vector.broadcast %35 : vector<8x1xf32> to vector<8x1024xf32>
    %37 = arith.mulf %36, %3 : vector<8x1024xf32>
    %38 = arith.addf %37, %6 : vector<8x1024xf32>
    %cst_15 = arith.constant dense<0.000000e+00> : vector<8x1024xf32>
    %39 = tpu.matmul %32, %0, %cst_15 {dimension_numbers = #tpu.dot_dimension_numbers<[1], [0], [0], [1], [0, 0, 1, 1], [], []>} : vector<8x192xf32>, vector<192x1024xf32>, vector<8x1024xf32> -> vector<8x1024xf32>
    %40 = arith.addf %38, %39 : vector<8x1024xf32>
    %41 = vector.extract_strided_slice %40 {offsets = [0, 0], sizes = [8, 192], strides = [1, 1]} : vector<8x1024xf32> to vector<8x192xf32>
    %cst_16 = arith.constant 5.000000e-01 : f32
    %42 = vector.broadcast %cst_16 : f32 to vector<8x192xf32>
    %43 = arith.mulf %42, %41 : vector<8x192xf32>
    %44 = math.tanh %43 : vector<8x192xf32>
    %cst_17 = arith.constant 1.000000e+00 : f32
    %45 = vector.broadcast %cst_17 : f32 to vector<8x192xf32>
    %46 = arith.addf %44, %45 : vector<8x192xf32>
    %cst_18 = arith.constant 5.000000e-01 : f32
    %47 = vector.broadcast %cst_18 : f32 to vector<8x192xf32>
    %48 = arith.mulf %47, %46 : vector<8x192xf32>
    %49 = vector.extract_strided_slice %40 {offsets = [0, 256], sizes = [8, 192], strides = [1, 1]} : vector<8x1024xf32> to vector<8x192xf32>
    %cst_19 = arith.constant 5.000000e-01 : f32
    %50 = vector.broadcast %cst_19 : f32 to vector<8x192xf32>
    %51 = arith.mulf %50, %49 : vector<8x192xf32>
    %52 = math.tanh %51 : vector<8x192xf32>
    %cst_20 = arith.constant 1.000000e+00 : f32
    %53 = vector.broadcast %cst_20 : f32 to vector<8x192xf32>
    %54 = arith.addf %52, %53 : vector<8x192xf32>
    %cst_21 = arith.constant 5.000000e-01 : f32
    %55 = vector.broadcast %cst_21 : f32 to vector<8x192xf32>
    %56 = arith.mulf %55, %54 : vector<8x192xf32>
    %57 = vector.extract_strided_slice %40 {offsets = [0, 512], sizes = [8, 192], strides = [1, 1]} : vector<8x1024xf32> to vector<8x192xf32>
    %58 = math.tanh %57 : vector<8x192xf32>
    %59 = vector.extract_strided_slice %40 {offsets = [0, 768], sizes = [8, 192], strides = [1, 1]} : vector<8x1024xf32> to vector<8x192xf32>
    %cst_22 = arith.constant 5.000000e-01 : f32
    %60 = vector.broadcast %cst_22 : f32 to vector<8x192xf32>
    %61 = arith.mulf %60, %59 : vector<8x192xf32>
    %62 = math.tanh %61 : vector<8x192xf32>
    %cst_23 = arith.constant 1.000000e+00 : f32
    %63 = vector.broadcast %cst_23 : f32 to vector<8x192xf32>
    %64 = arith.addf %62, %63 : vector<8x192xf32>
    %cst_24 = arith.constant 5.000000e-01 : f32
    %65 = vector.broadcast %cst_24 : f32 to vector<8x192xf32>
    %66 = arith.mulf %65, %64 : vector<8x192xf32>
    %67 = arith.mulf %56, %22 : vector<8x192xf32>
    %68 = arith.mulf %48, %58 : vector<8x192xf32>
    %69 = arith.addf %67, %68 : vector<8x192xf32>
    %70 = math.tanh %69 : vector<8x192xf32>
    %71 = arith.mulf %66, %70 : vector<8x192xf32>
    %c2_i32 = arith.constant 2 : i32
    %72 = arith.index_cast %c2_i32 : i32 to index
    %c0_25 = arith.constant 0 : index
    %c0_26 = arith.constant 0 : index
    %73 = vector.load %arg0[%72, %c0_25, %c0_26] : memref<16x8x1xf32, #tpu.memory_space<vmem>>, vector<1x8x1xf32>
    %74 = vector.shape_cast %73 : vector<1x8x1xf32> to vector<8x1xf32>
    %75 = vector.broadcast %74 : vector<8x1xf32> to vector<8x1024xf32>
    %76 = arith.mulf %75, %3 : vector<8x1024xf32>
    %77 = arith.addf %76, %6 : vector<8x1024xf32>
    %cst_27 = arith.constant dense<0.000000e+00> : vector<8x1024xf32>
    %78 = tpu.matmul %71, %0, %cst_27 {dimension_numbers = #tpu.dot_dimension_numbers<[1], [0], [0], [1], [0, 0, 1, 1], [], []>} : vector<8x192xf32>, vector<192x1024xf32>, vector<8x1024xf32> -> vector<8x1024xf32>
    %79 = arith.addf %77, %78 : vector<8x1024xf32>
    %80 = vector.extract_strided_slice %79 {offsets = [0, 0], sizes = [8, 192], strides = [1, 1]} : vector<8x1024xf32> to vector<8x192xf32>
    %cst_28 = arith.constant 5.000000e-01 : f32
    %81 = vector.broadcast %cst_28 : f32 to vector<8x192xf32>
    %82 = arith.mulf %81, %80 : vector<8x192xf32>
    %83 = math.tanh %82 : vector<8x192xf32>
    %cst_29 = arith.constant 1.000000e+00 : f32
    %84 = vector.broadcast %cst_29 : f32 to vector<8x192xf32>
    %85 = arith.addf %83, %84 : vector<8x192xf32>
    %cst_30 = arith.constant 5.000000e-01 : f32
    %86 = vector.broadcast %cst_30 : f32 to vector<8x192xf32>
    %87 = arith.mulf %86, %85 : vector<8x192xf32>
    %88 = vector.extract_strided_slice %79 {offsets = [0, 256], sizes = [8, 192], strides = [1, 1]} : vector<8x1024xf32> to vector<8x192xf32>
    %cst_31 = arith.constant 5.000000e-01 : f32
    %89 = vector.broadcast %cst_31 : f32 to vector<8x192xf32>
    %90 = arith.mulf %89, %88 : vector<8x192xf32>
    %91 = math.tanh %90 : vector<8x192xf32>
    %cst_32 = arith.constant 1.000000e+00 : f32
    %92 = vector.broadcast %cst_32 : f32 to vector<8x192xf32>
    %93 = arith.addf %91, %92 : vector<8x192xf32>
    %cst_33 = arith.constant 5.000000e-01 : f32
    %94 = vector.broadcast %cst_33 : f32 to vector<8x192xf32>
    %95 = arith.mulf %94, %93 : vector<8x192xf32>
    %96 = vector.extract_strided_slice %79 {offsets = [0, 512], sizes = [8, 192], strides = [1, 1]} : vector<8x1024xf32> to vector<8x192xf32>
    %97 = math.tanh %96 : vector<8x192xf32>
    %98 = vector.extract_strided_slice %79 {offsets = [0, 768], sizes = [8, 192], strides = [1, 1]} : vector<8x1024xf32> to vector<8x192xf32>
    %cst_34 = arith.constant 5.000000e-01 : f32
    %99 = vector.broadcast %cst_34 : f32 to vector<8x192xf32>
    %100 = arith.mulf %99, %98 : vector<8x192xf32>
    %101 = math.tanh %100 : vector<8x192xf32>
    %cst_35 = arith.constant 1.000000e+00 : f32
    %102 = vector.broadcast %cst_35 : f32 to vector<8x192xf32>
    %103 = arith.addf %101, %102 : vector<8x192xf32>
    %cst_36 = arith.constant 5.000000e-01 : f32
    %104 = vector.broadcast %cst_36 : f32 to vector<8x192xf32>
    %105 = arith.mulf %104, %103 : vector<8x192xf32>
    %106 = arith.mulf %95, %69 : vector<8x192xf32>
    %107 = arith.mulf %87, %97 : vector<8x192xf32>
    %108 = arith.addf %106, %107 : vector<8x192xf32>
    %109 = math.tanh %108 : vector<8x192xf32>
    %110 = arith.mulf %105, %109 : vector<8x192xf32>
    %c3_i32 = arith.constant 3 : i32
    %111 = arith.index_cast %c3_i32 : i32 to index
    %c0_37 = arith.constant 0 : index
    %c0_38 = arith.constant 0 : index
    %112 = vector.load %arg0[%111, %c0_37, %c0_38] : memref<16x8x1xf32, #tpu.memory_space<vmem>>, vector<1x8x1xf32>
    %113 = vector.shape_cast %112 : vector<1x8x1xf32> to vector<8x1xf32>
    %114 = vector.broadcast %113 : vector<8x1xf32> to vector<8x1024xf32>
    %115 = arith.mulf %114, %3 : vector<8x1024xf32>
    %116 = arith.addf %115, %6 : vector<8x1024xf32>
    %cst_39 = arith.constant dense<0.000000e+00> : vector<8x1024xf32>
    %117 = tpu.matmul %110, %0, %cst_39 {dimension_numbers = #tpu.dot_dimension_numbers<[1], [0], [0], [1], [0, 0, 1, 1], [], []>} : vector<8x192xf32>, vector<192x1024xf32>, vector<8x1024xf32> -> vector<8x1024xf32>
    %118 = arith.addf %116, %117 : vector<8x1024xf32>
    %119 = vector.extract_strided_slice %118 {offsets = [0, 0], sizes = [8, 192], strides = [1, 1]} : vector<8x1024xf32> to vector<8x192xf32>
    %cst_40 = arith.constant 5.000000e-01 : f32
    %120 = vector.broadcast %cst_40 : f32 to vector<8x192xf32>
    %121 = arith.mulf %120, %119 : vector<8x192xf32>
    %122 = math.tanh %121 : vector<8x192xf32>
    %cst_41 = arith.constant 1.000000e+00 : f32
    %123 = vector.broadcast %cst_41 : f32 to vector<8x192xf32>
    %124 = arith.addf %122, %123 : vector<8x192xf32>
    %cst_42 = arith.constant 5.000000e-01 : f32
    %125 = vector.broadcast %cst_42 : f32 to vector<8x192xf32>
    %126 = arith.mulf %125, %124 : vector<8x192xf32>
    %127 = vector.extract_strided_slice %118 {offsets = [0, 256], sizes = [8, 192], strides = [1, 1]} : vector<8x1024xf32> to vector<8x192xf32>
    %cst_43 = arith.constant 5.000000e-01 : f32
    %128 = vector.broadcast %cst_43 : f32 to vector<8x192xf32>
    %129 = arith.mulf %128, %127 : vector<8x192xf32>
    %130 = math.tanh %129 : vector<8x192xf32>
    %cst_44 = arith.constant 1.000000e+00 : f32
    %131 = vector.broadcast %cst_44 : f32 to vector<8x192xf32>
    %132 = arith.addf %130, %131 : vector<8x192xf32>
    %cst_45 = arith.constant 5.000000e-01 : f32
    %133 = vector.broadcast %cst_45 : f32 to vector<8x192xf32>
    %134 = arith.mulf %133, %132 : vector<8x192xf32>
    %135 = vector.extract_strided_slice %118 {offsets = [0, 512], sizes = [8, 192], strides = [1, 1]} : vector<8x1024xf32> to vector<8x192xf32>
    %136 = math.tanh %135 : vector<8x192xf32>
    %137 = vector.extract_strided_slice %118 {offsets = [0, 768], sizes = [8, 192], strides = [1, 1]} : vector<8x1024xf32> to vector<8x192xf32>
    %cst_46 = arith.constant 5.000000e-01 : f32
    %138 = vector.broadcast %cst_46 : f32 to vector<8x192xf32>
    %139 = arith.mulf %138, %137 : vector<8x192xf32>
    %140 = math.tanh %139 : vector<8x192xf32>
    %cst_47 = arith.constant 1.000000e+00 : f32
    %141 = vector.broadcast %cst_47 : f32 to vector<8x192xf32>
    %142 = arith.addf %140, %141 : vector<8x192xf32>
    %cst_48 = arith.constant 5.000000e-01 : f32
    %143 = vector.broadcast %cst_48 : f32 to vector<8x192xf32>
    %144 = arith.mulf %143, %142 : vector<8x192xf32>
    %145 = arith.mulf %134, %108 : vector<8x192xf32>
    %146 = arith.mulf %126, %136 : vector<8x192xf32>
    %147 = arith.addf %145, %146 : vector<8x192xf32>
    %148 = math.tanh %147 : vector<8x192xf32>
    %149 = arith.mulf %144, %148 : vector<8x192xf32>
    %c4_i32 = arith.constant 4 : i32
    %150 = arith.index_cast %c4_i32 : i32 to index
    %c0_49 = arith.constant 0 : index
    %c0_50 = arith.constant 0 : index
    %151 = vector.load %arg0[%150, %c0_49, %c0_50] : memref<16x8x1xf32, #tpu.memory_space<vmem>>, vector<1x8x1xf32>
    %152 = vector.shape_cast %151 : vector<1x8x1xf32> to vector<8x1xf32>
    %153 = vector.broadcast %152 : vector<8x1xf32> to vector<8x1024xf32>
    %154 = arith.mulf %153, %3 : vector<8x1024xf32>
    %155 = arith.addf %154, %6 : vector<8x1024xf32>
    %cst_51 = arith.constant dense<0.000000e+00> : vector<8x1024xf32>
    %156 = tpu.matmul %149, %0, %cst_51 {dimension_numbers = #tpu.dot_dimension_numbers<[1], [0], [0], [1], [0, 0, 1, 1], [], []>} : vector<8x192xf32>, vector<192x1024xf32>, vector<8x1024xf32> -> vector<8x1024xf32>
    %157 = arith.addf %155, %156 : vector<8x1024xf32>
    %158 = vector.extract_strided_slice %157 {offsets = [0, 0], sizes = [8, 192], strides = [1, 1]} : vector<8x1024xf32> to vector<8x192xf32>
    %cst_52 = arith.constant 5.000000e-01 : f32
    %159 = vector.broadcast %cst_52 : f32 to vector<8x192xf32>
    %160 = arith.mulf %159, %158 : vector<8x192xf32>
    %161 = math.tanh %160 : vector<8x192xf32>
    %cst_53 = arith.constant 1.000000e+00 : f32
    %162 = vector.broadcast %cst_53 : f32 to vector<8x192xf32>
    %163 = arith.addf %161, %162 : vector<8x192xf32>
    %cst_54 = arith.constant 5.000000e-01 : f32
    %164 = vector.broadcast %cst_54 : f32 to vector<8x192xf32>
    %165 = arith.mulf %164, %163 : vector<8x192xf32>
    %166 = vector.extract_strided_slice %157 {offsets = [0, 256], sizes = [8, 192], strides = [1, 1]} : vector<8x1024xf32> to vector<8x192xf32>
    %cst_55 = arith.constant 5.000000e-01 : f32
    %167 = vector.broadcast %cst_55 : f32 to vector<8x192xf32>
    %168 = arith.mulf %167, %166 : vector<8x192xf32>
    %169 = math.tanh %168 : vector<8x192xf32>
    %cst_56 = arith.constant 1.000000e+00 : f32
    %170 = vector.broadcast %cst_56 : f32 to vector<8x192xf32>
    %171 = arith.addf %169, %170 : vector<8x192xf32>
    %cst_57 = arith.constant 5.000000e-01 : f32
    %172 = vector.broadcast %cst_57 : f32 to vector<8x192xf32>
    %173 = arith.mulf %172, %171 : vector<8x192xf32>
    %174 = vector.extract_strided_slice %157 {offsets = [0, 512], sizes = [8, 192], strides = [1, 1]} : vector<8x1024xf32> to vector<8x192xf32>
    %175 = math.tanh %174 : vector<8x192xf32>
    %176 = vector.extract_strided_slice %157 {offsets = [0, 768], sizes = [8, 192], strides = [1, 1]} : vector<8x1024xf32> to vector<8x192xf32>
    %cst_58 = arith.constant 5.000000e-01 : f32
    %177 = vector.broadcast %cst_58 : f32 to vector<8x192xf32>
    %178 = arith.mulf %177, %176 : vector<8x192xf32>
    %179 = math.tanh %178 : vector<8x192xf32>
    %cst_59 = arith.constant 1.000000e+00 : f32
    %180 = vector.broadcast %cst_59 : f32 to vector<8x192xf32>
    %181 = arith.addf %179, %180 : vector<8x192xf32>
    %cst_60 = arith.constant 5.000000e-01 : f32
    %182 = vector.broadcast %cst_60 : f32 to vector<8x192xf32>
    %183 = arith.mulf %182, %181 : vector<8x192xf32>
    %184 = arith.mulf %173, %147 : vector<8x192xf32>
    %185 = arith.mulf %165, %175 : vector<8x192xf32>
    %186 = arith.addf %184, %185 : vector<8x192xf32>
    %187 = math.tanh %186 : vector<8x192xf32>
    %188 = arith.mulf %183, %187 : vector<8x192xf32>
    %c5_i32 = arith.constant 5 : i32
    %189 = arith.index_cast %c5_i32 : i32 to index
    %c0_61 = arith.constant 0 : index
    %c0_62 = arith.constant 0 : index
    %190 = vector.load %arg0[%189, %c0_61, %c0_62] : memref<16x8x1xf32, #tpu.memory_space<vmem>>, vector<1x8x1xf32>
    %191 = vector.shape_cast %190 : vector<1x8x1xf32> to vector<8x1xf32>
    %192 = vector.broadcast %191 : vector<8x1xf32> to vector<8x1024xf32>
    %193 = arith.mulf %192, %3 : vector<8x1024xf32>
    %194 = arith.addf %193, %6 : vector<8x1024xf32>
    %cst_63 = arith.constant dense<0.000000e+00> : vector<8x1024xf32>
    %195 = tpu.matmul %188, %0, %cst_63 {dimension_numbers = #tpu.dot_dimension_numbers<[1], [0], [0], [1], [0, 0, 1, 1], [], []>} : vector<8x192xf32>, vector<192x1024xf32>, vector<8x1024xf32> -> vector<8x1024xf32>
    %196 = arith.addf %194, %195 : vector<8x1024xf32>
    %197 = vector.extract_strided_slice %196 {offsets = [0, 0], sizes = [8, 192], strides = [1, 1]} : vector<8x1024xf32> to vector<8x192xf32>
    %cst_64 = arith.constant 5.000000e-01 : f32
    %198 = vector.broadcast %cst_64 : f32 to vector<8x192xf32>
    %199 = arith.mulf %198, %197 : vector<8x192xf32>
    %200 = math.tanh %199 : vector<8x192xf32>
    %cst_65 = arith.constant 1.000000e+00 : f32
    %201 = vector.broadcast %cst_65 : f32 to vector<8x192xf32>
    %202 = arith.addf %200, %201 : vector<8x192xf32>
    %cst_66 = arith.constant 5.000000e-01 : f32
    %203 = vector.broadcast %cst_66 : f32 to vector<8x192xf32>
    %204 = arith.mulf %203, %202 : vector<8x192xf32>
    %205 = vector.extract_strided_slice %196 {offsets = [0, 256], sizes = [8, 192], strides = [1, 1]} : vector<8x1024xf32> to vector<8x192xf32>
    %cst_67 = arith.constant 5.000000e-01 : f32
    %206 = vector.broadcast %cst_67 : f32 to vector<8x192xf32>
    %207 = arith.mulf %206, %205 : vector<8x192xf32>
    %208 = math.tanh %207 : vector<8x192xf32>
    %cst_68 = arith.constant 1.000000e+00 : f32
    %209 = vector.broadcast %cst_68 : f32 to vector<8x192xf32>
    %210 = arith.addf %208, %209 : vector<8x192xf32>
    %cst_69 = arith.constant 5.000000e-01 : f32
    %211 = vector.broadcast %cst_69 : f32 to vector<8x192xf32>
    %212 = arith.mulf %211, %210 : vector<8x192xf32>
    %213 = vector.extract_strided_slice %196 {offsets = [0, 512], sizes = [8, 192], strides = [1, 1]} : vector<8x1024xf32> to vector<8x192xf32>
    %214 = math.tanh %213 : vector<8x192xf32>
    %215 = vector.extract_strided_slice %196 {offsets = [0, 768], sizes = [8, 192], strides = [1, 1]} : vector<8x1024xf32> to vector<8x192xf32>
    %cst_70 = arith.constant 5.000000e-01 : f32
    %216 = vector.broadcast %cst_70 : f32 to vector<8x192xf32>
    %217 = arith.mulf %216, %215 : vector<8x192xf32>
    %218 = math.tanh %217 : vector<8x192xf32>
    %cst_71 = arith.constant 1.000000e+00 : f32
    %219 = vector.broadcast %cst_71 : f32 to vector<8x192xf32>
    %220 = arith.addf %218, %219 : vector<8x192xf32>
    %cst_72 = arith.constant 5.000000e-01 : f32
    %221 = vector.broadcast %cst_72 : f32 to vector<8x192xf32>
    %222 = arith.mulf %221, %220 : vector<8x192xf32>
    %223 = arith.mulf %212, %186 : vector<8x192xf32>
    %224 = arith.mulf %204, %214 : vector<8x192xf32>
    %225 = arith.addf %223, %224 : vector<8x192xf32>
    %226 = math.tanh %225 : vector<8x192xf32>
    %227 = arith.mulf %222, %226 : vector<8x192xf32>
    %c6_i32 = arith.constant 6 : i32
    %228 = arith.index_cast %c6_i32 : i32 to index
    %c0_73 = arith.constant 0 : index
    %c0_74 = arith.constant 0 : index
    %229 = vector.load %arg0[%228, %c0_73, %c0_74] : memref<16x8x1xf32, #tpu.memory_space<vmem>>, vector<1x8x1xf32>
    %230 = vector.shape_cast %229 : vector<1x8x1xf32> to vector<8x1xf32>
    %231 = vector.broadcast %230 : vector<8x1xf32> to vector<8x1024xf32>
    %232 = arith.mulf %231, %3 : vector<8x1024xf32>
    %233 = arith.addf %232, %6 : vector<8x1024xf32>
    %cst_75 = arith.constant dense<0.000000e+00> : vector<8x1024xf32>
    %234 = tpu.matmul %227, %0, %cst_75 {dimension_numbers = #tpu.dot_dimension_numbers<[1], [0], [0], [1], [0, 0, 1, 1], [], []>} : vector<8x192xf32>, vector<192x1024xf32>, vector<8x1024xf32> -> vector<8x1024xf32>
    %235 = arith.addf %233, %234 : vector<8x1024xf32>
    %236 = vector.extract_strided_slice %235 {offsets = [0, 0], sizes = [8, 192], strides = [1, 1]} : vector<8x1024xf32> to vector<8x192xf32>
    %cst_76 = arith.constant 5.000000e-01 : f32
    %237 = vector.broadcast %cst_76 : f32 to vector<8x192xf32>
    %238 = arith.mulf %237, %236 : vector<8x192xf32>
    %239 = math.tanh %238 : vector<8x192xf32>
    %cst_77 = arith.constant 1.000000e+00 : f32
    %240 = vector.broadcast %cst_77 : f32 to vector<8x192xf32>
    %241 = arith.addf %239, %240 : vector<8x192xf32>
    %cst_78 = arith.constant 5.000000e-01 : f32
    %242 = vector.broadcast %cst_78 : f32 to vector<8x192xf32>
    %243 = arith.mulf %242, %241 : vector<8x192xf32>
    %244 = vector.extract_strided_slice %235 {offsets = [0, 256], sizes = [8, 192], strides = [1, 1]} : vector<8x1024xf32> to vector<8x192xf32>
    %cst_79 = arith.constant 5.000000e-01 : f32
    %245 = vector.broadcast %cst_79 : f32 to vector<8x192xf32>
    %246 = arith.mulf %245, %244 : vector<8x192xf32>
    %247 = math.tanh %246 : vector<8x192xf32>
    %cst_80 = arith.constant 1.000000e+00 : f32
    %248 = vector.broadcast %cst_80 : f32 to vector<8x192xf32>
    %249 = arith.addf %247, %248 : vector<8x192xf32>
    %cst_81 = arith.constant 5.000000e-01 : f32
    %250 = vector.broadcast %cst_81 : f32 to vector<8x192xf32>
    %251 = arith.mulf %250, %249 : vector<8x192xf32>
    %252 = vector.extract_strided_slice %235 {offsets = [0, 512], sizes = [8, 192], strides = [1, 1]} : vector<8x1024xf32> to vector<8x192xf32>
    %253 = math.tanh %252 : vector<8x192xf32>
    %254 = vector.extract_strided_slice %235 {offsets = [0, 768], sizes = [8, 192], strides = [1, 1]} : vector<8x1024xf32> to vector<8x192xf32>
    %cst_82 = arith.constant 5.000000e-01 : f32
    %255 = vector.broadcast %cst_82 : f32 to vector<8x192xf32>
    %256 = arith.mulf %255, %254 : vector<8x192xf32>
    %257 = math.tanh %256 : vector<8x192xf32>
    %cst_83 = arith.constant 1.000000e+00 : f32
    %258 = vector.broadcast %cst_83 : f32 to vector<8x192xf32>
    %259 = arith.addf %257, %258 : vector<8x192xf32>
    %cst_84 = arith.constant 5.000000e-01 : f32
    %260 = vector.broadcast %cst_84 : f32 to vector<8x192xf32>
    %261 = arith.mulf %260, %259 : vector<8x192xf32>
    %262 = arith.mulf %251, %225 : vector<8x192xf32>
    %263 = arith.mulf %243, %253 : vector<8x192xf32>
    %264 = arith.addf %262, %263 : vector<8x192xf32>
    %265 = math.tanh %264 : vector<8x192xf32>
    %266 = arith.mulf %261, %265 : vector<8x192xf32>
    %c7_i32 = arith.constant 7 : i32
    %267 = arith.index_cast %c7_i32 : i32 to index
    %c0_85 = arith.constant 0 : index
    %c0_86 = arith.constant 0 : index
    %268 = vector.load %arg0[%267, %c0_85, %c0_86] : memref<16x8x1xf32, #tpu.memory_space<vmem>>, vector<1x8x1xf32>
    %269 = vector.shape_cast %268 : vector<1x8x1xf32> to vector<8x1xf32>
    %270 = vector.broadcast %269 : vector<8x1xf32> to vector<8x1024xf32>
    %271 = arith.mulf %270, %3 : vector<8x1024xf32>
    %272 = arith.addf %271, %6 : vector<8x1024xf32>
    %cst_87 = arith.constant dense<0.000000e+00> : vector<8x1024xf32>
    %273 = tpu.matmul %266, %0, %cst_87 {dimension_numbers = #tpu.dot_dimension_numbers<[1], [0], [0], [1], [0, 0, 1, 1], [], []>} : vector<8x192xf32>, vector<192x1024xf32>, vector<8x1024xf32> -> vector<8x1024xf32>
    %274 = arith.addf %272, %273 : vector<8x1024xf32>
    %275 = vector.extract_strided_slice %274 {offsets = [0, 0], sizes = [8, 192], strides = [1, 1]} : vector<8x1024xf32> to vector<8x192xf32>
    %cst_88 = arith.constant 5.000000e-01 : f32
    %276 = vector.broadcast %cst_88 : f32 to vector<8x192xf32>
    %277 = arith.mulf %276, %275 : vector<8x192xf32>
    %278 = math.tanh %277 : vector<8x192xf32>
    %cst_89 = arith.constant 1.000000e+00 : f32
    %279 = vector.broadcast %cst_89 : f32 to vector<8x192xf32>
    %280 = arith.addf %278, %279 : vector<8x192xf32>
    %cst_90 = arith.constant 5.000000e-01 : f32
    %281 = vector.broadcast %cst_90 : f32 to vector<8x192xf32>
    %282 = arith.mulf %281, %280 : vector<8x192xf32>
    %283 = vector.extract_strided_slice %274 {offsets = [0, 256], sizes = [8, 192], strides = [1, 1]} : vector<8x1024xf32> to vector<8x192xf32>
    %cst_91 = arith.constant 5.000000e-01 : f32
    %284 = vector.broadcast %cst_91 : f32 to vector<8x192xf32>
    %285 = arith.mulf %284, %283 : vector<8x192xf32>
    %286 = math.tanh %285 : vector<8x192xf32>
    %cst_92 = arith.constant 1.000000e+00 : f32
    %287 = vector.broadcast %cst_92 : f32 to vector<8x192xf32>
    %288 = arith.addf %286, %287 : vector<8x192xf32>
    %cst_93 = arith.constant 5.000000e-01 : f32
    %289 = vector.broadcast %cst_93 : f32 to vector<8x192xf32>
    %290 = arith.mulf %289, %288 : vector<8x192xf32>
    %291 = vector.extract_strided_slice %274 {offsets = [0, 512], sizes = [8, 192], strides = [1, 1]} : vector<8x1024xf32> to vector<8x192xf32>
    %292 = math.tanh %291 : vector<8x192xf32>
    %293 = vector.extract_strided_slice %274 {offsets = [0, 768], sizes = [8, 192], strides = [1, 1]} : vector<8x1024xf32> to vector<8x192xf32>
    %cst_94 = arith.constant 5.000000e-01 : f32
    %294 = vector.broadcast %cst_94 : f32 to vector<8x192xf32>
    %295 = arith.mulf %294, %293 : vector<8x192xf32>
    %296 = math.tanh %295 : vector<8x192xf32>
    %cst_95 = arith.constant 1.000000e+00 : f32
    %297 = vector.broadcast %cst_95 : f32 to vector<8x192xf32>
    %298 = arith.addf %296, %297 : vector<8x192xf32>
    %cst_96 = arith.constant 5.000000e-01 : f32
    %299 = vector.broadcast %cst_96 : f32 to vector<8x192xf32>
    %300 = arith.mulf %299, %298 : vector<8x192xf32>
    %301 = arith.mulf %290, %264 : vector<8x192xf32>
    %302 = arith.mulf %282, %292 : vector<8x192xf32>
    %303 = arith.addf %301, %302 : vector<8x192xf32>
    %304 = math.tanh %303 : vector<8x192xf32>
    %305 = arith.mulf %300, %304 : vector<8x192xf32>
    %c8_i32 = arith.constant 8 : i32
    %306 = arith.index_cast %c8_i32 : i32 to index
    %c0_97 = arith.constant 0 : index
    %c0_98 = arith.constant 0 : index
    %307 = vector.load %arg0[%306, %c0_97, %c0_98] : memref<16x8x1xf32, #tpu.memory_space<vmem>>, vector<1x8x1xf32>
    %308 = vector.shape_cast %307 : vector<1x8x1xf32> to vector<8x1xf32>
    %309 = vector.broadcast %308 : vector<8x1xf32> to vector<8x1024xf32>
    %310 = arith.mulf %309, %3 : vector<8x1024xf32>
    %311 = arith.addf %310, %6 : vector<8x1024xf32>
    %cst_99 = arith.constant dense<0.000000e+00> : vector<8x1024xf32>
    %312 = tpu.matmul %305, %0, %cst_99 {dimension_numbers = #tpu.dot_dimension_numbers<[1], [0], [0], [1], [0, 0, 1, 1], [], []>} : vector<8x192xf32>, vector<192x1024xf32>, vector<8x1024xf32> -> vector<8x1024xf32>
    %313 = arith.addf %311, %312 : vector<8x1024xf32>
    %314 = vector.extract_strided_slice %313 {offsets = [0, 0], sizes = [8, 192], strides = [1, 1]} : vector<8x1024xf32> to vector<8x192xf32>
    %cst_100 = arith.constant 5.000000e-01 : f32
    %315 = vector.broadcast %cst_100 : f32 to vector<8x192xf32>
    %316 = arith.mulf %315, %314 : vector<8x192xf32>
    %317 = math.tanh %316 : vector<8x192xf32>
    %cst_101 = arith.constant 1.000000e+00 : f32
    %318 = vector.broadcast %cst_101 : f32 to vector<8x192xf32>
    %319 = arith.addf %317, %318 : vector<8x192xf32>
    %cst_102 = arith.constant 5.000000e-01 : f32
    %320 = vector.broadcast %cst_102 : f32 to vector<8x192xf32>
    %321 = arith.mulf %320, %319 : vector<8x192xf32>
    %322 = vector.extract_strided_slice %313 {offsets = [0, 256], sizes = [8, 192], strides = [1, 1]} : vector<8x1024xf32> to vector<8x192xf32>
    %cst_103 = arith.constant 5.000000e-01 : f32
    %323 = vector.broadcast %cst_103 : f32 to vector<8x192xf32>
    %324 = arith.mulf %323, %322 : vector<8x192xf32>
    %325 = math.tanh %324 : vector<8x192xf32>
    %cst_104 = arith.constant 1.000000e+00 : f32
    %326 = vector.broadcast %cst_104 : f32 to vector<8x192xf32>
    %327 = arith.addf %325, %326 : vector<8x192xf32>
    %cst_105 = arith.constant 5.000000e-01 : f32
    %328 = vector.broadcast %cst_105 : f32 to vector<8x192xf32>
    %329 = arith.mulf %328, %327 : vector<8x192xf32>
    %330 = vector.extract_strided_slice %313 {offsets = [0, 512], sizes = [8, 192], strides = [1, 1]} : vector<8x1024xf32> to vector<8x192xf32>
    %331 = math.tanh %330 : vector<8x192xf32>
    %332 = vector.extract_strided_slice %313 {offsets = [0, 768], sizes = [8, 192], strides = [1, 1]} : vector<8x1024xf32> to vector<8x192xf32>
    %cst_106 = arith.constant 5.000000e-01 : f32
    %333 = vector.broadcast %cst_106 : f32 to vector<8x192xf32>
    %334 = arith.mulf %333, %332 : vector<8x192xf32>
    %335 = math.tanh %334 : vector<8x192xf32>
    %cst_107 = arith.constant 1.000000e+00 : f32
    %336 = vector.broadcast %cst_107 : f32 to vector<8x192xf32>
    %337 = arith.addf %335, %336 : vector<8x192xf32>
    %cst_108 = arith.constant 5.000000e-01 : f32
    %338 = vector.broadcast %cst_108 : f32 to vector<8x192xf32>
    %339 = arith.mulf %338, %337 : vector<8x192xf32>
    %340 = arith.mulf %329, %303 : vector<8x192xf32>
    %341 = arith.mulf %321, %331 : vector<8x192xf32>
    %342 = arith.addf %340, %341 : vector<8x192xf32>
    %343 = math.tanh %342 : vector<8x192xf32>
    %344 = arith.mulf %339, %343 : vector<8x192xf32>
    %c9_i32 = arith.constant 9 : i32
    %345 = arith.index_cast %c9_i32 : i32 to index
    %c0_109 = arith.constant 0 : index
    %c0_110 = arith.constant 0 : index
    %346 = vector.load %arg0[%345, %c0_109, %c0_110] : memref<16x8x1xf32, #tpu.memory_space<vmem>>, vector<1x8x1xf32>
    %347 = vector.shape_cast %346 : vector<1x8x1xf32> to vector<8x1xf32>
    %348 = vector.broadcast %347 : vector<8x1xf32> to vector<8x1024xf32>
    %349 = arith.mulf %348, %3 : vector<8x1024xf32>
    %350 = arith.addf %349, %6 : vector<8x1024xf32>
    %cst_111 = arith.constant dense<0.000000e+00> : vector<8x1024xf32>
    %351 = tpu.matmul %344, %0, %cst_111 {dimension_numbers = #tpu.dot_dimension_numbers<[1], [0], [0], [1], [0, 0, 1, 1], [], []>} : vector<8x192xf32>, vector<192x1024xf32>, vector<8x1024xf32> -> vector<8x1024xf32>
    %352 = arith.addf %350, %351 : vector<8x1024xf32>
    %353 = vector.extract_strided_slice %352 {offsets = [0, 0], sizes = [8, 192], strides = [1, 1]} : vector<8x1024xf32> to vector<8x192xf32>
    %cst_112 = arith.constant 5.000000e-01 : f32
    %354 = vector.broadcast %cst_112 : f32 to vector<8x192xf32>
    %355 = arith.mulf %354, %353 : vector<8x192xf32>
    %356 = math.tanh %355 : vector<8x192xf32>
    %cst_113 = arith.constant 1.000000e+00 : f32
    %357 = vector.broadcast %cst_113 : f32 to vector<8x192xf32>
    %358 = arith.addf %356, %357 : vector<8x192xf32>
    %cst_114 = arith.constant 5.000000e-01 : f32
    %359 = vector.broadcast %cst_114 : f32 to vector<8x192xf32>
    %360 = arith.mulf %359, %358 : vector<8x192xf32>
    %361 = vector.extract_strided_slice %352 {offsets = [0, 256], sizes = [8, 192], strides = [1, 1]} : vector<8x1024xf32> to vector<8x192xf32>
    %cst_115 = arith.constant 5.000000e-01 : f32
    %362 = vector.broadcast %cst_115 : f32 to vector<8x192xf32>
    %363 = arith.mulf %362, %361 : vector<8x192xf32>
    %364 = math.tanh %363 : vector<8x192xf32>
    %cst_116 = arith.constant 1.000000e+00 : f32
    %365 = vector.broadcast %cst_116 : f32 to vector<8x192xf32>
    %366 = arith.addf %364, %365 : vector<8x192xf32>
    %cst_117 = arith.constant 5.000000e-01 : f32
    %367 = vector.broadcast %cst_117 : f32 to vector<8x192xf32>
    %368 = arith.mulf %367, %366 : vector<8x192xf32>
    %369 = vector.extract_strided_slice %352 {offsets = [0, 512], sizes = [8, 192], strides = [1, 1]} : vector<8x1024xf32> to vector<8x192xf32>
    %370 = math.tanh %369 : vector<8x192xf32>
    %371 = vector.extract_strided_slice %352 {offsets = [0, 768], sizes = [8, 192], strides = [1, 1]} : vector<8x1024xf32> to vector<8x192xf32>
    %cst_118 = arith.constant 5.000000e-01 : f32
    %372 = vector.broadcast %cst_118 : f32 to vector<8x192xf32>
    %373 = arith.mulf %372, %371 : vector<8x192xf32>
    %374 = math.tanh %373 : vector<8x192xf32>
    %cst_119 = arith.constant 1.000000e+00 : f32
    %375 = vector.broadcast %cst_119 : f32 to vector<8x192xf32>
    %376 = arith.addf %374, %375 : vector<8x192xf32>
    %cst_120 = arith.constant 5.000000e-01 : f32
    %377 = vector.broadcast %cst_120 : f32 to vector<8x192xf32>
    %378 = arith.mulf %377, %376 : vector<8x192xf32>
    %379 = arith.mulf %368, %342 : vector<8x192xf32>
    %380 = arith.mulf %360, %370 : vector<8x192xf32>
    %381 = arith.addf %379, %380 : vector<8x192xf32>
    %382 = math.tanh %381 : vector<8x192xf32>
    %383 = arith.mulf %378, %382 : vector<8x192xf32>
    %c10_i32 = arith.constant 10 : i32
    %384 = arith.index_cast %c10_i32 : i32 to index
    %c0_121 = arith.constant 0 : index
    %c0_122 = arith.constant 0 : index
    %385 = vector.load %arg0[%384, %c0_121, %c0_122] : memref<16x8x1xf32, #tpu.memory_space<vmem>>, vector<1x8x1xf32>
    %386 = vector.shape_cast %385 : vector<1x8x1xf32> to vector<8x1xf32>
    %387 = vector.broadcast %386 : vector<8x1xf32> to vector<8x1024xf32>
    %388 = arith.mulf %387, %3 : vector<8x1024xf32>
    %389 = arith.addf %388, %6 : vector<8x1024xf32>
    %cst_123 = arith.constant dense<0.000000e+00> : vector<8x1024xf32>
    %390 = tpu.matmul %383, %0, %cst_123 {dimension_numbers = #tpu.dot_dimension_numbers<[1], [0], [0], [1], [0, 0, 1, 1], [], []>} : vector<8x192xf32>, vector<192x1024xf32>, vector<8x1024xf32> -> vector<8x1024xf32>
    %391 = arith.addf %389, %390 : vector<8x1024xf32>
    %392 = vector.extract_strided_slice %391 {offsets = [0, 0], sizes = [8, 192], strides = [1, 1]} : vector<8x1024xf32> to vector<8x192xf32>
    %cst_124 = arith.constant 5.000000e-01 : f32
    %393 = vector.broadcast %cst_124 : f32 to vector<8x192xf32>
    %394 = arith.mulf %393, %392 : vector<8x192xf32>
    %395 = math.tanh %394 : vector<8x192xf32>
    %cst_125 = arith.constant 1.000000e+00 : f32
    %396 = vector.broadcast %cst_125 : f32 to vector<8x192xf32>
    %397 = arith.addf %395, %396 : vector<8x192xf32>
    %cst_126 = arith.constant 5.000000e-01 : f32
    %398 = vector.broadcast %cst_126 : f32 to vector<8x192xf32>
    %399 = arith.mulf %398, %397 : vector<8x192xf32>
    %400 = vector.extract_strided_slice %391 {offsets = [0, 256], sizes = [8, 192], strides = [1, 1]} : vector<8x1024xf32> to vector<8x192xf32>
    %cst_127 = arith.constant 5.000000e-01 : f32
    %401 = vector.broadcast %cst_127 : f32 to vector<8x192xf32>
    %402 = arith.mulf %401, %400 : vector<8x192xf32>
    %403 = math.tanh %402 : vector<8x192xf32>
    %cst_128 = arith.constant 1.000000e+00 : f32
    %404 = vector.broadcast %cst_128 : f32 to vector<8x192xf32>
    %405 = arith.addf %403, %404 : vector<8x192xf32>
    %cst_129 = arith.constant 5.000000e-01 : f32
    %406 = vector.broadcast %cst_129 : f32 to vector<8x192xf32>
    %407 = arith.mulf %406, %405 : vector<8x192xf32>
    %408 = vector.extract_strided_slice %391 {offsets = [0, 512], sizes = [8, 192], strides = [1, 1]} : vector<8x1024xf32> to vector<8x192xf32>
    %409 = math.tanh %408 : vector<8x192xf32>
    %410 = vector.extract_strided_slice %391 {offsets = [0, 768], sizes = [8, 192], strides = [1, 1]} : vector<8x1024xf32> to vector<8x192xf32>
    %cst_130 = arith.constant 5.000000e-01 : f32
    %411 = vector.broadcast %cst_130 : f32 to vector<8x192xf32>
    %412 = arith.mulf %411, %410 : vector<8x192xf32>
    %413 = math.tanh %412 : vector<8x192xf32>
    %cst_131 = arith.constant 1.000000e+00 : f32
    %414 = vector.broadcast %cst_131 : f32 to vector<8x192xf32>
    %415 = arith.addf %413, %414 : vector<8x192xf32>
    %cst_132 = arith.constant 5.000000e-01 : f32
    %416 = vector.broadcast %cst_132 : f32 to vector<8x192xf32>
    %417 = arith.mulf %416, %415 : vector<8x192xf32>
    %418 = arith.mulf %407, %381 : vector<8x192xf32>
    %419 = arith.mulf %399, %409 : vector<8x192xf32>
    %420 = arith.addf %418, %419 : vector<8x192xf32>
    %421 = math.tanh %420 : vector<8x192xf32>
    %422 = arith.mulf %417, %421 : vector<8x192xf32>
    %c11_i32 = arith.constant 11 : i32
    %423 = arith.index_cast %c11_i32 : i32 to index
    %c0_133 = arith.constant 0 : index
    %c0_134 = arith.constant 0 : index
    %424 = vector.load %arg0[%423, %c0_133, %c0_134] : memref<16x8x1xf32, #tpu.memory_space<vmem>>, vector<1x8x1xf32>
    %425 = vector.shape_cast %424 : vector<1x8x1xf32> to vector<8x1xf32>
    %426 = vector.broadcast %425 : vector<8x1xf32> to vector<8x1024xf32>
    %427 = arith.mulf %426, %3 : vector<8x1024xf32>
    %428 = arith.addf %427, %6 : vector<8x1024xf32>
    %cst_135 = arith.constant dense<0.000000e+00> : vector<8x1024xf32>
    %429 = tpu.matmul %422, %0, %cst_135 {dimension_numbers = #tpu.dot_dimension_numbers<[1], [0], [0], [1], [0, 0, 1, 1], [], []>} : vector<8x192xf32>, vector<192x1024xf32>, vector<8x1024xf32> -> vector<8x1024xf32>
    %430 = arith.addf %428, %429 : vector<8x1024xf32>
    %431 = vector.extract_strided_slice %430 {offsets = [0, 0], sizes = [8, 192], strides = [1, 1]} : vector<8x1024xf32> to vector<8x192xf32>
    %cst_136 = arith.constant 5.000000e-01 : f32
    %432 = vector.broadcast %cst_136 : f32 to vector<8x192xf32>
    %433 = arith.mulf %432, %431 : vector<8x192xf32>
    %434 = math.tanh %433 : vector<8x192xf32>
    %cst_137 = arith.constant 1.000000e+00 : f32
    %435 = vector.broadcast %cst_137 : f32 to vector<8x192xf32>
    %436 = arith.addf %434, %435 : vector<8x192xf32>
    %cst_138 = arith.constant 5.000000e-01 : f32
    %437 = vector.broadcast %cst_138 : f32 to vector<8x192xf32>
    %438 = arith.mulf %437, %436 : vector<8x192xf32>
    %439 = vector.extract_strided_slice %430 {offsets = [0, 256], sizes = [8, 192], strides = [1, 1]} : vector<8x1024xf32> to vector<8x192xf32>
    %cst_139 = arith.constant 5.000000e-01 : f32
    %440 = vector.broadcast %cst_139 : f32 to vector<8x192xf32>
    %441 = arith.mulf %440, %439 : vector<8x192xf32>
    %442 = math.tanh %441 : vector<8x192xf32>
    %cst_140 = arith.constant 1.000000e+00 : f32
    %443 = vector.broadcast %cst_140 : f32 to vector<8x192xf32>
    %444 = arith.addf %442, %443 : vector<8x192xf32>
    %cst_141 = arith.constant 5.000000e-01 : f32
    %445 = vector.broadcast %cst_141 : f32 to vector<8x192xf32>
    %446 = arith.mulf %445, %444 : vector<8x192xf32>
    %447 = vector.extract_strided_slice %430 {offsets = [0, 512], sizes = [8, 192], strides = [1, 1]} : vector<8x1024xf32> to vector<8x192xf32>
    %448 = math.tanh %447 : vector<8x192xf32>
    %449 = vector.extract_strided_slice %430 {offsets = [0, 768], sizes = [8, 192], strides = [1, 1]} : vector<8x1024xf32> to vector<8x192xf32>
    %cst_142 = arith.constant 5.000000e-01 : f32
    %450 = vector.broadcast %cst_142 : f32 to vector<8x192xf32>
    %451 = arith.mulf %450, %449 : vector<8x192xf32>
    %452 = math.tanh %451 : vector<8x192xf32>
    %cst_143 = arith.constant 1.000000e+00 : f32
    %453 = vector.broadcast %cst_143 : f32 to vector<8x192xf32>
    %454 = arith.addf %452, %453 : vector<8x192xf32>
    %cst_144 = arith.constant 5.000000e-01 : f32
    %455 = vector.broadcast %cst_144 : f32 to vector<8x192xf32>
    %456 = arith.mulf %455, %454 : vector<8x192xf32>
    %457 = arith.mulf %446, %420 : vector<8x192xf32>
    %458 = arith.mulf %438, %448 : vector<8x192xf32>
    %459 = arith.addf %457, %458 : vector<8x192xf32>
    %460 = math.tanh %459 : vector<8x192xf32>
    %461 = arith.mulf %456, %460 : vector<8x192xf32>
    %c12_i32 = arith.constant 12 : i32
    %462 = arith.index_cast %c12_i32 : i32 to index
    %c0_145 = arith.constant 0 : index
    %c0_146 = arith.constant 0 : index
    %463 = vector.load %arg0[%462, %c0_145, %c0_146] : memref<16x8x1xf32, #tpu.memory_space<vmem>>, vector<1x8x1xf32>
    %464 = vector.shape_cast %463 : vector<1x8x1xf32> to vector<8x1xf32>
    %465 = vector.broadcast %464 : vector<8x1xf32> to vector<8x1024xf32>
    %466 = arith.mulf %465, %3 : vector<8x1024xf32>
    %467 = arith.addf %466, %6 : vector<8x1024xf32>
    %cst_147 = arith.constant dense<0.000000e+00> : vector<8x1024xf32>
    %468 = tpu.matmul %461, %0, %cst_147 {dimension_numbers = #tpu.dot_dimension_numbers<[1], [0], [0], [1], [0, 0, 1, 1], [], []>} : vector<8x192xf32>, vector<192x1024xf32>, vector<8x1024xf32> -> vector<8x1024xf32>
    %469 = arith.addf %467, %468 : vector<8x1024xf32>
    %470 = vector.extract_strided_slice %469 {offsets = [0, 0], sizes = [8, 192], strides = [1, 1]} : vector<8x1024xf32> to vector<8x192xf32>
    %cst_148 = arith.constant 5.000000e-01 : f32
    %471 = vector.broadcast %cst_148 : f32 to vector<8x192xf32>
    %472 = arith.mulf %471, %470 : vector<8x192xf32>
    %473 = math.tanh %472 : vector<8x192xf32>
    %cst_149 = arith.constant 1.000000e+00 : f32
    %474 = vector.broadcast %cst_149 : f32 to vector<8x192xf32>
    %475 = arith.addf %473, %474 : vector<8x192xf32>
    %cst_150 = arith.constant 5.000000e-01 : f32
    %476 = vector.broadcast %cst_150 : f32 to vector<8x192xf32>
    %477 = arith.mulf %476, %475 : vector<8x192xf32>
    %478 = vector.extract_strided_slice %469 {offsets = [0, 256], sizes = [8, 192], strides = [1, 1]} : vector<8x1024xf32> to vector<8x192xf32>
    %cst_151 = arith.constant 5.000000e-01 : f32
    %479 = vector.broadcast %cst_151 : f32 to vector<8x192xf32>
    %480 = arith.mulf %479, %478 : vector<8x192xf32>
    %481 = math.tanh %480 : vector<8x192xf32>
    %cst_152 = arith.constant 1.000000e+00 : f32
    %482 = vector.broadcast %cst_152 : f32 to vector<8x192xf32>
    %483 = arith.addf %481, %482 : vector<8x192xf32>
    %cst_153 = arith.constant 5.000000e-01 : f32
    %484 = vector.broadcast %cst_153 : f32 to vector<8x192xf32>
    %485 = arith.mulf %484, %483 : vector<8x192xf32>
    %486 = vector.extract_strided_slice %469 {offsets = [0, 512], sizes = [8, 192], strides = [1, 1]} : vector<8x1024xf32> to vector<8x192xf32>
    %487 = math.tanh %486 : vector<8x192xf32>
    %488 = vector.extract_strided_slice %469 {offsets = [0, 768], sizes = [8, 192], strides = [1, 1]} : vector<8x1024xf32> to vector<8x192xf32>
    %cst_154 = arith.constant 5.000000e-01 : f32
    %489 = vector.broadcast %cst_154 : f32 to vector<8x192xf32>
    %490 = arith.mulf %489, %488 : vector<8x192xf32>
    %491 = math.tanh %490 : vector<8x192xf32>
    %cst_155 = arith.constant 1.000000e+00 : f32
    %492 = vector.broadcast %cst_155 : f32 to vector<8x192xf32>
    %493 = arith.addf %491, %492 : vector<8x192xf32>
    %cst_156 = arith.constant 5.000000e-01 : f32
    %494 = vector.broadcast %cst_156 : f32 to vector<8x192xf32>
    %495 = arith.mulf %494, %493 : vector<8x192xf32>
    %496 = arith.mulf %485, %459 : vector<8x192xf32>
    %497 = arith.mulf %477, %487 : vector<8x192xf32>
    %498 = arith.addf %496, %497 : vector<8x192xf32>
    %499 = math.tanh %498 : vector<8x192xf32>
    %500 = arith.mulf %495, %499 : vector<8x192xf32>
    %c13_i32 = arith.constant 13 : i32
    %501 = arith.index_cast %c13_i32 : i32 to index
    %c0_157 = arith.constant 0 : index
    %c0_158 = arith.constant 0 : index
    %502 = vector.load %arg0[%501, %c0_157, %c0_158] : memref<16x8x1xf32, #tpu.memory_space<vmem>>, vector<1x8x1xf32>
    %503 = vector.shape_cast %502 : vector<1x8x1xf32> to vector<8x1xf32>
    %504 = vector.broadcast %503 : vector<8x1xf32> to vector<8x1024xf32>
    %505 = arith.mulf %504, %3 : vector<8x1024xf32>
    %506 = arith.addf %505, %6 : vector<8x1024xf32>
    %cst_159 = arith.constant dense<0.000000e+00> : vector<8x1024xf32>
    %507 = tpu.matmul %500, %0, %cst_159 {dimension_numbers = #tpu.dot_dimension_numbers<[1], [0], [0], [1], [0, 0, 1, 1], [], []>} : vector<8x192xf32>, vector<192x1024xf32>, vector<8x1024xf32> -> vector<8x1024xf32>
    %508 = arith.addf %506, %507 : vector<8x1024xf32>
    %509 = vector.extract_strided_slice %508 {offsets = [0, 0], sizes = [8, 192], strides = [1, 1]} : vector<8x1024xf32> to vector<8x192xf32>
    %cst_160 = arith.constant 5.000000e-01 : f32
    %510 = vector.broadcast %cst_160 : f32 to vector<8x192xf32>
    %511 = arith.mulf %510, %509 : vector<8x192xf32>
    %512 = math.tanh %511 : vector<8x192xf32>
    %cst_161 = arith.constant 1.000000e+00 : f32
    %513 = vector.broadcast %cst_161 : f32 to vector<8x192xf32>
    %514 = arith.addf %512, %513 : vector<8x192xf32>
    %cst_162 = arith.constant 5.000000e-01 : f32
    %515 = vector.broadcast %cst_162 : f32 to vector<8x192xf32>
    %516 = arith.mulf %515, %514 : vector<8x192xf32>
    %517 = vector.extract_strided_slice %508 {offsets = [0, 256], sizes = [8, 192], strides = [1, 1]} : vector<8x1024xf32> to vector<8x192xf32>
    %cst_163 = arith.constant 5.000000e-01 : f32
    %518 = vector.broadcast %cst_163 : f32 to vector<8x192xf32>
    %519 = arith.mulf %518, %517 : vector<8x192xf32>
    %520 = math.tanh %519 : vector<8x192xf32>
    %cst_164 = arith.constant 1.000000e+00 : f32
    %521 = vector.broadcast %cst_164 : f32 to vector<8x192xf32>
    %522 = arith.addf %520, %521 : vector<8x192xf32>
    %cst_165 = arith.constant 5.000000e-01 : f32
    %523 = vector.broadcast %cst_165 : f32 to vector<8x192xf32>
    %524 = arith.mulf %523, %522 : vector<8x192xf32>
    %525 = vector.extract_strided_slice %508 {offsets = [0, 512], sizes = [8, 192], strides = [1, 1]} : vector<8x1024xf32> to vector<8x192xf32>
    %526 = math.tanh %525 : vector<8x192xf32>
    %527 = vector.extract_strided_slice %508 {offsets = [0, 768], sizes = [8, 192], strides = [1, 1]} : vector<8x1024xf32> to vector<8x192xf32>
    %cst_166 = arith.constant 5.000000e-01 : f32
    %528 = vector.broadcast %cst_166 : f32 to vector<8x192xf32>
    %529 = arith.mulf %528, %527 : vector<8x192xf32>
    %530 = math.tanh %529 : vector<8x192xf32>
    %cst_167 = arith.constant 1.000000e+00 : f32
    %531 = vector.broadcast %cst_167 : f32 to vector<8x192xf32>
    %532 = arith.addf %530, %531 : vector<8x192xf32>
    %cst_168 = arith.constant 5.000000e-01 : f32
    %533 = vector.broadcast %cst_168 : f32 to vector<8x192xf32>
    %534 = arith.mulf %533, %532 : vector<8x192xf32>
    %535 = arith.mulf %524, %498 : vector<8x192xf32>
    %536 = arith.mulf %516, %526 : vector<8x192xf32>
    %537 = arith.addf %535, %536 : vector<8x192xf32>
    %538 = math.tanh %537 : vector<8x192xf32>
    %539 = arith.mulf %534, %538 : vector<8x192xf32>
    %c14_i32 = arith.constant 14 : i32
    %540 = arith.index_cast %c14_i32 : i32 to index
    %c0_169 = arith.constant 0 : index
    %c0_170 = arith.constant 0 : index
    %541 = vector.load %arg0[%540, %c0_169, %c0_170] : memref<16x8x1xf32, #tpu.memory_space<vmem>>, vector<1x8x1xf32>
    %542 = vector.shape_cast %541 : vector<1x8x1xf32> to vector<8x1xf32>
    %543 = vector.broadcast %542 : vector<8x1xf32> to vector<8x1024xf32>
    %544 = arith.mulf %543, %3 : vector<8x1024xf32>
    %545 = arith.addf %544, %6 : vector<8x1024xf32>
    %cst_171 = arith.constant dense<0.000000e+00> : vector<8x1024xf32>
    %546 = tpu.matmul %539, %0, %cst_171 {dimension_numbers = #tpu.dot_dimension_numbers<[1], [0], [0], [1], [0, 0, 1, 1], [], []>} : vector<8x192xf32>, vector<192x1024xf32>, vector<8x1024xf32> -> vector<8x1024xf32>
    %547 = arith.addf %545, %546 : vector<8x1024xf32>
    %548 = vector.extract_strided_slice %547 {offsets = [0, 0], sizes = [8, 192], strides = [1, 1]} : vector<8x1024xf32> to vector<8x192xf32>
    %cst_172 = arith.constant 5.000000e-01 : f32
    %549 = vector.broadcast %cst_172 : f32 to vector<8x192xf32>
    %550 = arith.mulf %549, %548 : vector<8x192xf32>
    %551 = math.tanh %550 : vector<8x192xf32>
    %cst_173 = arith.constant 1.000000e+00 : f32
    %552 = vector.broadcast %cst_173 : f32 to vector<8x192xf32>
    %553 = arith.addf %551, %552 : vector<8x192xf32>
    %cst_174 = arith.constant 5.000000e-01 : f32
    %554 = vector.broadcast %cst_174 : f32 to vector<8x192xf32>
    %555 = arith.mulf %554, %553 : vector<8x192xf32>
    %556 = vector.extract_strided_slice %547 {offsets = [0, 256], sizes = [8, 192], strides = [1, 1]} : vector<8x1024xf32> to vector<8x192xf32>
    %cst_175 = arith.constant 5.000000e-01 : f32
    %557 = vector.broadcast %cst_175 : f32 to vector<8x192xf32>
    %558 = arith.mulf %557, %556 : vector<8x192xf32>
    %559 = math.tanh %558 : vector<8x192xf32>
    %cst_176 = arith.constant 1.000000e+00 : f32
    %560 = vector.broadcast %cst_176 : f32 to vector<8x192xf32>
    %561 = arith.addf %559, %560 : vector<8x192xf32>
    %cst_177 = arith.constant 5.000000e-01 : f32
    %562 = vector.broadcast %cst_177 : f32 to vector<8x192xf32>
    %563 = arith.mulf %562, %561 : vector<8x192xf32>
    %564 = vector.extract_strided_slice %547 {offsets = [0, 512], sizes = [8, 192], strides = [1, 1]} : vector<8x1024xf32> to vector<8x192xf32>
    %565 = math.tanh %564 : vector<8x192xf32>
    %566 = vector.extract_strided_slice %547 {offsets = [0, 768], sizes = [8, 192], strides = [1, 1]} : vector<8x1024xf32> to vector<8x192xf32>
    %cst_178 = arith.constant 5.000000e-01 : f32
    %567 = vector.broadcast %cst_178 : f32 to vector<8x192xf32>
    %568 = arith.mulf %567, %566 : vector<8x192xf32>
    %569 = math.tanh %568 : vector<8x192xf32>
    %cst_179 = arith.constant 1.000000e+00 : f32
    %570 = vector.broadcast %cst_179 : f32 to vector<8x192xf32>
    %571 = arith.addf %569, %570 : vector<8x192xf32>
    %cst_180 = arith.constant 5.000000e-01 : f32
    %572 = vector.broadcast %cst_180 : f32 to vector<8x192xf32>
    %573 = arith.mulf %572, %571 : vector<8x192xf32>
    %574 = arith.mulf %563, %537 : vector<8x192xf32>
    %575 = arith.mulf %555, %565 : vector<8x192xf32>
    %576 = arith.addf %574, %575 : vector<8x192xf32>
    %577 = math.tanh %576 : vector<8x192xf32>
    %578 = arith.mulf %573, %577 : vector<8x192xf32>
    %c15_i32 = arith.constant 15 : i32
    %579 = arith.index_cast %c15_i32 : i32 to index
    %c0_181 = arith.constant 0 : index
    %c0_182 = arith.constant 0 : index
    %580 = vector.load %arg0[%579, %c0_181, %c0_182] : memref<16x8x1xf32, #tpu.memory_space<vmem>>, vector<1x8x1xf32>
    %581 = vector.shape_cast %580 : vector<1x8x1xf32> to vector<8x1xf32>
    %582 = vector.broadcast %581 : vector<8x1xf32> to vector<8x1024xf32>
    %583 = arith.mulf %582, %3 : vector<8x1024xf32>
    %584 = arith.addf %583, %6 : vector<8x1024xf32>
    %cst_183 = arith.constant dense<0.000000e+00> : vector<8x1024xf32>
    %585 = tpu.matmul %578, %0, %cst_183 {dimension_numbers = #tpu.dot_dimension_numbers<[1], [0], [0], [1], [0, 0, 1, 1], [], []>} : vector<8x192xf32>, vector<192x1024xf32>, vector<8x1024xf32> -> vector<8x1024xf32>
    %586 = arith.addf %584, %585 : vector<8x1024xf32>
    %587 = vector.extract_strided_slice %586 {offsets = [0, 0], sizes = [8, 192], strides = [1, 1]} : vector<8x1024xf32> to vector<8x192xf32>
    %cst_184 = arith.constant 5.000000e-01 : f32
    %588 = vector.broadcast %cst_184 : f32 to vector<8x192xf32>
    %589 = arith.mulf %588, %587 : vector<8x192xf32>
    %590 = math.tanh %589 : vector<8x192xf32>
    %cst_185 = arith.constant 1.000000e+00 : f32
    %591 = vector.broadcast %cst_185 : f32 to vector<8x192xf32>
    %592 = arith.addf %590, %591 : vector<8x192xf32>
    %cst_186 = arith.constant 5.000000e-01 : f32
    %593 = vector.broadcast %cst_186 : f32 to vector<8x192xf32>
    %594 = arith.mulf %593, %592 : vector<8x192xf32>
    %595 = vector.extract_strided_slice %586 {offsets = [0, 256], sizes = [8, 192], strides = [1, 1]} : vector<8x1024xf32> to vector<8x192xf32>
    %cst_187 = arith.constant 5.000000e-01 : f32
    %596 = vector.broadcast %cst_187 : f32 to vector<8x192xf32>
    %597 = arith.mulf %596, %595 : vector<8x192xf32>
    %598 = math.tanh %597 : vector<8x192xf32>
    %cst_188 = arith.constant 1.000000e+00 : f32
    %599 = vector.broadcast %cst_188 : f32 to vector<8x192xf32>
    %600 = arith.addf %598, %599 : vector<8x192xf32>
    %cst_189 = arith.constant 5.000000e-01 : f32
    %601 = vector.broadcast %cst_189 : f32 to vector<8x192xf32>
    %602 = arith.mulf %601, %600 : vector<8x192xf32>
    %603 = vector.extract_strided_slice %586 {offsets = [0, 512], sizes = [8, 192], strides = [1, 1]} : vector<8x1024xf32> to vector<8x192xf32>
    %604 = math.tanh %603 : vector<8x192xf32>
    %605 = vector.extract_strided_slice %586 {offsets = [0, 768], sizes = [8, 192], strides = [1, 1]} : vector<8x1024xf32> to vector<8x192xf32>
    %cst_190 = arith.constant 5.000000e-01 : f32
    %606 = vector.broadcast %cst_190 : f32 to vector<8x192xf32>
    %607 = arith.mulf %606, %605 : vector<8x192xf32>
    %608 = math.tanh %607 : vector<8x192xf32>
    %cst_191 = arith.constant 1.000000e+00 : f32
    %609 = vector.broadcast %cst_191 : f32 to vector<8x192xf32>
    %610 = arith.addf %608, %609 : vector<8x192xf32>
    %cst_192 = arith.constant 5.000000e-01 : f32
    %611 = vector.broadcast %cst_192 : f32 to vector<8x192xf32>
    %612 = arith.mulf %611, %610 : vector<8x192xf32>
    %613 = arith.mulf %602, %576 : vector<8x192xf32>
    %614 = arith.mulf %594, %604 : vector<8x192xf32>
    %615 = arith.addf %613, %614 : vector<8x192xf32>
    %616 = math.tanh %615 : vector<8x192xf32>
    %617 = arith.mulf %612, %616 : vector<8x192xf32>
    %c15_i32_193 = arith.constant 15 : i32
    %c0_194 = arith.constant 0 : index
    %c0_195 = arith.constant 0 : index
    %618 = vector.load %arg4[%c0_194, %c0_195] : memref<1x192xf32, #tpu.memory_space<vmem>>, vector<1x192xf32>
    %619 = vector.broadcast %618 : vector<1x192xf32> to vector<8x192xf32>
    %620 = arith.mulf %617, %619 : vector<8x192xf32>
    %cst_196 = arith.constant dense<0.000000e+00> : vector<8xf32>
    %621 = vector.multi_reduction <add>, %620, %cst_196 [1] : vector<8x192xf32> to vector<8xf32>
    %622 = vector.shape_cast %621 : vector<8xf32> to vector<8x1xf32>
    %c0_197 = arith.constant 0 : index
    %623 = memref.load %arg5[%c0_197] : memref<1xf32, #tpu.memory_space<smem>>
    %624 = vector.broadcast %623 : f32 to vector<8x1xf32>
    %625 = arith.addf %622, %624 : vector<8x1xf32>
    %c0_198 = arith.constant 0 : index
    %c0_199 = arith.constant 0 : index
    %626 = vector.load %arg6[%c0_198, %c0_199] : memref<8x1xf32, #tpu.memory_space<vmem>>, vector<8x1xf32>
    tpu.vector_store %arg6[%c0_198, %c0_199], %625 {strides = array<i32>} : memref<8x1xf32, #tpu.memory_space<vmem>>, vector<8x1xf32>,
    return
  }
}

</mosaic_0001>

<bundles_post_ra>
// kernel: tpu_custom_call.1
= control target key start
LH: loop header
LB: loop body
LE: loop exit
PB: predicated region body
PF: predicated region fallthrough
CT: control target
= control target key end

     0   :  { %12 = vsyncpa [#allocation4], 0  ;;  %s8996_s21 = smov [#allocation3]   ;;  %s11253_s0 = inlined_call_operand.vmem [shape: f32[16,8,1], index: 0, kind: input, shape index: {}]   ;;  %s11254_s1 = inlined_call_operand.vmem [shape: f32[1,1024], index: 1, kind: input, shape index: {}]   ;;  %s11255_s2 = inlined_call_operand.vmem [shape: f32[1,1024], index: 2, kind: input, shape index: {}]   ;;  %s11256_s3 = inlined_call_operand.hbm [shape: f32[192,1024], index: 3, kind: input, shape index: {}]   ;;  %s11257_s4 = inlined_call_operand.vmem [shape: f32[1,192], index: 4, kind: input, shape index: {}]   ;;  %s11258_s5 = inlined_call_operand.<no memory space> [shape: f32[1], index: 5, kind: input, shape index: {}]   ;;  %s11259_s6 = inlined_call_operand.vmem [shape: f32[8,1], index: 6, kind: output, shape index: {}]  }
   0x1   :  { %s24_s22 = sshll.u32 %s8996_s21, 4  ;;  %s8972_s25 = scalar_lea.hbm %s11256_s3, 24576  ;;  %s25_s22 = int_to_ptr.vmem [resolvable:$true] %s24_s22 }
   0x2   :  { %p8973_p0 = scmp.ne.s32.totalorder %s11256_s3, %s8972_s25  ;;  %p8976_p1 = scmp.lt.u32.totalorder %s8972_s25, %s11256_s3 }
   0x4   :  { %p8978_p2 = pnand %p8976_p1, %p8973_p0 }
   0x6   :  { %8981 = shalt.err (!%p8978_p2)
}
   0x7   :  { %s8982_s30 = scalar_lea.vmem %s25_s22, 24576  ;;  %p8987_p4 = scmp.lt.s32.totalorder %s25_s22, %s25_s22 }
   0x8   :  { %p8983_p3 = scmp.ne.s32.totalorder %s25_s22, %s8982_s30  ;;  %p8988_p5 = scmp.lt.s32.totalorder %s8982_s30, %s8982_s30 }
   0xa   :  { %p8989_p6 = por %p8988_p5, %p8987_p4 }
   0xc   :  { %p8990_p7 = pnand %p8989_p6, %p8983_p3 }
   0xe   :  { %8993 = shalt.err (!%p8990_p7)
}
   0xf   :  { %s8997_s7 = smov 1024   ;;  %s8998_s8 = smov 64  }
  0x10   :  { %30 = dma.hbm_to_vmem [thread:$0]  %s11256_s3, 24576, %s25_s22, [#allocation4], %s8997_s7, %s8997_s7, %s8998_s8  }
  0x11   :  { %8994 = dma.done.wait [#allocation4], 24576  }
  0x12   :  { %8995 = vsyncadd [#allocation4], 4294942720  ;;  %v8999_v0 = vmov 0   ;;  %v314_v1 = vld [vmem:[%s11253_s0] sm:$0xff]  ;;  %v5695_v2 = vld [vmem:[%s11253_s0 + $0x8] sm:$0xff]  ;;  %v232_v22 = vlaneseq  ;;  %vm379_vm0 = vcmask 523264  }
  0x13   :  { %8654 = vset.pattern.permute.xlu0 %v8999_v0  ;;  %8655 = vset.pattern.permute.xlu1 %v8999_v0  ;;  %v39_v3 = vld [vmem:[#allocation3 + $0x8] sm:$0xff]  ;;  %v41_v5 = vld [vmem:[#allocation3 + $0x18] sm:$0xff]  ;;  %v5710_v7 = vld [vmem:[%s11253_s0 + $0x20] sm:$0xff]  ;;  %vm5688_vm1 = vcmask 7168  }
  0x14   :  { %317 = vperm.xlu0 %8654, %v314_v1   ;;  %v47_v4 = vld [vmem:[#allocation3 + $0x48] sm:$0xff]  ;;  %v49_v6 = vld [vmem:[#allocation3 + $0x58] sm:$0xff]  ;;  %v38_v10 = vld [vmem:[#allocation3] sm:$0xff]  ;;  %v9085_v40 = vshrl.u32 %v232_v22, 7 }
  0x15   :  { %v9056_v8 = vpack.c.bf16 %v47_v4, %v39_v3  ;;  %v9058_v9 = vpack.c.bf16 %v49_v6, %v41_v5  ;;  %v46_v11 = vld [vmem:[#allocation3 + $0x40] sm:$0xff]  ;;  %v40_v12 = vld [vmem:[#allocation3 + $0x10] sm:$0xff]  ;;  %v55_v15 = vld [vmem:[#allocation3 + $0x88] sm:$0xff] }
  0x16   :  { %v9060_v13 = vpack.c.bf16 %v46_v11, %v38_v10  ;;  %v48_v14 = vld [vmem:[#allocation3 + $0x50] sm:$0xff]  ;;  %v63_v16 = vld [vmem:[#allocation3 + $0xc8] sm:$0xff]  ;;  %v57_v19 = vld [vmem:[#allocation3 + $0x98] sm:$0xff]  ;;  %v242_v49 = vsub.s32 2, %v9085_v40  ;;  %v246_v53 = vsub.s32 3, %v9085_v40 }
  0x17   :  { %11488 = vst [vmem:[#allocation6_spill] sm:$0xff] %v9056_v8  ;;  %11489 = vst [vmem:[#allocation7_spill] sm:$0xff] %v9058_v9  ;;  %5771 = vmatprep.subr.bf16.mxu0 %v9056_v8  ;;  %5819 = vmatprep.subr.bf16.mxu1 %v9058_v9  ;;  %v9064_v17 = vpack.c.bf16 %v48_v14, %v40_v12  ;;  %v9066_v18 = vpack.c.bf16 %v63_v16, %v55_v15  ;;  %v65_v20 = vld [vmem:[#allocation3 + $0xd8] sm:$0xff]  ;;  %v54_v21 = vld [vmem:[#allocation3 + $0x80] sm:$0xff] }
  0x18   :  { %360 = vperm.xlu0 %8654, %v5695_v2   ;;  %11490 = vst [vmem:[#allocation8_spill] sm:$0xff] %v9060_v13  ;;  %5773 = vmatpush1.bf16.msra.mxu0 %v9060_v13  ;;  %v9069_v23 = vpack.c.bf16 %v65_v20, %v57_v19  ;;  %v62_v24 = vld [vmem:[#allocation3 + $0xc0] sm:$0xff]  ;;  %v56_v25 = vld [vmem:[#allocation3 + $0x90] sm:$0xff]  ;;  %v71_v29 = vld [vmem:[#allocation3 + $0x108] sm:$0xff] }
  0x19   :  { %11491 = vst [vmem:[#allocation9_spill] sm:$0xff] %v9064_v17  ;;  %11492 = vst [vmem:[#allocation10_spill] sm:$0xff] %v9066_v18  ;;  %v64_v26 = vld [vmem:[#allocation3 + $0xd0] sm:$0xff]  ;;  %5821 = vmatpush1.bf16.msra.mxu1 %v9064_v17  ;;  %5775 = vmatprep.subr.bf16.mxu0 %v9066_v18  ;;  %v9073_v27 = vpack.c.bf16 %v62_v24, %v54_v21  ;;  %v79_v30 = vld [vmem:[#allocation3 + $0x148] sm:$0xff] }
  0x1a   :  { %11493 = vst [vmem:[#allocation11_spill] sm:$0xff] %v9069_v23  ;;  %v9075_v28 = vpack.c.bf16 %v64_v26, %v56_v25  ;;  %v73_v31 = vld [vmem:[#allocation3 + $0x118] sm:$0xff]  ;;  %5823 = vmatprep.subr.bf16.mxu1 %v9069_v23  ;;  %v9078_v32 = vpack.c.bf16 %v79_v30, %v71_v29  ;;  %v70_v34 = vld [vmem:[#allocation3 + $0x100] sm:$0xff]  ;;  %v5720_v36 = vld [vmem:[%s11253_s0 + $0x30] sm:$0xff] }
  0x1b   :  { %11494 = vst [vmem:[#allocation12_spill] sm:$0xff] %v9073_v27  ;;  %v81_v33 = vld [vmem:[#allocation3 + $0x158] sm:$0xff]  ;;  %v78_v35 = vld [vmem:[#allocation3 + $0x140] sm:$0xff]  ;;  %v72_v38 = vld [vmem:[#allocation3 + $0x110] sm:$0xff] }
  0x1c   :  { %11495 = vst [vmem:[#allocation13_spill] sm:$0xff] %v9075_v28  ;;  %1423 = vperm.xlu0 %8654, %v5710_v7   ;;  %11496 = vst [vmem:[#allocation14_spill] sm:$0xff] %v9078_v32  ;;  %v9083_v37 = vpack.c.bf16 %v81_v33, %v73_v31  ;;  %v80_v39 = vld [vmem:[#allocation3 + $0x150] sm:$0xff]  ;;  %5777 = vmatpush1.bf16.msra.mxu0 %v9073_v27  ;;  %v9088_v41 = vpack.c.bf16 %v78_v35, %v70_v34  ;;  %v87_v42 = vld [vmem:[#allocation3 + $0x188] sm:$0xff] }
  0x1d   :  { %v95_v43 = vld [vmem:[#allocation3 + $0x1c8] sm:$0xff]  ;;  %v5730_v44 = vld [vmem:[%s11253_s0 + $0x40] sm:$0xff]  ;;  %5825 = vmatpush1.bf16.msra.mxu1 %v9075_v28  ;;  %5779 = vmatprep.subr.bf16.mxu0 %v9078_v32  ;;  %v9095_v45 = vpack.c.bf16 %v80_v39, %v72_v38  ;;  %v89_v46 = vld [vmem:[#allocation3 + $0x198] sm:$0xff] }
  0x1e   :  { %11497 = vst [vmem:[#allocation15_spill] sm:$0xff] %v9083_v37  ;;  %11498 = vst [vmem:[#allocation16_spill] sm:$0xff] %v9088_v41  ;;  %v97_v47 = vld [vmem:[#allocation3 + $0x1d8] sm:$0xff]  ;;  %v86_v48 = vld [vmem:[#allocation3 + $0x180] sm:$0xff]  ;;  %5827 = vmatprep.subr.bf16.mxu1 %v9083_v37  ;;  %v9100_v54 = vpack.c.bf16 %v95_v43, %v87_v42 }
  0x1f   :  { %11499 = vst [vmem:[#allocation17_spill] sm:$0xff] %v9095_v45  ;;  %v94_v50 = vld [vmem:[#allocation3 + $0x1c0] sm:$0xff]  ;;  %v88_v51 = vld [vmem:[#allocation3 + $0x190] sm:$0xff]  ;;  %v9102_v55 = vpack.c.bf16 %v97_v47, %v89_v46  ;;  %v103_v56 = vld [vmem:[#allocation3 + $0x208] sm:$0xff] }
  0x20   :  { %2131 = vperm.xlu0 %8654, %v5720_v36   ;;  %v96_v52 = vld [vmem:[#allocation3 + $0x1d0] sm:$0xff]  ;;  %11500 = vst [vmem:[#allocation18_spill] sm:$0xff] %v9100_v54  ;;  %v111_v57 = vld [vmem:[#allocation3 + $0x248] sm:$0xff]  ;;  %v105_v58 = vld [vmem:[#allocation3 + $0x218] sm:$0xff]  ;;  %5781 = vmatpush1.bf16.msra.mxu0 %v9088_v41  ;;  %v9115_v61 = vpack.c.bf16 %v94_v50, %v86_v48 }
  0x21   :  { %11501 = vst [vmem:[#allocation19_spill] sm:$0xff] %v9102_v55  ;;  %v9108_v59 = vld [vmem:[%s11254_s1] sm:$0xff]  ;;  %v113_v62 = vld [vmem:[#allocation3 + $0x258] sm:$0xff]  ;;  %5829 = vmatpush1.bf16.msra.mxu1 %v9095_v45  ;;  %5783 = vmatprep.subr.bf16.mxu0 %v9100_v54  ;;  %v9119_v63 = vpack.c.bf16 %v96_v52, %v88_v51  ;;  %v9121_v0 = vpack.c.bf16 %v111_v57, %v103_v56  ;;  %v104_v3 = vld [vmem:[#allocation3 + $0x210] sm:$0xff] }
  0x22   :  { %v9113_v60 = vld [vmem:[%s11255_s2] sm:$0xff]  ;;  %11502 = vst [vmem:[#allocation20_spill] sm:$0xff] %v9115_v61  ;;  %v9124_v4 = vrot.slane %v9108_v59, %v242_v49  ;;  %5831 = vmatprep.subr.bf16.mxu1 %v9102_v55  ;;  %v9127_v5 = vpack.c.bf16 %v113_v62, %v105_v58  ;;  %v112_v6 = vld [vmem:[#allocation3 + $0x250] sm:$0xff]  ;;  %v119_v7 = vld [vmem:[#allocation3 + $0x288] sm:$0xff]  ;;  %v9133_v12 = vrot.slane %v9108_v59, %v246_v53 }
  0x23   :  { %11503 = vst [vmem:[#allocation21_spill] sm:$0xff] %v9119_v63  ;;  %11504 = vst [vmem:[#allocation22_spill] sm:$0xff] %v9121_v0  ;;  %v102_v1 = vld [vmem:[#allocation3 + $0x200] sm:$0xff]  ;;  %v127_v10 = vld [vmem:[#allocation3 + $0x2c8] sm:$0xff]  ;;  %v9130_v11 = vrot.slane %v9113_v60, %v242_v49  ;;  %v9139_v19 = vrot.slane %v9113_v60, %v246_v53  ;;  %v9146_v21 = vpack.c.bf16 %v112_v6, %v104_v3 }
  0x24   :  { %v110_v2 = vld [vmem:[#allocation3 + $0x240] sm:$0xff]  ;;  %11505 = vst [vmem:[#allocation23_spill] sm:$0xff] %v9124_v4  ;;  %2839 = vperm.xlu0 %8654, %v5730_v44   ;;  %11506 = vst [vmem:[#allocation24_spill] sm:$0xff] %v9127_v5  ;;  %v5740_v14 = vld [vmem:[%s11253_s0 + $0x50] sm:$0xff]  ;;  %5785 = vmatpush1.bf16.msra.mxu0 %v9115_v61  ;;  %v9148_v22 = vpack.c.bf16 %v127_v10, %v119_v7 }
  0x25   :  { %11507 = vst [vmem:[#allocation25_spill] sm:$0xff] %v9130_v11  ;;  %11508 = vst [vmem:[#allocation26_spill] sm:$0xff] %v9133_v12  ;;  %v121_v15 = vld [vmem:[#allocation3 + $0x298] sm:$0xff]  ;;  %v9142_v20 = vpack.c.bf16 %v110_v2, %v102_v1  ;;  %5833 = vmatpush1.bf16.msra.mxu1 %v9119_v63  ;;  %5787 = vmatprep.subr.bf16.mxu0 %v9121_v0  ;;  %v118_v24 = vld [vmem:[#allocation3 + $0x280] sm:$0xff] }
  0x26   :  { %v129_v16 = vld [vmem:[#allocation3 + $0x2d8] sm:$0xff]  ;;  %11509 = vst [vmem:[#allocation27_spill] sm:$0xff] %v9139_v19  ;;  %11511 = vst [vmem:[#allocation29_spill] sm:$0xff] %v9146_v21  ;;  %v126_v25 = vld [vmem:[#allocation3 + $0x2c0] sm:$0xff]  ;;  %5835 = vmatprep.subr.bf16.mxu1 %v9127_v5 }
  0x27   :  { %11510 = vst [vmem:[#allocation28_spill] sm:$0xff] %v9142_v20  ;;  %11512 = vst [vmem:[#allocation30_spill] sm:$0xff] %v9148_v22  ;;  %v120_v26 = vld [vmem:[#allocation3 + $0x290] sm:$0xff]  ;;  %v9151_v29 = vpack.c.bf16 %v129_v16, %v121_v15  ;;  %v135_v31 = vld [vmem:[#allocation3 + $0x308] sm:$0xff]  ;;  %v9157_v38 = vpack.c.bf16 %v126_v25, %v118_v24 }
  0x28   :  { %3547 = vperm.xlu0 %8654, %v5740_v14   ;;  %v128_v30 = vld [vmem:[#allocation3 + $0x2d0] sm:$0xff]  ;;  %v143_v33 = vld [vmem:[#allocation3 + $0x348] sm:$0xff]  ;;  %v5750_v34 = vld [vmem:[%s11253_s0 + $0x60] sm:$0xff]  ;;  %5789 = vmatpush1.bf16.msra.mxu0 %v9142_v20 }
  0x29   :  { %11513 = vst [vmem:[#allocation31_spill] sm:$0xff] %v9151_v29  ;;  %v137_v35 = vld [vmem:[#allocation3 + $0x318] sm:$0xff]  ;;  %11514 = vst [vmem:[#allocation32_spill] sm:$0xff] %v9157_v38  ;;  %5837 = vmatpush1.bf16.msra.mxu1 %v9146_v21  ;;  %5791 = vmatprep.subr.bf16.mxu0 %v9148_v22  ;;  %v9161_v39 = vpack.c.bf16 %v128_v30, %v120_v26  ;;  %v9163_v42 = vpack.c.bf16 %v143_v33, %v135_v31  ;;  %v134_v43 = vld [vmem:[#allocation3 + $0x300] sm:$0xff] }
  0x2a   :  { %v145_v36 = vld [vmem:[#allocation3 + $0x358] sm:$0xff]  ;;  %v142_v44 = vld [vmem:[#allocation3 + $0x340] sm:$0xff]  ;;  %v136_v46 = vld [vmem:[#allocation3 + $0x310] sm:$0xff]  ;;  %5839 = vmatprep.subr.bf16.mxu1 %v9151_v29 }
  0x2b   :  { %11515 = vst [vmem:[#allocation33_spill] sm:$0xff] %v9161_v39  ;;  %11516 = vst [vmem:[#allocation34_spill] sm:$0xff] %v9163_v42  ;;  %v9166_v47 = vpack.c.bf16 %v145_v36, %v137_v35  ;;  %v144_v48 = vld [vmem:[#allocation3 + $0x350] sm:$0xff]  ;;  %v151_v49 = vld [vmem:[#allocation3 + $0x388] sm:$0xff]  ;;  %v9172_v56 = vpack.c.bf16 %v142_v44, %v134_v43 }
  0x2c   :  { %4255 = vperm.xlu0 %8654, %v5750_v34   ;;  %v159_v50 = vld [vmem:[#allocation3 + $0x3c8] sm:$0xff]  ;;  %v5760_v51 = vld [vmem:[%s11253_s0 + $0x70] sm:$0xff]  ;;  %v153_v52 = vld [vmem:[#allocation3 + $0x398] sm:$0xff]  ;;  %5793 = vmatpush1.bf16.msra.mxu0 %v9157_v38  ;;  %v9176_v57 = vpack.c.bf16 %v144_v48, %v136_v46 }
  0x2d   :  { %11517 = vst [vmem:[#allocation35_spill] sm:$0xff] %v9166_v47  ;;  %v161_v53 = vld [vmem:[#allocation3 + $0x3d8] sm:$0xff]  ;;  %11518 = vst [vmem:[#allocation36_spill] sm:$0xff] %v9172_v56  ;;  %5841 = vmatpush1.bf16.msra.mxu1 %v9161_v39  ;;  %5795 = vmatprep.subr.bf16.mxu0 %v9163_v42  ;;  %v9178_v58 = vpack.c.bf16 %v159_v50, %v151_v49  ;;  %v150_v62 = vld [vmem:[#allocation3 + $0x380] sm:$0xff] }
  0x2e   :  { %11519 = vst [vmem:[#allocation37_spill] sm:$0xff] %v9176_v57  ;;  %v158_v1 = vld [vmem:[#allocation3 + $0x3c0] sm:$0xff]  ;;  %v152_v2 = vld [vmem:[#allocation3 + $0x390] sm:$0xff]  ;;  %5843 = vmatprep.subr.bf16.mxu1 %v9166_v47  ;;  %v9181_v3 = vpack.c.bf16 %v161_v53, %v153_v52  ;;  %v167_v7 = vld [vmem:[#allocation3 + $0x408] sm:$0xff] }
  0x2f   :  { %11520 = vst [vmem:[#allocation38_spill] sm:$0xff] %v9178_v58  ;;  %v160_v6 = vld [vmem:[#allocation3 + $0x3d0] sm:$0xff]  ;;  %v175_v10 = vld [vmem:[#allocation3 + $0x448] sm:$0xff]  ;;  %v169_v14 = vld [vmem:[#allocation3 + $0x418] sm:$0xff]  ;;  %v9184_v16 = vpack.c.bf16 %v158_v1, %v150_v62 }
  0x30   :  { %4963 = vperm.xlu0 %8654, %v5760_v51   ;;  %11521 = vst [vmem:[#allocation39_spill] sm:$0xff] %v9181_v3  ;;  %v177_v15 = vld [vmem:[#allocation3 + $0x458] sm:$0xff]  ;;  %5797 = vmatpush1.bf16.msra.mxu0 %v9172_v56  ;;  %v9188_v24 = vpack.c.bf16 %v160_v6, %v152_v2  ;;  %v9190_v25 = vpack.c.bf16 %v175_v10, %v167_v7  ;;  %v166_v26 = vld [vmem:[#allocation3 + $0x400] sm:$0xff]  ;;  %v168_v31 = vld [vmem:[#allocation3 + $0x410] sm:$0xff] }
  0x31   :  { %11522 = vst [vmem:[#allocation40_spill] sm:$0xff] %v9184_v16  ;;  %5845 = vmatpush1.bf16.msra.mxu1 %v9176_v57  ;;  %5799 = vmatprep.subr.bf16.mxu0 %v9178_v58  ;;  %v174_v30 = vld [vmem:[#allocation3 + $0x440] sm:$0xff]  ;;  %v9193_v33 = vpack.c.bf16 %v177_v15, %v169_v14  ;;  %v176_v34 = vld [vmem:[#allocation3 + $0x450] sm:$0xff]  ;;  %v183_v35 = vld [vmem:[#allocation3 + $0x488] sm:$0xff] }
  0x32   :  { %11523 = vst [vmem:[#allocation41_spill] sm:$0xff] %v9188_v24  ;;  %11524 = vst [vmem:[#allocation42_spill] sm:$0xff] %v9190_v25  ;;  %5847 = vmatprep.subr.bf16.mxu1 %v9181_v3  ;;  %v191_v36 = vld [vmem:[#allocation3 + $0x4c8] sm:$0xff]  ;;  %v185_v43 = vld [vmem:[#allocation3 + $0x498] sm:$0xff]  ;;  %v9196_v46 = vpack.c.bf16 %v174_v30, %v166_v26  ;;  %v9200_v48 = vpack.c.bf16 %v176_v34, %v168_v31 }
  0x33   :  { %11525 = vst [vmem:[#allocation43_spill] sm:$0xff] %v9193_v33  ;;  %v193_v44 = vld [vmem:[#allocation3 + $0x4d8] sm:$0xff]  ;;  %v9202_v49 = vpack.c.bf16 %v191_v36, %v183_v35  ;;  %v182_v50 = vld [vmem:[#allocation3 + $0x480] sm:$0xff]  ;;  %v184_v52 = vld [vmem:[#allocation3 + $0x490] sm:$0xff] }
  0x34   :  { %5801 = vmatpush1.bf16.msra.mxu0 %v9184_v16  ;;  %11526 = vst [vmem:[#allocation44_spill] sm:$0xff] %v9196_v46  ;;  %11527 = vst [vmem:[#allocation45_spill] sm:$0xff] %v9200_v48  ;;  %v190_v51 = vld [vmem:[#allocation3 + $0x4c0] sm:$0xff]  ;;  %v9205_v53 = vpack.c.bf16 %v193_v44, %v185_v43  ;;  %v192_v62 = vld [vmem:[#allocation3 + $0x4d0] sm:$0xff] }
  0x35   :  { %5849 = vmatpush1.bf16.msra.mxu1 %v9188_v24  ;;  %5803 = vmatprep.subr.bf16.mxu0 %v9190_v25  ;;  %11528 = vst [vmem:[#allocation46_spill] sm:$0xff] %v9202_v49  ;;  %v199_v1 = vld [vmem:[#allocation3 + $0x508] sm:$0xff]  ;;  %v201_v6 = vld [vmem:[#allocation3 + $0x518] sm:$0xff]  ;;  %v9208_v10 = vpack.c.bf16 %v190_v51, %v182_v50  ;;  %v9212_v14 = vpack.c.bf16 %v192_v62, %v184_v52  ;;  %v198_v26 = vld [vmem:[#allocation3 + $0x500] sm:$0xff] }
  0x36   :  { %5851 = vmatprep.subr.bf16.mxu1 %v9193_v33  ;;  %11529 = vst [vmem:[#allocation47_spill] sm:$0xff] %v9205_v53  ;;  %v207_v2 = vld [vmem:[#allocation3 + $0x548] sm:$0xff]  ;;  %v209_v7 = vld [vmem:[#allocation3 + $0x558] sm:$0xff]  ;;  %v206_v30 = vld [vmem:[#allocation3 + $0x540] sm:$0xff] }
  0x37   :  { %11530 = vst [vmem:[#allocation48_spill] sm:$0xff] %v9208_v10  ;;  %11531 = vst [vmem:[#allocation49_spill] sm:$0xff] %v9212_v14  ;;  %v9214_v15 = vpack.c.bf16 %v207_v2, %v199_v1  ;;  %v200_v31 = vld [vmem:[#allocation3 + $0x510] sm:$0xff]  ;;  %v9217_v34 = vpack.c.bf16 %v209_v7, %v201_v6  ;;  %v215_v36 = vld [vmem:[#allocation3 + $0x588] sm:$0xff]  ;;  %v9220_v51 = vpack.c.bf16 %v206_v30, %v198_v26 }
  0x38   :  { %5805 = vmatpush1.bf16.msra.mxu0 %v9196_v46  ;;  %v208_v35 = vld [vmem:[#allocation3 + $0x550] sm:$0xff]  ;;  %v223_v43 = vld [vmem:[#allocation3 + $0x5c8] sm:$0xff]  ;;  %v217_v44 = vld [vmem:[#allocation3 + $0x598] sm:$0xff] }
  0x39   :  { %5853 = vmatpush1.bf16.msra.mxu1 %v9200_v48  ;;  %5807 = vmatprep.subr.bf16.mxu0 %v9202_v49  ;;  %11532 = vst [vmem:[#allocation50_spill] sm:$0xff] %v9214_v15  ;;  %11533 = vst [vmem:[#allocation51_spill] sm:$0xff] %v9217_v34  ;;  %v225_v50 = vld [vmem:[#allocation3 + $0x5d8] sm:$0xff]  ;;  %v9224_v52 = vpack.c.bf16 %v208_v35, %v200_v31  ;;  %v9226_v62 = vpack.c.bf16 %v223_v43, %v215_v36  ;;  %v214_v1 = vld [vmem:[#allocation3 + $0x580] sm:$0xff]  ;;  %v9248_v43 = vsub.s32 0, %v9085_v40 }
  0x3a   :  { %5855 = vmatprep.subr.bf16.mxu1 %v9205_v53  ;;  %11534 = vst [vmem:[#allocation52_spill] sm:$0xff] %v9220_v51  ;;  %v222_v2 = vld [vmem:[#allocation3 + $0x5c0] sm:$0xff]  ;;  %v216_v6 = vld [vmem:[#allocation3 + $0x590] sm:$0xff]  ;;  %v9229_v7 = vpack.c.bf16 %v225_v50, %v217_v44  ;;  %v43_v11 = vld [vmem:[#allocation3 + $0x28] sm:$0xff]  ;;  %v258_v44 = vsub.s32 6, %v9085_v40  ;;  %v262_v50 = vsub.s32 7, %v9085_v40 }
  0x3b   :  { %11535 = vst [vmem:[#allocation53_spill] sm:$0xff] %v9224_v52  ;;  %11536 = vst [vmem:[#allocation54_spill] sm:$0xff] %v9226_v62  ;;  %v224_v19 = vld [vmem:[#allocation3 + $0x5d0] sm:$0xff]  ;;  %v51_v12 = vld [vmem:[#allocation3 + $0x68] sm:$0xff]  ;;  %v9232_v4 = vpack.c.bf16 %v222_v2, %v214_v1  ;;  %v9259_v1 = vrot.slane %v9108_v59, %v9248_v43 }
  0x3c   :  { %5809 = vmatpush1.bf16.msra.mxu0 %v9208_v10  ;;  %11537 = vst [vmem:[#allocation55_spill] sm:$0xff] %v9229_v7  ;;  %v45_v26 = vld [vmem:[#allocation3 + $0x38] sm:$0xff]  ;;  %v9236_v31 = vpack.c.bf16 %v224_v19, %v216_v6  ;;  %v9238_v35 = vpack.c.bf16 %v51_v12, %v43_v11  ;;  %11542 = vst [vmem:[#allocation60_spill] sm:$0xff] %v9248_v43  ;;  %v9251_v19 = vsub.s32 1, %v9085_v40  ;;  %v250_v11 = vsub.s32 4, %v9085_v40 }
  0x3d   :  { %5857 = vmatpush1.bf16.msra.mxu1 %v9212_v14  ;;  %5811 = vmatprep.subr.bf16.mxu0 %v9214_v15  ;;  %v53_v30 = vld [vmem:[#allocation3 + $0x78] sm:$0xff]  ;;  %11538 = vst [vmem:[#allocation56_spill] sm:$0xff] %v9232_v4  ;;  %v254_v12 = vsub.s32 5, %v9085_v40  ;;  %11544 = vst [vmem:[#allocation62_spill] sm:$0xff] %v9259_v1 }
  0x3e   :  { %5859 = vmatprep.subr.bf16.mxu1 %v9217_v34  ;;  %11539 = vst [vmem:[#allocation57_spill] sm:$0xff] %v9236_v31  ;;  %11540 = vst [vmem:[#allocation58_spill] sm:$0xff] %v9238_v35  ;;  %v9241_v36 = vpack.c.bf16 %v53_v30, %v45_v26  ;;  %v9263_v2 = vrot.slane %v9108_v59, %v9251_v19  ;;  %v9266_v6 = vrot.slane %v9108_v59, %v250_v11 }
  0x3f   :  { %11543 = vst [vmem:[#allocation61_spill] sm:$0xff] %v9251_v19  ;;  %v9270_v26 = vrot.slane %v9113_v60, %v9248_v43  ;;  %v9274_v30 = vrot.slane %v9113_v60, %v9251_v19  ;;  %v9288_v43 = vrot.slane %v9113_v60, %v250_v11 }
  0x40   :  { %5813 = vmatpush1.bf16.msra.mxu0 %v9220_v51  ;;  %11541 = vst [vmem:[#allocation59_spill] sm:$0xff] %v9241_v36  ;;  %11545 = vst [vmem:[#allocation63_spill] sm:$0xff] %v9263_v2  ;;  %v9294_v51 = vrot.slane %v9113_v60, %v254_v12 }
  0x41   :  { %5861 = vmatpush1.bf16.msra.mxu1 %v9224_v52  ;;  %5815 = vmatprep.subr.bf16.mxu0 %v9226_v62  ;;  %11546 = vst [vmem:[#allocation64_spill] sm:$0xff] %v9266_v6  ;;  %11547 = vst [vmem:[#allocation65_spill] sm:$0xff] %v9270_v26 }
  0x42   :  { %5863 = vmatprep.subr.bf16.mxu1 %v9229_v7  ;;  %11548 = vst [vmem:[#allocation66_spill] sm:$0xff] %v9274_v30  ;;  %11552 = vst [vmem:[#allocation70_spill] sm:$0xff] %v9288_v43 }
  0x43   :  { %11553 = vst [vmem:[#allocation71_spill] sm:$0xff] %v9294_v51 }
  0x44   :  { %5817 = vmatpush1.bf16.msra.mxu0 %v9232_v4 }
  0x45   :  { %5865 = vmatpush1.bf16.msra.mxu1 %v9236_v31  ;;  %5867 = vmatprep.subr.bf16.mxu0 %v9238_v35  ;;  %v9280_v35 = vrot.slane %v9108_v59, %v258_v44  ;;  %v9283_v31 = vrot.slane %v9108_v59, %v262_v50 }
  0x46   :  { %5915 = vmatprep.subr.bf16.mxu1 %v9241_v36  ;;  %v9277_v36 = vrot.slane %v9108_v59, %v254_v12 }
  0x47   :  { %11550 = vst [vmem:[#allocation68_spill] sm:$0xff] %v9280_v35  ;;  %11551 = vst [vmem:[#allocation69_spill] sm:$0xff] %v9283_v31 }
  0x48   :  { %11549 = vst [vmem:[#allocation67_spill] sm:$0xff] %v9277_v36 }
  0x93   :  { %v318_v40 = vpop.permute.xlu0 %317 }
  0x94   :  { %v320_v4 = vmul.f32 %v318_v40, %v9259_v1  ;;  %v321_v7 = vmul.f32 %v318_v40, %v9263_v2  ;;  %v322_v19 = vmul.f32 %v318_v40, %v9266_v6  ;;  %v323_v34 = vmul.f32 %v318_v40, %v9277_v36 }
  0x95   :  { %v324_v59 = vmul.f32 %v318_v40, %v9280_v35  ;;  %v9299_v1 = vrot.slane %v9113_v60, %v258_v44  ;;  %v325_v2 = vmul.f32 %v318_v40, %v9283_v31  ;;  %v9303_v6 = vrot.slane %v9113_v60, %v262_v50  ;;  %v75_v31 = vld [vmem:[#allocation3 + $0x128] sm:$0xff] }
  0x96   :  { %v326_v62 = vadd.f32 %v320_v4, %v9270_v26  ;;  %v327_v52 = vadd.f32 %v321_v7, %v9274_v30  ;;  %v328_v4 = vadd.f32 %v322_v19, %v9288_v43  ;;  %v329_v7 = vadd.f32 %v323_v34, %v9294_v51  ;;  %v68_v51 = vld [vmem:[#allocation3 + $0xf0] sm:$0xff]  ;;  %v77_v30 = vld [vmem:[#allocation3 + $0x138] sm:$0xff] }
  0x97   :  { %11554 = vst [vmem:[#allocation72_spill] sm:$0xff] %v9299_v1  ;;  %11555 = vst [vmem:[#allocation73_spill] sm:$0xff] %v9303_v6  ;;  %v330_v12 = vadd.f32 %v324_v59, %v9299_v1  ;;  %v331_v35 = vadd.f32 %v325_v2, %v9303_v6  ;;  %v60_v6 = vld [vmem:[#allocation3 + $0xb0] sm:$0xff] }
  0x98   :  { %v332_v11 = vmul.f32 0.5, %v326_v62  ;;  %v333_v15 = vmul.f32 0.5, %v327_v52 }
  0x99   :  { %v344_v44 = vmul.f32 0.5, %v330_v12  ;;  %v345_v36 = vmul.f32 0.5, %v331_v35  ;;  %v50_v12 = vld [vmem:[#allocation3 + $0x60] sm:$0xff] }
  0x9a   :  { %8656 = vtanh.f32 %v332_v11 }
  0x9b   :  { %8658 = vtanh.f32 %v333_v15 }
  0x9c   :  { %8660 = vtanh.f32 %v328_v4 }
  0x9d   :  { %8662 = vtanh.f32 %v329_v7 }
  0x9e   :  { %8664 = vtanh.f32 %v344_v44  ;;  %v44_v44 = vld [vmem:[#allocation3 + $0x30] sm:$0xff] }
  0x9f   :  { %8666 = vtanh.f32 %v345_v36  ;;  %v42_v36 = vld [vmem:[#allocation3 + $0x20] sm:$0xff] }
  0xa0   :  { %v9317_v1 = vpack.c.bf16 %v50_v12, %v42_v36  ;;  %v9333_v12 = vpack.c.bf16 %v68_v51, %v60_v6  ;;  %v93_v51 = vld [vmem:[#allocation3 + $0x1b8] sm:$0xff] }
  0xa1   :  { %v101_v6 = vld [vmem:[#allocation3 + $0x1f8] sm:$0xff] }
  0xa2   :  { %11558 = vst [vmem:[#allocation76_spill] sm:$0xff] %v9317_v1  ;;  %11563 = vst [vmem:[#allocation81_spill] sm:$0xff] %v9333_v12 }
  0xa4   :  { %v8657_v62 = vpop.eup %8656 }
  0xa5   :  { %v8659_v52 = vpop.eup %8658  ;;  %v336_v60 = vadd.f32 1.0, %v8657_v62  ;;  %v52_v62 = vld [vmem:[#allocation3 + $0x70] sm:$0xff] }
  0xa6   :  { %v337_v50 = vadd.f32 1.0, %v8659_v52  ;;  %v8661_v19 = vpop.eup %8660 }
  0xa7   :  { %v338_v40 = vmul.f32 0.5, %v336_v60  ;;  %v8663_v43 = vpop.eup %8662 }
  0xa8   :  { %v339_v11 = vmul.f32 0.5, %v337_v50  ;;  %v8665_v2 = vpop.eup %8664  ;;  %v59_v50 = vld [vmem:[#allocation3 + $0xa8] sm:$0xff] }
  0xa9   :  { %v9309_v34 = vmul.f32 %v8661_v19, %v338_v40  ;;  %v8667_v35 = vpop.eup %8666  ;;  %v348_v59 = vadd.f32 1.0, %v8665_v2  ;;  %v67_v19 = vld [vmem:[#allocation3 + $0xe8] sm:$0xff]  ;;  %v9319_v2 = vpack.c.bf16 %v52_v62, %v44_v44  ;;  %v74_v44 = vld [vmem:[#allocation3 + $0x120] sm:$0xff] }
  0xaa   :  { %v9311_v15 = vmul.f32 %v8663_v43, %v339_v11  ;;  %v349_v4 = vadd.f32 1.0, %v8667_v35  ;;  %v61_v11 = vld [vmem:[#allocation3 + $0xb8] sm:$0xff]  ;;  %v58_v35 = vld [vmem:[#allocation3 + $0xa0] sm:$0xff] }
  0xab   :  { %11556 = vst [vmem:[#allocation74_spill] sm:$0xff] %v9309_v34  ;;  %8668 = vtanh.f32 %v9309_v34  ;;  %v350_v7 = vmul.f32 0.5, %v348_v59  ;;  %v69_v34 = vld [vmem:[#allocation3 + $0xf8] sm:$0xff]  ;;  %11559 = vst [vmem:[#allocation77_spill] sm:$0xff] %v9319_v2  ;;  %v66_v59 = vld [vmem:[#allocation3 + $0xe0] sm:$0xff] }
  0xac   :  { %11557 = vst [vmem:[#allocation75_spill] sm:$0xff] %v9311_v15  ;;  %8670 = vtanh.f32 %v9311_v15  ;;  %v351_v60 = vmul.f32 0.5, %v349_v4  ;;  %v9323_v4 = vpack.c.bf16 %v67_v19, %v59_v50  ;;  %v9331_v36 = vpack.c.bf16 %v66_v59, %v58_v35  ;;  %v82_v62 = vld [vmem:[#allocation3 + $0x160] sm:$0xff]  ;;  %v84_v19 = vld [vmem:[#allocation3 + $0x170] sm:$0xff]  ;;  %v99_v35 = vld [vmem:[#allocation3 + $0x1e8] sm:$0xff] }
  0xad   :  { %v9345_v59 = vpack.c.bf16 %v82_v62, %v74_v44 }
  0xae   :  { %11560 = vst [vmem:[#allocation78_spill] sm:$0xff] %v9323_v4  ;;  %11562 = vst [vmem:[#allocation80_spill] sm:$0xff] %v9331_v36 }
  0xaf   :  { %11566 = vst [vmem:[#allocation84_spill] sm:$0xff] %v9345_v59 }
  0xb5   :  { %v8669_v52 = vpop.eup %8668 }
  0xb6   :  { %v8671_v40 = vpop.eup %8670  ;;  %v9315_v43 = vmul.f32 %v8669_v52, %v350_v7  ;;  %v9325_v7 = vpack.c.bf16 %v69_v34, %v61_v11  ;;  %v83_v52 = vld [vmem:[#allocation3 + $0x168] sm:$0xff] }
  0xb7   :  { %v355_v15 = vmul.f32 %v8671_v40, %v351_v60  ;;  %v85_v60 = vld [vmem:[#allocation3 + $0x178] sm:$0xff]  ;;  %v9337_v34 = vpack.c.bf16 %v83_v52, %v75_v31  ;;  %v76_v40 = vld [vmem:[#allocation3 + $0x130] sm:$0xff]  ;;  %v91_v11 = vld [vmem:[#allocation3 + $0x1a8] sm:$0xff] }
  0xb8   :  { %11561 = vst [vmem:[#allocation79_spill] sm:$0xff] %v9325_v7  ;;  %v9339_v50 = vpack.c.bf16 %v85_v60, %v77_v30  ;;  %v9347_v31 = vpack.c.bf16 %v84_v19, %v76_v40  ;;  %v90_v30 = vld [vmem:[#allocation3 + $0x1a0] sm:$0xff]  ;;  %v9351_v52 = vpack.c.bf16 %v99_v35, %v91_v11  ;;  %v9353_v60 = vpack.c.bf16 %v101_v6, %v93_v51  ;;  %v108_v51 = vld [vmem:[#allocation3 + $0x230] sm:$0xff] }
  0xb9   :  { %5696 = vmatprep.mubr.msk.f32.mxu0 %vm379_vm0, %v355_v15  ;;  %5697 = vmatprep.mubr.msk.f32.mxu1 %vm379_vm0, %v355_v15  ;;  %11564 = vst [vmem:[#allocation82_spill] sm:$0xff] %v9337_v34  ;;  %v106_v40 = vld [vmem:[#allocation3 + $0x220] sm:$0xff]  ;;  %v116_v6 = vld [vmem:[#allocation3 + $0x270] sm:$0xff] }
  0xba   :  { %448 = vmatmul.mubr.f32.vlgmr.msra.gmra.mrb[0].mxu0 %v9315_v43  ;;  %519 = vmatmul.mubr.f32.vlgmr.msra.gmra.mrb[0].mxu1 %v9315_v43  ;;  %11565 = vst [vmem:[#allocation83_spill] sm:$0xff] %v9339_v50  ;;  %11567 = vst [vmem:[#allocation85_spill] sm:$0xff] %v9347_v31  ;;  %v114_v19 = vld [vmem:[#allocation3 + $0x260] sm:$0xff] }
  0xbb   :  { %5869 = vmatpush1.bf16.msra.mxu0 %v9317_v1  ;;  %5917 = vmatpush1.bf16.msra.mxu1 %v9319_v2  ;;  %11568 = vst [vmem:[#allocation86_spill] sm:$0xff] %v9351_v52  ;;  %11569 = vst [vmem:[#allocation87_spill] sm:$0xff] %v9353_v60  ;;  %v107_v2 = vld [vmem:[#allocation3 + $0x228] sm:$0xff]  ;;  %v109_v1 = vld [vmem:[#allocation3 + $0x238] sm:$0xff] }
  0xbc   :  { %5698 = vmatprep.mubr.msk.f32.mxu0 %vm379_vm0, %v355_v15  ;;  %5699 = vmatprep.mubr.msk.f32.mxu1 %vm379_vm0, %v355_v15  ;;  %v98_v15 = vld [vmem:[#allocation3 + $0x1e0] sm:$0xff] }
  0xbd   :  { %5871 = vmatprep.subr.bf16.mxu0 %v9323_v4  ;;  %5919 = vmatprep.subr.bf16.mxu1 %v9325_v7  ;;  %v92_v7 = vld [vmem:[#allocation3 + $0x1b0] sm:$0xff]  ;;  %v9357_v44 = vpack.c.bf16 %v98_v15, %v90_v30  ;;  %v122_v30 = vld [vmem:[#allocation3 + $0x2a0] sm:$0xff] }
  0xbe   :  { %v100_v4 = vld [vmem:[#allocation3 + $0x1f0] sm:$0xff]  ;;  %v130_v15 = vld [vmem:[#allocation3 + $0x2e0] sm:$0xff] }
  0xbf   :  { %5873 = vmatpush1.bf16.msra.mxu0 %v9331_v36  ;;  %5921 = vmatpush1.bf16.msra.mxu1 %v9333_v12  ;;  %v115_v36 = vld [vmem:[#allocation3 + $0x268] sm:$0xff]  ;;  %v117_v12 = vld [vmem:[#allocation3 + $0x278] sm:$0xff]  ;;  %11570 = vst [vmem:[#allocation88_spill] sm:$0xff] %v9357_v44  ;;  %v9359_v62 = vpack.c.bf16 %v100_v4, %v92_v7  ;;  %v9369_v4 = vpack.c.bf16 %v114_v19, %v106_v40 }
  0xc0   :  { %5875 = vmatprep.subr.bf16.mxu0 %v9337_v34  ;;  %5923 = vmatprep.subr.bf16.mxu1 %v9339_v50  ;;  %v9363_v11 = vpack.c.bf16 %v115_v36, %v107_v2  ;;  %v9365_v35 = vpack.c.bf16 %v117_v12, %v109_v1  ;;  %v123_v50 = vld [vmem:[#allocation3 + $0x2a8] sm:$0xff]  ;;  %v125_v34 = vld [vmem:[#allocation3 + $0x2b8] sm:$0xff]  ;;  %v9371_v7 = vpack.c.bf16 %v116_v6, %v108_v51  ;;  %v124_v36 = vld [vmem:[#allocation3 + $0x2b0] sm:$0xff] }
  0xc1   :  { %11571 = vst [vmem:[#allocation89_spill] sm:$0xff] %v9359_v62  ;;  %11574 = vst [vmem:[#allocation92_spill] sm:$0xff] %v9369_v4  ;;  %v132_v12 = vld [vmem:[#allocation3 + $0x2f0] sm:$0xff]  ;;  %v9381_v40 = vpack.c.bf16 %v130_v15, %v122_v30  ;;  %v138_v51 = vld [vmem:[#allocation3 + $0x320] sm:$0xff] }
  0xc2   :  { %11572 = vst [vmem:[#allocation90_spill] sm:$0xff] %v9363_v11  ;;  %11573 = vst [vmem:[#allocation91_spill] sm:$0xff] %v9365_v35  ;;  %v9383_v19 = vpack.c.bf16 %v132_v12, %v124_v36  ;;  %v146_v6 = vld [vmem:[#allocation3 + $0x360] sm:$0xff] }
  0xc3   :  { %5877 = vmatpush1.bf16.msra.mxu0 %v9345_v59  ;;  %5925 = vmatpush1.bf16.msra.mxu1 %v9347_v31  ;;  %v131_v59 = vld [vmem:[#allocation3 + $0x2e8] sm:$0xff]  ;;  %v133_v31 = vld [vmem:[#allocation3 + $0x2f8] sm:$0xff]  ;;  %11575 = vst [vmem:[#allocation93_spill] sm:$0xff] %v9371_v7  ;;  %11578 = vst [vmem:[#allocation96_spill] sm:$0xff] %v9381_v40  ;;  %v9393_v30 = vpack.c.bf16 %v146_v6, %v138_v51 }
  0xc4   :  { %5879 = vmatprep.subr.bf16.mxu0 %v9351_v52  ;;  %5927 = vmatprep.subr.bf16.mxu1 %v9353_v60  ;;  %v9375_v1 = vpack.c.bf16 %v131_v59, %v123_v50  ;;  %v9377_v2 = vpack.c.bf16 %v133_v31, %v125_v34  ;;  %v139_v60 = vld [vmem:[#allocation3 + $0x328] sm:$0xff]  ;;  %v141_v52 = vld [vmem:[#allocation3 + $0x338] sm:$0xff]  ;;  %11579 = vst [vmem:[#allocation97_spill] sm:$0xff] %v9383_v19  ;;  %v140_v59 = vld [vmem:[#allocation3 + $0x330] sm:$0xff] }
  0xc5   :  { %v148_v31 = vld [vmem:[#allocation3 + $0x370] sm:$0xff]  ;;  %11582 = vst [vmem:[#allocation100_spill] sm:$0xff] %v9393_v30  ;;  %v154_v36 = vld [vmem:[#allocation3 + $0x3a0] sm:$0xff] }
  0xc6   :  { %11576 = vst [vmem:[#allocation94_spill] sm:$0xff] %v9375_v1  ;;  %11577 = vst [vmem:[#allocation95_spill] sm:$0xff] %v9377_v2  ;;  %v9395_v15 = vpack.c.bf16 %v148_v31, %v140_v59  ;;  %v162_v12 = vld [vmem:[#allocation3 + $0x3e0] sm:$0xff] }
  0xc7   :  { %5881 = vmatpush1.bf16.msra.mxu0 %v9357_v44  ;;  %5929 = vmatpush1.bf16.msra.mxu1 %v9359_v62  ;;  %v147_v44 = vld [vmem:[#allocation3 + $0x368] sm:$0xff]  ;;  %v149_v62 = vld [vmem:[#allocation3 + $0x378] sm:$0xff]  ;;  %v9405_v51 = vpack.c.bf16 %v162_v12, %v154_v36  ;;  %v170_v59 = vld [vmem:[#allocation3 + $0x420] sm:$0xff] }
  0xc8   :  { %5883 = vmatprep.subr.bf16.mxu0 %v9363_v11  ;;  %5931 = vmatprep.subr.bf16.mxu1 %v9365_v35  ;;  %v9387_v34 = vpack.c.bf16 %v147_v44, %v139_v60  ;;  %v9389_v50 = vpack.c.bf16 %v149_v62, %v141_v52  ;;  %v155_v35 = vld [vmem:[#allocation3 + $0x3a8] sm:$0xff]  ;;  %v157_v11 = vld [vmem:[#allocation3 + $0x3b8] sm:$0xff]  ;;  %11583 = vst [vmem:[#allocation101_spill] sm:$0xff] %v9395_v15  ;;  %v156_v44 = vld [vmem:[#allocation3 + $0x3b0] sm:$0xff] }
  0xc9   :  { %v164_v62 = vld [vmem:[#allocation3 + $0x3f0] sm:$0xff]  ;;  %11586 = vst [vmem:[#allocation104_spill] sm:$0xff] %v9405_v51  ;;  %v178_v31 = vld [vmem:[#allocation3 + $0x460] sm:$0xff] }
  0xca   :  { %11580 = vst [vmem:[#allocation98_spill] sm:$0xff] %v9387_v34  ;;  %11581 = vst [vmem:[#allocation99_spill] sm:$0xff] %v9389_v50  ;;  %v9407_v6 = vpack.c.bf16 %v164_v62, %v156_v44  ;;  %v9417_v36 = vpack.c.bf16 %v178_v31, %v170_v59  ;;  %v186_v44 = vld [vmem:[#allocation3 + $0x4a0] sm:$0xff] }
  0xcb   :  { %5885 = vmatpush1.bf16.msra.mxu0 %v9369_v4  ;;  %5933 = vmatpush1.bf16.msra.mxu1 %v9371_v7  ;;  %v163_v4 = vld [vmem:[#allocation3 + $0x3e8] sm:$0xff]  ;;  %v165_v7 = vld [vmem:[#allocation3 + $0x3f8] sm:$0xff]  ;;  %v194_v62 = vld [vmem:[#allocation3 + $0x4e0] sm:$0xff] }
  0xcc   :  { %5887 = vmatprep.subr.bf16.mxu0 %v9375_v1  ;;  %5935 = vmatprep.subr.bf16.mxu1 %v9377_v2  ;;  %v9399_v52 = vpack.c.bf16 %v163_v4, %v155_v35  ;;  %v9401_v60 = vpack.c.bf16 %v165_v7, %v157_v11  ;;  %v171_v2 = vld [vmem:[#allocation3 + $0x428] sm:$0xff]  ;;  %v173_v1 = vld [vmem:[#allocation3 + $0x438] sm:$0xff]  ;;  %11587 = vst [vmem:[#allocation105_spill] sm:$0xff] %v9407_v6  ;;  %v172_v4 = vld [vmem:[#allocation3 + $0x430] sm:$0xff] }
  0xcd   :  { %v180_v7 = vld [vmem:[#allocation3 + $0x470] sm:$0xff]  ;;  %11590 = vst [vmem:[#allocation108_spill] sm:$0xff] %v9417_v36  ;;  %v9429_v59 = vpack.c.bf16 %v194_v62, %v186_v44 }
  0xce   :  { %11584 = vst [vmem:[#allocation102_spill] sm:$0xff] %v9399_v52  ;;  %11585 = vst [vmem:[#allocation103_spill] sm:$0xff] %v9401_v60  ;;  %v9419_v12 = vpack.c.bf16 %v180_v7, %v172_v4  ;;  %v202_v4 = vld [vmem:[#allocation3 + $0x520] sm:$0xff] }
  0xcf   :  { %5889 = vmatpush1.bf16.msra.mxu0 %v9381_v40  ;;  %5937 = vmatpush1.bf16.msra.mxu1 %v9383_v19  ;;  %v179_v40 = vld [vmem:[#allocation3 + $0x468] sm:$0xff]  ;;  %v181_v19 = vld [vmem:[#allocation3 + $0x478] sm:$0xff]  ;;  %11594 = vst [vmem:[#allocation112_spill] sm:$0xff] %v9429_v59  ;;  %v210_v7 = vld [vmem:[#allocation3 + $0x560] sm:$0xff] }
  0xd0   :  { %5891 = vmatprep.subr.bf16.mxu0 %v9387_v34  ;;  %5939 = vmatprep.subr.bf16.mxu1 %v9389_v50  ;;  %v9411_v11 = vpack.c.bf16 %v179_v40, %v171_v2  ;;  %v9413_v35 = vpack.c.bf16 %v181_v19, %v173_v1  ;;  %v187_v50 = vld [vmem:[#allocation3 + $0x4a8] sm:$0xff]  ;;  %v189_v34 = vld [vmem:[#allocation3 + $0x4b8] sm:$0xff]  ;;  %11591 = vst [vmem:[#allocation109_spill] sm:$0xff] %v9419_v12  ;;  %v188_v40 = vld [vmem:[#allocation3 + $0x4b0] sm:$0xff] }
  0xd1   :  { %v196_v19 = vld [vmem:[#allocation3 + $0x4f0] sm:$0xff]  ;;  %v9441_v44 = vpack.c.bf16 %v210_v7, %v202_v4 }
  0xd2   :  { %11588 = vst [vmem:[#allocation106_spill] sm:$0xff] %v9411_v11  ;;  %11589 = vst [vmem:[#allocation107_spill] sm:$0xff] %v9413_v35  ;;  %v9431_v31 = vpack.c.bf16 %v196_v19, %v188_v40  ;;  %v218_v40 = vld [vmem:[#allocation3 + $0x5a0] sm:$0xff]  ;;  %v228_v19 = vld [vmem:[#allocation3 + $0x5f0] sm:$0xff] }
  0xd3   :  { %5893 = vmatpush1.bf16.msra.mxu0 %v9393_v30  ;;  %5941 = vmatpush1.bf16.msra.mxu1 %v9395_v15  ;;  %v195_v30 = vld [vmem:[#allocation3 + $0x4e8] sm:$0xff]  ;;  %v197_v15 = vld [vmem:[#allocation3 + $0x4f8] sm:$0xff]  ;;  %11598 = vst [vmem:[#allocation116_spill] sm:$0xff] %v9441_v44 }
  0xd4   :  { %5895 = vmatprep.subr.bf16.mxu0 %v9399_v52  ;;  %5943 = vmatprep.subr.bf16.mxu1 %v9401_v60  ;;  %v9423_v1 = vpack.c.bf16 %v195_v30, %v187_v50  ;;  %v9425_v2 = vpack.c.bf16 %v197_v15, %v189_v34  ;;  %v203_v60 = vld [vmem:[#allocation3 + $0x528] sm:$0xff]  ;;  %v205_v52 = vld [vmem:[#allocation3 + $0x538] sm:$0xff]  ;;  %11595 = vst [vmem:[#allocation113_spill] sm:$0xff] %v9431_v31  ;;  %v204_v30 = vld [vmem:[#allocation3 + $0x530] sm:$0xff] }
  0xd5   :  { %v212_v15 = vld [vmem:[#allocation3 + $0x570] sm:$0xff] }
  0xd6   :  { %11592 = vst [vmem:[#allocation110_spill] sm:$0xff] %v9423_v1  ;;  %11593 = vst [vmem:[#allocation111_spill] sm:$0xff] %v9425_v2  ;;  %v9443_v62 = vpack.c.bf16 %v212_v15, %v204_v30  ;;  %v11609_v30 = vld [vmem:[#allocation55_spill] sm:$0xff]  ;;  %v11610_v15 = vld [vmem:[#allocation56_spill] sm:$0xff] }
  0xd7   :  { %5897 = vmatpush1.bf16.msra.mxu0 %v9405_v51  ;;  %5945 = vmatpush1.bf16.msra.mxu1 %v9407_v6  ;;  %v211_v51 = vld [vmem:[#allocation3 + $0x568] sm:$0xff]  ;;  %v213_v6 = vld [vmem:[#allocation3 + $0x578] sm:$0xff] }
  0xd8   :  { %5899 = vmatprep.subr.bf16.mxu0 %v9411_v11  ;;  %5947 = vmatprep.subr.bf16.mxu1 %v9413_v35  ;;  %v9435_v34 = vpack.c.bf16 %v211_v51, %v203_v60  ;;  %v9437_v50 = vpack.c.bf16 %v213_v6, %v205_v52  ;;  %v219_v35 = vld [vmem:[#allocation3 + $0x5a8] sm:$0xff]  ;;  %v221_v11 = vld [vmem:[#allocation3 + $0x5b8] sm:$0xff]  ;;  %11599 = vst [vmem:[#allocation117_spill] sm:$0xff] %v9443_v62  ;;  %v226_v51 = vld [vmem:[#allocation3 + $0x5e0] sm:$0xff] }
  0xd9   :  { %v220_v6 = vld [vmem:[#allocation3 + $0x5b0] sm:$0xff]  ;;  %v9453_v4 = vpack.c.bf16 %v226_v51, %v218_v40  ;;  %v11611_v40 = vld [vmem:[#allocation57_spill] sm:$0xff]  ;;  %v11612_v51 = vld [vmem:[#allocation58_spill] sm:$0xff] }
  0xda   :  { %11596 = vst [vmem:[#allocation114_spill] sm:$0xff] %v9435_v34  ;;  %11597 = vst [vmem:[#allocation115_spill] sm:$0xff] %v9437_v50  ;;  %v9455_v7 = vpack.c.bf16 %v228_v19, %v220_v6  ;;  %v11613_v6 = vld [vmem:[#allocation59_spill] sm:$0xff] }
  0xdb   :  { %5901 = vmatpush1.bf16.msra.mxu0 %v9417_v36  ;;  %5949 = vmatpush1.bf16.msra.mxu1 %v9419_v12  ;;  %v227_v36 = vld [vmem:[#allocation3 + $0x5e8] sm:$0xff]  ;;  %v229_v12 = vld [vmem:[#allocation3 + $0x5f8] sm:$0xff]  ;;  %11602 = vst [vmem:[#allocation120_spill] sm:$0xff] %v9453_v4 }
  0xdc   :  { %5903 = vmatprep.subr.bf16.mxu0 %v9423_v1  ;;  %5951 = vmatprep.subr.bf16.mxu1 %v9425_v2  ;;  %v9447_v52 = vpack.c.bf16 %v227_v36, %v219_v35  ;;  %v9449_v60 = vpack.c.bf16 %v229_v12, %v221_v11  ;;  %11603 = vst [vmem:[#allocation121_spill] sm:$0xff] %v9455_v7  ;;  %v11605_v11 = vld [vmem:[#allocation51_spill] sm:$0xff]  ;;  %v11606_v35 = vld [vmem:[#allocation52_spill] sm:$0xff]  ;;  %v11607_v36 = vld [vmem:[#allocation53_spill] sm:$0xff] }
  0xdd   :  { %v11608_v12 = vld [vmem:[#allocation54_spill] sm:$0xff] }
  0xde   :  { %11600 = vst [vmem:[#allocation118_spill] sm:$0xff] %v9447_v52  ;;  %11601 = vst [vmem:[#allocation119_spill] sm:$0xff] %v9449_v60 }
  0xdf   :  { %5905 = vmatpush1.bf16.msra.mxu0 %v9429_v59  ;;  %5953 = vmatpush1.bf16.msra.mxu1 %v9431_v31 }
  0xe0   :  { %5907 = vmatprep.subr.bf16.mxu0 %v9435_v34  ;;  %5955 = vmatprep.subr.bf16.mxu1 %v9437_v50 }
  0xe3   :  { %5909 = vmatpush1.bf16.msra.mxu0 %v9441_v44  ;;  %5957 = vmatpush1.bf16.msra.mxu1 %v9443_v62 }
  0xe4   :  { %5911 = vmatprep.subr.bf16.mxu0 %v9447_v52  ;;  %5959 = vmatprep.subr.bf16.mxu1 %v9449_v60 }
  0xe7   :  { %5913 = vmatpush1.bf16.msra.mxu0 %v9453_v4  ;;  %5961 = vmatpush1.bf16.msra.mxu1 %v9455_v7 }
  0xe8   :  { %5963 = vmatprep.subr.bf16.mxu0 %v9056_v8  ;;  %6011 = vmatprep.subr.bf16.mxu1 %v9058_v9 }
  0xea   :  { %590 = vmatmul.mubr.f32.vlgmr.msra.gmra.mrb[2].mxu0 %v9315_v43  ;;  %661 = vmatmul.mubr.f32.vlgmr.msra.gmra.mrb[2].mxu1 %v9315_v43  ;;  %v11604_v43 = vld [vmem:[#allocation50_spill] sm:$0xff] }
  0xeb   :  { %5965 = vmatpush1.bf16.msra.mxu0 %v9060_v13  ;;  %6013 = vmatpush1.bf16.msra.mxu1 %v9064_v17 }
  0xec   :  { %5967 = vmatprep.subr.bf16.mxu0 %v9066_v18  ;;  %6015 = vmatprep.subr.bf16.mxu1 %v9069_v23 }
  0xef   :  { %5969 = vmatpush1.bf16.msra.mxu0 %v9073_v27  ;;  %6017 = vmatpush1.bf16.msra.mxu1 %v9075_v28 }
  0xf0   :  { %5971 = vmatprep.subr.bf16.mxu0 %v9078_v32  ;;  %6019 = vmatprep.subr.bf16.mxu1 %v9083_v37 }
  0xf3   :  { %5973 = vmatpush1.bf16.msra.mxu0 %v9088_v41  ;;  %6021 = vmatpush1.bf16.msra.mxu1 %v9095_v45 }
  0xf4   :  { %5975 = vmatprep.subr.bf16.mxu0 %v9100_v54  ;;  %6023 = vmatprep.subr.bf16.mxu1 %v9102_v55 }
  0xf7   :  { %5977 = vmatpush1.bf16.msra.mxu0 %v9115_v61  ;;  %6025 = vmatpush1.bf16.msra.mxu1 %v9119_v63 }
  0xf8   :  { %5979 = vmatprep.subr.bf16.mxu0 %v9121_v0  ;;  %6027 = vmatprep.subr.bf16.mxu1 %v9127_v5 }
  0xfb   :  { %5981 = vmatpush1.bf16.msra.mxu0 %v9142_v20  ;;  %6029 = vmatpush1.bf16.msra.mxu1 %v9146_v21 }
  0xfc   :  { %5983 = vmatprep.subr.bf16.mxu0 %v9148_v22  ;;  %6031 = vmatprep.subr.bf16.mxu1 %v9151_v29 }
  0xff   :  { %5985 = vmatpush1.bf16.msra.mxu0 %v9157_v38  ;;  %6033 = vmatpush1.bf16.msra.mxu1 %v9161_v39 }
 0x100   :  { %5987 = vmatprep.subr.bf16.mxu0 %v9163_v42  ;;  %6035 = vmatprep.subr.bf16.mxu1 %v9166_v47 }
 0x103   :  { %5989 = vmatpush1.bf16.msra.mxu0 %v9172_v56  ;;  %6037 = vmatpush1.bf16.msra.mxu1 %v9176_v57 }
 0x104   :  { %5991 = vmatprep.subr.bf16.mxu0 %v9178_v58  ;;  %6039 = vmatprep.subr.bf16.mxu1 %v9181_v3 }
 0x107   :  { %5993 = vmatpush1.bf16.msra.mxu0 %v9184_v16  ;;  %6041 = vmatpush1.bf16.msra.mxu1 %v9188_v24  ;;  %v11620_v16 = vld [vmem:[#allocation66_spill] sm:$0xff] }
 0x108   :  { %5995 = vmatprep.subr.bf16.mxu0 %v9190_v25  ;;  %6043 = vmatprep.subr.bf16.mxu1 %v9193_v33  ;;  %v11619_v33 = vld [vmem:[#allocation27_spill] sm:$0xff] }
 0x10b   :  { %5997 = vmatpush1.bf16.msra.mxu0 %v9196_v46  ;;  %6045 = vmatpush1.bf16.msra.mxu1 %v9200_v48 }
 0x10c   :  { %5999 = vmatprep.subr.bf16.mxu0 %v9202_v49  ;;  %6047 = vmatprep.subr.bf16.mxu1 %v9205_v53  ;;  %v11617_v49 = vld [vmem:[#allocation63_spill] sm:$0xff] }
 0x10f   :  { %6001 = vmatpush1.bf16.msra.mxu0 %v9208_v10  ;;  %6049 = vmatpush1.bf16.msra.mxu1 %v9212_v14 }
 0x110   :  { %6003 = vmatprep.subr.bf16.mxu0 %v11604_v43  ;;  %6051 = vmatprep.subr.bf16.mxu1 %v11605_v11 }
 0x113   :  { %6005 = vmatpush1.bf16.msra.mxu0 %v11606_v35  ;;  %6053 = vmatpush1.bf16.msra.mxu1 %v11607_v36  ;;  %v5700_v36 = vld [vmem:[%s11253_s0 + $0x10] sm:$0xff]  ;;  %v11615_v35 = vld [vmem:[#allocation26_spill] sm:$0xff] }
 0x114   :  { %6007 = vmatprep.subr.bf16.mxu0 %v11608_v12  ;;  %6055 = vmatprep.subr.bf16.mxu1 %v11609_v30  ;;  %v5705_v30 = vld [vmem:[%s11253_s0 + $0x18] sm:$0xff] }
 0x115   :  { %715 = vperm.xlu1 %8655, %v5700_v36   ;;  %v5745_v36 = vld [vmem:[%s11253_s0 + $0x58] sm:$0xff] }
 0x117   :  { %6009 = vmatpush1.bf16.msra.mxu0 %v11610_v15  ;;  %6057 = vmatpush1.bf16.msra.mxu1 %v11611_v40  ;;  %v5735_v40 = vld [vmem:[%s11253_s0 + $0x48] sm:$0xff] }
 0x118   :  { %6059 = vmatprep.subr.bf16.mxu0 %v11612_v51  ;;  %6107 = vmatprep.subr.bf16.mxu1 %v11613_v6  ;;  %v5715_v51 = vld [vmem:[%s11253_s0 + $0x28] sm:$0xff]  ;;  %v5725_v6 = vld [vmem:[%s11253_s0 + $0x38] sm:$0xff] }
 0x119   :  { %1069 = vperm.xlu1 %8655, %v5705_v30   ;;  %v5755_v30 = vld [vmem:[%s11253_s0 + $0x68] sm:$0xff] }
 0x11a   :  { %v11614_v15 = vld [vmem:[#allocation23_spill] sm:$0xff] }
 0x11d   :  { %1777 = vperm.xlu1 %8655, %v5715_v51   ;;  %v361_v51 = vpop.permute.xlu0 %360 }
 0x11e   :  { %v365_v12 = vmul.f32 %v361_v51, %v11614_v15  ;;  %v366_v10 = vmul.f32 %v361_v51, %v11615_v35  ;;  %v364_v48 = vmul.f32 %v361_v51, %v11617_v49 }
 0x120   :  { %v374_v25 = vadd.f32 %v366_v10, %v11619_v33  ;;  %v372_v15 = vadd.f32 %v364_v48, %v11620_v16  ;;  %v11623_v33 = vld [vmem:[#allocation69_spill] sm:$0xff]  ;;  %v11625_v48 = vld [vmem:[#allocation70_spill] sm:$0xff] }
 0x121   :  { %2485 = vperm.xlu1 %8655, %v5725_v6   ;;  %v5765_v6 = vld [vmem:[%s11253_s0 + $0x78] sm:$0xff] }
 0x125   :  { %3193 = vperm.xlu1 %8655, %v5735_v40   ;;  %v11616_v40 = vld [vmem:[#allocation62_spill] sm:$0xff] }
 0x126   :  { %v363_v53 = vmul.f32 %v361_v51, %v11616_v40 }
 0x128   :  { %v371_v24 = vadd.f32 %v363_v53, %v9270_v26  ;;  %v370_v53 = vmul.f32 %v361_v51, %v11623_v33 }
 0x129   :  { %3901 = vperm.xlu1 %8655, %v5745_v36   ;;  %v11618_v36 = vld [vmem:[#allocation25_spill] sm:$0xff] }
 0x12a   :  { %v373_v46 = vadd.f32 %v365_v12, %v11618_v36  ;;  %v11622_v12 = vld [vmem:[#allocation67_spill] sm:$0xff] }
 0x12b   :  { %v368_v10 = vmul.f32 %v361_v51, %v11622_v12 }
 0x12d   :  { %4609 = vperm.xlu1 %8655, %v5755_v30  }
 0x131   :  { %5317 = vperm.xlu1 %8655, %v5765_v6   ;;  %v11621_v6 = vld [vmem:[#allocation64_spill] sm:$0xff] }
 0x132   :  { %v367_v49 = vmul.f32 %v361_v51, %v11621_v6 }
 0x18d   :  { %v449_v19 = vpop.f32.mrb[0].mxu0  ;;  %v520_v43 = vpop.f32.mrb[0].mxu1 }
 0x18e   :  { %v451_v14 = vpop.f32.mrb[1].mxu0  ;;  %v522_v11 = vpop.f32.mrb[1].mxu1  ;;  %v669_v30 = vadd.f32 %v520_v43, %v373_v46  ;;  %v667_v58 = vadd.f32 %v449_v19, %v371_v24  ;;  %v11624_v46 = vld [vmem:[#allocation68_spill] sm:$0xff] }
 0x18f   :  { %v670_v3 = vadd.f32 %v522_v11, %v374_v25  ;;  %v668_v57 = vadd.f32 %v451_v14, %v372_v15  ;;  %v369_v43 = vmul.f32 %v361_v51, %v11624_v46  ;;  %v375_v25 = vadd.f32 %v367_v49, %v11625_v48  ;;  %v11626_v11 = vld [vmem:[#allocation71_spill] sm:$0xff]  ;;  %v11628_v15 = vld [vmem:[#allocation72_spill] sm:$0xff] }
 0x190   :  { %v683_v56 = vmul.f32 0.5, %v669_v30  ;;  %v675_v35 = vmul.f32 0.5, %v667_v58 }
 0x191   :  { %v684_v47 = vmul.f32 0.5, %v670_v3  ;;  %v676_v42 = vmul.f32 0.5, %v668_v57  ;;  %v376_v3 = vadd.f32 %v368_v10, %v11626_v11  ;;  %v377_v19 = vadd.f32 %v369_v43, %v11628_v15 }
 0x192   :  { %8672 = vtanh.f32 %v683_v56  ;;  %v11627_v56 = vld [vmem:[#allocation73_spill] sm:$0xff] }
 0x193   :  { %8674 = vtanh.f32 %v684_v47  ;;  %v378_v47 = vadd.f32 %v370_v53, %v11627_v56 }
 0x194   :  { %8676 = vtanh.f32 %v675_v35 }
 0x195   :  { %8678 = vtanh.f32 %v676_v42 }
 0x19c   :  { %v8673_v30 = vpop.eup %8672 }
 0x19d   :  { %v8675_v33 = vpop.eup %8674  ;;  %v687_v48 = vadd.f32 1.0, %v8673_v30 }
 0x19e   :  { %v8677_v51 = vpop.eup %8676  ;;  %v688_v46 = vadd.f32 1.0, %v8675_v33 }
 0x19f   :  { %v8679_v49 = vpop.eup %8678  ;;  %v679_v10 = vadd.f32 1.0, %v8677_v51  ;;  %v689_v11 = vmul.f32 0.5, %v687_v48 }
 0x1a0   :  { %v690_v53 = vmul.f32 0.5, %v688_v46 }
 0x1a1   :  { %v681_v56 = vmul.f32 0.5, %v679_v10 }
 0x1bd   :  { %v591_v24 = vpop.f32.mrb[2].mxu0  ;;  %v662_v14 = vpop.f32.mrb[2].mxu1 }
 0x1be   :  { %v671_v58 = vadd.f32 %v591_v24, %v375_v25  ;;  %v593_v57 = vpop.f32.mrb[3].mxu0  ;;  %v664_v35 = vpop.f32.mrb[3].mxu1  ;;  %v673_v6 = vadd.f32 %v662_v14, %v377_v19  ;;  %v680_v24 = vadd.f32 1.0, %v8679_v49 }
 0x1bf   :  { %v672_v42 = vadd.f32 %v593_v57, %v376_v3  ;;  %v674_v12 = vadd.f32 %v664_v35, %v378_v47  ;;  %v11629_v57 = vld [vmem:[#allocation74_spill] sm:$0xff]  ;;  %v11630_v35 = vld [vmem:[#allocation75_spill] sm:$0xff] }
 0x1c0   :  { %8680 = vtanh.f32 %v671_v58  ;;  %v693_v25 = vmul.f32 0.5, %v673_v6  ;;  %v682_v3 = vmul.f32 0.5, %v680_v24  ;;  %v701_v47 = vmul.f32 %v689_v11, %v11629_v57  ;;  %v11632_v24 = vld [vmem:[#allocation77_spill] sm:$0xff]  ;;  %v11637_v57 = vld [vmem:[#allocation82_spill] sm:$0xff] }
 0x1c1   :  { %8682 = vtanh.f32 %v672_v42  ;;  %v694_v16 = vmul.f32 0.5, %v674_v12  ;;  %v702_v19 = vmul.f32 %v690_v53, %v11630_v35  ;;  %v11633_v53 = vld [vmem:[#allocation78_spill] sm:$0xff]  ;;  %v11640_v35 = vld [vmem:[#allocation85_spill] sm:$0xff] }
 0x1c3   :  { %8684 = vtanh.f32 %v694_v16 }
 0x1c4   :  { %8686 = vtanh.f32 %v693_v25  ;;  %v11631_v25 = vld [vmem:[#allocation76_spill] sm:$0xff] }
 0x1ca   :  { %v8681_v43 = vpop.eup %8680 }
 0x1cb   :  { %v8683_v58 = vpop.eup %8682  ;;  %v703_v14 = vmul.f32 %v8681_v43, %v681_v56  ;;  %v11634_v43 = vld [vmem:[#allocation79_spill] sm:$0xff] }
 0x1cc   :  { %v704_v42 = vmul.f32 %v8683_v58, %v682_v3  ;;  %v11635_v3 = vld [vmem:[#allocation80_spill] sm:$0xff]  ;;  %v11636_v58 = vld [vmem:[#allocation81_spill] sm:$0xff] }
 0x1cd   :  { %v9555_v30 = vadd.f32 %v703_v14, %v701_v47  ;;  %v8685_v16 = vpop.eup %8684  ;;  %v11638_v47 = vld [vmem:[#allocation83_spill] sm:$0xff]  ;;  %v11639_v14 = vld [vmem:[#allocation84_spill] sm:$0xff] }
 0x1ce   :  { %v9557_v33 = vadd.f32 %v704_v42, %v702_v19  ;;  %v8687_v6 = vpop.eup %8686  ;;  %v698_v12 = vadd.f32 1.0, %v8685_v16  ;;  %v11641_v19 = vld [vmem:[#allocation86_spill] sm:$0xff]  ;;  %v11642_v42 = vld [vmem:[#allocation87_spill] sm:$0xff]  ;;  %v11643_v16 = vld [vmem:[#allocation88_spill] sm:$0xff] }
 0x1cf   :  { %8688 = vtanh.f32 %v9555_v30  ;;  %v697_v46 = vadd.f32 1.0, %v8687_v6  ;;  %v11644_v6 = vld [vmem:[#allocation89_spill] sm:$0xff] }
 0x1d0   :  { %8690 = vtanh.f32 %v9557_v33  ;;  %v700_v51 = vmul.f32 0.5, %v698_v12  ;;  %v11645_v12 = vld [vmem:[#allocation90_spill] sm:$0xff] }
 0x1d1   :  { %v699_v11 = vmul.f32 0.5, %v697_v46  ;;  %v11646_v46 = vld [vmem:[#allocation91_spill] sm:$0xff] }
 0x1d9   :  { %v8689_v48 = vpop.eup %8688 }
 0x1da   :  { %v8691_v49 = vpop.eup %8690  ;;  %v709_v10 = vmul.f32 %v8689_v48, %v699_v11  ;;  %v11647_v48 = vld [vmem:[#allocation92_spill] sm:$0xff]  ;;  %v11650_v11 = vld [vmem:[#allocation95_spill] sm:$0xff] }
 0x1db   :  { %v710_v56 = vmul.f32 %v8691_v49, %v700_v51  ;;  %v11648_v51 = vld [vmem:[#allocation93_spill] sm:$0xff]  ;;  %v11649_v49 = vld [vmem:[#allocation94_spill] sm:$0xff] }
 0x1dd   :  { %5701 = vmatprep.mubr.msk.f32.mxu0 %vm379_vm0, %v710_v56  ;;  %5702 = vmatprep.mubr.msk.f32.mxu1 %vm379_vm0, %v710_v56 }
 0x1de   :  { %802 = vmatmul.mubr.f32.vlgmr.msra.gmra.mrb[4].mxu0 %v709_v10  ;;  %873 = vmatmul.mubr.f32.vlgmr.msra.gmra.mrb[4].mxu1 %v709_v10 }
 0x1df   :  { %6061 = vmatpush1.bf16.msra.mxu0 %v11631_v25  ;;  %6109 = vmatpush1.bf16.msra.mxu1 %v11632_v24 }
 0x1e0   :  { %5703 = vmatprep.mubr.msk.f32.mxu0 %vm379_vm0, %v710_v56  ;;  %5704 = vmatprep.mubr.msk.f32.mxu1 %vm379_vm0, %v710_v56  ;;  %v11651_v56 = vld [vmem:[#allocation96_spill] sm:$0xff] }
 0x1e1   :  { %6063 = vmatprep.subr.bf16.mxu0 %v11633_v53  ;;  %6111 = vmatprep.subr.bf16.mxu1 %v11634_v43 }
 0x1e3   :  { %6065 = vmatpush1.bf16.msra.mxu0 %v11635_v3  ;;  %6113 = vmatpush1.bf16.msra.mxu1 %v11636_v58 }
 0x1e4   :  { %6067 = vmatprep.subr.bf16.mxu0 %v11637_v57  ;;  %6115 = vmatprep.subr.bf16.mxu1 %v11638_v47 }
 0x1e7   :  { %6069 = vmatpush1.bf16.msra.mxu0 %v11639_v14  ;;  %6117 = vmatpush1.bf16.msra.mxu1 %v11640_v35 }
 0x1e8   :  { %6071 = vmatprep.subr.bf16.mxu0 %v11641_v19  ;;  %6119 = vmatprep.subr.bf16.mxu1 %v11642_v42  ;;  %v11652_v19 = vld [vmem:[#allocation97_spill] sm:$0xff]  ;;  %v11653_v42 = vld [vmem:[#allocation98_spill] sm:$0xff] }
 0x1eb   :  { %6073 = vmatpush1.bf16.msra.mxu0 %v11643_v16  ;;  %6121 = vmatpush1.bf16.msra.mxu1 %v11644_v6  ;;  %v11654_v16 = vld [vmem:[#allocation99_spill] sm:$0xff]  ;;  %v11655_v6 = vld [vmem:[#allocation100_spill] sm:$0xff] }
 0x1ec   :  { %6075 = vmatprep.subr.bf16.mxu0 %v11645_v12  ;;  %6123 = vmatprep.subr.bf16.mxu1 %v11646_v46  ;;  %v11656_v12 = vld [vmem:[#allocation101_spill] sm:$0xff]  ;;  %v11657_v46 = vld [vmem:[#allocation102_spill] sm:$0xff] }
 0x1ef   :  { %6077 = vmatpush1.bf16.msra.mxu0 %v11647_v48  ;;  %6125 = vmatpush1.bf16.msra.mxu1 %v11648_v51  ;;  %v11658_v48 = vld [vmem:[#allocation103_spill] sm:$0xff]  ;;  %v11659_v51 = vld [vmem:[#allocation104_spill] sm:$0xff] }
 0x1f0   :  { %6079 = vmatprep.subr.bf16.mxu0 %v11649_v49  ;;  %6127 = vmatprep.subr.bf16.mxu1 %v11650_v11  ;;  %v11660_v49 = vld [vmem:[#allocation105_spill] sm:$0xff]  ;;  %v11661_v11 = vld [vmem:[#allocation106_spill] sm:$0xff] }
 0x1f3   :  { %6081 = vmatpush1.bf16.msra.mxu0 %v11651_v56  ;;  %6129 = vmatpush1.bf16.msra.mxu1 %v11652_v19  ;;  %v11662_v56 = vld [vmem:[#allocation107_spill] sm:$0xff]  ;;  %v11663_v19 = vld [vmem:[#allocation108_spill] sm:$0xff] }
 0x1f4   :  { %6083 = vmatprep.subr.bf16.mxu0 %v11653_v42  ;;  %6131 = vmatprep.subr.bf16.mxu1 %v11654_v16  ;;  %v11664_v42 = vld [vmem:[#allocation109_spill] sm:$0xff] }
 0x1f7   :  { %6085 = vmatpush1.bf16.msra.mxu0 %v11655_v6  ;;  %6133 = vmatpush1.bf16.msra.mxu1 %v11656_v12 }
 0x1f8   :  { %6087 = vmatprep.subr.bf16.mxu0 %v11657_v46  ;;  %6135 = vmatprep.subr.bf16.mxu1 %v11658_v48 }
 0x1fb   :  { %6089 = vmatpush1.bf16.msra.mxu0 %v11659_v51  ;;  %6137 = vmatpush1.bf16.msra.mxu1 %v11660_v49 }
 0x1fc   :  { %6091 = vmatprep.subr.bf16.mxu0 %v11661_v11  ;;  %6139 = vmatprep.subr.bf16.mxu1 %v11662_v56 }
 0x1ff   :  { %6093 = vmatpush1.bf16.msra.mxu0 %v11663_v19  ;;  %6141 = vmatpush1.bf16.msra.mxu1 %v11664_v42 }
 0x200   :  { %6095 = vmatprep.subr.bf16.mxu0 %v9423_v1  ;;  %6143 = vmatprep.subr.bf16.mxu1 %v9425_v2 }
 0x203   :  { %6097 = vmatpush1.bf16.msra.mxu0 %v9429_v59  ;;  %6145 = vmatpush1.bf16.msra.mxu1 %v9431_v31 }
 0x204   :  { %6099 = vmatprep.subr.bf16.mxu0 %v9435_v34  ;;  %6147 = vmatprep.subr.bf16.mxu1 %v9437_v50 }
 0x207   :  { %6101 = vmatpush1.bf16.msra.mxu0 %v9441_v44  ;;  %6149 = vmatpush1.bf16.msra.mxu1 %v9443_v62 }
 0x208   :  { %6103 = vmatprep.subr.bf16.mxu0 %v9447_v52  ;;  %6151 = vmatprep.subr.bf16.mxu1 %v9449_v60 }
 0x20b   :  { %6105 = vmatpush1.bf16.msra.mxu0 %v9453_v4  ;;  %6153 = vmatpush1.bf16.msra.mxu1 %v9455_v7 }
 0x20c   :  { %6155 = vmatprep.subr.bf16.mxu0 %v9056_v8  ;;  %6203 = vmatprep.subr.bf16.mxu1 %v9058_v9 }
 0x20e   :  { %944 = vmatmul.mubr.f32.vlgmr.msra.gmra.mrb[6].mxu0 %v709_v10  ;;  %1015 = vmatmul.mubr.f32.vlgmr.msra.gmra.mrb[6].mxu1 %v709_v10  ;;  %v11665_v10 = vld [vmem:[#allocation34_spill] sm:$0xff] }
 0x20f   :  { %6157 = vmatpush1.bf16.msra.mxu0 %v9060_v13  ;;  %6205 = vmatpush1.bf16.msra.mxu1 %v9064_v17 }
 0x210   :  { %6159 = vmatprep.subr.bf16.mxu0 %v9066_v18  ;;  %6207 = vmatprep.subr.bf16.mxu1 %v9069_v23 }
 0x213   :  { %6161 = vmatpush1.bf16.msra.mxu0 %v9073_v27  ;;  %6209 = vmatpush1.bf16.msra.mxu1 %v9075_v28 }
 0x214   :  { %6163 = vmatprep.subr.bf16.mxu0 %v9078_v32  ;;  %6211 = vmatprep.subr.bf16.mxu1 %v9083_v37 }
 0x217   :  { %6165 = vmatpush1.bf16.msra.mxu0 %v9088_v41  ;;  %6213 = vmatpush1.bf16.msra.mxu1 %v9095_v45 }
 0x218   :  { %6167 = vmatprep.subr.bf16.mxu0 %v9100_v54  ;;  %6215 = vmatprep.subr.bf16.mxu1 %v9102_v55  ;;  %v716_v54 = vpop.permute.xlu1 %715 }
 0x21b   :  { %6169 = vmatpush1.bf16.msra.mxu0 %v9115_v61  ;;  %6217 = vmatpush1.bf16.msra.mxu1 %v9119_v63  ;;  %v11666_v61 = vld [vmem:[#allocation35_spill] sm:$0xff]  ;;  %v11667_v63 = vld [vmem:[#allocation36_spill] sm:$0xff] }
 0x21c   :  { %6171 = vmatprep.subr.bf16.mxu0 %v9121_v0  ;;  %6219 = vmatprep.subr.bf16.mxu1 %v9127_v5  ;;  %v11668_v0 = vld [vmem:[#allocation37_spill] sm:$0xff]  ;;  %v11669_v5 = vld [vmem:[#allocation38_spill] sm:$0xff] }
 0x21f   :  { %6173 = vmatpush1.bf16.msra.mxu0 %v9142_v20  ;;  %6221 = vmatpush1.bf16.msra.mxu1 %v9146_v21  ;;  %v11670_v20 = vld [vmem:[#allocation39_spill] sm:$0xff]  ;;  %v11671_v21 = vld [vmem:[#allocation40_spill] sm:$0xff] }
 0x220   :  { %6175 = vmatprep.subr.bf16.mxu0 %v9148_v22  ;;  %6223 = vmatprep.subr.bf16.mxu1 %v9151_v29  ;;  %v11672_v22 = vld [vmem:[#allocation41_spill] sm:$0xff]  ;;  %v11673_v29 = vld [vmem:[#allocation42_spill] sm:$0xff] }
 0x223   :  { %6177 = vmatpush1.bf16.msra.mxu0 %v9157_v38  ;;  %6225 = vmatpush1.bf16.msra.mxu1 %v9161_v39  ;;  %v11674_v38 = vld [vmem:[#allocation43_spill] sm:$0xff]  ;;  %v11675_v39 = vld [vmem:[#allocation44_spill] sm:$0xff] }
 0x224   :  { %6179 = vmatprep.subr.bf16.mxu0 %v11665_v10  ;;  %6227 = vmatprep.subr.bf16.mxu1 %v11666_v61  ;;  %v11676_v10 = vld [vmem:[#allocation45_spill] sm:$0xff]  ;;  %v11677_v61 = vld [vmem:[#allocation46_spill] sm:$0xff] }
 0x227   :  { %6181 = vmatpush1.bf16.msra.mxu0 %v11667_v63  ;;  %6229 = vmatpush1.bf16.msra.mxu1 %v11668_v0  ;;  %v11678_v63 = vld [vmem:[#allocation47_spill] sm:$0xff]  ;;  %v11679_v0 = vld [vmem:[#allocation48_spill] sm:$0xff] }
 0x228   :  { %6183 = vmatprep.subr.bf16.mxu0 %v11669_v5  ;;  %6231 = vmatprep.subr.bf16.mxu1 %v11670_v20  ;;  %v11680_v5 = vld [vmem:[#allocation49_spill] sm:$0xff]  ;;  %v11681_v20 = vld [vmem:[#allocation50_spill] sm:$0xff] }
 0x22b   :  { %6185 = vmatpush1.bf16.msra.mxu0 %v11671_v21  ;;  %6233 = vmatpush1.bf16.msra.mxu1 %v11672_v22  ;;  %v11682_v21 = vld [vmem:[#allocation51_spill] sm:$0xff]  ;;  %v11683_v22 = vld [vmem:[#allocation52_spill] sm:$0xff] }
 0x22c   :  { %6187 = vmatprep.subr.bf16.mxu0 %v11673_v29  ;;  %6235 = vmatprep.subr.bf16.mxu1 %v11674_v38  ;;  %v11684_v29 = vld [vmem:[#allocation53_spill] sm:$0xff]  ;;  %v11685_v38 = vld [vmem:[#allocation54_spill] sm:$0xff] }
 0x22f   :  { %6189 = vmatpush1.bf16.msra.mxu0 %v11675_v39  ;;  %6237 = vmatpush1.bf16.msra.mxu1 %v11676_v10  ;;  %v11686_v39 = vld [vmem:[#allocation55_spill] sm:$0xff]  ;;  %v11687_v10 = vld [vmem:[#allocation56_spill] sm:$0xff] }
 0x230   :  { %6191 = vmatprep.subr.bf16.mxu0 %v11677_v61  ;;  %6239 = vmatprep.subr.bf16.mxu1 %v11678_v63  ;;  %v11688_v61 = vld [vmem:[#allocation57_spill] sm:$0xff]  ;;  %v11689_v63 = vld [vmem:[#allocation58_spill] sm:$0xff] }
 0x233   :  { %6193 = vmatpush1.bf16.msra.mxu0 %v11679_v0  ;;  %6241 = vmatpush1.bf16.msra.mxu1 %v11680_v5  ;;  %v11690_v0 = vld [vmem:[#allocation59_spill] sm:$0xff] }
 0x234   :  { %6195 = vmatprep.subr.bf16.mxu0 %v11681_v20  ;;  %6243 = vmatprep.subr.bf16.mxu1 %v11682_v21 }
 0x237   :  { %6197 = vmatpush1.bf16.msra.mxu0 %v11683_v22  ;;  %6245 = vmatpush1.bf16.msra.mxu1 %v11684_v29  ;;  %v11691_v22 = vld [vmem:[#allocation23_spill] sm:$0xff]  ;;  %v11692_v29 = vld [vmem:[#allocation26_spill] sm:$0xff] }
 0x238   :  { %6199 = vmatprep.subr.bf16.mxu0 %v11685_v38  ;;  %6247 = vmatprep.subr.bf16.mxu1 %v11686_v39  ;;  %v720_v45 = vmul.f32 %v716_v54, %v11691_v22  ;;  %v721_v41 = vmul.f32 %v716_v54, %v11692_v29  ;;  %v718_v38 = vmul.f32 %v716_v54, %v11616_v40  ;;  %v11693_v39 = vld [vmem:[#allocation63_spill] sm:$0xff] }
 0x239   :  { %v719_v37 = vmul.f32 %v716_v54, %v11693_v39  ;;  %v11696_v39 = vld [vmem:[#allocation64_spill] sm:$0xff] }
 0x23a   :  { %v722_v40 = vmul.f32 %v716_v54, %v11696_v39 }
 0x23b   :  { %6201 = vmatpush1.bf16.msra.mxu0 %v11687_v10  ;;  %6249 = vmatpush1.bf16.msra.mxu1 %v11688_v61  ;;  %v728_v10 = vadd.f32 %v720_v45, %v11618_v36  ;;  %v11694_v61 = vld [vmem:[#allocation27_spill] sm:$0xff] }
 0x23c   :  { %6251 = vmatprep.subr.bf16.mxu0 %v11689_v63  ;;  %6299 = vmatprep.subr.bf16.mxu1 %v11690_v0  ;;  %v729_v32 = vadd.f32 %v721_v41, %v11694_v61  ;;  %v726_v63 = vadd.f32 %v718_v38, %v9270_v26  ;;  %v11695_v0 = vld [vmem:[#allocation66_spill] sm:$0xff]  ;;  %v11697_v45 = vld [vmem:[#allocation67_spill] sm:$0xff]  ;;  %v11698_v61 = vld [vmem:[#allocation69_spill] sm:$0xff] }
 0x23d   :  { %v727_v28 = vadd.f32 %v719_v37, %v11695_v0  ;;  %v723_v41 = vmul.f32 %v716_v54, %v11697_v45  ;;  %v725_v38 = vmul.f32 %v716_v54, %v11698_v61  ;;  %v11699_v26 = vld [vmem:[#allocation68_spill] sm:$0xff] }
 0x23e   :  { %v724_v37 = vmul.f32 %v716_v54, %v11699_v26 }
 0x2b1   :  { %v803_v5 = vpop.f32.mrb[4].mxu0  ;;  %v874_v20 = vpop.f32.mrb[4].mxu1 }
 0x2b2   :  { %v805_v55 = vpop.f32.mrb[5].mxu0  ;;  %v876_v21 = vpop.f32.mrb[5].mxu1  ;;  %v1023_v27 = vadd.f32 %v874_v20, %v728_v10  ;;  %v1021_v18 = vadd.f32 %v803_v5, %v726_v63  ;;  %v11700_v20 = vld [vmem:[#allocation70_spill] sm:$0xff]  ;;  %v732_v5 = vadd.f32 %v724_v37, %v11628_v15 }
 0x2b3   :  { %v1024_v23 = vadd.f32 %v876_v21, %v729_v32  ;;  %v1022_v17 = vadd.f32 %v805_v55, %v727_v28  ;;  %v730_v32 = vadd.f32 %v722_v40, %v11700_v20 }
 0x2b4   :  { %v1037_v13 = vmul.f32 0.5, %v1023_v27  ;;  %v1029_v9 = vmul.f32 0.5, %v1021_v18  ;;  %v11701_v27 = vld [vmem:[#allocation71_spill] sm:$0xff] }
 0x2b5   :  { %v1038_v22 = vmul.f32 0.5, %v1024_v23  ;;  %v1030_v29 = vmul.f32 0.5, %v1022_v17  ;;  %v731_v23 = vadd.f32 %v723_v41, %v11701_v27 }
 0x2b6   :  { %8692 = vtanh.f32 %v1037_v13  ;;  %v11702_v13 = vld [vmem:[#allocation73_spill] sm:$0xff] }
 0x2b7   :  { %8694 = vtanh.f32 %v1038_v22  ;;  %v733_v55 = vadd.f32 %v725_v38, %v11702_v13 }
 0x2b8   :  { %8696 = vtanh.f32 %v1029_v9 }
 0x2b9   :  { %8698 = vtanh.f32 %v1030_v29 }
 0x2c0   :  { %v8693_v22 = vpop.eup %8692 }
 0x2c1   :  { %v8695_v10 = vpop.eup %8694  ;;  %v1041_v20 = vadd.f32 1.0, %v8693_v22 }
 0x2c2   :  { %v8697_v54 = vpop.eup %8696  ;;  %v1042_v26 = vadd.f32 1.0, %v8695_v10 }
 0x2c3   :  { %v8699_v40 = vpop.eup %8698  ;;  %v1033_v41 = vadd.f32 1.0, %v8697_v54  ;;  %v1043_v27 = vmul.f32 0.5, %v1041_v20  ;;  %v11704_v54 = vld [vmem:[#allocation87_spill] sm:$0xff] }
 0x2c4   :  { %v1044_v38 = vmul.f32 0.5, %v1042_v26 }
 0x2c5   :  { %v1035_v13 = vmul.f32 0.5, %v1033_v41  ;;  %v11706_v41 = vld [vmem:[#allocation89_spill] sm:$0xff] }
 0x2e1   :  { %v945_v63 = vpop.f32.mrb[6].mxu0  ;;  %v1016_v28 = vpop.f32.mrb[6].mxu1 }
 0x2e2   :  { %v1025_v18 = vadd.f32 %v945_v63, %v730_v32  ;;  %v947_v17 = vpop.f32.mrb[7].mxu0  ;;  %v1018_v9 = vpop.f32.mrb[7].mxu1  ;;  %v1027_v61 = vadd.f32 %v1016_v28, %v732_v5  ;;  %v1034_v63 = vadd.f32 1.0, %v8699_v40  ;;  %v11705_v40 = vld [vmem:[#allocation88_spill] sm:$0xff] }
 0x2e3   :  { %v1026_v21 = vadd.f32 %v947_v17, %v731_v23  ;;  %v1028_v29 = vadd.f32 %v1018_v9, %v733_v55  ;;  %v1055_v17 = vmul.f32 %v1043_v27, %v9555_v30  ;;  %v1056_v55 = vmul.f32 %v1044_v38, %v9557_v33  ;;  %v11703_v33 = vld [vmem:[#allocation86_spill] sm:$0xff]  ;;  %v11709_v38 = vld [vmem:[#allocation92_spill] sm:$0xff] }
 0x2e4   :  { %8700 = vtanh.f32 %v1025_v18  ;;  %v1047_v32 = vmul.f32 0.5, %v1027_v61  ;;  %v1036_v23 = vmul.f32 0.5, %v1034_v63  ;;  %v11708_v63 = vld [vmem:[#allocation91_spill] sm:$0xff] }
 0x2e5   :  { %8702 = vtanh.f32 %v1026_v21  ;;  %v1048_v45 = vmul.f32 0.5, %v1028_v29 }
 0x2e7   :  { %8704 = vtanh.f32 %v1048_v45 }
 0x2e8   :  { %8706 = vtanh.f32 %v1047_v32  ;;  %v11707_v32 = vld [vmem:[#allocation90_spill] sm:$0xff] }
 0x2ee   :  { %v8701_v37 = vpop.eup %8700 }
 0x2ef   :  { %v8703_v18 = vpop.eup %8702  ;;  %v1057_v28 = vmul.f32 %v8701_v37, %v1035_v13  ;;  %v11710_v37 = vld [vmem:[#allocation93_spill] sm:$0xff] }
 0x2f0   :  { %v1058_v9 = vmul.f32 %v8703_v18, %v1036_v23  ;;  %v11711_v23 = vld [vmem:[#allocation94_spill] sm:$0xff]  ;;  %v11712_v18 = vld [vmem:[#allocation95_spill] sm:$0xff] }
 0x2f1   :  { %v9679_v5 = vadd.f32 %v1057_v28, %v1055_v17  ;;  %v8705_v61 = vpop.eup %8704  ;;  %v11713_v17 = vld [vmem:[#allocation96_spill] sm:$0xff]  ;;  %v11714_v28 = vld [vmem:[#allocation97_spill] sm:$0xff] }
 0x2f2   :  { %v9681_v21 = vadd.f32 %v1058_v9, %v1056_v55  ;;  %v8707_v26 = vpop.eup %8706  ;;  %v1052_v45 = vadd.f32 1.0, %v8705_v61  ;;  %v11715_v55 = vld [vmem:[#allocation98_spill] sm:$0xff]  ;;  %v11716_v9 = vld [vmem:[#allocation7_spill] sm:$0xff]  ;;  %v11717_v61 = vld [vmem:[#allocation8_spill] sm:$0xff] }
 0x2f3   :  { %8708 = vtanh.f32 %v9679_v5  ;;  %v1051_v20 = vadd.f32 1.0, %v8707_v26  ;;  %v11718_v26 = vld [vmem:[#allocation9_spill] sm:$0xff] }
 0x2f4   :  { %8710 = vtanh.f32 %v9681_v21  ;;  %v1054_v29 = vmul.f32 0.5, %v1052_v45  ;;  %v11719_v45 = vld [vmem:[#allocation10_spill] sm:$0xff] }
 0x2f5   :  { %v1053_v30 = vmul.f32 0.5, %v1051_v20  ;;  %v11720_v20 = vld [vmem:[#allocation11_spill] sm:$0xff] }
 0x2fd   :  { %v8709_v22 = vpop.eup %8708 }
 0x2fe   :  { %v8711_v10 = vpop.eup %8710  ;;  %v1063_v13 = vmul.f32 %v8709_v22, %v1053_v30  ;;  %v11721_v22 = vld [vmem:[#allocation12_spill] sm:$0xff]  ;;  %v11724_v30 = vld [vmem:[#allocation15_spill] sm:$0xff] }
 0x2ff   :  { %v1064_v27 = vmul.f32 %v8711_v10, %v1054_v29  ;;  %v11722_v29 = vld [vmem:[#allocation13_spill] sm:$0xff]  ;;  %v11723_v10 = vld [vmem:[#allocation14_spill] sm:$0xff] }
 0x301   :  { %5706 = vmatprep.mubr.msk.f32.mxu0 %vm379_vm0, %v1064_v27  ;;  %5707 = vmatprep.mubr.msk.f32.mxu1 %vm379_vm0, %v1064_v27 }
 0x302   :  { %1156 = vmatmul.mubr.f32.vlgmr.msra.gmra.mrb[8].mxu0 %v1063_v13  ;;  %1227 = vmatmul.mubr.f32.vlgmr.msra.gmra.mrb[8].mxu1 %v1063_v13 }
 0x303   :  { %6253 = vmatpush1.bf16.msra.mxu0 %v11631_v25  ;;  %6301 = vmatpush1.bf16.msra.mxu1 %v11632_v24 }
 0x304   :  { %5708 = vmatprep.mubr.msk.f32.mxu0 %vm379_vm0, %v1064_v27  ;;  %5709 = vmatprep.mubr.msk.f32.mxu1 %vm379_vm0, %v1064_v27  ;;  %v11725_v27 = vld [vmem:[#allocation16_spill] sm:$0xff] }
 0x305   :  { %6255 = vmatprep.subr.bf16.mxu0 %v11633_v53  ;;  %6303 = vmatprep.subr.bf16.mxu1 %v11634_v43 }
 0x307   :  { %6257 = vmatpush1.bf16.msra.mxu0 %v11635_v3  ;;  %6305 = vmatpush1.bf16.msra.mxu1 %v11636_v58 }
 0x308   :  { %6259 = vmatprep.subr.bf16.mxu0 %v11637_v57  ;;  %6307 = vmatprep.subr.bf16.mxu1 %v11638_v47 }
 0x30b   :  { %6261 = vmatpush1.bf16.msra.mxu0 %v11639_v14  ;;  %6309 = vmatpush1.bf16.msra.mxu1 %v11640_v35 }
 0x30c   :  { %6263 = vmatprep.subr.bf16.mxu0 %v11703_v33  ;;  %6311 = vmatprep.subr.bf16.mxu1 %v11704_v54 }
 0x30f   :  { %6265 = vmatpush1.bf16.msra.mxu0 %v11705_v40  ;;  %6313 = vmatpush1.bf16.msra.mxu1 %v11706_v41 }
 0x310   :  { %6267 = vmatprep.subr.bf16.mxu0 %v11707_v32  ;;  %6315 = vmatprep.subr.bf16.mxu1 %v11708_v63 }
 0x313   :  { %6269 = vmatpush1.bf16.msra.mxu0 %v11709_v38  ;;  %6317 = vmatpush1.bf16.msra.mxu1 %v11710_v37 }
 0x314   :  { %6271 = vmatprep.subr.bf16.mxu0 %v11711_v23  ;;  %6319 = vmatprep.subr.bf16.mxu1 %v11712_v18 }
 0x317   :  { %6273 = vmatpush1.bf16.msra.mxu0 %v11713_v17  ;;  %6321 = vmatpush1.bf16.msra.mxu1 %v11714_v28 }
 0x318   :  { %6275 = vmatprep.subr.bf16.mxu0 %v11715_v55  ;;  %6323 = vmatprep.subr.bf16.mxu1 %v11654_v16 }
 0x31b   :  { %6277 = vmatpush1.bf16.msra.mxu0 %v11655_v6  ;;  %6325 = vmatpush1.bf16.msra.mxu1 %v11656_v12 }
 0x31c   :  { %6279 = vmatprep.subr.bf16.mxu0 %v11657_v46  ;;  %6327 = vmatprep.subr.bf16.mxu1 %v11658_v48 }
 0x31f   :  { %6281 = vmatpush1.bf16.msra.mxu0 %v11659_v51  ;;  %6329 = vmatpush1.bf16.msra.mxu1 %v11660_v49 }
 0x320   :  { %6283 = vmatprep.subr.bf16.mxu0 %v11661_v11  ;;  %6331 = vmatprep.subr.bf16.mxu1 %v11662_v56 }
 0x323   :  { %6285 = vmatpush1.bf16.msra.mxu0 %v11663_v19  ;;  %6333 = vmatpush1.bf16.msra.mxu1 %v11664_v42 }
 0x324   :  { %6287 = vmatprep.subr.bf16.mxu0 %v9423_v1  ;;  %6335 = vmatprep.subr.bf16.mxu1 %v9425_v2 }
 0x327   :  { %6289 = vmatpush1.bf16.msra.mxu0 %v9429_v59  ;;  %6337 = vmatpush1.bf16.msra.mxu1 %v9431_v31 }
 0x328   :  { %6291 = vmatprep.subr.bf16.mxu0 %v9435_v34  ;;  %6339 = vmatprep.subr.bf16.mxu1 %v9437_v50 }
 0x32b   :  { %6293 = vmatpush1.bf16.msra.mxu0 %v9441_v44  ;;  %6341 = vmatpush1.bf16.msra.mxu1 %v9443_v62 }
 0x32c   :  { %6295 = vmatprep.subr.bf16.mxu0 %v9447_v52  ;;  %6343 = vmatprep.subr.bf16.mxu1 %v9449_v60 }
 0x32f   :  { %6297 = vmatpush1.bf16.msra.mxu0 %v9453_v4  ;;  %6345 = vmatpush1.bf16.msra.mxu1 %v9455_v7  ;;  %v1070_v7 = vpop.permute.xlu1 %1069 }
 0x330   :  { %6347 = vmatprep.subr.bf16.mxu0 %v9056_v8  ;;  %6395 = vmatprep.subr.bf16.mxu1 %v11716_v9  ;;  %v11726_v9 = vld [vmem:[#allocation17_spill] sm:$0xff] }
 0x332   :  { %1298 = vmatmul.mubr.f32.vlgmr.msra.gmra.mrb[10].mxu0 %v1063_v13  ;;  %1369 = vmatmul.mubr.f32.vlgmr.msra.gmra.mrb[10].mxu1 %v1063_v13  ;;  %v11727_v13 = vld [vmem:[#allocation18_spill] sm:$0xff] }
 0x333   :  { %6349 = vmatpush1.bf16.msra.mxu0 %v11717_v61  ;;  %6397 = vmatpush1.bf16.msra.mxu1 %v11718_v26  ;;  %v11728_v61 = vld [vmem:[#allocation19_spill] sm:$0xff]  ;;  %v11729_v26 = vld [vmem:[#allocation20_spill] sm:$0xff] }
 0x334   :  { %6351 = vmatprep.subr.bf16.mxu0 %v11719_v45  ;;  %6399 = vmatprep.subr.bf16.mxu1 %v11720_v20  ;;  %v11730_v45 = vld [vmem:[#allocation21_spill] sm:$0xff]  ;;  %v11731_v20 = vld [vmem:[#allocation22_spill] sm:$0xff] }
 0x337   :  { %6353 = vmatpush1.bf16.msra.mxu0 %v11721_v22  ;;  %6401 = vmatpush1.bf16.msra.mxu1 %v11722_v29  ;;  %v11732_v22 = vld [vmem:[#allocation24_spill] sm:$0xff] }
 0x338   :  { %6355 = vmatprep.subr.bf16.mxu0 %v11723_v10  ;;  %6403 = vmatprep.subr.bf16.mxu1 %v11724_v30  ;;  %v11733_v29 = vld [vmem:[#allocation28_spill] sm:$0xff]  ;;  %v11734_v10 = vld [vmem:[#allocation29_spill] sm:$0xff]  ;;  %v11735_v30 = vld [vmem:[#allocation30_spill] sm:$0xff] }
 0x33b   :  { %6357 = vmatpush1.bf16.msra.mxu0 %v11725_v27  ;;  %6405 = vmatpush1.bf16.msra.mxu1 %v11726_v9  ;;  %v11736_v27 = vld [vmem:[#allocation31_spill] sm:$0xff]  ;;  %v11737_v9 = vld [vmem:[#allocation32_spill] sm:$0xff] }
 0x33c   :  { %6359 = vmatprep.subr.bf16.mxu0 %v11727_v13  ;;  %6407 = vmatprep.subr.bf16.mxu1 %v11728_v61  ;;  %v11738_v13 = vld [vmem:[#allocation33_spill] sm:$0xff]  ;;  %v11739_v61 = vld [vmem:[#allocation34_spill] sm:$0xff] }
 0x33f   :  { %6361 = vmatpush1.bf16.msra.mxu0 %v11729_v26  ;;  %6409 = vmatpush1.bf16.msra.mxu1 %v11730_v45  ;;  %v11740_v26 = vld [vmem:[#allocation35_spill] sm:$0xff]  ;;  %v11741_v45 = vld [vmem:[#allocation36_spill] sm:$0xff] }
 0x340   :  { %6363 = vmatprep.subr.bf16.mxu0 %v11731_v20  ;;  %6411 = vmatprep.subr.bf16.mxu1 %v11732_v22  ;;  %v11742_v20 = vld [vmem:[#allocation37_spill] sm:$0xff]  ;;  %v11743_v22 = vld [vmem:[#allocation38_spill] sm:$0xff] }
 0x343   :  { %6365 = vmatpush1.bf16.msra.mxu0 %v11733_v29  ;;  %6413 = vmatpush1.bf16.msra.mxu1 %v11734_v10  ;;  %v11744_v29 = vld [vmem:[#allocation39_spill] sm:$0xff]  ;;  %v11745_v10 = vld [vmem:[#allocation40_spill] sm:$0xff] }
 0x344   :  { %6367 = vmatprep.subr.bf16.mxu0 %v11735_v30  ;;  %6415 = vmatprep.subr.bf16.mxu1 %v11736_v27  ;;  %v11746_v30 = vld [vmem:[#allocation41_spill] sm:$0xff]  ;;  %v11747_v27 = vld [vmem:[#allocation42_spill] sm:$0xff] }
 0x347   :  { %6369 = vmatpush1.bf16.msra.mxu0 %v11737_v9  ;;  %6417 = vmatpush1.bf16.msra.mxu1 %v11738_v13  ;;  %v11748_v9 = vld [vmem:[#allocation43_spill] sm:$0xff]  ;;  %v11749_v13 = vld [vmem:[#allocation44_spill] sm:$0xff] }
 0x348   :  { %6371 = vmatprep.subr.bf16.mxu0 %v11739_v61  ;;  %6419 = vmatprep.subr.bf16.mxu1 %v11740_v26  ;;  %v11750_v61 = vld [vmem:[#allocation45_spill] sm:$0xff]  ;;  %v11751_v26 = vld [vmem:[#allocation46_spill] sm:$0xff] }
 0x34b   :  { %6373 = vmatpush1.bf16.msra.mxu0 %v11741_v45  ;;  %6421 = vmatpush1.bf16.msra.mxu1 %v11742_v20  ;;  %v11752_v45 = vld [vmem:[#allocation47_spill] sm:$0xff]  ;;  %v11753_v20 = vld [vmem:[#allocation48_spill] sm:$0xff] }
 0x34c   :  { %6375 = vmatprep.subr.bf16.mxu0 %v11743_v22  ;;  %6423 = vmatprep.subr.bf16.mxu1 %v11744_v29  ;;  %v11754_v22 = vld [vmem:[#allocation49_spill] sm:$0xff]  ;;  %v11755_v29 = vld [vmem:[#allocation50_spill] sm:$0xff] }
 0x34f   :  { %6377 = vmatpush1.bf16.msra.mxu0 %v11745_v10  ;;  %6425 = vmatpush1.bf16.msra.mxu1 %v11746_v30  ;;  %v11756_v10 = vld [vmem:[#allocation51_spill] sm:$0xff]  ;;  %v11757_v30 = vld [vmem:[#allocation52_spill] sm:$0xff] }
 0x350   :  { %6379 = vmatprep.subr.bf16.mxu0 %v11747_v27  ;;  %6427 = vmatprep.subr.bf16.mxu1 %v11748_v9  ;;  %v11758_v27 = vld [vmem:[#allocation53_spill] sm:$0xff]  ;;  %v11759_v9 = vld [vmem:[#allocation54_spill] sm:$0xff] }
 0x353   :  { %6381 = vmatpush1.bf16.msra.mxu0 %v11749_v13  ;;  %6429 = vmatpush1.bf16.msra.mxu1 %v11750_v61  ;;  %v11760_v13 = vld [vmem:[#allocation55_spill] sm:$0xff]  ;;  %v11761_v61 = vld [vmem:[#allocation56_spill] sm:$0xff] }
 0x354   :  { %6383 = vmatprep.subr.bf16.mxu0 %v11751_v26  ;;  %6431 = vmatprep.subr.bf16.mxu1 %v11752_v45  ;;  %v11762_v26 = vld [vmem:[#allocation57_spill] sm:$0xff]  ;;  %v11763_v45 = vld [vmem:[#allocation58_spill] sm:$0xff] }
 0x357   :  { %6385 = vmatpush1.bf16.msra.mxu0 %v11753_v20  ;;  %6433 = vmatpush1.bf16.msra.mxu1 %v11754_v22  ;;  %v11764_v20 = vld [vmem:[#allocation59_spill] sm:$0xff] }
 0x358   :  { %6387 = vmatprep.subr.bf16.mxu0 %v11755_v29  ;;  %6435 = vmatprep.subr.bf16.mxu1 %v11756_v10 }
 0x35b   :  { %6389 = vmatpush1.bf16.msra.mxu0 %v11757_v30  ;;  %6437 = vmatpush1.bf16.msra.mxu1 %v11758_v27  ;;  %v11765_v30 = vld [vmem:[#allocation23_spill] sm:$0xff]  ;;  %v11766_v27 = vld [vmem:[#allocation26_spill] sm:$0xff] }
 0x35c   :  { %6391 = vmatprep.subr.bf16.mxu0 %v11759_v9  ;;  %6439 = vmatprep.subr.bf16.mxu1 %v11760_v13  ;;  %v1074_v4 = vmul.f32 %v1070_v7, %v11765_v30  ;;  %v1075_v60 = vmul.f32 %v1070_v7, %v11766_v27  ;;  %v11767_v9 = vld [vmem:[#allocation62_spill] sm:$0xff]  ;;  %v11768_v13 = vld [vmem:[#allocation63_spill] sm:$0xff] }
 0x35d   :  { %v1072_v52 = vmul.f32 %v1070_v7, %v11767_v9  ;;  %v1073_v62 = vmul.f32 %v1070_v7, %v11768_v13  ;;  %v1076_v13 = vmul.f32 %v1070_v7, %v11696_v39 }
 0x35f   :  { %6393 = vmatpush1.bf16.msra.mxu0 %v11761_v61  ;;  %6441 = vmatpush1.bf16.msra.mxu1 %v11762_v26  ;;  %v1082_v61 = vadd.f32 %v1074_v4, %v11618_v36  ;;  %v11769_v26 = vld [vmem:[#allocation27_spill] sm:$0xff]  ;;  %v1081_v34 = vadd.f32 %v1073_v62, %v11695_v0  ;;  %v11774_v62 = vld [vmem:[#allocation70_spill] sm:$0xff] }
 0x360   :  { %6443 = vmatprep.subr.bf16.mxu0 %v11763_v45  ;;  %6491 = vmatprep.subr.bf16.mxu1 %v11764_v20  ;;  %v1083_v44 = vadd.f32 %v1075_v60, %v11769_v26  ;;  %v11770_v45 = vld [vmem:[#allocation65_spill] sm:$0xff]  ;;  %v11771_v4 = vld [vmem:[#allocation67_spill] sm:$0xff] }
 0x361   :  { %v1080_v50 = vadd.f32 %v1072_v52, %v11770_v45  ;;  %v1077_v60 = vmul.f32 %v1070_v7, %v11771_v4  ;;  %v11772_v26 = vld [vmem:[#allocation69_spill] sm:$0xff] }
 0x362   :  { %v1079_v52 = vmul.f32 %v1070_v7, %v11772_v26 }
 0x3d5   :  { %v1157_v22 = vpop.f32.mrb[8].mxu0  ;;  %v1228_v29 = vpop.f32.mrb[8].mxu1 }
 0x3d6   :  { %v1159_v8 = vpop.f32.mrb[9].mxu0  ;;  %v1230_v10 = vpop.f32.mrb[9].mxu1  ;;  %v1377_v20 = vadd.f32 %v1228_v29, %v1082_v61  ;;  %v1375_v59 = vadd.f32 %v1157_v22, %v1080_v50  ;;  %v11773_v61 = vld [vmem:[#allocation68_spill] sm:$0xff] }
 0x3d7   :  { %v1378_v31 = vadd.f32 %v1230_v10, %v1083_v44  ;;  %v1376_v2 = vadd.f32 %v1159_v8, %v1081_v34  ;;  %v1078_v29 = vmul.f32 %v1070_v7, %v11773_v61  ;;  %v1084_v44 = vadd.f32 %v1076_v13, %v11774_v62  ;;  %v11775_v34 = vld [vmem:[#allocation71_spill] sm:$0xff] }
 0x3d8   :  { %v1391_v1 = vmul.f32 0.5, %v1377_v20  ;;  %v1383_v42 = vmul.f32 0.5, %v1375_v59 }
 0x3d9   :  { %v1392_v30 = vmul.f32 0.5, %v1378_v31  ;;  %v1384_v27 = vmul.f32 0.5, %v1376_v2  ;;  %v1085_v31 = vadd.f32 %v1077_v60, %v11775_v34  ;;  %v1086_v22 = vadd.f32 %v1078_v29, %v11628_v15 }
 0x3da   :  { %8712 = vtanh.f32 %v1391_v1  ;;  %v11776_v1 = vld [vmem:[#allocation73_spill] sm:$0xff] }
 0x3db   :  { %8714 = vtanh.f32 %v1392_v30  ;;  %v1087_v20 = vadd.f32 %v1079_v52, %v11776_v1 }
 0x3dc   :  { %8716 = vtanh.f32 %v1383_v42 }
 0x3dd   :  { %8718 = vtanh.f32 %v1384_v27 }
 0x3e4   :  { %v8713_v30 = vpop.eup %8712 }
 0x3e5   :  { %v8715_v26 = vpop.eup %8714  ;;  %v1395_v62 = vadd.f32 1.0, %v8713_v30 }
 0x3e6   :  { %v8717_v7 = vpop.eup %8716  ;;  %v1396_v61 = vadd.f32 1.0, %v8715_v26 }
 0x3e7   :  { %v8719_v13 = vpop.eup %8718  ;;  %v1387_v60 = vadd.f32 1.0, %v8717_v7  ;;  %v1397_v34 = vmul.f32 0.5, %v1395_v62  ;;  %v11778_v7 = vld [vmem:[#allocation110_spill] sm:$0xff] }
 0x3e8   :  { %v1398_v52 = vmul.f32 0.5, %v1396_v61 }
 0x3e9   :  { %v1389_v1 = vmul.f32 0.5, %v1387_v60  ;;  %v11780_v60 = vld [vmem:[#allocation112_spill] sm:$0xff] }
 0x405   :  { %v1299_v50 = vpop.f32.mrb[10].mxu0  ;;  %v1370_v8 = vpop.f32.mrb[10].mxu1 }
 0x406   :  { %v1379_v59 = vadd.f32 %v1299_v50, %v1084_v44  ;;  %v1301_v2 = vpop.f32.mrb[11].mxu0  ;;  %v1372_v42 = vpop.f32.mrb[11].mxu1  ;;  %v1381_v4 = vadd.f32 %v1370_v8, %v1086_v22  ;;  %v1388_v50 = vadd.f32 1.0, %v8719_v13  ;;  %v11779_v13 = vld [vmem:[#allocation111_spill] sm:$0xff] }
 0x407   :  { %v1380_v10 = vadd.f32 %v1301_v2, %v1085_v31  ;;  %v1382_v27 = vadd.f32 %v1372_v42, %v1087_v20  ;;  %v1409_v2 = vmul.f32 %v1397_v34, %v9679_v5  ;;  %v1410_v20 = vmul.f32 %v1398_v52, %v9681_v21  ;;  %v11777_v21 = vld [vmem:[#allocation109_spill] sm:$0xff]  ;;  %v11783_v52 = vld [vmem:[#allocation115_spill] sm:$0xff] }
 0x408   :  { %8720 = vtanh.f32 %v1379_v59  ;;  %v1401_v44 = vmul.f32 0.5, %v1381_v4  ;;  %v1390_v31 = vmul.f32 0.5, %v1388_v50  ;;  %v11782_v50 = vld [vmem:[#allocation114_spill] sm:$0xff] }
 0x409   :  { %8722 = vtanh.f32 %v1380_v10  ;;  %v1402_v39 = vmul.f32 0.5, %v1382_v27 }
 0x40b   :  { %8724 = vtanh.f32 %v1402_v39 }
 0x40c   :  { %8726 = vtanh.f32 %v1401_v44  ;;  %v11781_v44 = vld [vmem:[#allocation113_spill] sm:$0xff] }
 0x412   :  { %v8721_v29 = vpop.eup %8720 }
 0x413   :  { %v8723_v59 = vpop.eup %8722  ;;  %v1411_v8 = vmul.f32 %v8721_v29, %v1389_v1  ;;  %v11784_v29 = vld [vmem:[#allocation116_spill] sm:$0xff] }
 0x414   :  { %v1412_v42 = vmul.f32 %v8723_v59, %v1390_v31  ;;  %v11785_v31 = vld [vmem:[#allocation117_spill] sm:$0xff]  ;;  %v11786_v59 = vld [vmem:[#allocation118_spill] sm:$0xff] }
 0x415   :  { %v9803_v22 = vadd.f32 %v1411_v8, %v1409_v2  ;;  %v8725_v39 = vpop.eup %8724  ;;  %v11787_v2 = vld [vmem:[#allocation119_spill] sm:$0xff]  ;;  %v11788_v8 = vld [vmem:[#allocation120_spill] sm:$0xff] }
 0x416   :  { %v9805_v26 = vadd.f32 %v1412_v42, %v1410_v20  ;;  %v8727_v4 = vpop.eup %8726  ;;  %v1406_v61 = vadd.f32 1.0, %v8725_v39  ;;  %v11789_v20 = vld [vmem:[#allocation121_spill] sm:$0xff]  ;;  %v11790_v42 = vld [vmem:[#allocation6_spill] sm:$0xff]  ;;  %v11791_v39 = vld [vmem:[#allocation7_spill] sm:$0xff] }
 0x417   :  { %8728 = vtanh.f32 %v9803_v22  ;;  %v1405_v62 = vadd.f32 1.0, %v8727_v4  ;;  %v11792_v4 = vld [vmem:[#allocation8_spill] sm:$0xff] }
 0x418   :  { %8730 = vtanh.f32 %v9805_v26  ;;  %v1408_v30 = vmul.f32 0.5, %v1406_v61  ;;  %v11793_v61 = vld [vmem:[#allocation9_spill] sm:$0xff] }
 0x419   :  { %v1407_v5 = vmul.f32 0.5, %v1405_v62  ;;  %v11794_v62 = vld [vmem:[#allocation10_spill] sm:$0xff] }
 0x421   :  { %v8729_v10 = vpop.eup %8728 }
 0x422   :  { %v8731_v27 = vpop.eup %8730  ;;  %v1417_v1 = vmul.f32 %v8729_v10, %v1407_v5  ;;  %v11795_v10 = vld [vmem:[#allocation11_spill] sm:$0xff]  ;;  %v11798_v5 = vld [vmem:[#allocation14_spill] sm:$0xff] }
 0x423   :  { %v1418_v34 = vmul.f32 %v8731_v27, %v1408_v30  ;;  %v11796_v30 = vld [vmem:[#allocation12_spill] sm:$0xff]  ;;  %v11797_v27 = vld [vmem:[#allocation13_spill] sm:$0xff] }
 0x425   :  { %5711 = vmatprep.mubr.msk.f32.mxu0 %vm379_vm0, %v1418_v34  ;;  %5712 = vmatprep.mubr.msk.f32.mxu1 %vm379_vm0, %v1418_v34 }
 0x426   :  { %1510 = vmatmul.mubr.f32.vlgmr.msra.gmra.mrb[12].mxu0 %v1417_v1  ;;  %1581 = vmatmul.mubr.f32.vlgmr.msra.gmra.mrb[12].mxu1 %v1417_v1 }
 0x427   :  { %6445 = vmatpush1.bf16.msra.mxu0 %v11631_v25  ;;  %6493 = vmatpush1.bf16.msra.mxu1 %v11632_v24 }
 0x428   :  { %5713 = vmatprep.mubr.msk.f32.mxu0 %vm379_vm0, %v1418_v34  ;;  %5714 = vmatprep.mubr.msk.f32.mxu1 %vm379_vm0, %v1418_v34  ;;  %v11799_v34 = vld [vmem:[#allocation15_spill] sm:$0xff] }
 0x429   :  { %6447 = vmatprep.subr.bf16.mxu0 %v11633_v53  ;;  %6495 = vmatprep.subr.bf16.mxu1 %v11634_v43 }
 0x42b   :  { %6449 = vmatpush1.bf16.msra.mxu0 %v11635_v3  ;;  %6497 = vmatpush1.bf16.msra.mxu1 %v11636_v58 }
 0x42c   :  { %6451 = vmatprep.subr.bf16.mxu0 %v11637_v57  ;;  %6499 = vmatprep.subr.bf16.mxu1 %v11638_v47 }
 0x42f   :  { %6453 = vmatpush1.bf16.msra.mxu0 %v11639_v14  ;;  %6501 = vmatpush1.bf16.msra.mxu1 %v11640_v35 }
 0x430   :  { %6455 = vmatprep.subr.bf16.mxu0 %v11703_v33  ;;  %6503 = vmatprep.subr.bf16.mxu1 %v11704_v54 }
 0x433   :  { %6457 = vmatpush1.bf16.msra.mxu0 %v11705_v40  ;;  %6505 = vmatpush1.bf16.msra.mxu1 %v11706_v41 }
 0x434   :  { %6459 = vmatprep.subr.bf16.mxu0 %v11707_v32  ;;  %6507 = vmatprep.subr.bf16.mxu1 %v11708_v63 }
 0x437   :  { %6461 = vmatpush1.bf16.msra.mxu0 %v11709_v38  ;;  %6509 = vmatpush1.bf16.msra.mxu1 %v11710_v37 }
 0x438   :  { %6463 = vmatprep.subr.bf16.mxu0 %v11711_v23  ;;  %6511 = vmatprep.subr.bf16.mxu1 %v11712_v18 }
 0x43b   :  { %6465 = vmatpush1.bf16.msra.mxu0 %v11713_v17  ;;  %6513 = vmatpush1.bf16.msra.mxu1 %v11714_v28 }
 0x43c   :  { %6467 = vmatprep.subr.bf16.mxu0 %v11715_v55  ;;  %6515 = vmatprep.subr.bf16.mxu1 %v11654_v16 }
 0x43f   :  { %6469 = vmatpush1.bf16.msra.mxu0 %v11655_v6  ;;  %6517 = vmatpush1.bf16.msra.mxu1 %v11656_v12 }
 0x440   :  { %6471 = vmatprep.subr.bf16.mxu0 %v11657_v46  ;;  %6519 = vmatprep.subr.bf16.mxu1 %v11658_v48 }
 0x443   :  { %6473 = vmatpush1.bf16.msra.mxu0 %v11659_v51  ;;  %6521 = vmatpush1.bf16.msra.mxu1 %v11660_v49 }
 0x444   :  { %6475 = vmatprep.subr.bf16.mxu0 %v11661_v11  ;;  %6523 = vmatprep.subr.bf16.mxu1 %v11662_v56 }
 0x447   :  { %6477 = vmatpush1.bf16.msra.mxu0 %v11663_v19  ;;  %6525 = vmatpush1.bf16.msra.mxu1 %v11777_v21 }
 0x448   :  { %6479 = vmatprep.subr.bf16.mxu0 %v11778_v7  ;;  %6527 = vmatprep.subr.bf16.mxu1 %v11779_v13 }
 0x44b   :  { %6481 = vmatpush1.bf16.msra.mxu0 %v11780_v60  ;;  %6529 = vmatpush1.bf16.msra.mxu1 %v11781_v44 }
 0x44c   :  { %6483 = vmatprep.subr.bf16.mxu0 %v11782_v50  ;;  %6531 = vmatprep.subr.bf16.mxu1 %v11783_v52 }
 0x44f   :  { %6485 = vmatpush1.bf16.msra.mxu0 %v11784_v29  ;;  %6533 = vmatpush1.bf16.msra.mxu1 %v11785_v31 }
 0x450   :  { %6487 = vmatprep.subr.bf16.mxu0 %v11786_v59  ;;  %6535 = vmatprep.subr.bf16.mxu1 %v11787_v2 }
 0x453   :  { %6489 = vmatpush1.bf16.msra.mxu0 %v11788_v8  ;;  %6537 = vmatpush1.bf16.msra.mxu1 %v11789_v20  ;;  %v1424_v8 = vpop.permute.xlu0 %1423 }
 0x454   :  { %6539 = vmatprep.subr.bf16.mxu0 %v11790_v42  ;;  %6587 = vmatprep.subr.bf16.mxu1 %v11791_v39  ;;  %v11800_v42 = vld [vmem:[#allocation16_spill] sm:$0xff]  ;;  %v11801_v39 = vld [vmem:[#allocation17_spill] sm:$0xff] }
 0x456   :  { %1652 = vmatmul.mubr.f32.vlgmr.msra.gmra.mrb[14].mxu0 %v1417_v1  ;;  %1723 = vmatmul.mubr.f32.vlgmr.msra.gmra.mrb[14].mxu1 %v1417_v1  ;;  %v11802_v1 = vld [vmem:[#allocation18_spill] sm:$0xff] }
 0x457   :  { %6541 = vmatpush1.bf16.msra.mxu0 %v11792_v4  ;;  %6589 = vmatpush1.bf16.msra.mxu1 %v11793_v61  ;;  %v11803_v4 = vld [vmem:[#allocation19_spill] sm:$0xff]  ;;  %v11804_v61 = vld [vmem:[#allocation20_spill] sm:$0xff] }
 0x458   :  { %6543 = vmatprep.subr.bf16.mxu0 %v11794_v62  ;;  %6591 = vmatprep.subr.bf16.mxu1 %v11795_v10  ;;  %v11805_v62 = vld [vmem:[#allocation21_spill] sm:$0xff]  ;;  %v11806_v10 = vld [vmem:[#allocation22_spill] sm:$0xff] }
 0x45b   :  { %6545 = vmatpush1.bf16.msra.mxu0 %v11796_v30  ;;  %6593 = vmatpush1.bf16.msra.mxu1 %v11797_v27  ;;  %v11807_v30 = vld [vmem:[#allocation24_spill] sm:$0xff] }
 0x45c   :  { %6547 = vmatprep.subr.bf16.mxu0 %v11798_v5  ;;  %6595 = vmatprep.subr.bf16.mxu1 %v11799_v34  ;;  %v11808_v27 = vld [vmem:[#allocation28_spill] sm:$0xff]  ;;  %v11809_v5 = vld [vmem:[#allocation29_spill] sm:$0xff]  ;;  %v11810_v34 = vld [vmem:[#allocation30_spill] sm:$0xff] }
 0x45f   :  { %6549 = vmatpush1.bf16.msra.mxu0 %v11800_v42  ;;  %6597 = vmatpush1.bf16.msra.mxu1 %v11801_v39  ;;  %v11811_v42 = vld [vmem:[#allocation31_spill] sm:$0xff]  ;;  %v11812_v39 = vld [vmem:[#allocation32_spill] sm:$0xff] }
 0x460   :  { %6551 = vmatprep.subr.bf16.mxu0 %v11802_v1  ;;  %6599 = vmatprep.subr.bf16.mxu1 %v11803_v4  ;;  %v11813_v1 = vld [vmem:[#allocation33_spill] sm:$0xff]  ;;  %v11814_v4 = vld [vmem:[#allocation34_spill] sm:$0xff] }
 0x463   :  { %6553 = vmatpush1.bf16.msra.mxu0 %v11804_v61  ;;  %6601 = vmatpush1.bf16.msra.mxu1 %v11805_v62  ;;  %v11815_v61 = vld [vmem:[#allocation35_spill] sm:$0xff]  ;;  %v11816_v62 = vld [vmem:[#allocation36_spill] sm:$0xff] }
 0x464   :  { %6555 = vmatprep.subr.bf16.mxu0 %v11806_v10  ;;  %6603 = vmatprep.subr.bf16.mxu1 %v11807_v30  ;;  %v11817_v10 = vld [vmem:[#allocation37_spill] sm:$0xff]  ;;  %v11818_v30 = vld [vmem:[#allocation38_spill] sm:$0xff] }
 0x467   :  { %6557 = vmatpush1.bf16.msra.mxu0 %v11808_v27  ;;  %6605 = vmatpush1.bf16.msra.mxu1 %v11809_v5  ;;  %v11819_v27 = vld [vmem:[#allocation39_spill] sm:$0xff]  ;;  %v11820_v5 = vld [vmem:[#allocation40_spill] sm:$0xff] }
 0x468   :  { %6559 = vmatprep.subr.bf16.mxu0 %v11810_v34  ;;  %6607 = vmatprep.subr.bf16.mxu1 %v11811_v42  ;;  %v11821_v34 = vld [vmem:[#allocation41_spill] sm:$0xff]  ;;  %v11822_v42 = vld [vmem:[#allocation42_spill] sm:$0xff] }
 0x46b   :  { %6561 = vmatpush1.bf16.msra.mxu0 %v11812_v39  ;;  %6609 = vmatpush1.bf16.msra.mxu1 %v11813_v1  ;;  %v11823_v39 = vld [vmem:[#allocation43_spill] sm:$0xff]  ;;  %v11824_v1 = vld [vmem:[#allocation44_spill] sm:$0xff] }
 0x46c   :  { %6563 = vmatprep.subr.bf16.mxu0 %v11814_v4  ;;  %6611 = vmatprep.subr.bf16.mxu1 %v11815_v61  ;;  %v11825_v4 = vld [vmem:[#allocation45_spill] sm:$0xff]  ;;  %v11826_v61 = vld [vmem:[#allocation46_spill] sm:$0xff] }
 0x46f   :  { %6565 = vmatpush1.bf16.msra.mxu0 %v11816_v62  ;;  %6613 = vmatpush1.bf16.msra.mxu1 %v11817_v10  ;;  %v11827_v62 = vld [vmem:[#allocation47_spill] sm:$0xff]  ;;  %v11828_v10 = vld [vmem:[#allocation48_spill] sm:$0xff] }
 0x470   :  { %6567 = vmatprep.subr.bf16.mxu0 %v11818_v30  ;;  %6615 = vmatprep.subr.bf16.mxu1 %v11819_v27  ;;  %v11829_v30 = vld [vmem:[#allocation49_spill] sm:$0xff]  ;;  %v11830_v27 = vld [vmem:[#allocation50_spill] sm:$0xff] }
 0x473   :  { %6569 = vmatpush1.bf16.msra.mxu0 %v11820_v5  ;;  %6617 = vmatpush1.bf16.msra.mxu1 %v11821_v34  ;;  %v11831_v5 = vld [vmem:[#allocation51_spill] sm:$0xff]  ;;  %v11832_v34 = vld [vmem:[#allocation52_spill] sm:$0xff] }
 0x474   :  { %6571 = vmatprep.subr.bf16.mxu0 %v11822_v42  ;;  %6619 = vmatprep.subr.bf16.mxu1 %v11823_v39  ;;  %v11833_v42 = vld [vmem:[#allocation53_spill] sm:$0xff]  ;;  %v11834_v39 = vld [vmem:[#allocation54_spill] sm:$0xff] }
 0x477   :  { %6573 = vmatpush1.bf16.msra.mxu0 %v11824_v1  ;;  %6621 = vmatpush1.bf16.msra.mxu1 %v11825_v4  ;;  %v11835_v1 = vld [vmem:[#allocation55_spill] sm:$0xff]  ;;  %v11836_v4 = vld [vmem:[#allocation56_spill] sm:$0xff] }
 0x478   :  { %6575 = vmatprep.subr.bf16.mxu0 %v11826_v61  ;;  %6623 = vmatprep.subr.bf16.mxu1 %v11827_v62  ;;  %v11837_v61 = vld [vmem:[#allocation57_spill] sm:$0xff]  ;;  %v11838_v62 = vld [vmem:[#allocation58_spill] sm:$0xff] }
 0x47b   :  { %6577 = vmatpush1.bf16.msra.mxu0 %v11828_v10  ;;  %6625 = vmatpush1.bf16.msra.mxu1 %v11829_v30  ;;  %v11839_v10 = vld [vmem:[#allocation59_spill] sm:$0xff] }
 0x47c   :  { %6579 = vmatprep.subr.bf16.mxu0 %v11830_v27  ;;  %6627 = vmatprep.subr.bf16.mxu1 %v11831_v5 }
 0x47f   :  { %6581 = vmatpush1.bf16.msra.mxu0 %v11832_v34  ;;  %6629 = vmatpush1.bf16.msra.mxu1 %v11833_v42  ;;  %v11840_v34 = vld [vmem:[#allocation23_spill] sm:$0xff]  ;;  %v11841_v42 = vld [vmem:[#allocation26_spill] sm:$0xff] }
 0x480   :  { %6583 = vmatprep.subr.bf16.mxu0 %v11834_v39  ;;  %6631 = vmatprep.subr.bf16.mxu1 %v11835_v1  ;;  %v1428_v2 = vmul.f32 %v1424_v8, %v11840_v34  ;;  %v1429_v59 = vmul.f32 %v1424_v8, %v11841_v42  ;;  %v1426_v39 = vmul.f32 %v1424_v8, %v11767_v9  ;;  %v11842_v1 = vld [vmem:[#allocation63_spill] sm:$0xff] }
 0x481   :  { %v1427_v31 = vmul.f32 %v1424_v8, %v11842_v1  ;;  %v11844_v1 = vld [vmem:[#allocation64_spill] sm:$0xff] }
 0x482   :  { %v1430_v9 = vmul.f32 %v1424_v8, %v11844_v1 }
 0x483   :  { %6585 = vmatpush1.bf16.msra.mxu0 %v11836_v4  ;;  %6633 = vmatpush1.bf16.msra.mxu1 %v11837_v61  ;;  %v1436_v4 = vadd.f32 %v1428_v2, %v11618_v36  ;;  %v11843_v61 = vld [vmem:[#allocation27_spill] sm:$0xff]  ;;  %v1435_v52 = vadd.f32 %v1427_v31, %v11695_v0  ;;  %v11848_v31 = vld [vmem:[#allocation70_spill] sm:$0xff] }
 0x484   :  { %6635 = vmatprep.subr.bf16.mxu0 %v11838_v62  ;;  %6683 = vmatprep.subr.bf16.mxu1 %v11839_v10  ;;  %v1437_v29 = vadd.f32 %v1429_v59, %v11843_v61  ;;  %v1434_v62 = vadd.f32 %v1426_v39, %v11770_v45  ;;  %v11845_v2 = vld [vmem:[#allocation67_spill] sm:$0xff]  ;;  %v11846_v61 = vld [vmem:[#allocation69_spill] sm:$0xff] }
 0x485   :  { %v1431_v59 = vmul.f32 %v1424_v8, %v11845_v2  ;;  %v1433_v39 = vmul.f32 %v1424_v8, %v11846_v61 }
 0x4f9   :  { %v1511_v30 = vpop.f32.mrb[12].mxu0  ;;  %v1582_v27 = vpop.f32.mrb[12].mxu1 }
 0x4fa   :  { %v1513_v20 = vpop.f32.mrb[13].mxu0  ;;  %v1584_v5 = vpop.f32.mrb[13].mxu1  ;;  %v1731_v10 = vadd.f32 %v1582_v27, %v1436_v4  ;;  %v1729_v44 = vadd.f32 %v1511_v30, %v1434_v62  ;;  %v11847_v4 = vld [vmem:[#allocation68_spill] sm:$0xff] }
 0x4fb   :  { %v1732_v50 = vadd.f32 %v1584_v5, %v1437_v29  ;;  %v1730_v60 = vadd.f32 %v1513_v20, %v1435_v52  ;;  %v1432_v27 = vmul.f32 %v1424_v8, %v11847_v4  ;;  %v1438_v29 = vadd.f32 %v1430_v9, %v11848_v31  ;;  %v11849_v20 = vld [vmem:[#allocation71_spill] sm:$0xff] }
 0x4fc   :  { %v1745_v13 = vmul.f32 0.5, %v1731_v10  ;;  %v1737_v7 = vmul.f32 0.5, %v1729_v44 }
 0x4fd   :  { %v1746_v34 = vmul.f32 0.5, %v1732_v50  ;;  %v1738_v42 = vmul.f32 0.5, %v1730_v60  ;;  %v1439_v50 = vadd.f32 %v1431_v59, %v11849_v20  ;;  %v1440_v30 = vadd.f32 %v1432_v27, %v11628_v15 }
 0x4fe   :  { %8732 = vtanh.f32 %v1745_v13  ;;  %v11850_v13 = vld [vmem:[#allocation73_spill] sm:$0xff] }
 0x4ff   :  { %8734 = vtanh.f32 %v1746_v34  ;;  %v1441_v10 = vadd.f32 %v1433_v39, %v11850_v13 }
 0x500   :  { %8736 = vtanh.f32 %v1737_v7 }
 0x501   :  { %8738 = vtanh.f32 %v1738_v42 }
 0x508   :  { %v8733_v5 = vpop.eup %8732 }
 0x509   :  { %v8735_v61 = vpop.eup %8734  ;;  %v1749_v31 = vadd.f32 1.0, %v8733_v5 }
 0x50a   :  { %v8737_v8 = vpop.eup %8736  ;;  %v1750_v4 = vadd.f32 1.0, %v8735_v61 }
 0x50b   :  { %v8739_v9 = vpop.eup %8738  ;;  %v1741_v59 = vadd.f32 1.0, %v8737_v8  ;;  %v1751_v20 = vmul.f32 0.5, %v1749_v31  ;;  %v11852_v8 = vld [vmem:[#allocation111_spill] sm:$0xff] }
 0x50c   :  { %v1752_v39 = vmul.f32 0.5, %v1750_v4 }
 0x50d   :  { %v1743_v13 = vmul.f32 0.5, %v1741_v59  ;;  %v11854_v59 = vld [vmem:[#allocation113_spill] sm:$0xff] }
 0x529   :  { %v1653_v62 = vpop.f32.mrb[14].mxu0  ;;  %v1724_v52 = vpop.f32.mrb[14].mxu1 }
 0x52a   :  { %v1733_v44 = vadd.f32 %v1653_v62, %v1438_v29  ;;  %v1655_v60 = vpop.f32.mrb[15].mxu0  ;;  %v1726_v7 = vpop.f32.mrb[15].mxu1  ;;  %v1735_v2 = vadd.f32 %v1724_v52, %v1440_v30  ;;  %v1742_v62 = vadd.f32 1.0, %v8739_v9  ;;  %v11853_v9 = vld [vmem:[#allocation112_spill] sm:$0xff] }
 0x52b   :  { %v1734_v42 = vadd.f32 %v1655_v60, %v1439_v50  ;;  %v1736_v34 = vadd.f32 %v1726_v7, %v1441_v10  ;;  %v1763_v60 = vmul.f32 %v1751_v20, %v9803_v22  ;;  %v1764_v10 = vmul.f32 %v1752_v39, %v9805_v26  ;;  %v11851_v26 = vld [vmem:[#allocation110_spill] sm:$0xff]  ;;  %v11857_v39 = vld [vmem:[#allocation116_spill] sm:$0xff] }
 0x52c   :  { %8740 = vtanh.f32 %v1733_v44  ;;  %v1755_v29 = vmul.f32 0.5, %v1735_v2  ;;  %v1744_v50 = vmul.f32 0.5, %v1742_v62  ;;  %v11856_v62 = vld [vmem:[#allocation115_spill] sm:$0xff] }
 0x52d   :  { %8742 = vtanh.f32 %v1734_v42  ;;  %v1756_v1 = vmul.f32 0.5, %v1736_v34 }
 0x52f   :  { %8744 = vtanh.f32 %v1756_v1 }
 0x530   :  { %8746 = vtanh.f32 %v1755_v29  ;;  %v11855_v29 = vld [vmem:[#allocation114_spill] sm:$0xff] }
 0x536   :  { %v8741_v27 = vpop.eup %8740 }
 0x537   :  { %v8743_v44 = vpop.eup %8742  ;;  %v1765_v52 = vmul.f32 %v8741_v27, %v1743_v13  ;;  %v11858_v27 = vld [vmem:[#allocation117_spill] sm:$0xff] }
 0x538   :  { %v1766_v7 = vmul.f32 %v8743_v44, %v1744_v50  ;;  %v11859_v50 = vld [vmem:[#allocation118_spill] sm:$0xff]  ;;  %v11860_v44 = vld [vmem:[#allocation119_spill] sm:$0xff] }
 0x539   :  { %v9927_v30 = vadd.f32 %v1765_v52, %v1763_v60  ;;  %v8745_v1 = vpop.eup %8744  ;;  %v11861_v60 = vld [vmem:[#allocation120_spill] sm:$0xff]  ;;  %v11862_v52 = vld [vmem:[#allocation121_spill] sm:$0xff] }
 0x53a   :  { %v9929_v61 = vadd.f32 %v1766_v7, %v1764_v10  ;;  %v8747_v2 = vpop.eup %8746  ;;  %v1760_v4 = vadd.f32 1.0, %v8745_v1  ;;  %v11863_v10 = vld [vmem:[#allocation6_spill] sm:$0xff]  ;;  %v11864_v7 = vld [vmem:[#allocation7_spill] sm:$0xff]  ;;  %v11865_v1 = vld [vmem:[#allocation8_spill] sm:$0xff] }
 0x53b   :  { %8748 = vtanh.f32 %v9927_v30  ;;  %v1759_v31 = vadd.f32 1.0, %v8747_v2  ;;  %v11866_v2 = vld [vmem:[#allocation9_spill] sm:$0xff] }
 0x53c   :  { %8750 = vtanh.f32 %v9929_v61  ;;  %v1762_v5 = vmul.f32 0.5, %v1760_v4  ;;  %v11867_v4 = vld [vmem:[#allocation10_spill] sm:$0xff] }
 0x53d   :  { %v1761_v22 = vmul.f32 0.5, %v1759_v31  ;;  %v11868_v31 = vld [vmem:[#allocation11_spill] sm:$0xff] }
 0x545   :  { %v8749_v42 = vpop.eup %8748 }
 0x546   :  { %v8751_v34 = vpop.eup %8750  ;;  %v1771_v13 = vmul.f32 %v8749_v42, %v1761_v22  ;;  %v11869_v42 = vld [vmem:[#allocation12_spill] sm:$0xff]  ;;  %v11872_v22 = vld [vmem:[#allocation15_spill] sm:$0xff] }
 0x547   :  { %v1772_v20 = vmul.f32 %v8751_v34, %v1762_v5  ;;  %v11870_v5 = vld [vmem:[#allocation13_spill] sm:$0xff]  ;;  %v11871_v34 = vld [vmem:[#allocation14_spill] sm:$0xff] }
 0x549   :  { %5716 = vmatprep.mubr.msk.f32.mxu0 %vm379_vm0, %v1772_v20  ;;  %5717 = vmatprep.mubr.msk.f32.mxu1 %vm379_vm0, %v1772_v20 }
 0x54a   :  { %1864 = vmatmul.mubr.f32.vlgmr.msra.gmra.mrb[16].mxu0 %v1771_v13  ;;  %1935 = vmatmul.mubr.f32.vlgmr.msra.gmra.mrb[16].mxu1 %v1771_v13 }
 0x54b   :  { %6637 = vmatpush1.bf16.msra.mxu0 %v11631_v25  ;;  %6685 = vmatpush1.bf16.msra.mxu1 %v11632_v24 }
 0x54c   :  { %5718 = vmatprep.mubr.msk.f32.mxu0 %vm379_vm0, %v1772_v20  ;;  %5719 = vmatprep.mubr.msk.f32.mxu1 %vm379_vm0, %v1772_v20  ;;  %v11873_v20 = vld [vmem:[#allocation16_spill] sm:$0xff] }
 0x54d   :  { %6639 = vmatprep.subr.bf16.mxu0 %v11633_v53  ;;  %6687 = vmatprep.subr.bf16.mxu1 %v11634_v43 }
 0x54f   :  { %6641 = vmatpush1.bf16.msra.mxu0 %v11635_v3  ;;  %6689 = vmatpush1.bf16.msra.mxu1 %v11636_v58 }
 0x550   :  { %6643 = vmatprep.subr.bf16.mxu0 %v11637_v57  ;;  %6691 = vmatprep.subr.bf16.mxu1 %v11638_v47 }
 0x553   :  { %6645 = vmatpush1.bf16.msra.mxu0 %v11639_v14  ;;  %6693 = vmatpush1.bf16.msra.mxu1 %v11640_v35 }
 0x554   :  { %6647 = vmatprep.subr.bf16.mxu0 %v11703_v33  ;;  %6695 = vmatprep.subr.bf16.mxu1 %v11704_v54 }
 0x557   :  { %6649 = vmatpush1.bf16.msra.mxu0 %v11705_v40  ;;  %6697 = vmatpush1.bf16.msra.mxu1 %v11706_v41 }
 0x558   :  { %6651 = vmatprep.subr.bf16.mxu0 %v11707_v32  ;;  %6699 = vmatprep.subr.bf16.mxu1 %v11708_v63 }
 0x55b   :  { %6653 = vmatpush1.bf16.msra.mxu0 %v11709_v38  ;;  %6701 = vmatpush1.bf16.msra.mxu1 %v11710_v37 }
 0x55c   :  { %6655 = vmatprep.subr.bf16.mxu0 %v11711_v23  ;;  %6703 = vmatprep.subr.bf16.mxu1 %v11712_v18 }
 0x55f   :  { %6657 = vmatpush1.bf16.msra.mxu0 %v11713_v17  ;;  %6705 = vmatpush1.bf16.msra.mxu1 %v11714_v28 }
 0x560   :  { %6659 = vmatprep.subr.bf16.mxu0 %v11715_v55  ;;  %6707 = vmatprep.subr.bf16.mxu1 %v11654_v16 }
 0x563   :  { %6661 = vmatpush1.bf16.msra.mxu0 %v11655_v6  ;;  %6709 = vmatpush1.bf16.msra.mxu1 %v11656_v12 }
 0x564   :  { %6663 = vmatprep.subr.bf16.mxu0 %v11657_v46  ;;  %6711 = vmatprep.subr.bf16.mxu1 %v11658_v48 }
 0x567   :  { %6665 = vmatpush1.bf16.msra.mxu0 %v11659_v51  ;;  %6713 = vmatpush1.bf16.msra.mxu1 %v11660_v49 }
 0x568   :  { %6667 = vmatprep.subr.bf16.mxu0 %v11661_v11  ;;  %6715 = vmatprep.subr.bf16.mxu1 %v11662_v56 }
 0x56b   :  { %6669 = vmatpush1.bf16.msra.mxu0 %v11663_v19  ;;  %6717 = vmatpush1.bf16.msra.mxu1 %v11777_v21 }
 0x56c   :  { %6671 = vmatprep.subr.bf16.mxu0 %v11851_v26  ;;  %6719 = vmatprep.subr.bf16.mxu1 %v11852_v8 }
 0x56f   :  { %6673 = vmatpush1.bf16.msra.mxu0 %v11853_v9  ;;  %6721 = vmatpush1.bf16.msra.mxu1 %v11854_v59 }
 0x570   :  { %6675 = vmatprep.subr.bf16.mxu0 %v11855_v29  ;;  %6723 = vmatprep.subr.bf16.mxu1 %v11856_v62 }
 0x573   :  { %6677 = vmatpush1.bf16.msra.mxu0 %v11857_v39  ;;  %6725 = vmatpush1.bf16.msra.mxu1 %v11858_v27 }
 0x574   :  { %6679 = vmatprep.subr.bf16.mxu0 %v11859_v50  ;;  %6727 = vmatprep.subr.bf16.mxu1 %v11860_v44 }
 0x577   :  { %6681 = vmatpush1.bf16.msra.mxu0 %v11861_v60  ;;  %6729 = vmatpush1.bf16.msra.mxu1 %v11862_v52  ;;  %v1778_v52 = vpop.permute.xlu1 %1777 }
 0x578   :  { %6731 = vmatprep.subr.bf16.mxu0 %v11863_v10  ;;  %6779 = vmatprep.subr.bf16.mxu1 %v11864_v7  ;;  %v11874_v7 = vld [vmem:[#allocation17_spill] sm:$0xff] }
 0x57a   :  { %2006 = vmatmul.mubr.f32.vlgmr.msra.gmra.mrb[18].mxu0 %v1771_v13  ;;  %2077 = vmatmul.mubr.f32.vlgmr.msra.gmra.mrb[18].mxu1 %v1771_v13  ;;  %v11875_v13 = vld [vmem:[#allocation18_spill] sm:$0xff] }
 0x57b   :  { %6733 = vmatpush1.bf16.msra.mxu0 %v11865_v1  ;;  %6781 = vmatpush1.bf16.msra.mxu1 %v11866_v2  ;;  %v11876_v1 = vld [vmem:[#allocation19_spill] sm:$0xff]  ;;  %v11877_v2 = vld [vmem:[#allocation20_spill] sm:$0xff] }
 0x57c   :  { %6735 = vmatprep.subr.bf16.mxu0 %v11867_v4  ;;  %6783 = vmatprep.subr.bf16.mxu1 %v11868_v31  ;;  %v11878_v4 = vld [vmem:[#allocation21_spill] sm:$0xff]  ;;  %v11879_v31 = vld [vmem:[#allocation22_spill] sm:$0xff] }
 0x57f   :  { %6737 = vmatpush1.bf16.msra.mxu0 %v11869_v42  ;;  %6785 = vmatpush1.bf16.msra.mxu1 %v11870_v5  ;;  %v11880_v42 = vld [vmem:[#allocation24_spill] sm:$0xff] }
 0x580   :  { %6739 = vmatprep.subr.bf16.mxu0 %v11871_v34  ;;  %6787 = vmatprep.subr.bf16.mxu1 %v11872_v22  ;;  %v11881_v5 = vld [vmem:[#allocation28_spill] sm:$0xff]  ;;  %v11882_v34 = vld [vmem:[#allocation29_spill] sm:$0xff]  ;;  %v11883_v22 = vld [vmem:[#allocation30_spill] sm:$0xff] }
 0x583   :  { %6741 = vmatpush1.bf16.msra.mxu0 %v11873_v20  ;;  %6789 = vmatpush1.bf16.msra.mxu1 %v11874_v7  ;;  %v11884_v20 = vld [vmem:[#allocation31_spill] sm:$0xff]  ;;  %v11885_v7 = vld [vmem:[#allocation32_spill] sm:$0xff] }
 0x584   :  { %6743 = vmatprep.subr.bf16.mxu0 %v11875_v13  ;;  %6791 = vmatprep.subr.bf16.mxu1 %v11876_v1  ;;  %v11886_v13 = vld [vmem:[#allocation33_spill] sm:$0xff]  ;;  %v11887_v1 = vld [vmem:[#allocation34_spill] sm:$0xff] }
 0x587   :  { %6745 = vmatpush1.bf16.msra.mxu0 %v11877_v2  ;;  %6793 = vmatpush1.bf16.msra.mxu1 %v11878_v4  ;;  %v11888_v2 = vld [vmem:[#allocation35_spill] sm:$0xff]  ;;  %v11889_v4 = vld [vmem:[#allocation36_spill] sm:$0xff] }
 0x588   :  { %6747 = vmatprep.subr.bf16.mxu0 %v11879_v31  ;;  %6795 = vmatprep.subr.bf16.mxu1 %v11880_v42  ;;  %v11890_v31 = vld [vmem:[#allocation37_spill] sm:$0xff]  ;;  %v11891_v42 = vld [vmem:[#allocation38_spill] sm:$0xff] }
 0x58b   :  { %6749 = vmatpush1.bf16.msra.mxu0 %v11881_v5  ;;  %6797 = vmatpush1.bf16.msra.mxu1 %v11882_v34  ;;  %v11892_v5 = vld [vmem:[#allocation39_spill] sm:$0xff]  ;;  %v11893_v34 = vld [vmem:[#allocation40_spill] sm:$0xff] }
 0x58c   :  { %6751 = vmatprep.subr.bf16.mxu0 %v11883_v22  ;;  %6799 = vmatprep.subr.bf16.mxu1 %v11884_v20  ;;  %v11894_v22 = vld [vmem:[#allocation41_spill] sm:$0xff]  ;;  %v11895_v20 = vld [vmem:[#allocation42_spill] sm:$0xff] }
 0x58f   :  { %6753 = vmatpush1.bf16.msra.mxu0 %v11885_v7  ;;  %6801 = vmatpush1.bf16.msra.mxu1 %v11886_v13  ;;  %v11896_v7 = vld [vmem:[#allocation43_spill] sm:$0xff]  ;;  %v11897_v13 = vld [vmem:[#allocation44_spill] sm:$0xff] }
 0x590   :  { %6755 = vmatprep.subr.bf16.mxu0 %v11887_v1  ;;  %6803 = vmatprep.subr.bf16.mxu1 %v11888_v2  ;;  %v11898_v1 = vld [vmem:[#allocation45_spill] sm:$0xff]  ;;  %v11899_v2 = vld [vmem:[#allocation46_spill] sm:$0xff] }
 0x593   :  { %6757 = vmatpush1.bf16.msra.mxu0 %v11889_v4  ;;  %6805 = vmatpush1.bf16.msra.mxu1 %v11890_v31  ;;  %v11900_v4 = vld [vmem:[#allocation47_spill] sm:$0xff]  ;;  %v11901_v31 = vld [vmem:[#allocation48_spill] sm:$0xff] }
 0x594   :  { %6759 = vmatprep.subr.bf16.mxu0 %v11891_v42  ;;  %6807 = vmatprep.subr.bf16.mxu1 %v11892_v5  ;;  %v11902_v42 = vld [vmem:[#allocation49_spill] sm:$0xff]  ;;  %v11903_v5 = vld [vmem:[#allocation50_spill] sm:$0xff] }
 0x597   :  { %6761 = vmatpush1.bf16.msra.mxu0 %v11893_v34  ;;  %6809 = vmatpush1.bf16.msra.mxu1 %v11894_v22  ;;  %v11904_v34 = vld [vmem:[#allocation51_spill] sm:$0xff]  ;;  %v11905_v22 = vld [vmem:[#allocation52_spill] sm:$0xff] }
 0x598   :  { %6763 = vmatprep.subr.bf16.mxu0 %v11895_v20  ;;  %6811 = vmatprep.subr.bf16.mxu1 %v11896_v7  ;;  %v11906_v20 = vld [vmem:[#allocation53_spill] sm:$0xff]  ;;  %v11907_v7 = vld [vmem:[#allocation54_spill] sm:$0xff] }
 0x59b   :  { %6765 = vmatpush1.bf16.msra.mxu0 %v11897_v13  ;;  %6813 = vmatpush1.bf16.msra.mxu1 %v11898_v1  ;;  %v11908_v13 = vld [vmem:[#allocation55_spill] sm:$0xff]  ;;  %v11909_v1 = vld [vmem:[#allocation56_spill] sm:$0xff] }
 0x59c   :  { %6767 = vmatprep.subr.bf16.mxu0 %v11899_v2  ;;  %6815 = vmatprep.subr.bf16.mxu1 %v11900_v4  ;;  %v11910_v2 = vld [vmem:[#allocation57_spill] sm:$0xff]  ;;  %v11911_v4 = vld [vmem:[#allocation58_spill] sm:$0xff] }
 0x59f   :  { %6769 = vmatpush1.bf16.msra.mxu0 %v11901_v31  ;;  %6817 = vmatpush1.bf16.msra.mxu1 %v11902_v42  ;;  %v11912_v31 = vld [vmem:[#allocation59_spill] sm:$0xff] }
 0x5a0   :  { %6771 = vmatprep.subr.bf16.mxu0 %v11903_v5  ;;  %6819 = vmatprep.subr.bf16.mxu1 %v11904_v34 }
 0x5a3   :  { %6773 = vmatpush1.bf16.msra.mxu0 %v11905_v22  ;;  %6821 = vmatpush1.bf16.msra.mxu1 %v11906_v20  ;;  %v11913_v22 = vld [vmem:[#allocation23_spill] sm:$0xff]  ;;  %v11914_v20 = vld [vmem:[#allocation26_spill] sm:$0xff] }
 0x5a4   :  { %6775 = vmatprep.subr.bf16.mxu0 %v11907_v7  ;;  %6823 = vmatprep.subr.bf16.mxu1 %v11908_v13  ;;  %v1782_v60 = vmul.f32 %v1778_v52, %v11913_v22  ;;  %v1783_v44 = vmul.f32 %v1778_v52, %v11914_v20  ;;  %v11915_v7 = vld [vmem:[#allocation62_spill] sm:$0xff]  ;;  %v11916_v13 = vld [vmem:[#allocation63_spill] sm:$0xff] }
 0x5a5   :  { %v1780_v50 = vmul.f32 %v1778_v52, %v11915_v7  ;;  %v1781_v27 = vmul.f32 %v1778_v52, %v11916_v13  ;;  %v11918_v13 = vld [vmem:[#allocation64_spill] sm:$0xff] }
 0x5a6   :  { %v1784_v7 = vmul.f32 %v1778_v52, %v11918_v13 }
 0x5a7   :  { %6777 = vmatpush1.bf16.msra.mxu0 %v11909_v1  ;;  %6825 = vmatpush1.bf16.msra.mxu1 %v11910_v2  ;;  %v1790_v1 = vadd.f32 %v1782_v60, %v11618_v36  ;;  %v11917_v2 = vld [vmem:[#allocation27_spill] sm:$0xff]  ;;  %v1789_v62 = vadd.f32 %v1781_v27, %v11695_v0  ;;  %v11922_v27 = vld [vmem:[#allocation70_spill] sm:$0xff] }
 0x5a8   :  { %6827 = vmatprep.subr.bf16.mxu0 %v11911_v4  ;;  %6875 = vmatprep.subr.bf16.mxu1 %v11912_v31  ;;  %v1791_v39 = vadd.f32 %v1783_v44, %v11917_v2  ;;  %v1788_v4 = vadd.f32 %v1780_v50, %v11770_v45  ;;  %v11919_v60 = vld [vmem:[#allocation67_spill] sm:$0xff]  ;;  %v11920_v2 = vld [vmem:[#allocation69_spill] sm:$0xff] }
 0x5a9   :  { %v1785_v44 = vmul.f32 %v1778_v52, %v11919_v60  ;;  %v1787_v50 = vmul.f32 %v1778_v52, %v11920_v2 }
 0x61d   :  { %v1865_v42 = vpop.f32.mrb[16].mxu0  ;;  %v1936_v5 = vpop.f32.mrb[16].mxu1 }
 0x61e   :  { %v1867_v10 = vpop.f32.mrb[17].mxu0  ;;  %v1938_v34 = vpop.f32.mrb[17].mxu1  ;;  %v2085_v31 = vadd.f32 %v1936_v5, %v1790_v1  ;;  %v2083_v59 = vadd.f32 %v1865_v42, %v1788_v4  ;;  %v11921_v1 = vld [vmem:[#allocation68_spill] sm:$0xff] }
 0x61f   :  { %v2086_v29 = vadd.f32 %v1938_v34, %v1791_v39  ;;  %v2084_v9 = vadd.f32 %v1867_v10, %v1789_v62  ;;  %v1786_v5 = vmul.f32 %v1778_v52, %v11921_v1  ;;  %v1792_v39 = vadd.f32 %v1784_v7, %v11922_v27  ;;  %v11923_v10 = vld [vmem:[#allocation71_spill] sm:$0xff] }
 0x620   :  { %v2099_v8 = vmul.f32 0.5, %v2085_v31  ;;  %v2091_v26 = vmul.f32 0.5, %v2083_v59 }
 0x621   :  { %v2100_v22 = vmul.f32 0.5, %v2086_v29  ;;  %v2092_v20 = vmul.f32 0.5, %v2084_v9  ;;  %v1793_v29 = vadd.f32 %v1785_v44, %v11923_v10  ;;  %v1794_v42 = vadd.f32 %v1786_v5, %v11628_v15 }
 0x622   :  { %8752 = vtanh.f32 %v2099_v8  ;;  %v11924_v8 = vld [vmem:[#allocation73_spill] sm:$0xff] }
 0x623   :  { %8754 = vtanh.f32 %v2100_v22  ;;  %v1795_v31 = vadd.f32 %v1787_v50, %v11924_v8 }
 0x624   :  { %8756 = vtanh.f32 %v2091_v26 }
 0x625   :  { %8758 = vtanh.f32 %v2092_v20 }
 0x62c   :  { %v8753_v22 = vpop.eup %8752 }
 0x62d   :  { %v8755_v2 = vpop.eup %8754  ;;  %v2103_v27 = vadd.f32 1.0, %v8753_v22 }
 0x62e   :  { %v8757_v52 = vpop.eup %8756  ;;  %v2104_v1 = vadd.f32 1.0, %v8755_v2 }
 0x62f   :  { %v8759_v7 = vpop.eup %8758  ;;  %v2095_v44 = vadd.f32 1.0, %v8757_v52  ;;  %v2105_v10 = vmul.f32 0.5, %v2103_v27  ;;  %v11926_v52 = vld [vmem:[#allocation111_spill] sm:$0xff] }
 0x630   :  { %v2106_v50 = vmul.f32 0.5, %v2104_v1 }
 0x631   :  { %v2097_v8 = vmul.f32 0.5, %v2095_v44  ;;  %v11928_v44 = vld [vmem:[#allocation113_spill] sm:$0xff] }
 0x64d   :  { %v2007_v4 = vpop.f32.mrb[18].mxu0  ;;  %v2078_v62 = vpop.f32.mrb[18].mxu1 }
 0x64e   :  { %v2087_v59 = vadd.f32 %v2007_v4, %v1792_v39  ;;  %v2009_v9 = vpop.f32.mrb[19].mxu0  ;;  %v2080_v26 = vpop.f32.mrb[19].mxu1  ;;  %v2089_v60 = vadd.f32 %v2078_v62, %v1794_v42  ;;  %v2096_v4 = vadd.f32 1.0, %v8759_v7  ;;  %v11927_v7 = vld [vmem:[#allocation112_spill] sm:$0xff] }
 0x64f   :  { %v2088_v34 = vadd.f32 %v2009_v9, %v1793_v29  ;;  %v2090_v20 = vadd.f32 %v2080_v26, %v1795_v31  ;;  %v2117_v9 = vmul.f32 %v2105_v10, %v9927_v30  ;;  %v2118_v31 = vmul.f32 %v2106_v50, %v9929_v61  ;;  %v11925_v61 = vld [vmem:[#allocation110_spill] sm:$0xff]  ;;  %v11931_v50 = vld [vmem:[#allocation116_spill] sm:$0xff] }
 0x650   :  { %8760 = vtanh.f32 %v2087_v59  ;;  %v2109_v39 = vmul.f32 0.5, %v2089_v60  ;;  %v2098_v29 = vmul.f32 0.5, %v2096_v4  ;;  %v11930_v4 = vld [vmem:[#allocation115_spill] sm:$0xff] }
 0x651   :  { %8762 = vtanh.f32 %v2088_v34  ;;  %v2110_v13 = vmul.f32 0.5, %v2090_v20 }
 0x653   :  { %8764 = vtanh.f32 %v2110_v13 }
 0x654   :  { %8766 = vtanh.f32 %v2109_v39  ;;  %v11929_v39 = vld [vmem:[#allocation114_spill] sm:$0xff] }
 0x65a   :  { %v8761_v5 = vpop.eup %8760 }
 0x65b   :  { %v8763_v59 = vpop.eup %8762  ;;  %v2119_v62 = vmul.f32 %v8761_v5, %v2097_v8  ;;  %v11932_v5 = vld [vmem:[#allocation117_spill] sm:$0xff] }
 0x65c   :  { %v2120_v26 = vmul.f32 %v8763_v59, %v2098_v29  ;;  %v11933_v29 = vld [vmem:[#allocation118_spill] sm:$0xff]  ;;  %v11934_v59 = vld [vmem:[#allocation119_spill] sm:$0xff] }
 0x65d   :  { %v10051_v42 = vadd.f32 %v2119_v62, %v2117_v9  ;;  %v8765_v13 = vpop.eup %8764  ;;  %v11935_v9 = vld [vmem:[#allocation120_spill] sm:$0xff]  ;;  %v11936_v62 = vld [vmem:[#allocation121_spill] sm:$0xff] }
 0x65e   :  { %v10053_v2 = vadd.f32 %v2120_v26, %v2118_v31  ;;  %v8767_v60 = vpop.eup %8766  ;;  %v2114_v1 = vadd.f32 1.0, %v8765_v13  ;;  %v11937_v31 = vld [vmem:[#allocation6_spill] sm:$0xff]  ;;  %v11938_v26 = vld [vmem:[#allocation7_spill] sm:$0xff]  ;;  %v11939_v13 = vld [vmem:[#allocation8_spill] sm:$0xff] }
 0x65f   :  { %8768 = vtanh.f32 %v10051_v42  ;;  %v2113_v27 = vadd.f32 1.0, %v8767_v60  ;;  %v11940_v60 = vld [vmem:[#allocation9_spill] sm:$0xff] }
 0x660   :  { %8770 = vtanh.f32 %v10053_v2  ;;  %v2116_v22 = vmul.f32 0.5, %v2114_v1  ;;  %v11941_v1 = vld [vmem:[#allocation10_spill] sm:$0xff] }
 0x661   :  { %v2115_v30 = vmul.f32 0.5, %v2113_v27  ;;  %v11942_v27 = vld [vmem:[#allocation11_spill] sm:$0xff] }
 0x669   :  { %v8769_v34 = vpop.eup %8768 }
 0x66a   :  { %v8771_v20 = vpop.eup %8770  ;;  %v2125_v8 = vmul.f32 %v8769_v34, %v2115_v30  ;;  %v11943_v34 = vld [vmem:[#allocation12_spill] sm:$0xff]  ;;  %v11946_v30 = vld [vmem:[#allocation15_spill] sm:$0xff] }
 0x66b   :  { %v2126_v10 = vmul.f32 %v8771_v20, %v2116_v22  ;;  %v11944_v22 = vld [vmem:[#allocation13_spill] sm:$0xff]  ;;  %v11945_v20 = vld [vmem:[#allocation14_spill] sm:$0xff] }
 0x66d   :  { %5721 = vmatprep.mubr.msk.f32.mxu0 %vm379_vm0, %v2126_v10  ;;  %5722 = vmatprep.mubr.msk.f32.mxu1 %vm379_vm0, %v2126_v10 }
 0x66e   :  { %2218 = vmatmul.mubr.f32.vlgmr.msra.gmra.mrb[20].mxu0 %v2125_v8  ;;  %2289 = vmatmul.mubr.f32.vlgmr.msra.gmra.mrb[20].mxu1 %v2125_v8 }
 0x66f   :  { %6829 = vmatpush1.bf16.msra.mxu0 %v11631_v25  ;;  %6877 = vmatpush1.bf16.msra.mxu1 %v11632_v24 }
 0x670   :  { %5723 = vmatprep.mubr.msk.f32.mxu0 %vm379_vm0, %v2126_v10  ;;  %5724 = vmatprep.mubr.msk.f32.mxu1 %vm379_vm0, %v2126_v10  ;;  %v11947_v10 = vld [vmem:[#allocation16_spill] sm:$0xff] }
 0x671   :  { %6831 = vmatprep.subr.bf16.mxu0 %v11633_v53  ;;  %6879 = vmatprep.subr.bf16.mxu1 %v11634_v43 }
 0x673   :  { %6833 = vmatpush1.bf16.msra.mxu0 %v11635_v3  ;;  %6881 = vmatpush1.bf16.msra.mxu1 %v11636_v58 }
 0x674   :  { %6835 = vmatprep.subr.bf16.mxu0 %v11637_v57  ;;  %6883 = vmatprep.subr.bf16.mxu1 %v11638_v47 }
 0x677   :  { %6837 = vmatpush1.bf16.msra.mxu0 %v11639_v14  ;;  %6885 = vmatpush1.bf16.msra.mxu1 %v11640_v35 }
 0x678   :  { %6839 = vmatprep.subr.bf16.mxu0 %v11703_v33  ;;  %6887 = vmatprep.subr.bf16.mxu1 %v11704_v54 }
 0x67b   :  { %6841 = vmatpush1.bf16.msra.mxu0 %v11705_v40  ;;  %6889 = vmatpush1.bf16.msra.mxu1 %v11706_v41 }
 0x67c   :  { %6843 = vmatprep.subr.bf16.mxu0 %v11707_v32  ;;  %6891 = vmatprep.subr.bf16.mxu1 %v11708_v63 }
 0x67f   :  { %6845 = vmatpush1.bf16.msra.mxu0 %v11709_v38  ;;  %6893 = vmatpush1.bf16.msra.mxu1 %v11710_v37 }
 0x680   :  { %6847 = vmatprep.subr.bf16.mxu0 %v11711_v23  ;;  %6895 = vmatprep.subr.bf16.mxu1 %v11712_v18 }
 0x683   :  { %6849 = vmatpush1.bf16.msra.mxu0 %v11713_v17  ;;  %6897 = vmatpush1.bf16.msra.mxu1 %v11714_v28 }
 0x684   :  { %6851 = vmatprep.subr.bf16.mxu0 %v11715_v55  ;;  %6899 = vmatprep.subr.bf16.mxu1 %v11654_v16 }
 0x687   :  { %6853 = vmatpush1.bf16.msra.mxu0 %v11655_v6  ;;  %6901 = vmatpush1.bf16.msra.mxu1 %v11656_v12 }
 0x688   :  { %6855 = vmatprep.subr.bf16.mxu0 %v11657_v46  ;;  %6903 = vmatprep.subr.bf16.mxu1 %v11658_v48 }
 0x68b   :  { %6857 = vmatpush1.bf16.msra.mxu0 %v11659_v51  ;;  %6905 = vmatpush1.bf16.msra.mxu1 %v11660_v49 }
 0x68c   :  { %6859 = vmatprep.subr.bf16.mxu0 %v11661_v11  ;;  %6907 = vmatprep.subr.bf16.mxu1 %v11662_v56 }
 0x68f   :  { %6861 = vmatpush1.bf16.msra.mxu0 %v11663_v19  ;;  %6909 = vmatpush1.bf16.msra.mxu1 %v11777_v21 }
 0x690   :  { %6863 = vmatprep.subr.bf16.mxu0 %v11925_v61  ;;  %6911 = vmatprep.subr.bf16.mxu1 %v11926_v52 }
 0x693   :  { %6865 = vmatpush1.bf16.msra.mxu0 %v11927_v7  ;;  %6913 = vmatpush1.bf16.msra.mxu1 %v11928_v44 }
 0x694   :  { %6867 = vmatprep.subr.bf16.mxu0 %v11929_v39  ;;  %6915 = vmatprep.subr.bf16.mxu1 %v11930_v4 }
 0x697   :  { %6869 = vmatpush1.bf16.msra.mxu0 %v11931_v50  ;;  %6917 = vmatpush1.bf16.msra.mxu1 %v11932_v5 }
 0x698   :  { %6871 = vmatprep.subr.bf16.mxu0 %v11933_v29  ;;  %6919 = vmatprep.subr.bf16.mxu1 %v11934_v59 }
 0x69b   :  { %6873 = vmatpush1.bf16.msra.mxu0 %v11935_v9  ;;  %6921 = vmatpush1.bf16.msra.mxu1 %v11936_v62  ;;  %v2132_v62 = vpop.permute.xlu0 %2131 }
 0x69c   :  { %6923 = vmatprep.subr.bf16.mxu0 %v11937_v31  ;;  %6971 = vmatprep.subr.bf16.mxu1 %v11938_v26  ;;  %v11948_v26 = vld [vmem:[#allocation17_spill] sm:$0xff] }
 0x69e   :  { %2360 = vmatmul.mubr.f32.vlgmr.msra.gmra.mrb[22].mxu0 %v2125_v8  ;;  %2431 = vmatmul.mubr.f32.vlgmr.msra.gmra.mrb[22].mxu1 %v2125_v8  ;;  %v11949_v8 = vld [vmem:[#allocation18_spill] sm:$0xff] }
 0x69f   :  { %6925 = vmatpush1.bf16.msra.mxu0 %v11939_v13  ;;  %6973 = vmatpush1.bf16.msra.mxu1 %v11940_v60  ;;  %v11950_v13 = vld [vmem:[#allocation19_spill] sm:$0xff]  ;;  %v11951_v60 = vld [vmem:[#allocation20_spill] sm:$0xff] }
 0x6a0   :  { %6927 = vmatprep.subr.bf16.mxu0 %v11941_v1  ;;  %6975 = vmatprep.subr.bf16.mxu1 %v11942_v27  ;;  %v11952_v1 = vld [vmem:[#allocation21_spill] sm:$0xff]  ;;  %v11953_v27 = vld [vmem:[#allocation22_spill] sm:$0xff] }
 0x6a3   :  { %6929 = vmatpush1.bf16.msra.mxu0 %v11943_v34  ;;  %6977 = vmatpush1.bf16.msra.mxu1 %v11944_v22  ;;  %v11954_v34 = vld [vmem:[#allocation24_spill] sm:$0xff] }
 0x6a4   :  { %6931 = vmatprep.subr.bf16.mxu0 %v11945_v20  ;;  %6979 = vmatprep.subr.bf16.mxu1 %v11946_v30  ;;  %v11955_v22 = vld [vmem:[#allocation28_spill] sm:$0xff]  ;;  %v11956_v20 = vld [vmem:[#allocation29_spill] sm:$0xff]  ;;  %v11957_v30 = vld [vmem:[#allocation30_spill] sm:$0xff] }
 0x6a7   :  { %6933 = vmatpush1.bf16.msra.mxu0 %v11947_v10  ;;  %6981 = vmatpush1.bf16.msra.mxu1 %v11948_v26  ;;  %v11958_v10 = vld [vmem:[#allocation31_spill] sm:$0xff]  ;;  %v11959_v26 = vld [vmem:[#allocation32_spill] sm:$0xff] }
 0x6a8   :  { %6935 = vmatprep.subr.bf16.mxu0 %v11949_v8  ;;  %6983 = vmatprep.subr.bf16.mxu1 %v11950_v13  ;;  %v11960_v8 = vld [vmem:[#allocation33_spill] sm:$0xff]  ;;  %v11961_v13 = vld [vmem:[#allocation34_spill] sm:$0xff] }
 0x6ab   :  { %6937 = vmatpush1.bf16.msra.mxu0 %v11951_v60  ;;  %6985 = vmatpush1.bf16.msra.mxu1 %v11952_v1  ;;  %v11962_v60 = vld [vmem:[#allocation35_spill] sm:$0xff]  ;;  %v11963_v1 = vld [vmem:[#allocation36_spill] sm:$0xff] }
 0x6ac   :  { %6939 = vmatprep.subr.bf16.mxu0 %v11953_v27  ;;  %6987 = vmatprep.subr.bf16.mxu1 %v11954_v34  ;;  %v11964_v27 = vld [vmem:[#allocation37_spill] sm:$0xff]  ;;  %v11965_v34 = vld [vmem:[#allocation38_spill] sm:$0xff] }
 0x6af   :  { %6941 = vmatpush1.bf16.msra.mxu0 %v11955_v22  ;;  %6989 = vmatpush1.bf16.msra.mxu1 %v11956_v20  ;;  %v11966_v22 = vld [vmem:[#allocation39_spill] sm:$0xff]  ;;  %v11967_v20 = vld [vmem:[#allocation40_spill] sm:$0xff] }
 0x6b0   :  { %6943 = vmatprep.subr.bf16.mxu0 %v11957_v30  ;;  %6991 = vmatprep.subr.bf16.mxu1 %v11958_v10  ;;  %v11968_v30 = vld [vmem:[#allocation41_spill] sm:$0xff]  ;;  %v11969_v10 = vld [vmem:[#allocation42_spill] sm:$0xff] }
 0x6b3   :  { %6945 = vmatpush1.bf16.msra.mxu0 %v11959_v26  ;;  %6993 = vmatpush1.bf16.msra.mxu1 %v11960_v8  ;;  %v11970_v26 = vld [vmem:[#allocation43_spill] sm:$0xff]  ;;  %v11971_v8 = vld [vmem:[#allocation44_spill] sm:$0xff] }
 0x6b4   :  { %6947 = vmatprep.subr.bf16.mxu0 %v11961_v13  ;;  %6995 = vmatprep.subr.bf16.mxu1 %v11962_v60  ;;  %v11972_v13 = vld [vmem:[#allocation45_spill] sm:$0xff]  ;;  %v11973_v60 = vld [vmem:[#allocation46_spill] sm:$0xff] }
 0x6b7   :  { %6949 = vmatpush1.bf16.msra.mxu0 %v11963_v1  ;;  %6997 = vmatpush1.bf16.msra.mxu1 %v11964_v27  ;;  %v11974_v1 = vld [vmem:[#allocation47_spill] sm:$0xff]  ;;  %v11975_v27 = vld [vmem:[#allocation48_spill] sm:$0xff] }
 0x6b8   :  { %6951 = vmatprep.subr.bf16.mxu0 %v11965_v34  ;;  %6999 = vmatprep.subr.bf16.mxu1 %v11966_v22  ;;  %v11976_v34 = vld [vmem:[#allocation49_spill] sm:$0xff]  ;;  %v11977_v22 = vld [vmem:[#allocation50_spill] sm:$0xff] }
 0x6bb   :  { %6953 = vmatpush1.bf16.msra.mxu0 %v11967_v20  ;;  %7001 = vmatpush1.bf16.msra.mxu1 %v11968_v30  ;;  %v11978_v20 = vld [vmem:[#allocation51_spill] sm:$0xff]  ;;  %v11979_v30 = vld [vmem:[#allocation52_spill] sm:$0xff] }
 0x6bc   :  { %6955 = vmatprep.subr.bf16.mxu0 %v11969_v10  ;;  %7003 = vmatprep.subr.bf16.mxu1 %v11970_v26  ;;  %v11980_v10 = vld [vmem:[#allocation53_spill] sm:$0xff]  ;;  %v11981_v26 = vld [vmem:[#allocation54_spill] sm:$0xff] }
 0x6bf   :  { %6957 = vmatpush1.bf16.msra.mxu0 %v11971_v8  ;;  %7005 = vmatpush1.bf16.msra.mxu1 %v11972_v13  ;;  %v11982_v8 = vld [vmem:[#allocation55_spill] sm:$0xff]  ;;  %v11983_v13 = vld [vmem:[#allocation56_spill] sm:$0xff] }
 0x6c0   :  { %6959 = vmatprep.subr.bf16.mxu0 %v11973_v60  ;;  %7007 = vmatprep.subr.bf16.mxu1 %v11974_v1  ;;  %v11984_v60 = vld [vmem:[#allocation57_spill] sm:$0xff]  ;;  %v11985_v1 = vld [vmem:[#allocation58_spill] sm:$0xff] }
 0x6c3   :  { %6961 = vmatpush1.bf16.msra.mxu0 %v11975_v27  ;;  %7009 = vmatpush1.bf16.msra.mxu1 %v11976_v34  ;;  %v11986_v27 = vld [vmem:[#allocation59_spill] sm:$0xff] }
 0x6c4   :  { %6963 = vmatprep.subr.bf16.mxu0 %v11977_v22  ;;  %7011 = vmatprep.subr.bf16.mxu1 %v11978_v20 }
 0x6c7   :  { %6965 = vmatpush1.bf16.msra.mxu0 %v11979_v30  ;;  %7013 = vmatpush1.bf16.msra.mxu1 %v11980_v10  ;;  %v11987_v30 = vld [vmem:[#allocation23_spill] sm:$0xff]  ;;  %v11988_v10 = vld [vmem:[#allocation26_spill] sm:$0xff] }
 0x6c8   :  { %6967 = vmatprep.subr.bf16.mxu0 %v11981_v26  ;;  %7015 = vmatprep.subr.bf16.mxu1 %v11982_v8  ;;  %v2136_v9 = vmul.f32 %v2132_v62, %v11987_v30  ;;  %v2137_v59 = vmul.f32 %v2132_v62, %v11988_v10  ;;  %v11989_v26 = vld [vmem:[#allocation62_spill] sm:$0xff]  ;;  %v11990_v8 = vld [vmem:[#allocation63_spill] sm:$0xff] }
 0x6c9   :  { %v2134_v29 = vmul.f32 %v2132_v62, %v11989_v26  ;;  %v2135_v5 = vmul.f32 %v2132_v62, %v11990_v8  ;;  %v11992_v8 = vld [vmem:[#allocation64_spill] sm:$0xff] }
 0x6ca   :  { %v2138_v26 = vmul.f32 %v2132_v62, %v11992_v8 }
 0x6cb   :  { %6969 = vmatpush1.bf16.msra.mxu0 %v11983_v13  ;;  %7017 = vmatpush1.bf16.msra.mxu1 %v11984_v60  ;;  %v2144_v13 = vadd.f32 %v2136_v9, %v11618_v36  ;;  %v11991_v60 = vld [vmem:[#allocation27_spill] sm:$0xff]  ;;  %v2143_v4 = vadd.f32 %v2135_v5, %v11695_v0  ;;  %v11996_v5 = vld [vmem:[#allocation70_spill] sm:$0xff] }
 0x6cc   :  { %7019 = vmatprep.subr.bf16.mxu0 %v11985_v1  ;;  %7067 = vmatprep.subr.bf16.mxu1 %v11986_v27  ;;  %v2145_v50 = vadd.f32 %v2137_v59, %v11991_v60  ;;  %v2142_v1 = vadd.f32 %v2134_v29, %v11770_v45  ;;  %v11993_v9 = vld [vmem:[#allocation67_spill] sm:$0xff]  ;;  %v11994_v60 = vld [vmem:[#allocation69_spill] sm:$0xff] }
 0x6cd   :  { %v2139_v59 = vmul.f32 %v2132_v62, %v11993_v9  ;;  %v2141_v29 = vmul.f32 %v2132_v62, %v11994_v60 }
 0x741   :  { %v2219_v34 = vpop.f32.mrb[20].mxu0  ;;  %v2290_v22 = vpop.f32.mrb[20].mxu1 }
 0x742   :  { %v2221_v31 = vpop.f32.mrb[21].mxu0  ;;  %v2292_v20 = vpop.f32.mrb[21].mxu1  ;;  %v2439_v27 = vadd.f32 %v2290_v22, %v2144_v13  ;;  %v2437_v44 = vadd.f32 %v2219_v34, %v2142_v1  ;;  %v11995_v13 = vld [vmem:[#allocation68_spill] sm:$0xff] }
 0x743   :  { %v2440_v39 = vadd.f32 %v2292_v20, %v2145_v50  ;;  %v2438_v7 = vadd.f32 %v2221_v31, %v2143_v4  ;;  %v2140_v22 = vmul.f32 %v2132_v62, %v11995_v13  ;;  %v2146_v50 = vadd.f32 %v2138_v26, %v11996_v5  ;;  %v11997_v31 = vld [vmem:[#allocation71_spill] sm:$0xff] }
 0x744   :  { %v2453_v52 = vmul.f32 0.5, %v2439_v27  ;;  %v2445_v61 = vmul.f32 0.5, %v2437_v44 }
 0x745   :  { %v2454_v30 = vmul.f32 0.5, %v2440_v39  ;;  %v2446_v10 = vmul.f32 0.5, %v2438_v7  ;;  %v2147_v39 = vadd.f32 %v2139_v59, %v11997_v31  ;;  %v2148_v34 = vadd.f32 %v2140_v22, %v11628_v15 }
 0x746   :  { %8772 = vtanh.f32 %v2453_v52  ;;  %v11998_v52 = vld [vmem:[#allocation73_spill] sm:$0xff] }
 0x747   :  { %8774 = vtanh.f32 %v2454_v30  ;;  %v2149_v27 = vadd.f32 %v2141_v29, %v11998_v52 }
 0x748   :  { %8776 = vtanh.f32 %v2445_v61 }
 0x749   :  { %8778 = vtanh.f32 %v2446_v10 }
 0x750   :  { %v8773_v30 = vpop.eup %8772 }
 0x751   :  { %v8775_v60 = vpop.eup %8774  ;;  %v2457_v5 = vadd.f32 1.0, %v8773_v30 }
 0x752   :  { %v8777_v62 = vpop.eup %8776  ;;  %v2458_v13 = vadd.f32 1.0, %v8775_v60 }
 0x753   :  { %v8779_v26 = vpop.eup %8778  ;;  %v2449_v59 = vadd.f32 1.0, %v8777_v62  ;;  %v2459_v31 = vmul.f32 0.5, %v2457_v5  ;;  %v12000_v62 = vld [vmem:[#allocation111_spill] sm:$0xff] }
 0x754   :  { %v2460_v29 = vmul.f32 0.5, %v2458_v13 }
 0x755   :  { %v2451_v52 = vmul.f32 0.5, %v2449_v59  ;;  %v12002_v59 = vld [vmem:[#allocation113_spill] sm:$0xff] }
 0x771   :  { %v2361_v1 = vpop.f32.mrb[22].mxu0  ;;  %v2432_v4 = vpop.f32.mrb[22].mxu1 }
 0x772   :  { %v2441_v44 = vadd.f32 %v2361_v1, %v2146_v50  ;;  %v2363_v7 = vpop.f32.mrb[23].mxu0  ;;  %v2434_v61 = vpop.f32.mrb[23].mxu1  ;;  %v2443_v9 = vadd.f32 %v2432_v4, %v2148_v34  ;;  %v2450_v1 = vadd.f32 1.0, %v8779_v26  ;;  %v12001_v26 = vld [vmem:[#allocation112_spill] sm:$0xff] }
 0x773   :  { %v2442_v20 = vadd.f32 %v2363_v7, %v2147_v39  ;;  %v2444_v10 = vadd.f32 %v2434_v61, %v2149_v27  ;;  %v2471_v7 = vmul.f32 %v2459_v31, %v10051_v42  ;;  %v2472_v27 = vmul.f32 %v2460_v29, %v10053_v2  ;;  %v11999_v2 = vld [vmem:[#allocation110_spill] sm:$0xff]  ;;  %v12005_v29 = vld [vmem:[#allocation116_spill] sm:$0xff] }
 0x774   :  { %8780 = vtanh.f32 %v2441_v44  ;;  %v2463_v50 = vmul.f32 0.5, %v2443_v9  ;;  %v2452_v39 = vmul.f32 0.5, %v2450_v1  ;;  %v12004_v1 = vld [vmem:[#allocation115_spill] sm:$0xff] }
 0x775   :  { %8782 = vtanh.f32 %v2442_v20  ;;  %v2464_v8 = vmul.f32 0.5, %v2444_v10 }
 0x777   :  { %8784 = vtanh.f32 %v2464_v8 }
 0x778   :  { %8786 = vtanh.f32 %v2463_v50  ;;  %v12003_v50 = vld [vmem:[#allocation114_spill] sm:$0xff] }
 0x77e   :  { %v8781_v22 = vpop.eup %8780 }
 0x77f   :  { %v8783_v44 = vpop.eup %8782  ;;  %v2473_v4 = vmul.f32 %v8781_v22, %v2451_v52  ;;  %v12006_v22 = vld [vmem:[#allocation117_spill] sm:$0xff] }
 0x780   :  { %v2474_v61 = vmul.f32 %v8783_v44, %v2452_v39  ;;  %v12007_v39 = vld [vmem:[#allocation118_spill] sm:$0xff]  ;;  %v12008_v44 = vld [vmem:[#allocation119_spill] sm:$0xff] }
 0x781   :  { %v10175_v34 = vadd.f32 %v2473_v4, %v2471_v7  ;;  %v8785_v8 = vpop.eup %8784  ;;  %v12009_v7 = vld [vmem:[#allocation120_spill] sm:$0xff]  ;;  %v12010_v4 = vld [vmem:[#allocation121_spill] sm:$0xff] }
 0x782   :  { %v10177_v60 = vadd.f32 %v2474_v61, %v2472_v27  ;;  %v8787_v9 = vpop.eup %8786  ;;  %v2468_v13 = vadd.f32 1.0, %v8785_v8  ;;  %v12011_v27 = vld [vmem:[#allocation6_spill] sm:$0xff]  ;;  %v12012_v61 = vld [vmem:[#allocation7_spill] sm:$0xff]  ;;  %v12013_v8 = vld [vmem:[#allocation8_spill] sm:$0xff] }
 0x783   :  { %8788 = vtanh.f32 %v10175_v34  ;;  %v2467_v5 = vadd.f32 1.0, %v8787_v9  ;;  %v12014_v9 = vld [vmem:[#allocation9_spill] sm:$0xff] }
 0x784   :  { %8790 = vtanh.f32 %v10177_v60  ;;  %v2470_v30 = vmul.f32 0.5, %v2468_v13  ;;  %v12015_v13 = vld [vmem:[#allocation10_spill] sm:$0xff] }
 0x785   :  { %v2469_v42 = vmul.f32 0.5, %v2467_v5  ;;  %v12016_v5 = vld [vmem:[#allocation11_spill] sm:$0xff] }
 0x78d   :  { %v8789_v20 = vpop.eup %8788 }
 0x78e   :  { %v8791_v10 = vpop.eup %8790  ;;  %v2479_v52 = vmul.f32 %v8789_v20, %v2469_v42  ;;  %v12017_v20 = vld [vmem:[#allocation12_spill] sm:$0xff]  ;;  %v12020_v42 = vld [vmem:[#allocation15_spill] sm:$0xff] }
 0x78f   :  { %v2480_v31 = vmul.f32 %v8791_v10, %v2470_v30  ;;  %v12018_v30 = vld [vmem:[#allocation13_spill] sm:$0xff]  ;;  %v12019_v10 = vld [vmem:[#allocation14_spill] sm:$0xff] }
 0x791   :  { %5726 = vmatprep.mubr.msk.f32.mxu0 %vm379_vm0, %v2480_v31  ;;  %5727 = vmatprep.mubr.msk.f32.mxu1 %vm379_vm0, %v2480_v31 }
 0x792   :  { %2572 = vmatmul.mubr.f32.vlgmr.msra.gmra.mrb[24].mxu0 %v2479_v52  ;;  %2643 = vmatmul.mubr.f32.vlgmr.msra.gmra.mrb[24].mxu1 %v2479_v52 }
 0x793   :  { %7021 = vmatpush1.bf16.msra.mxu0 %v11631_v25  ;;  %7069 = vmatpush1.bf16.msra.mxu1 %v11632_v24 }
 0x794   :  { %5728 = vmatprep.mubr.msk.f32.mxu0 %vm379_vm0, %v2480_v31  ;;  %5729 = vmatprep.mubr.msk.f32.mxu1 %vm379_vm0, %v2480_v31  ;;  %v12021_v31 = vld [vmem:[#allocation16_spill] sm:$0xff] }
 0x795   :  { %7023 = vmatprep.subr.bf16.mxu0 %v11633_v53  ;;  %7071 = vmatprep.subr.bf16.mxu1 %v11634_v43 }
 0x797   :  { %7025 = vmatpush1.bf16.msra.mxu0 %v11635_v3  ;;  %7073 = vmatpush1.bf16.msra.mxu1 %v11636_v58 }
 0x798   :  { %7027 = vmatprep.subr.bf16.mxu0 %v11637_v57  ;;  %7075 = vmatprep.subr.bf16.mxu1 %v11638_v47 }
 0x79b   :  { %7029 = vmatpush1.bf16.msra.mxu0 %v11639_v14  ;;  %7077 = vmatpush1.bf16.msra.mxu1 %v11640_v35 }
 0x79c   :  { %7031 = vmatprep.subr.bf16.mxu0 %v11703_v33  ;;  %7079 = vmatprep.subr.bf16.mxu1 %v11704_v54 }
 0x79f   :  { %7033 = vmatpush1.bf16.msra.mxu0 %v11705_v40  ;;  %7081 = vmatpush1.bf16.msra.mxu1 %v11706_v41 }
 0x7a0   :  { %7035 = vmatprep.subr.bf16.mxu0 %v11707_v32  ;;  %7083 = vmatprep.subr.bf16.mxu1 %v11708_v63 }
 0x7a3   :  { %7037 = vmatpush1.bf16.msra.mxu0 %v11709_v38  ;;  %7085 = vmatpush1.bf16.msra.mxu1 %v11710_v37 }
 0x7a4   :  { %7039 = vmatprep.subr.bf16.mxu0 %v11711_v23  ;;  %7087 = vmatprep.subr.bf16.mxu1 %v11712_v18 }
 0x7a7   :  { %7041 = vmatpush1.bf16.msra.mxu0 %v11713_v17  ;;  %7089 = vmatpush1.bf16.msra.mxu1 %v11714_v28 }
 0x7a8   :  { %7043 = vmatprep.subr.bf16.mxu0 %v11715_v55  ;;  %7091 = vmatprep.subr.bf16.mxu1 %v11654_v16 }
 0x7ab   :  { %7045 = vmatpush1.bf16.msra.mxu0 %v11655_v6  ;;  %7093 = vmatpush1.bf16.msra.mxu1 %v11656_v12 }
 0x7ac   :  { %7047 = vmatprep.subr.bf16.mxu0 %v11657_v46  ;;  %7095 = vmatprep.subr.bf16.mxu1 %v11658_v48 }
 0x7af   :  { %7049 = vmatpush1.bf16.msra.mxu0 %v11659_v51  ;;  %7097 = vmatpush1.bf16.msra.mxu1 %v11660_v49 }
 0x7b0   :  { %7051 = vmatprep.subr.bf16.mxu0 %v11661_v11  ;;  %7099 = vmatprep.subr.bf16.mxu1 %v11662_v56 }
 0x7b3   :  { %7053 = vmatpush1.bf16.msra.mxu0 %v11663_v19  ;;  %7101 = vmatpush1.bf16.msra.mxu1 %v11777_v21 }
 0x7b4   :  { %7055 = vmatprep.subr.bf16.mxu0 %v11999_v2  ;;  %7103 = vmatprep.subr.bf16.mxu1 %v12000_v62 }
 0x7b7   :  { %7057 = vmatpush1.bf16.msra.mxu0 %v12001_v26  ;;  %7105 = vmatpush1.bf16.msra.mxu1 %v12002_v59 }
 0x7b8   :  { %7059 = vmatprep.subr.bf16.mxu0 %v12003_v50  ;;  %7107 = vmatprep.subr.bf16.mxu1 %v12004_v1 }
 0x7bb   :  { %7061 = vmatpush1.bf16.msra.mxu0 %v12005_v29  ;;  %7109 = vmatpush1.bf16.msra.mxu1 %v12006_v22 }
 0x7bc   :  { %7063 = vmatprep.subr.bf16.mxu0 %v12007_v39  ;;  %7111 = vmatprep.subr.bf16.mxu1 %v12008_v44 }
 0x7bf   :  { %7065 = vmatpush1.bf16.msra.mxu0 %v12009_v7  ;;  %7113 = vmatpush1.bf16.msra.mxu1 %v12010_v4  ;;  %v2486_v4 = vpop.permute.xlu1 %2485 }
 0x7c0   :  { %7115 = vmatprep.subr.bf16.mxu0 %v12011_v27  ;;  %7163 = vmatprep.subr.bf16.mxu1 %v12012_v61  ;;  %v12022_v61 = vld [vmem:[#allocation17_spill] sm:$0xff] }
 0x7c2   :  { %2714 = vmatmul.mubr.f32.vlgmr.msra.gmra.mrb[26].mxu0 %v2479_v52  ;;  %2785 = vmatmul.mubr.f32.vlgmr.msra.gmra.mrb[26].mxu1 %v2479_v52  ;;  %v12023_v52 = vld [vmem:[#allocation18_spill] sm:$0xff] }
 0x7c3   :  { %7117 = vmatpush1.bf16.msra.mxu0 %v12013_v8  ;;  %7165 = vmatpush1.bf16.msra.mxu1 %v12014_v9  ;;  %v12024_v8 = vld [vmem:[#allocation19_spill] sm:$0xff]  ;;  %v12025_v9 = vld [vmem:[#allocation20_spill] sm:$0xff] }
 0x7c4   :  { %7119 = vmatprep.subr.bf16.mxu0 %v12015_v13  ;;  %7167 = vmatprep.subr.bf16.mxu1 %v12016_v5  ;;  %v12026_v13 = vld [vmem:[#allocation21_spill] sm:$0xff]  ;;  %v12027_v5 = vld [vmem:[#allocation22_spill] sm:$0xff] }
 0x7c7   :  { %7121 = vmatpush1.bf16.msra.mxu0 %v12017_v20  ;;  %7169 = vmatpush1.bf16.msra.mxu1 %v12018_v30  ;;  %v12028_v20 = vld [vmem:[#allocation24_spill] sm:$0xff] }
 0x7c8   :  { %7123 = vmatprep.subr.bf16.mxu0 %v12019_v10  ;;  %7171 = vmatprep.subr.bf16.mxu1 %v12020_v42  ;;  %v12029_v30 = vld [vmem:[#allocation28_spill] sm:$0xff]  ;;  %v12030_v10 = vld [vmem:[#allocation29_spill] sm:$0xff]  ;;  %v12031_v42 = vld [vmem:[#allocation30_spill] sm:$0xff] }
 0x7cb   :  { %7125 = vmatpush1.bf16.msra.mxu0 %v12021_v31  ;;  %7173 = vmatpush1.bf16.msra.mxu1 %v12022_v61  ;;  %v12032_v31 = vld [vmem:[#allocation31_spill] sm:$0xff]  ;;  %v12033_v61 = vld [vmem:[#allocation32_spill] sm:$0xff] }
 0x7cc   :  { %7127 = vmatprep.subr.bf16.mxu0 %v12023_v52  ;;  %7175 = vmatprep.subr.bf16.mxu1 %v12024_v8  ;;  %v12034_v52 = vld [vmem:[#allocation33_spill] sm:$0xff]  ;;  %v12035_v8 = vld [vmem:[#allocation34_spill] sm:$0xff] }
 0x7cf   :  { %7129 = vmatpush1.bf16.msra.mxu0 %v12025_v9  ;;  %7177 = vmatpush1.bf16.msra.mxu1 %v12026_v13  ;;  %v12036_v9 = vld [vmem:[#allocation35_spill] sm:$0xff]  ;;  %v12037_v13 = vld [vmem:[#allocation36_spill] sm:$0xff] }
 0x7d0   :  { %7131 = vmatprep.subr.bf16.mxu0 %v12027_v5  ;;  %7179 = vmatprep.subr.bf16.mxu1 %v12028_v20  ;;  %v12038_v5 = vld [vmem:[#allocation37_spill] sm:$0xff]  ;;  %v12039_v20 = vld [vmem:[#allocation38_spill] sm:$0xff] }
 0x7d3   :  { %7133 = vmatpush1.bf16.msra.mxu0 %v12029_v30  ;;  %7181 = vmatpush1.bf16.msra.mxu1 %v12030_v10  ;;  %v12040_v30 = vld [vmem:[#allocation39_spill] sm:$0xff]  ;;  %v12041_v10 = vld [vmem:[#allocation40_spill] sm:$0xff] }
 0x7d4   :  { %7135 = vmatprep.subr.bf16.mxu0 %v12031_v42  ;;  %7183 = vmatprep.subr.bf16.mxu1 %v12032_v31  ;;  %v12042_v42 = vld [vmem:[#allocation41_spill] sm:$0xff]  ;;  %v12043_v31 = vld [vmem:[#allocation42_spill] sm:$0xff] }
 0x7d7   :  { %7137 = vmatpush1.bf16.msra.mxu0 %v12033_v61  ;;  %7185 = vmatpush1.bf16.msra.mxu1 %v12034_v52  ;;  %v12044_v61 = vld [vmem:[#allocation43_spill] sm:$0xff]  ;;  %v12045_v52 = vld [vmem:[#allocation44_spill] sm:$0xff] }
 0x7d8   :  { %7139 = vmatprep.subr.bf16.mxu0 %v12035_v8  ;;  %7187 = vmatprep.subr.bf16.mxu1 %v12036_v9  ;;  %v12046_v8 = vld [vmem:[#allocation45_spill] sm:$0xff]  ;;  %v12047_v9 = vld [vmem:[#allocation46_spill] sm:$0xff] }
 0x7db   :  { %7141 = vmatpush1.bf16.msra.mxu0 %v12037_v13  ;;  %7189 = vmatpush1.bf16.msra.mxu1 %v12038_v5  ;;  %v12048_v13 = vld [vmem:[#allocation47_spill] sm:$0xff]  ;;  %v12049_v5 = vld [vmem:[#allocation48_spill] sm:$0xff] }
 0x7dc   :  { %7143 = vmatprep.subr.bf16.mxu0 %v12039_v20  ;;  %7191 = vmatprep.subr.bf16.mxu1 %v12040_v30  ;;  %v12050_v20 = vld [vmem:[#allocation49_spill] sm:$0xff]  ;;  %v12051_v30 = vld [vmem:[#allocation50_spill] sm:$0xff] }
 0x7df   :  { %7145 = vmatpush1.bf16.msra.mxu0 %v12041_v10  ;;  %7193 = vmatpush1.bf16.msra.mxu1 %v12042_v42  ;;  %v12052_v10 = vld [vmem:[#allocation51_spill] sm:$0xff]  ;;  %v12053_v42 = vld [vmem:[#allocation52_spill] sm:$0xff] }
 0x7e0   :  { %7147 = vmatprep.subr.bf16.mxu0 %v12043_v31  ;;  %7195 = vmatprep.subr.bf16.mxu1 %v12044_v61  ;;  %v12054_v31 = vld [vmem:[#allocation53_spill] sm:$0xff]  ;;  %v12055_v61 = vld [vmem:[#allocation54_spill] sm:$0xff] }
 0x7e3   :  { %7149 = vmatpush1.bf16.msra.mxu0 %v12045_v52  ;;  %7197 = vmatpush1.bf16.msra.mxu1 %v12046_v8  ;;  %v12056_v52 = vld [vmem:[#allocation55_spill] sm:$0xff]  ;;  %v12057_v8 = vld [vmem:[#allocation56_spill] sm:$0xff] }
 0x7e4   :  { %7151 = vmatprep.subr.bf16.mxu0 %v12047_v9  ;;  %7199 = vmatprep.subr.bf16.mxu1 %v12048_v13  ;;  %v12058_v9 = vld [vmem:[#allocation57_spill] sm:$0xff]  ;;  %v12059_v13 = vld [vmem:[#allocation58_spill] sm:$0xff] }
 0x7e7   :  { %7153 = vmatpush1.bf16.msra.mxu0 %v12049_v5  ;;  %7201 = vmatpush1.bf16.msra.mxu1 %v12050_v20  ;;  %v12060_v5 = vld [vmem:[#allocation59_spill] sm:$0xff] }
 0x7e8   :  { %7155 = vmatprep.subr.bf16.mxu0 %v12051_v30  ;;  %7203 = vmatprep.subr.bf16.mxu1 %v12052_v10 }
 0x7eb   :  { %7157 = vmatpush1.bf16.msra.mxu0 %v12053_v42  ;;  %7205 = vmatpush1.bf16.msra.mxu1 %v12054_v31  ;;  %v12061_v42 = vld [vmem:[#allocation23_spill] sm:$0xff]  ;;  %v12062_v31 = vld [vmem:[#allocation26_spill] sm:$0xff] }
 0x7ec   :  { %7159 = vmatprep.subr.bf16.mxu0 %v12055_v61  ;;  %7207 = vmatprep.subr.bf16.mxu1 %v12056_v52  ;;  %v2490_v7 = vmul.f32 %v2486_v4, %v12061_v42  ;;  %v2491_v44 = vmul.f32 %v2486_v4, %v12062_v31  ;;  %v12063_v61 = vld [vmem:[#allocation62_spill] sm:$0xff]  ;;  %v12064_v52 = vld [vmem:[#allocation63_spill] sm:$0xff] }
 0x7ed   :  { %v2488_v39 = vmul.f32 %v2486_v4, %v12063_v61  ;;  %v2489_v22 = vmul.f32 %v2486_v4, %v12064_v52  ;;  %v12066_v52 = vld [vmem:[#allocation64_spill] sm:$0xff] }
 0x7ee   :  { %v2492_v61 = vmul.f32 %v2486_v4, %v12066_v52 }
 0x7ef   :  { %7161 = vmatpush1.bf16.msra.mxu0 %v12057_v8  ;;  %7209 = vmatpush1.bf16.msra.mxu1 %v12058_v9  ;;  %v2498_v8 = vadd.f32 %v2490_v7, %v11618_v36  ;;  %v12065_v9 = vld [vmem:[#allocation27_spill] sm:$0xff]  ;;  %v2497_v1 = vadd.f32 %v2489_v22, %v11695_v0  ;;  %v12070_v22 = vld [vmem:[#allocation70_spill] sm:$0xff] }
 0x7f0   :  { %7211 = vmatprep.subr.bf16.mxu0 %v12059_v13  ;;  %7259 = vmatprep.subr.bf16.mxu1 %v12060_v5  ;;  %v2499_v29 = vadd.f32 %v2491_v44, %v12065_v9  ;;  %v2496_v13 = vadd.f32 %v2488_v39, %v11770_v45  ;;  %v12067_v7 = vld [vmem:[#allocation67_spill] sm:$0xff]  ;;  %v12068_v9 = vld [vmem:[#allocation69_spill] sm:$0xff] }
 0x7f1   :  { %v2493_v44 = vmul.f32 %v2486_v4, %v12067_v7  ;;  %v2495_v39 = vmul.f32 %v2486_v4, %v12068_v9 }
 0x865   :  { %v2573_v20 = vpop.f32.mrb[24].mxu0  ;;  %v2644_v30 = vpop.f32.mrb[24].mxu1 }
 0x866   :  { %v2575_v27 = vpop.f32.mrb[25].mxu0  ;;  %v2646_v10 = vpop.f32.mrb[25].mxu1  ;;  %v2793_v5 = vadd.f32 %v2644_v30, %v2498_v8  ;;  %v2791_v59 = vadd.f32 %v2573_v20, %v2496_v13  ;;  %v12069_v8 = vld [vmem:[#allocation68_spill] sm:$0xff] }
 0x867   :  { %v2794_v50 = vadd.f32 %v2646_v10, %v2499_v29  ;;  %v2792_v26 = vadd.f32 %v2575_v27, %v2497_v1  ;;  %v2494_v30 = vmul.f32 %v2486_v4, %v12069_v8  ;;  %v2500_v29 = vadd.f32 %v2492_v61, %v12070_v22  ;;  %v12071_v27 = vld [vmem:[#allocation71_spill] sm:$0xff] }
 0x868   :  { %v2807_v62 = vmul.f32 0.5, %v2793_v5  ;;  %v2799_v2 = vmul.f32 0.5, %v2791_v59 }
 0x869   :  { %v2808_v42 = vmul.f32 0.5, %v2794_v50  ;;  %v2800_v31 = vmul.f32 0.5, %v2792_v26  ;;  %v2501_v50 = vadd.f32 %v2493_v44, %v12071_v27  ;;  %v2502_v20 = vadd.f32 %v2494_v30, %v11628_v15 }
 0x86a   :  { %8792 = vtanh.f32 %v2807_v62  ;;  %v12072_v62 = vld [vmem:[#allocation73_spill] sm:$0xff] }
 0x86b   :  { %8794 = vtanh.f32 %v2808_v42  ;;  %v2503_v5 = vadd.f32 %v2495_v39, %v12072_v62 }
 0x86c   :  { %8796 = vtanh.f32 %v2799_v2 }
 0x86d   :  { %8798 = vtanh.f32 %v2800_v31 }
 0x874   :  { %v8793_v42 = vpop.eup %8792 }
 0x875   :  { %v8795_v9 = vpop.eup %8794  ;;  %v2811_v22 = vadd.f32 1.0, %v8793_v42 }
 0x876   :  { %v8797_v4 = vpop.eup %8796  ;;  %v2812_v8 = vadd.f32 1.0, %v8795_v9 }
 0x877   :  { %v8799_v61 = vpop.eup %8798  ;;  %v2803_v44 = vadd.f32 1.0, %v8797_v4  ;;  %v2813_v27 = vmul.f32 0.5, %v2811_v22  ;;  %v12074_v4 = vld [vmem:[#allocation111_spill] sm:$0xff] }
 0x878   :  { %v2814_v39 = vmul.f32 0.5, %v2812_v8 }
 0x879   :  { %v2805_v62 = vmul.f32 0.5, %v2803_v44  ;;  %v12076_v44 = vld [vmem:[#allocation113_spill] sm:$0xff] }
 0x895   :  { %v2715_v13 = vpop.f32.mrb[26].mxu0  ;;  %v2786_v1 = vpop.f32.mrb[26].mxu1 }
 0x896   :  { %v2795_v59 = vadd.f32 %v2715_v13, %v2500_v29  ;;  %v2717_v26 = vpop.f32.mrb[27].mxu0  ;;  %v2788_v2 = vpop.f32.mrb[27].mxu1  ;;  %v2797_v7 = vadd.f32 %v2786_v1, %v2502_v20  ;;  %v2804_v13 = vadd.f32 1.0, %v8799_v61  ;;  %v12075_v61 = vld [vmem:[#allocation112_spill] sm:$0xff] }
 0x897   :  { %v2796_v10 = vadd.f32 %v2717_v26, %v2501_v50  ;;  %v2798_v31 = vadd.f32 %v2788_v2, %v2503_v5  ;;  %v2825_v26 = vmul.f32 %v2813_v27, %v10175_v34  ;;  %v2826_v5 = vmul.f32 %v2814_v39, %v10177_v60  ;;  %v12073_v60 = vld [vmem:[#allocation110_spill] sm:$0xff]  ;;  %v12079_v39 = vld [vmem:[#allocation116_spill] sm:$0xff] }
 0x898   :  { %8800 = vtanh.f32 %v2795_v59  ;;  %v2817_v29 = vmul.f32 0.5, %v2797_v7  ;;  %v2806_v50 = vmul.f32 0.5, %v2804_v13  ;;  %v12078_v13 = vld [vmem:[#allocation115_spill] sm:$0xff] }
 0x899   :  { %8802 = vtanh.f32 %v2796_v10  ;;  %v2818_v52 = vmul.f32 0.5, %v2798_v31 }
 0x89b   :  { %8804 = vtanh.f32 %v2818_v52 }
 0x89c   :  { %8806 = vtanh.f32 %v2817_v29  ;;  %v12077_v29 = vld [vmem:[#allocation114_spill] sm:$0xff] }
 0x8a2   :  { %v8801_v30 = vpop.eup %8800 }
 0x8a3   :  { %v8803_v59 = vpop.eup %8802  ;;  %v2827_v1 = vmul.f32 %v8801_v30, %v2805_v62  ;;  %v12080_v30 = vld [vmem:[#allocation117_spill] sm:$0xff] }
 0x8a4   :  { %v2828_v2 = vmul.f32 %v8803_v59, %v2806_v50  ;;  %v12081_v50 = vld [vmem:[#allocation118_spill] sm:$0xff]  ;;  %v12082_v59 = vld [vmem:[#allocation119_spill] sm:$0xff] }
 0x8a5   :  { %v10299_v20 = vadd.f32 %v2827_v1, %v2825_v26  ;;  %v8805_v52 = vpop.eup %8804  ;;  %v12083_v26 = vld [vmem:[#allocation120_spill] sm:$0xff]  ;;  %v12084_v1 = vld [vmem:[#allocation121_spill] sm:$0xff] }
 0x8a6   :  { %v10301_v9 = vadd.f32 %v2828_v2, %v2826_v5  ;;  %v8807_v7 = vpop.eup %8806  ;;  %v2822_v8 = vadd.f32 1.0, %v8805_v52  ;;  %v12085_v5 = vld [vmem:[#allocation6_spill] sm:$0xff]  ;;  %v12086_v2 = vld [vmem:[#allocation7_spill] sm:$0xff]  ;;  %v12087_v52 = vld [vmem:[#allocation8_spill] sm:$0xff] }
 0x8a7   :  { %8808 = vtanh.f32 %v10299_v20  ;;  %v2821_v22 = vadd.f32 1.0, %v8807_v7  ;;  %v12088_v7 = vld [vmem:[#allocation9_spill] sm:$0xff] }
 0x8a8   :  { %8810 = vtanh.f32 %v10301_v9  ;;  %v2824_v42 = vmul.f32 0.5, %v2822_v8  ;;  %v12089_v8 = vld [vmem:[#allocation10_spill] sm:$0xff] }
 0x8a9   :  { %v2823_v34 = vmul.f32 0.5, %v2821_v22  ;;  %v12090_v22 = vld [vmem:[#allocation11_spill] sm:$0xff] }
 0x8b1   :  { %v8809_v10 = vpop.eup %8808 }
 0x8b2   :  { %v8811_v31 = vpop.eup %8810  ;;  %v2833_v62 = vmul.f32 %v8809_v10, %v2823_v34  ;;  %v12091_v10 = vld [vmem:[#allocation12_spill] sm:$0xff]  ;;  %v12094_v34 = vld [vmem:[#allocation15_spill] sm:$0xff] }
 0x8b3   :  { %v2834_v27 = vmul.f32 %v8811_v31, %v2824_v42  ;;  %v12092_v42 = vld [vmem:[#allocation13_spill] sm:$0xff]  ;;  %v12093_v31 = vld [vmem:[#allocation14_spill] sm:$0xff] }
 0x8b5   :  { %5731 = vmatprep.mubr.msk.f32.mxu0 %vm379_vm0, %v2834_v27  ;;  %5732 = vmatprep.mubr.msk.f32.mxu1 %vm379_vm0, %v2834_v27 }
 0x8b6   :  { %2926 = vmatmul.mubr.f32.vlgmr.msra.gmra.mrb[28].mxu0 %v2833_v62  ;;  %2997 = vmatmul.mubr.f32.vlgmr.msra.gmra.mrb[28].mxu1 %v2833_v62 }
 0x8b7   :  { %7213 = vmatpush1.bf16.msra.mxu0 %v11631_v25  ;;  %7261 = vmatpush1.bf16.msra.mxu1 %v11632_v24 }
 0x8b8   :  { %5733 = vmatprep.mubr.msk.f32.mxu0 %vm379_vm0, %v2834_v27  ;;  %5734 = vmatprep.mubr.msk.f32.mxu1 %vm379_vm0, %v2834_v27  ;;  %v12095_v27 = vld [vmem:[#allocation16_spill] sm:$0xff] }
 0x8b9   :  { %7215 = vmatprep.subr.bf16.mxu0 %v11633_v53  ;;  %7263 = vmatprep.subr.bf16.mxu1 %v11634_v43 }
 0x8bb   :  { %7217 = vmatpush1.bf16.msra.mxu0 %v11635_v3  ;;  %7265 = vmatpush1.bf16.msra.mxu1 %v11636_v58 }
 0x8bc   :  { %7219 = vmatprep.subr.bf16.mxu0 %v11637_v57  ;;  %7267 = vmatprep.subr.bf16.mxu1 %v11638_v47 }
 0x8bf   :  { %7221 = vmatpush1.bf16.msra.mxu0 %v11639_v14  ;;  %7269 = vmatpush1.bf16.msra.mxu1 %v11640_v35 }
 0x8c0   :  { %7223 = vmatprep.subr.bf16.mxu0 %v11703_v33  ;;  %7271 = vmatprep.subr.bf16.mxu1 %v11704_v54 }
 0x8c3   :  { %7225 = vmatpush1.bf16.msra.mxu0 %v11705_v40  ;;  %7273 = vmatpush1.bf16.msra.mxu1 %v11706_v41 }
 0x8c4   :  { %7227 = vmatprep.subr.bf16.mxu0 %v11707_v32  ;;  %7275 = vmatprep.subr.bf16.mxu1 %v11708_v63 }
 0x8c7   :  { %7229 = vmatpush1.bf16.msra.mxu0 %v11709_v38  ;;  %7277 = vmatpush1.bf16.msra.mxu1 %v11710_v37 }
 0x8c8   :  { %7231 = vmatprep.subr.bf16.mxu0 %v11711_v23  ;;  %7279 = vmatprep.subr.bf16.mxu1 %v11712_v18 }
 0x8cb   :  { %7233 = vmatpush1.bf16.msra.mxu0 %v11713_v17  ;;  %7281 = vmatpush1.bf16.msra.mxu1 %v11714_v28 }
 0x8cc   :  { %7235 = vmatprep.subr.bf16.mxu0 %v11715_v55  ;;  %7283 = vmatprep.subr.bf16.mxu1 %v11654_v16 }
 0x8cf   :  { %7237 = vmatpush1.bf16.msra.mxu0 %v11655_v6  ;;  %7285 = vmatpush1.bf16.msra.mxu1 %v11656_v12 }
 0x8d0   :  { %7239 = vmatprep.subr.bf16.mxu0 %v11657_v46  ;;  %7287 = vmatprep.subr.bf16.mxu1 %v11658_v48 }
 0x8d3   :  { %7241 = vmatpush1.bf16.msra.mxu0 %v11659_v51  ;;  %7289 = vmatpush1.bf16.msra.mxu1 %v11660_v49 }
 0x8d4   :  { %7243 = vmatprep.subr.bf16.mxu0 %v11661_v11  ;;  %7291 = vmatprep.subr.bf16.mxu1 %v11662_v56 }
 0x8d7   :  { %7245 = vmatpush1.bf16.msra.mxu0 %v11663_v19  ;;  %7293 = vmatpush1.bf16.msra.mxu1 %v11777_v21 }
 0x8d8   :  { %7247 = vmatprep.subr.bf16.mxu0 %v12073_v60  ;;  %7295 = vmatprep.subr.bf16.mxu1 %v12074_v4 }
 0x8db   :  { %7249 = vmatpush1.bf16.msra.mxu0 %v12075_v61  ;;  %7297 = vmatpush1.bf16.msra.mxu1 %v12076_v44 }
 0x8dc   :  { %7251 = vmatprep.subr.bf16.mxu0 %v12077_v29  ;;  %7299 = vmatprep.subr.bf16.mxu1 %v12078_v13 }
 0x8df   :  { %7253 = vmatpush1.bf16.msra.mxu0 %v12079_v39  ;;  %7301 = vmatpush1.bf16.msra.mxu1 %v12080_v30 }
 0x8e0   :  { %7255 = vmatprep.subr.bf16.mxu0 %v12081_v50  ;;  %7303 = vmatprep.subr.bf16.mxu1 %v12082_v59 }
 0x8e3   :  { %7257 = vmatpush1.bf16.msra.mxu0 %v12083_v26  ;;  %7305 = vmatpush1.bf16.msra.mxu1 %v12084_v1  ;;  %v2840_v1 = vpop.permute.xlu0 %2839 }
 0x8e4   :  { %7307 = vmatprep.subr.bf16.mxu0 %v12085_v5  ;;  %7355 = vmatprep.subr.bf16.mxu1 %v12086_v2  ;;  %v12096_v2 = vld [vmem:[#allocation17_spill] sm:$0xff] }
 0x8e6   :  { %3068 = vmatmul.mubr.f32.vlgmr.msra.gmra.mrb[30].mxu0 %v2833_v62  ;;  %3139 = vmatmul.mubr.f32.vlgmr.msra.gmra.mrb[30].mxu1 %v2833_v62  ;;  %v12097_v62 = vld [vmem:[#allocation18_spill] sm:$0xff] }
 0x8e7   :  { %7309 = vmatpush1.bf16.msra.mxu0 %v12087_v52  ;;  %7357 = vmatpush1.bf16.msra.mxu1 %v12088_v7  ;;  %v12098_v52 = vld [vmem:[#allocation19_spill] sm:$0xff]  ;;  %v12099_v7 = vld [vmem:[#allocation20_spill] sm:$0xff] }
 0x8e8   :  { %7311 = vmatprep.subr.bf16.mxu0 %v12089_v8  ;;  %7359 = vmatprep.subr.bf16.mxu1 %v12090_v22  ;;  %v12100_v8 = vld [vmem:[#allocation21_spill] sm:$0xff]  ;;  %v12101_v22 = vld [vmem:[#allocation22_spill] sm:$0xff] }
 0x8eb   :  { %7313 = vmatpush1.bf16.msra.mxu0 %v12091_v10  ;;  %7361 = vmatpush1.bf16.msra.mxu1 %v12092_v42  ;;  %v12102_v10 = vld [vmem:[#allocation24_spill] sm:$0xff] }
 0x8ec   :  { %7315 = vmatprep.subr.bf16.mxu0 %v12093_v31  ;;  %7363 = vmatprep.subr.bf16.mxu1 %v12094_v34  ;;  %v12103_v42 = vld [vmem:[#allocation28_spill] sm:$0xff]  ;;  %v12104_v31 = vld [vmem:[#allocation29_spill] sm:$0xff]  ;;  %v12105_v34 = vld [vmem:[#allocation30_spill] sm:$0xff] }
 0x8ef   :  { %7317 = vmatpush1.bf16.msra.mxu0 %v12095_v27  ;;  %7365 = vmatpush1.bf16.msra.mxu1 %v12096_v2  ;;  %v12106_v27 = vld [vmem:[#allocation31_spill] sm:$0xff]  ;;  %v12107_v2 = vld [vmem:[#allocation32_spill] sm:$0xff] }
 0x8f0   :  { %7319 = vmatprep.subr.bf16.mxu0 %v12097_v62  ;;  %7367 = vmatprep.subr.bf16.mxu1 %v12098_v52  ;;  %v12108_v62 = vld [vmem:[#allocation33_spill] sm:$0xff]  ;;  %v12109_v52 = vld [vmem:[#allocation34_spill] sm:$0xff] }
 0x8f3   :  { %7321 = vmatpush1.bf16.msra.mxu0 %v12099_v7  ;;  %7369 = vmatpush1.bf16.msra.mxu1 %v12100_v8  ;;  %v12110_v7 = vld [vmem:[#allocation35_spill] sm:$0xff]  ;;  %v12111_v8 = vld [vmem:[#allocation36_spill] sm:$0xff] }
 0x8f4   :  { %7323 = vmatprep.subr.bf16.mxu0 %v12101_v22  ;;  %7371 = vmatprep.subr.bf16.mxu1 %v12102_v10  ;;  %v12112_v22 = vld [vmem:[#allocation37_spill] sm:$0xff]  ;;  %v12113_v10 = vld [vmem:[#allocation38_spill] sm:$0xff] }
 0x8f7   :  { %7325 = vmatpush1.bf16.msra.mxu0 %v12103_v42  ;;  %7373 = vmatpush1.bf16.msra.mxu1 %v12104_v31  ;;  %v12114_v42 = vld [vmem:[#allocation39_spill] sm:$0xff]  ;;  %v12115_v31 = vld [vmem:[#allocation40_spill] sm:$0xff] }
 0x8f8   :  { %7327 = vmatprep.subr.bf16.mxu0 %v12105_v34  ;;  %7375 = vmatprep.subr.bf16.mxu1 %v12106_v27  ;;  %v12116_v34 = vld [vmem:[#allocation41_spill] sm:$0xff]  ;;  %v12117_v27 = vld [vmem:[#allocation42_spill] sm:$0xff] }
 0x8fb   :  { %7329 = vmatpush1.bf16.msra.mxu0 %v12107_v2  ;;  %7377 = vmatpush1.bf16.msra.mxu1 %v12108_v62  ;;  %v12118_v2 = vld [vmem:[#allocation43_spill] sm:$0xff]  ;;  %v12119_v62 = vld [vmem:[#allocation44_spill] sm:$0xff] }
 0x8fc   :  { %7331 = vmatprep.subr.bf16.mxu0 %v12109_v52  ;;  %7379 = vmatprep.subr.bf16.mxu1 %v12110_v7  ;;  %v12120_v52 = vld [vmem:[#allocation45_spill] sm:$0xff]  ;;  %v12121_v7 = vld [vmem:[#allocation46_spill] sm:$0xff] }
 0x8ff   :  { %7333 = vmatpush1.bf16.msra.mxu0 %v12111_v8  ;;  %7381 = vmatpush1.bf16.msra.mxu1 %v12112_v22  ;;  %v12122_v8 = vld [vmem:[#allocation47_spill] sm:$0xff]  ;;  %v12123_v22 = vld [vmem:[#allocation48_spill] sm:$0xff] }
 0x900   :  { %7335 = vmatprep.subr.bf16.mxu0 %v12113_v10  ;;  %7383 = vmatprep.subr.bf16.mxu1 %v12114_v42  ;;  %v12124_v10 = vld [vmem:[#allocation49_spill] sm:$0xff]  ;;  %v12125_v42 = vld [vmem:[#allocation50_spill] sm:$0xff] }
 0x903   :  { %7337 = vmatpush1.bf16.msra.mxu0 %v12115_v31  ;;  %7385 = vmatpush1.bf16.msra.mxu1 %v12116_v34  ;;  %v12126_v31 = vld [vmem:[#allocation51_spill] sm:$0xff]  ;;  %v12127_v34 = vld [vmem:[#allocation52_spill] sm:$0xff] }
 0x904   :  { %7339 = vmatprep.subr.bf16.mxu0 %v12117_v27  ;;  %7387 = vmatprep.subr.bf16.mxu1 %v12118_v2  ;;  %v12128_v27 = vld [vmem:[#allocation53_spill] sm:$0xff]  ;;  %v12129_v2 = vld [vmem:[#allocation54_spill] sm:$0xff] }
 0x907   :  { %7341 = vmatpush1.bf16.msra.mxu0 %v12119_v62  ;;  %7389 = vmatpush1.bf16.msra.mxu1 %v12120_v52  ;;  %v12130_v62 = vld [vmem:[#allocation55_spill] sm:$0xff]  ;;  %v12131_v52 = vld [vmem:[#allocation56_spill] sm:$0xff] }
 0x908   :  { %7343 = vmatprep.subr.bf16.mxu0 %v12121_v7  ;;  %7391 = vmatprep.subr.bf16.mxu1 %v12122_v8  ;;  %v12132_v7 = vld [vmem:[#allocation57_spill] sm:$0xff]  ;;  %v12133_v8 = vld [vmem:[#allocation58_spill] sm:$0xff] }
 0x90b   :  { %7345 = vmatpush1.bf16.msra.mxu0 %v12123_v22  ;;  %7393 = vmatpush1.bf16.msra.mxu1 %v12124_v10  ;;  %v12134_v22 = vld [vmem:[#allocation59_spill] sm:$0xff] }
 0x90c   :  { %7347 = vmatprep.subr.bf16.mxu0 %v12125_v42  ;;  %7395 = vmatprep.subr.bf16.mxu1 %v12126_v31 }
 0x90f   :  { %7349 = vmatpush1.bf16.msra.mxu0 %v12127_v34  ;;  %7397 = vmatpush1.bf16.msra.mxu1 %v12128_v27  ;;  %v12135_v34 = vld [vmem:[#allocation23_spill] sm:$0xff]  ;;  %v12136_v27 = vld [vmem:[#allocation26_spill] sm:$0xff] }
 0x910   :  { %7351 = vmatprep.subr.bf16.mxu0 %v12129_v2  ;;  %7399 = vmatprep.subr.bf16.mxu1 %v12130_v62  ;;  %v2844_v26 = vmul.f32 %v2840_v1, %v12135_v34  ;;  %v2845_v59 = vmul.f32 %v2840_v1, %v12136_v27  ;;  %v12137_v2 = vld [vmem:[#allocation62_spill] sm:$0xff]  ;;  %v12138_v62 = vld [vmem:[#allocation63_spill] sm:$0xff] }
 0x911   :  { %v2842_v50 = vmul.f32 %v2840_v1, %v12137_v2  ;;  %v2843_v30 = vmul.f32 %v2840_v1, %v12138_v62  ;;  %v12140_v62 = vld [vmem:[#allocation64_spill] sm:$0xff] }
 0x912   :  { %v2846_v2 = vmul.f32 %v2840_v1, %v12140_v62 }
 0x913   :  { %7353 = vmatpush1.bf16.msra.mxu0 %v12131_v52  ;;  %7401 = vmatpush1.bf16.msra.mxu1 %v12132_v7  ;;  %v2852_v52 = vadd.f32 %v2844_v26, %v11618_v36  ;;  %v12139_v7 = vld [vmem:[#allocation27_spill] sm:$0xff]  ;;  %v2851_v13 = vadd.f32 %v2843_v30, %v11695_v0  ;;  %v12144_v30 = vld [vmem:[#allocation70_spill] sm:$0xff] }
 0x914   :  { %7403 = vmatprep.subr.bf16.mxu0 %v12133_v8  ;;  %7451 = vmatprep.subr.bf16.mxu1 %v12134_v22  ;;  %v2853_v39 = vadd.f32 %v2845_v59, %v12139_v7  ;;  %v2850_v8 = vadd.f32 %v2842_v50, %v11770_v45  ;;  %v12141_v26 = vld [vmem:[#allocation67_spill] sm:$0xff]  ;;  %v12142_v7 = vld [vmem:[#allocation69_spill] sm:$0xff] }
 0x915   :  { %v2847_v59 = vmul.f32 %v2840_v1, %v12141_v26  ;;  %v2849_v50 = vmul.f32 %v2840_v1, %v12142_v7 }
 0x989   :  { %v2927_v10 = vpop.f32.mrb[28].mxu0  ;;  %v2998_v42 = vpop.f32.mrb[28].mxu1 }
 0x98a   :  { %v2929_v5 = vpop.f32.mrb[29].mxu0  ;;  %v3000_v31 = vpop.f32.mrb[29].mxu1  ;;  %v3147_v22 = vadd.f32 %v2998_v42, %v2852_v52  ;;  %v3145_v44 = vadd.f32 %v2927_v10, %v2850_v8  ;;  %v12143_v52 = vld [vmem:[#allocation68_spill] sm:$0xff] }
 0x98b   :  { %v3148_v29 = vadd.f32 %v3000_v31, %v2853_v39  ;;  %v3146_v61 = vadd.f32 %v2929_v5, %v2851_v13  ;;  %v2848_v42 = vmul.f32 %v2840_v1, %v12143_v52  ;;  %v2854_v39 = vadd.f32 %v2846_v2, %v12144_v30  ;;  %v12145_v5 = vld [vmem:[#allocation71_spill] sm:$0xff] }
 0x98c   :  { %v3161_v4 = vmul.f32 0.5, %v3147_v22  ;;  %v3153_v60 = vmul.f32 0.5, %v3145_v44 }
 0x98d   :  { %v3162_v34 = vmul.f32 0.5, %v3148_v29  ;;  %v3154_v27 = vmul.f32 0.5, %v3146_v61  ;;  %v2855_v29 = vadd.f32 %v2847_v59, %v12145_v5  ;;  %v2856_v10 = vadd.f32 %v2848_v42, %v11628_v15 }
 0x98e   :  { %8812 = vtanh.f32 %v3161_v4  ;;  %v12146_v4 = vld [vmem:[#allocation73_spill] sm:$0xff] }
 0x98f   :  { %8814 = vtanh.f32 %v3162_v34  ;;  %v2857_v22 = vadd.f32 %v2849_v50, %v12146_v4 }
 0x990   :  { %8816 = vtanh.f32 %v3153_v60 }
 0x991   :  { %8818 = vtanh.f32 %v3154_v27 }
 0x998   :  { %v8813_v34 = vpop.eup %8812 }
 0x999   :  { %v8815_v7 = vpop.eup %8814  ;;  %v3165_v30 = vadd.f32 1.0, %v8813_v34 }
 0x99a   :  { %v8817_v1 = vpop.eup %8816  ;;  %v3166_v52 = vadd.f32 1.0, %v8815_v7 }
 0x99b   :  { %v8819_v2 = vpop.eup %8818  ;;  %v3157_v59 = vadd.f32 1.0, %v8817_v1  ;;  %v3167_v5 = vmul.f32 0.5, %v3165_v30  ;;  %v12148_v1 = vld [vmem:[#allocation111_spill] sm:$0xff] }
 0x99c   :  { %v3168_v50 = vmul.f32 0.5, %v3166_v52 }
 0x99d   :  { %v3159_v4 = vmul.f32 0.5, %v3157_v59  ;;  %v12150_v59 = vld [vmem:[#allocation113_spill] sm:$0xff] }
 0x9b9   :  { %v3069_v8 = vpop.f32.mrb[30].mxu0  ;;  %v3140_v13 = vpop.f32.mrb[30].mxu1 }
 0x9ba   :  { %v3149_v44 = vadd.f32 %v3069_v8, %v2854_v39  ;;  %v3071_v61 = vpop.f32.mrb[31].mxu0  ;;  %v3142_v60 = vpop.f32.mrb[31].mxu1  ;;  %v3151_v26 = vadd.f32 %v3140_v13, %v2856_v10  ;;  %v3158_v8 = vadd.f32 1.0, %v8819_v2  ;;  %v12149_v2 = vld [vmem:[#allocation112_spill] sm:$0xff] }
 0x9bb   :  { %v3150_v31 = vadd.f32 %v3071_v61, %v2855_v29  ;;  %v3152_v27 = vadd.f32 %v3142_v60, %v2857_v22  ;;  %v3179_v61 = vmul.f32 %v3167_v5, %v10299_v20  ;;  %v3180_v22 = vmul.f32 %v3168_v50, %v10301_v9  ;;  %v12147_v9 = vld [vmem:[#allocation110_spill] sm:$0xff]  ;;  %v12153_v50 = vld [vmem:[#allocation116_spill] sm:$0xff] }
 0x9bc   :  { %8820 = vtanh.f32 %v3149_v44  ;;  %v3171_v39 = vmul.f32 0.5, %v3151_v26  ;;  %v3160_v29 = vmul.f32 0.5, %v3158_v8  ;;  %v12152_v8 = vld [vmem:[#allocation115_spill] sm:$0xff] }
 0x9bd   :  { %8822 = vtanh.f32 %v3150_v31  ;;  %v3172_v62 = vmul.f32 0.5, %v3152_v27 }
 0x9bf   :  { %8824 = vtanh.f32 %v3172_v62 }
 0x9c0   :  { %8826 = vtanh.f32 %v3171_v39  ;;  %v12151_v39 = vld [vmem:[#allocation114_spill] sm:$0xff] }
 0x9c6   :  { %v8821_v42 = vpop.eup %8820 }
 0x9c7   :  { %v8823_v44 = vpop.eup %8822  ;;  %v3181_v13 = vmul.f32 %v8821_v42, %v3159_v4  ;;  %v12154_v42 = vld [vmem:[#allocation117_spill] sm:$0xff] }
 0x9c8   :  { %v3182_v60 = vmul.f32 %v8823_v44, %v3160_v29  ;;  %v12155_v29 = vld [vmem:[#allocation118_spill] sm:$0xff]  ;;  %v12156_v44 = vld [vmem:[#allocation119_spill] sm:$0xff] }
 0x9c9   :  { %v10423_v10 = vadd.f32 %v3181_v13, %v3179_v61  ;;  %v8825_v62 = vpop.eup %8824  ;;  %v12157_v61 = vld [vmem:[#allocation120_spill] sm:$0xff]  ;;  %v12158_v13 = vld [vmem:[#allocation121_spill] sm:$0xff] }
 0x9ca   :  { %v10425_v7 = vadd.f32 %v3182_v60, %v3180_v22  ;;  %v8827_v26 = vpop.eup %8826  ;;  %v3176_v52 = vadd.f32 1.0, %v8825_v62  ;;  %v12159_v22 = vld [vmem:[#allocation6_spill] sm:$0xff]  ;;  %v12160_v60 = vld [vmem:[#allocation7_spill] sm:$0xff]  ;;  %v12161_v62 = vld [vmem:[#allocation8_spill] sm:$0xff] }
 0x9cb   :  { %8828 = vtanh.f32 %v10423_v10  ;;  %v3175_v30 = vadd.f32 1.0, %v8827_v26  ;;  %v12162_v26 = vld [vmem:[#allocation9_spill] sm:$0xff] }
 0x9cc   :  { %8830 = vtanh.f32 %v10425_v7  ;;  %v3178_v34 = vmul.f32 0.5, %v3176_v52  ;;  %v12163_v52 = vld [vmem:[#allocation10_spill] sm:$0xff] }
 0x9cd   :  { %v3177_v20 = vmul.f32 0.5, %v3175_v30  ;;  %v12164_v30 = vld [vmem:[#allocation11_spill] sm:$0xff] }
 0x9d5   :  { %v8829_v31 = vpop.eup %8828 }
 0x9d6   :  { %v8831_v27 = vpop.eup %8830  ;;  %v3187_v4 = vmul.f32 %v8829_v31, %v3177_v20  ;;  %v12165_v31 = vld [vmem:[#allocation12_spill] sm:$0xff]  ;;  %v12168_v20 = vld [vmem:[#allocation15_spill] sm:$0xff] }
 0x9d7   :  { %v3188_v5 = vmul.f32 %v8831_v27, %v3178_v34  ;;  %v12166_v34 = vld [vmem:[#allocation13_spill] sm:$0xff]  ;;  %v12167_v27 = vld [vmem:[#allocation14_spill] sm:$0xff] }
 0x9d9   :  { %5736 = vmatprep.mubr.msk.f32.mxu0 %vm379_vm0, %v3188_v5  ;;  %5737 = vmatprep.mubr.msk.f32.mxu1 %vm379_vm0, %v3188_v5 }
 0x9da   :  { %3280 = vmatmul.mubr.f32.vlgmr.msra.gmra.mrb[32].mxu0 %v3187_v4  ;;  %3351 = vmatmul.mubr.f32.vlgmr.msra.gmra.mrb[32].mxu1 %v3187_v4 }
 0x9db   :  { %7405 = vmatpush1.bf16.msra.mxu0 %v11631_v25  ;;  %7453 = vmatpush1.bf16.msra.mxu1 %v11632_v24 }
 0x9dc   :  { %5738 = vmatprep.mubr.msk.f32.mxu0 %vm379_vm0, %v3188_v5  ;;  %5739 = vmatprep.mubr.msk.f32.mxu1 %vm379_vm0, %v3188_v5  ;;  %v12169_v5 = vld [vmem:[#allocation16_spill] sm:$0xff] }
 0x9dd   :  { %7407 = vmatprep.subr.bf16.mxu0 %v11633_v53  ;;  %7455 = vmatprep.subr.bf16.mxu1 %v11634_v43 }
 0x9df   :  { %7409 = vmatpush1.bf16.msra.mxu0 %v11635_v3  ;;  %7457 = vmatpush1.bf16.msra.mxu1 %v11636_v58 }
 0x9e0   :  { %7411 = vmatprep.subr.bf16.mxu0 %v11637_v57  ;;  %7459 = vmatprep.subr.bf16.mxu1 %v11638_v47 }
 0x9e3   :  { %7413 = vmatpush1.bf16.msra.mxu0 %v11639_v14  ;;  %7461 = vmatpush1.bf16.msra.mxu1 %v11640_v35 }
 0x9e4   :  { %7415 = vmatprep.subr.bf16.mxu0 %v11703_v33  ;;  %7463 = vmatprep.subr.bf16.mxu1 %v11704_v54 }
 0x9e7   :  { %7417 = vmatpush1.bf16.msra.mxu0 %v11705_v40  ;;  %7465 = vmatpush1.bf16.msra.mxu1 %v11706_v41 }
 0x9e8   :  { %7419 = vmatprep.subr.bf16.mxu0 %v11707_v32  ;;  %7467 = vmatprep.subr.bf16.mxu1 %v11708_v63 }
 0x9eb   :  { %7421 = vmatpush1.bf16.msra.mxu0 %v11709_v38  ;;  %7469 = vmatpush1.bf16.msra.mxu1 %v11710_v37 }
 0x9ec   :  { %7423 = vmatprep.subr.bf16.mxu0 %v11711_v23  ;;  %7471 = vmatprep.subr.bf16.mxu1 %v11712_v18 }
 0x9ef   :  { %7425 = vmatpush1.bf16.msra.mxu0 %v11713_v17  ;;  %7473 = vmatpush1.bf16.msra.mxu1 %v11714_v28 }
 0x9f0   :  { %7427 = vmatprep.subr.bf16.mxu0 %v11715_v55  ;;  %7475 = vmatprep.subr.bf16.mxu1 %v11654_v16 }
 0x9f3   :  { %7429 = vmatpush1.bf16.msra.mxu0 %v11655_v6  ;;  %7477 = vmatpush1.bf16.msra.mxu1 %v11656_v12 }
 0x9f4   :  { %7431 = vmatprep.subr.bf16.mxu0 %v11657_v46  ;;  %7479 = vmatprep.subr.bf16.mxu1 %v11658_v48 }
 0x9f7   :  { %7433 = vmatpush1.bf16.msra.mxu0 %v11659_v51  ;;  %7481 = vmatpush1.bf16.msra.mxu1 %v11660_v49 }
 0x9f8   :  { %7435 = vmatprep.subr.bf16.mxu0 %v11661_v11  ;;  %7483 = vmatprep.subr.bf16.mxu1 %v11662_v56 }
 0x9fb   :  { %7437 = vmatpush1.bf16.msra.mxu0 %v11663_v19  ;;  %7485 = vmatpush1.bf16.msra.mxu1 %v11777_v21 }
 0x9fc   :  { %7439 = vmatprep.subr.bf16.mxu0 %v12147_v9  ;;  %7487 = vmatprep.subr.bf16.mxu1 %v12148_v1 }
 0x9ff   :  { %7441 = vmatpush1.bf16.msra.mxu0 %v12149_v2  ;;  %7489 = vmatpush1.bf16.msra.mxu1 %v12150_v59 }
 0xa00   :  { %7443 = vmatprep.subr.bf16.mxu0 %v12151_v39  ;;  %7491 = vmatprep.subr.bf16.mxu1 %v12152_v8 }
 0xa03   :  { %7445 = vmatpush1.bf16.msra.mxu0 %v12153_v50  ;;  %7493 = vmatpush1.bf16.msra.mxu1 %v12154_v42 }
 0xa04   :  { %7447 = vmatprep.subr.bf16.mxu0 %v12155_v29  ;;  %7495 = vmatprep.subr.bf16.mxu1 %v12156_v44 }
 0xa07   :  { %7449 = vmatpush1.bf16.msra.mxu0 %v12157_v61  ;;  %7497 = vmatpush1.bf16.msra.mxu1 %v12158_v13  ;;  %v3194_v13 = vpop.permute.xlu1 %3193 }
 0xa08   :  { %7499 = vmatprep.subr.bf16.mxu0 %v12159_v22  ;;  %7547 = vmatprep.subr.bf16.mxu1 %v12160_v60  ;;  %v12170_v60 = vld [vmem:[#allocation17_spill] sm:$0xff] }
 0xa0a   :  { %3422 = vmatmul.mubr.f32.vlgmr.msra.gmra.mrb[34].mxu0 %v3187_v4  ;;  %3493 = vmatmul.mubr.f32.vlgmr.msra.gmra.mrb[34].mxu1 %v3187_v4  ;;  %v12171_v4 = vld [vmem:[#allocation18_spill] sm:$0xff] }
 0xa0b   :  { %7501 = vmatpush1.bf16.msra.mxu0 %v12161_v62  ;;  %7549 = vmatpush1.bf16.msra.mxu1 %v12162_v26  ;;  %v12172_v62 = vld [vmem:[#allocation19_spill] sm:$0xff]  ;;  %v12173_v26 = vld [vmem:[#allocation20_spill] sm:$0xff] }
 0xa0c   :  { %7503 = vmatprep.subr.bf16.mxu0 %v12163_v52  ;;  %7551 = vmatprep.subr.bf16.mxu1 %v12164_v30  ;;  %v12174_v52 = vld [vmem:[#allocation21_spill] sm:$0xff]  ;;  %v12175_v30 = vld [vmem:[#allocation22_spill] sm:$0xff] }
 0xa0f   :  { %7505 = vmatpush1.bf16.msra.mxu0 %v12165_v31  ;;  %7553 = vmatpush1.bf16.msra.mxu1 %v12166_v34  ;;  %v12176_v31 = vld [vmem:[#allocation24_spill] sm:$0xff] }
 0xa10   :  { %7507 = vmatprep.subr.bf16.mxu0 %v12167_v27  ;;  %7555 = vmatprep.subr.bf16.mxu1 %v12168_v20  ;;  %v12177_v34 = vld [vmem:[#allocation28_spill] sm:$0xff]  ;;  %v12178_v27 = vld [vmem:[#allocation29_spill] sm:$0xff]  ;;  %v12179_v20 = vld [vmem:[#allocation30_spill] sm:$0xff] }
 0xa13   :  { %7509 = vmatpush1.bf16.msra.mxu0 %v12169_v5  ;;  %7557 = vmatpush1.bf16.msra.mxu1 %v12170_v60  ;;  %v12180_v5 = vld [vmem:[#allocation31_spill] sm:$0xff]  ;;  %v12181_v60 = vld [vmem:[#allocation32_spill] sm:$0xff] }
 0xa14   :  { %7511 = vmatprep.subr.bf16.mxu0 %v12171_v4  ;;  %7559 = vmatprep.subr.bf16.mxu1 %v12172_v62  ;;  %v12182_v4 = vld [vmem:[#allocation33_spill] sm:$0xff]  ;;  %v12183_v62 = vld [vmem:[#allocation34_spill] sm:$0xff] }
 0xa17   :  { %7513 = vmatpush1.bf16.msra.mxu0 %v12173_v26  ;;  %7561 = vmatpush1.bf16.msra.mxu1 %v12174_v52  ;;  %v12184_v26 = vld [vmem:[#allocation35_spill] sm:$0xff]  ;;  %v12185_v52 = vld [vmem:[#allocation36_spill] sm:$0xff] }
 0xa18   :  { %7515 = vmatprep.subr.bf16.mxu0 %v12175_v30  ;;  %7563 = vmatprep.subr.bf16.mxu1 %v12176_v31  ;;  %v12186_v30 = vld [vmem:[#allocation37_spill] sm:$0xff]  ;;  %v12187_v31 = vld [vmem:[#allocation38_spill] sm:$0xff] }
 0xa1b   :  { %7517 = vmatpush1.bf16.msra.mxu0 %v12177_v34  ;;  %7565 = vmatpush1.bf16.msra.mxu1 %v12178_v27  ;;  %v12188_v34 = vld [vmem:[#allocation39_spill] sm:$0xff]  ;;  %v12189_v27 = vld [vmem:[#allocation40_spill] sm:$0xff] }
 0xa1c   :  { %7519 = vmatprep.subr.bf16.mxu0 %v12179_v20  ;;  %7567 = vmatprep.subr.bf16.mxu1 %v12180_v5  ;;  %v12190_v20 = vld [vmem:[#allocation41_spill] sm:$0xff]  ;;  %v12191_v5 = vld [vmem:[#allocation42_spill] sm:$0xff] }
 0xa1f   :  { %7521 = vmatpush1.bf16.msra.mxu0 %v12181_v60  ;;  %7569 = vmatpush1.bf16.msra.mxu1 %v12182_v4  ;;  %v12192_v60 = vld [vmem:[#allocation43_spill] sm:$0xff]  ;;  %v12193_v4 = vld [vmem:[#allocation44_spill] sm:$0xff] }
 0xa20   :  { %7523 = vmatprep.subr.bf16.mxu0 %v12183_v62  ;;  %7571 = vmatprep.subr.bf16.mxu1 %v12184_v26  ;;  %v12194_v62 = vld [vmem:[#allocation45_spill] sm:$0xff]  ;;  %v12195_v26 = vld [vmem:[#allocation46_spill] sm:$0xff] }
 0xa23   :  { %7525 = vmatpush1.bf16.msra.mxu0 %v12185_v52  ;;  %7573 = vmatpush1.bf16.msra.mxu1 %v12186_v30  ;;  %v12196_v52 = vld [vmem:[#allocation47_spill] sm:$0xff]  ;;  %v12197_v30 = vld [vmem:[#allocation48_spill] sm:$0xff] }
 0xa24   :  { %7527 = vmatprep.subr.bf16.mxu0 %v12187_v31  ;;  %7575 = vmatprep.subr.bf16.mxu1 %v12188_v34  ;;  %v12198_v31 = vld [vmem:[#allocation49_spill] sm:$0xff]  ;;  %v12199_v34 = vld [vmem:[#allocation50_spill] sm:$0xff] }
 0xa27   :  { %7529 = vmatpush1.bf16.msra.mxu0 %v12189_v27  ;;  %7577 = vmatpush1.bf16.msra.mxu1 %v12190_v20  ;;  %v12200_v27 = vld [vmem:[#allocation51_spill] sm:$0xff]  ;;  %v12201_v20 = vld [vmem:[#allocation52_spill] sm:$0xff] }
 0xa28   :  { %7531 = vmatprep.subr.bf16.mxu0 %v12191_v5  ;;  %7579 = vmatprep.subr.bf16.mxu1 %v12192_v60  ;;  %v12202_v5 = vld [vmem:[#allocation53_spill] sm:$0xff]  ;;  %v12203_v60 = vld [vmem:[#allocation54_spill] sm:$0xff] }
 0xa2b   :  { %7533 = vmatpush1.bf16.msra.mxu0 %v12193_v4  ;;  %7581 = vmatpush1.bf16.msra.mxu1 %v12194_v62  ;;  %v12204_v4 = vld [vmem:[#allocation55_spill] sm:$0xff]  ;;  %v12205_v62 = vld [vmem:[#allocation56_spill] sm:$0xff] }
 0xa2c   :  { %7535 = vmatprep.subr.bf16.mxu0 %v12195_v26  ;;  %7583 = vmatprep.subr.bf16.mxu1 %v12196_v52  ;;  %v12206_v26 = vld [vmem:[#allocation57_spill] sm:$0xff]  ;;  %v12207_v52 = vld [vmem:[#allocation58_spill] sm:$0xff] }
 0xa2f   :  { %7537 = vmatpush1.bf16.msra.mxu0 %v12197_v30  ;;  %7585 = vmatpush1.bf16.msra.mxu1 %v12198_v31  ;;  %v12208_v30 = vld [vmem:[#allocation59_spill] sm:$0xff] }
 0xa30   :  { %7539 = vmatprep.subr.bf16.mxu0 %v12199_v34  ;;  %7587 = vmatprep.subr.bf16.mxu1 %v12200_v27 }
 0xa33   :  { %7541 = vmatpush1.bf16.msra.mxu0 %v12201_v20  ;;  %7589 = vmatpush1.bf16.msra.mxu1 %v12202_v5  ;;  %v12209_v20 = vld [vmem:[#allocation23_spill] sm:$0xff]  ;;  %v12210_v5 = vld [vmem:[#allocation26_spill] sm:$0xff] }
 0xa34   :  { %7543 = vmatprep.subr.bf16.mxu0 %v12203_v60  ;;  %7591 = vmatprep.subr.bf16.mxu1 %v12204_v4  ;;  %v3198_v61 = vmul.f32 %v3194_v13, %v12209_v20  ;;  %v3199_v44 = vmul.f32 %v3194_v13, %v12210_v5  ;;  %v12211_v60 = vld [vmem:[#allocation62_spill] sm:$0xff]  ;;  %v12212_v4 = vld [vmem:[#allocation63_spill] sm:$0xff] }
 0xa35   :  { %v3196_v29 = vmul.f32 %v3194_v13, %v12211_v60  ;;  %v3197_v42 = vmul.f32 %v3194_v13, %v12212_v4  ;;  %v12214_v4 = vld [vmem:[#allocation64_spill] sm:$0xff] }
 0xa36   :  { %v3200_v60 = vmul.f32 %v3194_v13, %v12214_v4 }
 0xa37   :  { %7545 = vmatpush1.bf16.msra.mxu0 %v12205_v62  ;;  %7593 = vmatpush1.bf16.msra.mxu1 %v12206_v26  ;;  %v3206_v62 = vadd.f32 %v3198_v61, %v11618_v36  ;;  %v12213_v26 = vld [vmem:[#allocation27_spill] sm:$0xff]  ;;  %v3205_v8 = vadd.f32 %v3197_v42, %v11695_v0  ;;  %v12218_v42 = vld [vmem:[#allocation70_spill] sm:$0xff] }
 0xa38   :  { %7595 = vmatprep.subr.bf16.mxu0 %v12207_v52  ;;  %7643 = vmatprep.subr.bf16.mxu1 %v12208_v30  ;;  %v3207_v50 = vadd.f32 %v3199_v44, %v12213_v26  ;;  %v3204_v52 = vadd.f32 %v3196_v29, %v11770_v45  ;;  %v12215_v61 = vld [vmem:[#allocation67_spill] sm:$0xff]  ;;  %v12216_v26 = vld [vmem:[#allocation69_spill] sm:$0xff] }
 0xa39   :  { %v3201_v44 = vmul.f32 %v3194_v13, %v12215_v61  ;;  %v3203_v29 = vmul.f32 %v3194_v13, %v12216_v26 }
 0xaad   :  { %v3281_v31 = vpop.f32.mrb[32].mxu0  ;;  %v3352_v34 = vpop.f32.mrb[32].mxu1 }
 0xaae   :  { %v3283_v22 = vpop.f32.mrb[33].mxu0  ;;  %v3354_v27 = vpop.f32.mrb[33].mxu1  ;;  %v3501_v30 = vadd.f32 %v3352_v34, %v3206_v62  ;;  %v3499_v59 = vadd.f32 %v3281_v31, %v3204_v52  ;;  %v12217_v62 = vld [vmem:[#allocation68_spill] sm:$0xff] }
 0xaaf   :  { %v3502_v39 = vadd.f32 %v3354_v27, %v3207_v50  ;;  %v3500_v2 = vadd.f32 %v3283_v22, %v3205_v8  ;;  %v3202_v34 = vmul.f32 %v3194_v13, %v12217_v62  ;;  %v3208_v50 = vadd.f32 %v3200_v60, %v12218_v42  ;;  %v12219_v22 = vld [vmem:[#allocation71_spill] sm:$0xff] }
 0xab0   :  { %v3515_v1 = vmul.f32 0.5, %v3501_v30  ;;  %v3507_v9 = vmul.f32 0.5, %v3499_v59 }
 0xab1   :  { %v3516_v20 = vmul.f32 0.5, %v3502_v39  ;;  %v3508_v5 = vmul.f32 0.5, %v3500_v2  ;;  %v3209_v39 = vadd.f32 %v3201_v44, %v12219_v22  ;;  %v3210_v31 = vadd.f32 %v3202_v34, %v11628_v15 }
 0xab2   :  { %8832 = vtanh.f32 %v3515_v1  ;;  %v12220_v1 = vld [vmem:[#allocation73_spill] sm:$0xff] }
 0xab3   :  { %8834 = vtanh.f32 %v3516_v20  ;;  %v3211_v30 = vadd.f32 %v3203_v29, %v12220_v1 }
 0xab4   :  { %8836 = vtanh.f32 %v3507_v9 }
 0xab5   :  { %8838 = vtanh.f32 %v3508_v5 }
 0xabc   :  { %v8833_v20 = vpop.eup %8832 }
 0xabd   :  { %v8835_v26 = vpop.eup %8834  ;;  %v3519_v42 = vadd.f32 1.0, %v8833_v20 }
 0xabe   :  { %v8837_v13 = vpop.eup %8836  ;;  %v3520_v62 = vadd.f32 1.0, %v8835_v26 }
 0xabf   :  { %v8839_v60 = vpop.eup %8838  ;;  %v3511_v44 = vadd.f32 1.0, %v8837_v13  ;;  %v3521_v22 = vmul.f32 0.5, %v3519_v42  ;;  %v12222_v13 = vld [vmem:[#allocation111_spill] sm:$0xff] }
 0xac0   :  { %v3522_v29 = vmul.f32 0.5, %v3520_v62 }
 0xac1   :  { %v3513_v1 = vmul.f32 0.5, %v3511_v44  ;;  %v12224_v44 = vld [vmem:[#allocation113_spill] sm:$0xff] }
 0xadd   :  { %v3423_v52 = vpop.f32.mrb[34].mxu0  ;;  %v3494_v8 = vpop.f32.mrb[34].mxu1 }
 0xade   :  { %v3503_v59 = vadd.f32 %v3423_v52, %v3208_v50  ;;  %v3425_v2 = vpop.f32.mrb[35].mxu0  ;;  %v3496_v9 = vpop.f32.mrb[35].mxu1  ;;  %v3505_v61 = vadd.f32 %v3494_v8, %v3210_v31  ;;  %v3512_v52 = vadd.f32 1.0, %v8839_v60  ;;  %v12223_v60 = vld [vmem:[#allocation112_spill] sm:$0xff] }
 0xadf   :  { %v3504_v27 = vadd.f32 %v3425_v2, %v3209_v39  ;;  %v3506_v5 = vadd.f32 %v3496_v9, %v3211_v30  ;;  %v3533_v2 = vmul.f32 %v3521_v22, %v10423_v10  ;;  %v3534_v30 = vmul.f32 %v3522_v29, %v10425_v7  ;;  %v12221_v7 = vld [vmem:[#allocation110_spill] sm:$0xff]  ;;  %v12227_v29 = vld [vmem:[#allocation116_spill] sm:$0xff] }
 0xae0   :  { %8840 = vtanh.f32 %v3503_v59  ;;  %v3525_v50 = vmul.f32 0.5, %v3505_v61  ;;  %v3514_v39 = vmul.f32 0.5, %v3512_v52  ;;  %v12226_v52 = vld [vmem:[#allocation115_spill] sm:$0xff] }
 0xae1   :  { %8842 = vtanh.f32 %v3504_v27  ;;  %v3526_v4 = vmul.f32 0.5, %v3506_v5 }
 0xae3   :  { %8844 = vtanh.f32 %v3526_v4 }
 0xae4   :  { %8846 = vtanh.f32 %v3525_v50  ;;  %v12225_v50 = vld [vmem:[#allocation114_spill] sm:$0xff] }
 0xaea   :  { %v8841_v34 = vpop.eup %8840 }
 0xaeb   :  { %v8843_v59 = vpop.eup %8842  ;;  %v3535_v8 = vmul.f32 %v8841_v34, %v3513_v1  ;;  %v12228_v34 = vld [vmem:[#allocation117_spill] sm:$0xff] }
 0xaec   :  { %v3536_v9 = vmul.f32 %v8843_v59, %v3514_v39  ;;  %v12229_v39 = vld [vmem:[#allocation118_spill] sm:$0xff]  ;;  %v12230_v59 = vld [vmem:[#allocation119_spill] sm:$0xff] }
 0xaed   :  { %v10547_v31 = vadd.f32 %v3535_v8, %v3533_v2  ;;  %v8845_v4 = vpop.eup %8844  ;;  %v12231_v2 = vld [vmem:[#allocation120_spill] sm:$0xff]  ;;  %v12232_v8 = vld [vmem:[#allocation121_spill] sm:$0xff] }
 0xaee   :  { %v10549_v26 = vadd.f32 %v3536_v9, %v3534_v30  ;;  %v8847_v61 = vpop.eup %8846  ;;  %v3530_v62 = vadd.f32 1.0, %v8845_v4  ;;  %v12233_v30 = vld [vmem:[#allocation6_spill] sm:$0xff]  ;;  %v12234_v9 = vld [vmem:[#allocation7_spill] sm:$0xff]  ;;  %v12235_v4 = vld [vmem:[#allocation8_spill] sm:$0xff] }
 0xaef   :  { %8848 = vtanh.f32 %v10547_v31  ;;  %v3529_v42 = vadd.f32 1.0, %v8847_v61  ;;  %v12236_v61 = vld [vmem:[#allocation9_spill] sm:$0xff] }
 0xaf0   :  { %8850 = vtanh.f32 %v10549_v26  ;;  %v3532_v20 = vmul.f32 0.5, %v3530_v62  ;;  %v12237_v62 = vld [vmem:[#allocation10_spill] sm:$0xff] }
 0xaf1   :  { %v3531_v10 = vmul.f32 0.5, %v3529_v42  ;;  %v12238_v42 = vld [vmem:[#allocation11_spill] sm:$0xff] }
 0xaf9   :  { %v8849_v27 = vpop.eup %8848 }
 0xafa   :  { %v8851_v5 = vpop.eup %8850  ;;  %v3541_v1 = vmul.f32 %v8849_v27, %v3531_v10  ;;  %v12239_v27 = vld [vmem:[#allocation12_spill] sm:$0xff]  ;;  %v12242_v10 = vld [vmem:[#allocation15_spill] sm:$0xff] }
 0xafb   :  { %v3542_v22 = vmul.f32 %v8851_v5, %v3532_v20  ;;  %v12240_v20 = vld [vmem:[#allocation13_spill] sm:$0xff]  ;;  %v12241_v5 = vld [vmem:[#allocation14_spill] sm:$0xff] }
 0xafd   :  { %5741 = vmatprep.mubr.msk.f32.mxu0 %vm379_vm0, %v3542_v22  ;;  %5742 = vmatprep.mubr.msk.f32.mxu1 %vm379_vm0, %v3542_v22 }
 0xafe   :  { %3634 = vmatmul.mubr.f32.vlgmr.msra.gmra.mrb[36].mxu0 %v3541_v1  ;;  %3705 = vmatmul.mubr.f32.vlgmr.msra.gmra.mrb[36].mxu1 %v3541_v1 }
 0xaff   :  { %7597 = vmatpush1.bf16.msra.mxu0 %v11631_v25  ;;  %7645 = vmatpush1.bf16.msra.mxu1 %v11632_v24 }
 0xb00   :  { %5743 = vmatprep.mubr.msk.f32.mxu0 %vm379_vm0, %v3542_v22  ;;  %5744 = vmatprep.mubr.msk.f32.mxu1 %vm379_vm0, %v3542_v22  ;;  %v12243_v22 = vld [vmem:[#allocation16_spill] sm:$0xff] }
 0xb01   :  { %7599 = vmatprep.subr.bf16.mxu0 %v11633_v53  ;;  %7647 = vmatprep.subr.bf16.mxu1 %v11634_v43 }
 0xb03   :  { %7601 = vmatpush1.bf16.msra.mxu0 %v11635_v3  ;;  %7649 = vmatpush1.bf16.msra.mxu1 %v11636_v58 }
 0xb04   :  { %7603 = vmatprep.subr.bf16.mxu0 %v11637_v57  ;;  %7651 = vmatprep.subr.bf16.mxu1 %v11638_v47 }
 0xb07   :  { %7605 = vmatpush1.bf16.msra.mxu0 %v11639_v14  ;;  %7653 = vmatpush1.bf16.msra.mxu1 %v11640_v35 }
 0xb08   :  { %7607 = vmatprep.subr.bf16.mxu0 %v11703_v33  ;;  %7655 = vmatprep.subr.bf16.mxu1 %v11704_v54 }
 0xb0b   :  { %7609 = vmatpush1.bf16.msra.mxu0 %v11705_v40  ;;  %7657 = vmatpush1.bf16.msra.mxu1 %v11706_v41 }
 0xb0c   :  { %7611 = vmatprep.subr.bf16.mxu0 %v11707_v32  ;;  %7659 = vmatprep.subr.bf16.mxu1 %v11708_v63 }
 0xb0f   :  { %7613 = vmatpush1.bf16.msra.mxu0 %v11709_v38  ;;  %7661 = vmatpush1.bf16.msra.mxu1 %v11710_v37 }
 0xb10   :  { %7615 = vmatprep.subr.bf16.mxu0 %v11711_v23  ;;  %7663 = vmatprep.subr.bf16.mxu1 %v11712_v18 }
 0xb13   :  { %7617 = vmatpush1.bf16.msra.mxu0 %v11713_v17  ;;  %7665 = vmatpush1.bf16.msra.mxu1 %v11714_v28 }
 0xb14   :  { %7619 = vmatprep.subr.bf16.mxu0 %v11715_v55  ;;  %7667 = vmatprep.subr.bf16.mxu1 %v11654_v16 }
 0xb17   :  { %7621 = vmatpush1.bf16.msra.mxu0 %v11655_v6  ;;  %7669 = vmatpush1.bf16.msra.mxu1 %v11656_v12 }
 0xb18   :  { %7623 = vmatprep.subr.bf16.mxu0 %v11657_v46  ;;  %7671 = vmatprep.subr.bf16.mxu1 %v11658_v48 }
 0xb1b   :  { %7625 = vmatpush1.bf16.msra.mxu0 %v11659_v51  ;;  %7673 = vmatpush1.bf16.msra.mxu1 %v11660_v49 }
 0xb1c   :  { %7627 = vmatprep.subr.bf16.mxu0 %v11661_v11  ;;  %7675 = vmatprep.subr.bf16.mxu1 %v11662_v56 }
 0xb1f   :  { %7629 = vmatpush1.bf16.msra.mxu0 %v11663_v19  ;;  %7677 = vmatpush1.bf16.msra.mxu1 %v11777_v21 }
 0xb20   :  { %7631 = vmatprep.subr.bf16.mxu0 %v12221_v7  ;;  %7679 = vmatprep.subr.bf16.mxu1 %v12222_v13 }
 0xb23   :  { %7633 = vmatpush1.bf16.msra.mxu0 %v12223_v60  ;;  %7681 = vmatpush1.bf16.msra.mxu1 %v12224_v44 }
 0xb24   :  { %7635 = vmatprep.subr.bf16.mxu0 %v12225_v50  ;;  %7683 = vmatprep.subr.bf16.mxu1 %v12226_v52 }
 0xb27   :  { %7637 = vmatpush1.bf16.msra.mxu0 %v12227_v29  ;;  %7685 = vmatpush1.bf16.msra.mxu1 %v12228_v34 }
 0xb28   :  { %7639 = vmatprep.subr.bf16.mxu0 %v12229_v39  ;;  %7687 = vmatprep.subr.bf16.mxu1 %v12230_v59 }
 0xb2b   :  { %7641 = vmatpush1.bf16.msra.mxu0 %v12231_v2  ;;  %7689 = vmatpush1.bf16.msra.mxu1 %v12232_v8  ;;  %v3548_v8 = vpop.permute.xlu0 %3547 }
 0xb2c   :  { %7691 = vmatprep.subr.bf16.mxu0 %v12233_v30  ;;  %7739 = vmatprep.subr.bf16.mxu1 %v12234_v9  ;;  %v12244_v9 = vld [vmem:[#allocation17_spill] sm:$0xff] }
 0xb2e   :  { %3776 = vmatmul.mubr.f32.vlgmr.msra.gmra.mrb[38].mxu0 %v3541_v1  ;;  %3847 = vmatmul.mubr.f32.vlgmr.msra.gmra.mrb[38].mxu1 %v3541_v1  ;;  %v12245_v1 = vld [vmem:[#allocation18_spill] sm:$0xff] }
 0xb2f   :  { %7693 = vmatpush1.bf16.msra.mxu0 %v12235_v4  ;;  %7741 = vmatpush1.bf16.msra.mxu1 %v12236_v61  ;;  %v12246_v4 = vld [vmem:[#allocation19_spill] sm:$0xff]  ;;  %v12247_v61 = vld [vmem:[#allocation20_spill] sm:$0xff] }
 0xb30   :  { %7695 = vmatprep.subr.bf16.mxu0 %v12237_v62  ;;  %7743 = vmatprep.subr.bf16.mxu1 %v12238_v42  ;;  %v12248_v62 = vld [vmem:[#allocation21_spill] sm:$0xff]  ;;  %v12249_v42 = vld [vmem:[#allocation22_spill] sm:$0xff] }
 0xb33   :  { %7697 = vmatpush1.bf16.msra.mxu0 %v12239_v27  ;;  %7745 = vmatpush1.bf16.msra.mxu1 %v12240_v20  ;;  %v12250_v27 = vld [vmem:[#allocation24_spill] sm:$0xff] }
 0xb34   :  { %7699 = vmatprep.subr.bf16.mxu0 %v12241_v5  ;;  %7747 = vmatprep.subr.bf16.mxu1 %v12242_v10  ;;  %v12251_v20 = vld [vmem:[#allocation28_spill] sm:$0xff]  ;;  %v12252_v5 = vld [vmem:[#allocation29_spill] sm:$0xff]  ;;  %v12253_v10 = vld [vmem:[#allocation30_spill] sm:$0xff] }
 0xb37   :  { %7701 = vmatpush1.bf16.msra.mxu0 %v12243_v22  ;;  %7749 = vmatpush1.bf16.msra.mxu1 %v12244_v9  ;;  %v12254_v22 = vld [vmem:[#allocation31_spill] sm:$0xff]  ;;  %v12255_v9 = vld [vmem:[#allocation32_spill] sm:$0xff] }
 0xb38   :  { %7703 = vmatprep.subr.bf16.mxu0 %v12245_v1  ;;  %7751 = vmatprep.subr.bf16.mxu1 %v12246_v4  ;;  %v12256_v1 = vld [vmem:[#allocation33_spill] sm:$0xff]  ;;  %v12257_v4 = vld [vmem:[#allocation34_spill] sm:$0xff] }
 0xb3b   :  { %7705 = vmatpush1.bf16.msra.mxu0 %v12247_v61  ;;  %7753 = vmatpush1.bf16.msra.mxu1 %v12248_v62  ;;  %v12258_v61 = vld [vmem:[#allocation35_spill] sm:$0xff]  ;;  %v12259_v62 = vld [vmem:[#allocation36_spill] sm:$0xff] }
 0xb3c   :  { %7707 = vmatprep.subr.bf16.mxu0 %v12249_v42  ;;  %7755 = vmatprep.subr.bf16.mxu1 %v12250_v27  ;;  %v12260_v42 = vld [vmem:[#allocation37_spill] sm:$0xff]  ;;  %v12261_v27 = vld [vmem:[#allocation38_spill] sm:$0xff] }
 0xb3f   :  { %7709 = vmatpush1.bf16.msra.mxu0 %v12251_v20  ;;  %7757 = vmatpush1.bf16.msra.mxu1 %v12252_v5  ;;  %v12262_v20 = vld [vmem:[#allocation39_spill] sm:$0xff]  ;;  %v12263_v5 = vld [vmem:[#allocation40_spill] sm:$0xff] }
 0xb40   :  { %7711 = vmatprep.subr.bf16.mxu0 %v12253_v10  ;;  %7759 = vmatprep.subr.bf16.mxu1 %v12254_v22  ;;  %v12264_v10 = vld [vmem:[#allocation41_spill] sm:$0xff]  ;;  %v12265_v22 = vld [vmem:[#allocation42_spill] sm:$0xff] }
 0xb43   :  { %7713 = vmatpush1.bf16.msra.mxu0 %v12255_v9  ;;  %7761 = vmatpush1.bf16.msra.mxu1 %v12256_v1  ;;  %v12266_v9 = vld [vmem:[#allocation43_spill] sm:$0xff]  ;;  %v12267_v1 = vld [vmem:[#allocation44_spill] sm:$0xff] }
 0xb44   :  { %7715 = vmatprep.subr.bf16.mxu0 %v12257_v4  ;;  %7763 = vmatprep.subr.bf16.mxu1 %v12258_v61  ;;  %v12268_v4 = vld [vmem:[#allocation45_spill] sm:$0xff]  ;;  %v12269_v61 = vld [vmem:[#allocation46_spill] sm:$0xff] }
 0xb47   :  { %7717 = vmatpush1.bf16.msra.mxu0 %v12259_v62  ;;  %7765 = vmatpush1.bf16.msra.mxu1 %v12260_v42  ;;  %v12270_v62 = vld [vmem:[#allocation47_spill] sm:$0xff]  ;;  %v12271_v42 = vld [vmem:[#allocation48_spill] sm:$0xff] }
 0xb48   :  { %7719 = vmatprep.subr.bf16.mxu0 %v12261_v27  ;;  %7767 = vmatprep.subr.bf16.mxu1 %v12262_v20  ;;  %v12272_v27 = vld [vmem:[#allocation49_spill] sm:$0xff]  ;;  %v12273_v20 = vld [vmem:[#allocation50_spill] sm:$0xff] }
 0xb4b   :  { %7721 = vmatpush1.bf16.msra.mxu0 %v12263_v5  ;;  %7769 = vmatpush1.bf16.msra.mxu1 %v12264_v10  ;;  %v12274_v5 = vld [vmem:[#allocation51_spill] sm:$0xff]  ;;  %v12275_v10 = vld [vmem:[#allocation52_spill] sm:$0xff] }
 0xb4c   :  { %7723 = vmatprep.subr.bf16.mxu0 %v12265_v22  ;;  %7771 = vmatprep.subr.bf16.mxu1 %v12266_v9  ;;  %v12276_v22 = vld [vmem:[#allocation53_spill] sm:$0xff]  ;;  %v12277_v9 = vld [vmem:[#allocation54_spill] sm:$0xff] }
 0xb4f   :  { %7725 = vmatpush1.bf16.msra.mxu0 %v12267_v1  ;;  %7773 = vmatpush1.bf16.msra.mxu1 %v12268_v4  ;;  %v12278_v1 = vld [vmem:[#allocation55_spill] sm:$0xff]  ;;  %v12279_v4 = vld [vmem:[#allocation56_spill] sm:$0xff] }
 0xb50   :  { %7727 = vmatprep.subr.bf16.mxu0 %v12269_v61  ;;  %7775 = vmatprep.subr.bf16.mxu1 %v12270_v62  ;;  %v12280_v61 = vld [vmem:[#allocation57_spill] sm:$0xff]  ;;  %v12281_v62 = vld [vmem:[#allocation58_spill] sm:$0xff] }
 0xb53   :  { %7729 = vmatpush1.bf16.msra.mxu0 %v12271_v42  ;;  %7777 = vmatpush1.bf16.msra.mxu1 %v12272_v27  ;;  %v12282_v42 = vld [vmem:[#allocation59_spill] sm:$0xff] }
 0xb54   :  { %7731 = vmatprep.subr.bf16.mxu0 %v12273_v20  ;;  %7779 = vmatprep.subr.bf16.mxu1 %v12274_v5 }
 0xb57   :  { %7733 = vmatpush1.bf16.msra.mxu0 %v12275_v10  ;;  %7781 = vmatpush1.bf16.msra.mxu1 %v12276_v22  ;;  %v12283_v10 = vld [vmem:[#allocation23_spill] sm:$0xff]  ;;  %v12284_v22 = vld [vmem:[#allocation26_spill] sm:$0xff] }
 0xb58   :  { %7735 = vmatprep.subr.bf16.mxu0 %v12277_v9  ;;  %7783 = vmatprep.subr.bf16.mxu1 %v12278_v1  ;;  %v3552_v2 = vmul.f32 %v3548_v8, %v12283_v10  ;;  %v3553_v59 = vmul.f32 %v3548_v8, %v12284_v22  ;;  %v12285_v9 = vld [vmem:[#allocation62_spill] sm:$0xff]  ;;  %v12286_v1 = vld [vmem:[#allocation63_spill] sm:$0xff] }
 0xb59   :  { %v3550_v39 = vmul.f32 %v3548_v8, %v12285_v9  ;;  %v3551_v34 = vmul.f32 %v3548_v8, %v12286_v1  ;;  %v12288_v1 = vld [vmem:[#allocation64_spill] sm:$0xff] }
 0xb5a   :  { %v3554_v9 = vmul.f32 %v3548_v8, %v12288_v1 }
 0xb5b   :  { %7737 = vmatpush1.bf16.msra.mxu0 %v12279_v4  ;;  %7785 = vmatpush1.bf16.msra.mxu1 %v12280_v61  ;;  %v3560_v4 = vadd.f32 %v3552_v2, %v11618_v36  ;;  %v12287_v61 = vld [vmem:[#allocation27_spill] sm:$0xff]  ;;  %v3559_v52 = vadd.f32 %v3551_v34, %v11695_v0  ;;  %v12292_v34 = vld [vmem:[#allocation70_spill] sm:$0xff] }
 0xb5c   :  { %7787 = vmatprep.subr.bf16.mxu0 %v12281_v62  ;;  %7835 = vmatprep.subr.bf16.mxu1 %v12282_v42  ;;  %v3561_v29 = vadd.f32 %v3553_v59, %v12287_v61  ;;  %v3558_v62 = vadd.f32 %v3550_v39, %v11770_v45  ;;  %v12289_v2 = vld [vmem:[#allocation67_spill] sm:$0xff]  ;;  %v12290_v61 = vld [vmem:[#allocation69_spill] sm:$0xff] }
 0xb5d   :  { %v3555_v59 = vmul.f32 %v3548_v8, %v12289_v2  ;;  %v3557_v39 = vmul.f32 %v3548_v8, %v12290_v61 }
 0xbd1   :  { %v3635_v27 = vpop.f32.mrb[36].mxu0  ;;  %v3706_v20 = vpop.f32.mrb[36].mxu1 }
 0xbd2   :  { %v3637_v30 = vpop.f32.mrb[37].mxu0  ;;  %v3708_v5 = vpop.f32.mrb[37].mxu1  ;;  %v3855_v42 = vadd.f32 %v3706_v20, %v3560_v4  ;;  %v3853_v44 = vadd.f32 %v3635_v27, %v3558_v62  ;;  %v12291_v4 = vld [vmem:[#allocation68_spill] sm:$0xff] }
 0xbd3   :  { %v3856_v50 = vadd.f32 %v3708_v5, %v3561_v29  ;;  %v3854_v60 = vadd.f32 %v3637_v30, %v3559_v52  ;;  %v3556_v20 = vmul.f32 %v3548_v8, %v12291_v4  ;;  %v3562_v29 = vadd.f32 %v3554_v9, %v12292_v34  ;;  %v12293_v30 = vld [vmem:[#allocation71_spill] sm:$0xff] }
 0xbd4   :  { %v3869_v13 = vmul.f32 0.5, %v3855_v42  ;;  %v3861_v7 = vmul.f32 0.5, %v3853_v44 }
 0xbd5   :  { %v3870_v10 = vmul.f32 0.5, %v3856_v50  ;;  %v3862_v22 = vmul.f32 0.5, %v3854_v60  ;;  %v3563_v50 = vadd.f32 %v3555_v59, %v12293_v30  ;;  %v3564_v27 = vadd.f32 %v3556_v20, %v11628_v15 }
 0xbd6   :  { %8852 = vtanh.f32 %v3869_v13  ;;  %v12294_v13 = vld [vmem:[#allocation73_spill] sm:$0xff] }
 0xbd7   :  { %8854 = vtanh.f32 %v3870_v10  ;;  %v3565_v42 = vadd.f32 %v3557_v39, %v12294_v13 }
 0xbd8   :  { %8856 = vtanh.f32 %v3861_v7 }
 0xbd9   :  { %8858 = vtanh.f32 %v3862_v22 }
 0xbe0   :  { %v8853_v10 = vpop.eup %8852 }
 0xbe1   :  { %v8855_v61 = vpop.eup %8854  ;;  %v3873_v34 = vadd.f32 1.0, %v8853_v10 }
 0xbe2   :  { %v8857_v8 = vpop.eup %8856  ;;  %v3874_v4 = vadd.f32 1.0, %v8855_v61 }
 0xbe3   :  { %v8859_v9 = vpop.eup %8858  ;;  %v3865_v59 = vadd.f32 1.0, %v8857_v8  ;;  %v3875_v30 = vmul.f32 0.5, %v3873_v34  ;;  %v12296_v8 = vld [vmem:[#allocation111_spill] sm:$0xff] }
 0xbe4   :  { %v3876_v39 = vmul.f32 0.5, %v3874_v4 }
 0xbe5   :  { %v3867_v13 = vmul.f32 0.5, %v3865_v59  ;;  %v12298_v59 = vld [vmem:[#allocation113_spill] sm:$0xff] }
 0xc01   :  { %v3777_v62 = vpop.f32.mrb[38].mxu0  ;;  %v3848_v52 = vpop.f32.mrb[38].mxu1 }
 0xc02   :  { %v3857_v44 = vadd.f32 %v3777_v62, %v3562_v29  ;;  %v3779_v60 = vpop.f32.mrb[39].mxu0  ;;  %v3850_v7 = vpop.f32.mrb[39].mxu1  ;;  %v3859_v2 = vadd.f32 %v3848_v52, %v3564_v27  ;;  %v3866_v62 = vadd.f32 1.0, %v8859_v9  ;;  %v12297_v9 = vld [vmem:[#allocation112_spill] sm:$0xff] }
 0xc03   :  { %v3858_v5 = vadd.f32 %v3779_v60, %v3563_v50  ;;  %v3860_v22 = vadd.f32 %v3850_v7, %v3565_v42  ;;  %v3887_v60 = vmul.f32 %v3875_v30, %v10547_v31  ;;  %v3888_v42 = vmul.f32 %v3876_v39, %v10549_v26  ;;  %v12295_v26 = vld [vmem:[#allocation110_spill] sm:$0xff]  ;;  %v12301_v39 = vld [vmem:[#allocation116_spill] sm:$0xff] }
 0xc04   :  { %8860 = vtanh.f32 %v3857_v44  ;;  %v3879_v29 = vmul.f32 0.5, %v3859_v2  ;;  %v3868_v50 = vmul.f32 0.5, %v3866_v62  ;;  %v12300_v62 = vld [vmem:[#allocation115_spill] sm:$0xff] }
 0xc05   :  { %8862 = vtanh.f32 %v3858_v5  ;;  %v3880_v1 = vmul.f32 0.5, %v3860_v22 }
 0xc07   :  { %8864 = vtanh.f32 %v3880_v1 }
 0xc08   :  { %8866 = vtanh.f32 %v3879_v29  ;;  %v12299_v29 = vld [vmem:[#allocation114_spill] sm:$0xff] }
 0xc0e   :  { %v8861_v20 = vpop.eup %8860 }
 0xc0f   :  { %v8863_v44 = vpop.eup %8862  ;;  %v3889_v52 = vmul.f32 %v8861_v20, %v3867_v13  ;;  %v12302_v20 = vld [vmem:[#allocation117_spill] sm:$0xff] }
 0xc10   :  { %v3890_v7 = vmul.f32 %v8863_v44, %v3868_v50  ;;  %v12303_v50 = vld [vmem:[#allocation118_spill] sm:$0xff]  ;;  %v12304_v44 = vld [vmem:[#allocation119_spill] sm:$0xff] }
 0xc11   :  { %v10671_v27 = vadd.f32 %v3889_v52, %v3887_v60  ;;  %v8865_v1 = vpop.eup %8864  ;;  %v12305_v60 = vld [vmem:[#allocation120_spill] sm:$0xff]  ;;  %v12306_v52 = vld [vmem:[#allocation121_spill] sm:$0xff] }
 0xc12   :  { %v10673_v61 = vadd.f32 %v3890_v7, %v3888_v42  ;;  %v8867_v2 = vpop.eup %8866  ;;  %v3884_v4 = vadd.f32 1.0, %v8865_v1  ;;  %v12307_v42 = vld [vmem:[#allocation6_spill] sm:$0xff]  ;;  %v12308_v7 = vld [vmem:[#allocation7_spill] sm:$0xff]  ;;  %v12309_v1 = vld [vmem:[#allocation8_spill] sm:$0xff] }
 0xc13   :  { %8868 = vtanh.f32 %v10671_v27  ;;  %v3883_v34 = vadd.f32 1.0, %v8867_v2  ;;  %v12310_v2 = vld [vmem:[#allocation9_spill] sm:$0xff] }
 0xc14   :  { %8870 = vtanh.f32 %v10673_v61  ;;  %v3886_v10 = vmul.f32 0.5, %v3884_v4  ;;  %v12311_v4 = vld [vmem:[#allocation10_spill] sm:$0xff] }
 0xc15   :  { %v3885_v31 = vmul.f32 0.5, %v3883_v34  ;;  %v12312_v34 = vld [vmem:[#allocation11_spill] sm:$0xff] }
 0xc1d   :  { %v8869_v5 = vpop.eup %8868 }
 0xc1e   :  { %v8871_v22 = vpop.eup %8870  ;;  %v3895_v13 = vmul.f32 %v8869_v5, %v3885_v31  ;;  %v12313_v5 = vld [vmem:[#allocation12_spill] sm:$0xff]  ;;  %v12316_v31 = vld [vmem:[#allocation15_spill] sm:$0xff] }
 0xc1f   :  { %v3896_v30 = vmul.f32 %v8871_v22, %v3886_v10  ;;  %v12314_v10 = vld [vmem:[#allocation13_spill] sm:$0xff]  ;;  %v12315_v22 = vld [vmem:[#allocation14_spill] sm:$0xff] }
 0xc21   :  { %5746 = vmatprep.mubr.msk.f32.mxu0 %vm379_vm0, %v3896_v30  ;;  %5747 = vmatprep.mubr.msk.f32.mxu1 %vm379_vm0, %v3896_v30 }
 0xc22   :  { %3988 = vmatmul.mubr.f32.vlgmr.msra.gmra.mrb[40].mxu0 %v3895_v13  ;;  %4059 = vmatmul.mubr.f32.vlgmr.msra.gmra.mrb[40].mxu1 %v3895_v13 }
 0xc23   :  { %7789 = vmatpush1.bf16.msra.mxu0 %v11631_v25  ;;  %7837 = vmatpush1.bf16.msra.mxu1 %v11632_v24 }
 0xc24   :  { %5748 = vmatprep.mubr.msk.f32.mxu0 %vm379_vm0, %v3896_v30  ;;  %5749 = vmatprep.mubr.msk.f32.mxu1 %vm379_vm0, %v3896_v30  ;;  %v12317_v30 = vld [vmem:[#allocation16_spill] sm:$0xff] }
 0xc25   :  { %7791 = vmatprep.subr.bf16.mxu0 %v11633_v53  ;;  %7839 = vmatprep.subr.bf16.mxu1 %v11634_v43 }
 0xc27   :  { %7793 = vmatpush1.bf16.msra.mxu0 %v11635_v3  ;;  %7841 = vmatpush1.bf16.msra.mxu1 %v11636_v58 }
 0xc28   :  { %7795 = vmatprep.subr.bf16.mxu0 %v11637_v57  ;;  %7843 = vmatprep.subr.bf16.mxu1 %v11638_v47 }
 0xc2b   :  { %7797 = vmatpush1.bf16.msra.mxu0 %v11639_v14  ;;  %7845 = vmatpush1.bf16.msra.mxu1 %v11640_v35 }
 0xc2c   :  { %7799 = vmatprep.subr.bf16.mxu0 %v11703_v33  ;;  %7847 = vmatprep.subr.bf16.mxu1 %v11704_v54 }
 0xc2f   :  { %7801 = vmatpush1.bf16.msra.mxu0 %v11705_v40  ;;  %7849 = vmatpush1.bf16.msra.mxu1 %v11706_v41 }
 0xc30   :  { %7803 = vmatprep.subr.bf16.mxu0 %v11707_v32  ;;  %7851 = vmatprep.subr.bf16.mxu1 %v11708_v63 }
 0xc33   :  { %7805 = vmatpush1.bf16.msra.mxu0 %v11709_v38  ;;  %7853 = vmatpush1.bf16.msra.mxu1 %v11710_v37 }
 0xc34   :  { %7807 = vmatprep.subr.bf16.mxu0 %v11711_v23  ;;  %7855 = vmatprep.subr.bf16.mxu1 %v11712_v18 }
 0xc37   :  { %7809 = vmatpush1.bf16.msra.mxu0 %v11713_v17  ;;  %7857 = vmatpush1.bf16.msra.mxu1 %v11714_v28 }
 0xc38   :  { %7811 = vmatprep.subr.bf16.mxu0 %v11715_v55  ;;  %7859 = vmatprep.subr.bf16.mxu1 %v11654_v16 }
 0xc3b   :  { %7813 = vmatpush1.bf16.msra.mxu0 %v11655_v6  ;;  %7861 = vmatpush1.bf16.msra.mxu1 %v11656_v12 }
 0xc3c   :  { %7815 = vmatprep.subr.bf16.mxu0 %v11657_v46  ;;  %7863 = vmatprep.subr.bf16.mxu1 %v11658_v48 }
 0xc3f   :  { %7817 = vmatpush1.bf16.msra.mxu0 %v11659_v51  ;;  %7865 = vmatpush1.bf16.msra.mxu1 %v11660_v49 }
 0xc40   :  { %7819 = vmatprep.subr.bf16.mxu0 %v11661_v11  ;;  %7867 = vmatprep.subr.bf16.mxu1 %v11662_v56 }
 0xc43   :  { %7821 = vmatpush1.bf16.msra.mxu0 %v11663_v19  ;;  %7869 = vmatpush1.bf16.msra.mxu1 %v11777_v21 }
 0xc44   :  { %7823 = vmatprep.subr.bf16.mxu0 %v12295_v26  ;;  %7871 = vmatprep.subr.bf16.mxu1 %v12296_v8 }
 0xc47   :  { %7825 = vmatpush1.bf16.msra.mxu0 %v12297_v9  ;;  %7873 = vmatpush1.bf16.msra.mxu1 %v12298_v59 }
 0xc48   :  { %7827 = vmatprep.subr.bf16.mxu0 %v12299_v29  ;;  %7875 = vmatprep.subr.bf16.mxu1 %v12300_v62 }
 0xc4b   :  { %7829 = vmatpush1.bf16.msra.mxu0 %v12301_v39  ;;  %7877 = vmatpush1.bf16.msra.mxu1 %v12302_v20 }
 0xc4c   :  { %7831 = vmatprep.subr.bf16.mxu0 %v12303_v50  ;;  %7879 = vmatprep.subr.bf16.mxu1 %v12304_v44 }
 0xc4f   :  { %7833 = vmatpush1.bf16.msra.mxu0 %v12305_v60  ;;  %7881 = vmatpush1.bf16.msra.mxu1 %v12306_v52  ;;  %v3902_v52 = vpop.permute.xlu1 %3901 }
 0xc50   :  { %7883 = vmatprep.subr.bf16.mxu0 %v12307_v42  ;;  %7931 = vmatprep.subr.bf16.mxu1 %v12308_v7  ;;  %v12318_v7 = vld [vmem:[#allocation17_spill] sm:$0xff] }
 0xc52   :  { %4130 = vmatmul.mubr.f32.vlgmr.msra.gmra.mrb[42].mxu0 %v3895_v13  ;;  %4201 = vmatmul.mubr.f32.vlgmr.msra.gmra.mrb[42].mxu1 %v3895_v13  ;;  %v12319_v13 = vld [vmem:[#allocation18_spill] sm:$0xff] }
 0xc53   :  { %7885 = vmatpush1.bf16.msra.mxu0 %v12309_v1  ;;  %7933 = vmatpush1.bf16.msra.mxu1 %v12310_v2  ;;  %v12320_v1 = vld [vmem:[#allocation19_spill] sm:$0xff]  ;;  %v12321_v2 = vld [vmem:[#allocation20_spill] sm:$0xff] }
 0xc54   :  { %7887 = vmatprep.subr.bf16.mxu0 %v12311_v4  ;;  %7935 = vmatprep.subr.bf16.mxu1 %v12312_v34  ;;  %v12322_v4 = vld [vmem:[#allocation21_spill] sm:$0xff]  ;;  %v12323_v34 = vld [vmem:[#allocation22_spill] sm:$0xff] }
 0xc57   :  { %7889 = vmatpush1.bf16.msra.mxu0 %v12313_v5  ;;  %7937 = vmatpush1.bf16.msra.mxu1 %v12314_v10  ;;  %v12324_v5 = vld [vmem:[#allocation24_spill] sm:$0xff] }
 0xc58   :  { %7891 = vmatprep.subr.bf16.mxu0 %v12315_v22  ;;  %7939 = vmatprep.subr.bf16.mxu1 %v12316_v31  ;;  %v12325_v10 = vld [vmem:[#allocation28_spill] sm:$0xff]  ;;  %v12326_v22 = vld [vmem:[#allocation29_spill] sm:$0xff]  ;;  %v12327_v31 = vld [vmem:[#allocation30_spill] sm:$0xff] }
 0xc5b   :  { %7893 = vmatpush1.bf16.msra.mxu0 %v12317_v30  ;;  %7941 = vmatpush1.bf16.msra.mxu1 %v12318_v7  ;;  %v12328_v30 = vld [vmem:[#allocation31_spill] sm:$0xff]  ;;  %v12329_v7 = vld [vmem:[#allocation32_spill] sm:$0xff] }
 0xc5c   :  { %7895 = vmatprep.subr.bf16.mxu0 %v12319_v13  ;;  %7943 = vmatprep.subr.bf16.mxu1 %v12320_v1  ;;  %v12330_v13 = vld [vmem:[#allocation33_spill] sm:$0xff]  ;;  %v12331_v1 = vld [vmem:[#allocation34_spill] sm:$0xff] }
 0xc5f   :  { %7897 = vmatpush1.bf16.msra.mxu0 %v12321_v2  ;;  %7945 = vmatpush1.bf16.msra.mxu1 %v12322_v4  ;;  %v12332_v2 = vld [vmem:[#allocation35_spill] sm:$0xff]  ;;  %v12333_v4 = vld [vmem:[#allocation36_spill] sm:$0xff] }
 0xc60   :  { %7899 = vmatprep.subr.bf16.mxu0 %v12323_v34  ;;  %7947 = vmatprep.subr.bf16.mxu1 %v12324_v5  ;;  %v12334_v34 = vld [vmem:[#allocation37_spill] sm:$0xff]  ;;  %v12335_v5 = vld [vmem:[#allocation38_spill] sm:$0xff] }
 0xc63   :  { %7901 = vmatpush1.bf16.msra.mxu0 %v12325_v10  ;;  %7949 = vmatpush1.bf16.msra.mxu1 %v12326_v22  ;;  %v12336_v10 = vld [vmem:[#allocation39_spill] sm:$0xff]  ;;  %v12337_v22 = vld [vmem:[#allocation40_spill] sm:$0xff] }
 0xc64   :  { %7903 = vmatprep.subr.bf16.mxu0 %v12327_v31  ;;  %7951 = vmatprep.subr.bf16.mxu1 %v12328_v30  ;;  %v12338_v31 = vld [vmem:[#allocation41_spill] sm:$0xff]  ;;  %v12339_v30 = vld [vmem:[#allocation42_spill] sm:$0xff] }
 0xc67   :  { %7905 = vmatpush1.bf16.msra.mxu0 %v12329_v7  ;;  %7953 = vmatpush1.bf16.msra.mxu1 %v12330_v13  ;;  %v12340_v7 = vld [vmem:[#allocation43_spill] sm:$0xff]  ;;  %v12341_v13 = vld [vmem:[#allocation44_spill] sm:$0xff] }
 0xc68   :  { %7907 = vmatprep.subr.bf16.mxu0 %v12331_v1  ;;  %7955 = vmatprep.subr.bf16.mxu1 %v12332_v2  ;;  %v12342_v1 = vld [vmem:[#allocation45_spill] sm:$0xff]  ;;  %v12343_v2 = vld [vmem:[#allocation46_spill] sm:$0xff] }
 0xc6b   :  { %7909 = vmatpush1.bf16.msra.mxu0 %v12333_v4  ;;  %7957 = vmatpush1.bf16.msra.mxu1 %v12334_v34  ;;  %v12344_v4 = vld [vmem:[#allocation47_spill] sm:$0xff]  ;;  %v12345_v34 = vld [vmem:[#allocation48_spill] sm:$0xff] }
 0xc6c   :  { %7911 = vmatprep.subr.bf16.mxu0 %v12335_v5  ;;  %7959 = vmatprep.subr.bf16.mxu1 %v12336_v10  ;;  %v12346_v5 = vld [vmem:[#allocation49_spill] sm:$0xff]  ;;  %v12347_v10 = vld [vmem:[#allocation50_spill] sm:$0xff] }
 0xc6f   :  { %7913 = vmatpush1.bf16.msra.mxu0 %v12337_v22  ;;  %7961 = vmatpush1.bf16.msra.mxu1 %v12338_v31  ;;  %v12348_v22 = vld [vmem:[#allocation51_spill] sm:$0xff]  ;;  %v12349_v31 = vld [vmem:[#allocation52_spill] sm:$0xff] }
 0xc70   :  { %7915 = vmatprep.subr.bf16.mxu0 %v12339_v30  ;;  %7963 = vmatprep.subr.bf16.mxu1 %v12340_v7  ;;  %v12350_v30 = vld [vmem:[#allocation53_spill] sm:$0xff]  ;;  %v12351_v7 = vld [vmem:[#allocation54_spill] sm:$0xff] }
 0xc73   :  { %7917 = vmatpush1.bf16.msra.mxu0 %v12341_v13  ;;  %7965 = vmatpush1.bf16.msra.mxu1 %v12342_v1  ;;  %v12352_v13 = vld [vmem:[#allocation55_spill] sm:$0xff]  ;;  %v12353_v1 = vld [vmem:[#allocation56_spill] sm:$0xff] }
 0xc74   :  { %7919 = vmatprep.subr.bf16.mxu0 %v12343_v2  ;;  %7967 = vmatprep.subr.bf16.mxu1 %v12344_v4  ;;  %v12354_v2 = vld [vmem:[#allocation57_spill] sm:$0xff]  ;;  %v12355_v4 = vld [vmem:[#allocation58_spill] sm:$0xff] }
 0xc77   :  { %7921 = vmatpush1.bf16.msra.mxu0 %v12345_v34  ;;  %7969 = vmatpush1.bf16.msra.mxu1 %v12346_v5  ;;  %v12356_v34 = vld [vmem:[#allocation59_spill] sm:$0xff] }
 0xc78   :  { %7923 = vmatprep.subr.bf16.mxu0 %v12347_v10  ;;  %7971 = vmatprep.subr.bf16.mxu1 %v12348_v22 }
 0xc7b   :  { %7925 = vmatpush1.bf16.msra.mxu0 %v12349_v31  ;;  %7973 = vmatpush1.bf16.msra.mxu1 %v12350_v30  ;;  %v12357_v31 = vld [vmem:[#allocation23_spill] sm:$0xff]  ;;  %v12358_v30 = vld [vmem:[#allocation26_spill] sm:$0xff] }
 0xc7c   :  { %7927 = vmatprep.subr.bf16.mxu0 %v12351_v7  ;;  %7975 = vmatprep.subr.bf16.mxu1 %v12352_v13  ;;  %v3906_v60 = vmul.f32 %v3902_v52, %v12357_v31  ;;  %v3907_v44 = vmul.f32 %v3902_v52, %v12358_v30  ;;  %v12359_v7 = vld [vmem:[#allocation62_spill] sm:$0xff]  ;;  %v12360_v13 = vld [vmem:[#allocation63_spill] sm:$0xff] }
 0xc7d   :  { %v3904_v50 = vmul.f32 %v3902_v52, %v12359_v7  ;;  %v3905_v20 = vmul.f32 %v3902_v52, %v12360_v13  ;;  %v12362_v13 = vld [vmem:[#allocation64_spill] sm:$0xff] }
 0xc7e   :  { %v3908_v7 = vmul.f32 %v3902_v52, %v12362_v13 }
 0xc7f   :  { %7929 = vmatpush1.bf16.msra.mxu0 %v12353_v1  ;;  %7977 = vmatpush1.bf16.msra.mxu1 %v12354_v2  ;;  %v3914_v1 = vadd.f32 %v3906_v60, %v11618_v36  ;;  %v12361_v2 = vld [vmem:[#allocation27_spill] sm:$0xff]  ;;  %v3913_v62 = vadd.f32 %v3905_v20, %v11695_v0  ;;  %v12366_v20 = vld [vmem:[#allocation70_spill] sm:$0xff] }
 0xc80   :  { %7979 = vmatprep.subr.bf16.mxu0 %v12355_v4  ;;  %8027 = vmatprep.subr.bf16.mxu1 %v12356_v34  ;;  %v3915_v39 = vadd.f32 %v3907_v44, %v12361_v2  ;;  %v3912_v4 = vadd.f32 %v3904_v50, %v11770_v45  ;;  %v12363_v60 = vld [vmem:[#allocation67_spill] sm:$0xff]  ;;  %v12364_v2 = vld [vmem:[#allocation69_spill] sm:$0xff] }
 0xc81   :  { %v3909_v44 = vmul.f32 %v3902_v52, %v12363_v60  ;;  %v3911_v50 = vmul.f32 %v3902_v52, %v12364_v2 }
 0xcf5   :  { %v3989_v5 = vpop.f32.mrb[40].mxu0  ;;  %v4060_v10 = vpop.f32.mrb[40].mxu1 }
 0xcf6   :  { %v3991_v42 = vpop.f32.mrb[41].mxu0  ;;  %v4062_v22 = vpop.f32.mrb[41].mxu1  ;;  %v4209_v34 = vadd.f32 %v4060_v10, %v3914_v1  ;;  %v4207_v59 = vadd.f32 %v3989_v5, %v3912_v4  ;;  %v12365_v1 = vld [vmem:[#allocation68_spill] sm:$0xff] }
 0xcf7   :  { %v4210_v29 = vadd.f32 %v4062_v22, %v3915_v39  ;;  %v4208_v9 = vadd.f32 %v3991_v42, %v3913_v62  ;;  %v3910_v10 = vmul.f32 %v3902_v52, %v12365_v1  ;;  %v3916_v39 = vadd.f32 %v3908_v7, %v12366_v20  ;;  %v12367_v42 = vld [vmem:[#allocation71_spill] sm:$0xff] }
 0xcf8   :  { %v4223_v8 = vmul.f32 0.5, %v4209_v34  ;;  %v4215_v26 = vmul.f32 0.5, %v4207_v59 }
 0xcf9   :  { %v4224_v31 = vmul.f32 0.5, %v4210_v29  ;;  %v4216_v30 = vmul.f32 0.5, %v4208_v9  ;;  %v3917_v29 = vadd.f32 %v3909_v44, %v12367_v42  ;;  %v3918_v5 = vadd.f32 %v3910_v10, %v11628_v15 }
 0xcfa   :  { %8872 = vtanh.f32 %v4223_v8  ;;  %v12368_v8 = vld [vmem:[#allocation73_spill] sm:$0xff] }
 0xcfb   :  { %8874 = vtanh.f32 %v4224_v31  ;;  %v3919_v34 = vadd.f32 %v3911_v50, %v12368_v8 }
 0xcfc   :  { %8876 = vtanh.f32 %v4215_v26 }
 0xcfd   :  { %8878 = vtanh.f32 %v4216_v30 }
 0xd04   :  { %v8873_v31 = vpop.eup %8872 }
 0xd05   :  { %v8875_v2 = vpop.eup %8874  ;;  %v4227_v20 = vadd.f32 1.0, %v8873_v31 }
 0xd06   :  { %v8877_v52 = vpop.eup %8876  ;;  %v4228_v1 = vadd.f32 1.0, %v8875_v2 }
 0xd07   :  { %v8879_v7 = vpop.eup %8878  ;;  %v4219_v44 = vadd.f32 1.0, %v8877_v52  ;;  %v4229_v42 = vmul.f32 0.5, %v4227_v20  ;;  %v12370_v52 = vld [vmem:[#allocation111_spill] sm:$0xff] }
 0xd08   :  { %v4230_v50 = vmul.f32 0.5, %v4228_v1 }
 0xd09   :  { %v4221_v8 = vmul.f32 0.5, %v4219_v44  ;;  %v12372_v44 = vld [vmem:[#allocation113_spill] sm:$0xff] }
 0xd25   :  { %v4131_v4 = vpop.f32.mrb[42].mxu0  ;;  %v4202_v62 = vpop.f32.mrb[42].mxu1 }
 0xd26   :  { %v4211_v59 = vadd.f32 %v4131_v4, %v3916_v39  ;;  %v4133_v9 = vpop.f32.mrb[43].mxu0  ;;  %v4204_v26 = vpop.f32.mrb[43].mxu1  ;;  %v4213_v60 = vadd.f32 %v4202_v62, %v3918_v5  ;;  %v4220_v4 = vadd.f32 1.0, %v8879_v7  ;;  %v12371_v7 = vld [vmem:[#allocation112_spill] sm:$0xff] }
 0xd27   :  { %v4212_v22 = vadd.f32 %v4133_v9, %v3917_v29  ;;  %v4214_v30 = vadd.f32 %v4204_v26, %v3919_v34  ;;  %v4241_v9 = vmul.f32 %v4229_v42, %v10671_v27  ;;  %v4242_v34 = vmul.f32 %v4230_v50, %v10673_v61  ;;  %v12369_v61 = vld [vmem:[#allocation110_spill] sm:$0xff]  ;;  %v12375_v50 = vld [vmem:[#allocation116_spill] sm:$0xff] }
 0xd28   :  { %8880 = vtanh.f32 %v4211_v59  ;;  %v4233_v39 = vmul.f32 0.5, %v4213_v60  ;;  %v4222_v29 = vmul.f32 0.5, %v4220_v4  ;;  %v12374_v4 = vld [vmem:[#allocation115_spill] sm:$0xff] }
 0xd29   :  { %8882 = vtanh.f32 %v4212_v22  ;;  %v4234_v13 = vmul.f32 0.5, %v4214_v30 }
 0xd2b   :  { %8884 = vtanh.f32 %v4234_v13 }
 0xd2c   :  { %8886 = vtanh.f32 %v4233_v39  ;;  %v12373_v39 = vld [vmem:[#allocation114_spill] sm:$0xff] }
 0xd32   :  { %v8881_v10 = vpop.eup %8880 }
 0xd33   :  { %v8883_v59 = vpop.eup %8882  ;;  %v4243_v62 = vmul.f32 %v8881_v10, %v4221_v8  ;;  %v12376_v10 = vld [vmem:[#allocation117_spill] sm:$0xff] }
 0xd34   :  { %v4244_v26 = vmul.f32 %v8883_v59, %v4222_v29  ;;  %v12377_v29 = vld [vmem:[#allocation118_spill] sm:$0xff]  ;;  %v12378_v59 = vld [vmem:[#allocation119_spill] sm:$0xff] }
 0xd35   :  { %v10795_v5 = vadd.f32 %v4243_v62, %v4241_v9  ;;  %v8885_v13 = vpop.eup %8884  ;;  %v12379_v9 = vld [vmem:[#allocation120_spill] sm:$0xff]  ;;  %v12380_v62 = vld [vmem:[#allocation121_spill] sm:$0xff] }
 0xd36   :  { %v10797_v2 = vadd.f32 %v4244_v26, %v4242_v34  ;;  %v8887_v60 = vpop.eup %8886  ;;  %v4238_v1 = vadd.f32 1.0, %v8885_v13  ;;  %v12381_v34 = vld [vmem:[#allocation6_spill] sm:$0xff]  ;;  %v12382_v26 = vld [vmem:[#allocation7_spill] sm:$0xff]  ;;  %v12383_v13 = vld [vmem:[#allocation8_spill] sm:$0xff] }
 0xd37   :  { %8888 = vtanh.f32 %v10795_v5  ;;  %v4237_v20 = vadd.f32 1.0, %v8887_v60  ;;  %v12384_v60 = vld [vmem:[#allocation9_spill] sm:$0xff] }
 0xd38   :  { %8890 = vtanh.f32 %v10797_v2  ;;  %v4240_v31 = vmul.f32 0.5, %v4238_v1  ;;  %v12385_v1 = vld [vmem:[#allocation10_spill] sm:$0xff] }
 0xd39   :  { %v4239_v27 = vmul.f32 0.5, %v4237_v20  ;;  %v12386_v20 = vld [vmem:[#allocation11_spill] sm:$0xff] }
 0xd41   :  { %v8889_v22 = vpop.eup %8888 }
 0xd42   :  { %v8891_v30 = vpop.eup %8890  ;;  %v4249_v8 = vmul.f32 %v8889_v22, %v4239_v27  ;;  %v12387_v22 = vld [vmem:[#allocation12_spill] sm:$0xff]  ;;  %v12390_v27 = vld [vmem:[#allocation15_spill] sm:$0xff] }
 0xd43   :  { %v4250_v42 = vmul.f32 %v8891_v30, %v4240_v31  ;;  %v12388_v31 = vld [vmem:[#allocation13_spill] sm:$0xff]  ;;  %v12389_v30 = vld [vmem:[#allocation14_spill] sm:$0xff] }
 0xd45   :  { %5751 = vmatprep.mubr.msk.f32.mxu0 %vm379_vm0, %v4250_v42  ;;  %5752 = vmatprep.mubr.msk.f32.mxu1 %vm379_vm0, %v4250_v42 }
 0xd46   :  { %4342 = vmatmul.mubr.f32.vlgmr.msra.gmra.mrb[44].mxu0 %v4249_v8  ;;  %4413 = vmatmul.mubr.f32.vlgmr.msra.gmra.mrb[44].mxu1 %v4249_v8 }
 0xd47   :  { %7981 = vmatpush1.bf16.msra.mxu0 %v11631_v25  ;;  %8029 = vmatpush1.bf16.msra.mxu1 %v11632_v24 }
 0xd48   :  { %5753 = vmatprep.mubr.msk.f32.mxu0 %vm379_vm0, %v4250_v42  ;;  %5754 = vmatprep.mubr.msk.f32.mxu1 %vm379_vm0, %v4250_v42  ;;  %v12391_v42 = vld [vmem:[#allocation16_spill] sm:$0xff] }
 0xd49   :  { %7983 = vmatprep.subr.bf16.mxu0 %v11633_v53  ;;  %8031 = vmatprep.subr.bf16.mxu1 %v11634_v43 }
 0xd4b   :  { %7985 = vmatpush1.bf16.msra.mxu0 %v11635_v3  ;;  %8033 = vmatpush1.bf16.msra.mxu1 %v11636_v58 }
 0xd4c   :  { %7987 = vmatprep.subr.bf16.mxu0 %v11637_v57  ;;  %8035 = vmatprep.subr.bf16.mxu1 %v11638_v47 }
 0xd4f   :  { %7989 = vmatpush1.bf16.msra.mxu0 %v11639_v14  ;;  %8037 = vmatpush1.bf16.msra.mxu1 %v11640_v35 }
 0xd50   :  { %7991 = vmatprep.subr.bf16.mxu0 %v11703_v33  ;;  %8039 = vmatprep.subr.bf16.mxu1 %v11704_v54 }
 0xd53   :  { %7993 = vmatpush1.bf16.msra.mxu0 %v11705_v40  ;;  %8041 = vmatpush1.bf16.msra.mxu1 %v11706_v41 }
 0xd54   :  { %7995 = vmatprep.subr.bf16.mxu0 %v11707_v32  ;;  %8043 = vmatprep.subr.bf16.mxu1 %v11708_v63 }
 0xd57   :  { %7997 = vmatpush1.bf16.msra.mxu0 %v11709_v38  ;;  %8045 = vmatpush1.bf16.msra.mxu1 %v11710_v37 }
 0xd58   :  { %7999 = vmatprep.subr.bf16.mxu0 %v11711_v23  ;;  %8047 = vmatprep.subr.bf16.mxu1 %v11712_v18 }
 0xd5b   :  { %8001 = vmatpush1.bf16.msra.mxu0 %v11713_v17  ;;  %8049 = vmatpush1.bf16.msra.mxu1 %v11714_v28 }
 0xd5c   :  { %8003 = vmatprep.subr.bf16.mxu0 %v11715_v55  ;;  %8051 = vmatprep.subr.bf16.mxu1 %v11654_v16 }
 0xd5f   :  { %8005 = vmatpush1.bf16.msra.mxu0 %v11655_v6  ;;  %8053 = vmatpush1.bf16.msra.mxu1 %v11656_v12 }
 0xd60   :  { %8007 = vmatprep.subr.bf16.mxu0 %v11657_v46  ;;  %8055 = vmatprep.subr.bf16.mxu1 %v11658_v48 }
 0xd63   :  { %8009 = vmatpush1.bf16.msra.mxu0 %v11659_v51  ;;  %8057 = vmatpush1.bf16.msra.mxu1 %v11660_v49 }
 0xd64   :  { %8011 = vmatprep.subr.bf16.mxu0 %v11661_v11  ;;  %8059 = vmatprep.subr.bf16.mxu1 %v11662_v56 }
 0xd67   :  { %8013 = vmatpush1.bf16.msra.mxu0 %v11663_v19  ;;  %8061 = vmatpush1.bf16.msra.mxu1 %v11777_v21 }
 0xd68   :  { %8015 = vmatprep.subr.bf16.mxu0 %v12369_v61  ;;  %8063 = vmatprep.subr.bf16.mxu1 %v12370_v52 }
 0xd6b   :  { %8017 = vmatpush1.bf16.msra.mxu0 %v12371_v7  ;;  %8065 = vmatpush1.bf16.msra.mxu1 %v12372_v44 }
 0xd6c   :  { %8019 = vmatprep.subr.bf16.mxu0 %v12373_v39  ;;  %8067 = vmatprep.subr.bf16.mxu1 %v12374_v4 }
 0xd6f   :  { %8021 = vmatpush1.bf16.msra.mxu0 %v12375_v50  ;;  %8069 = vmatpush1.bf16.msra.mxu1 %v12376_v10 }
 0xd70   :  { %8023 = vmatprep.subr.bf16.mxu0 %v12377_v29  ;;  %8071 = vmatprep.subr.bf16.mxu1 %v12378_v59 }
 0xd73   :  { %8025 = vmatpush1.bf16.msra.mxu0 %v12379_v9  ;;  %8073 = vmatpush1.bf16.msra.mxu1 %v12380_v62  ;;  %v4256_v62 = vpop.permute.xlu0 %4255 }
 0xd74   :  { %8075 = vmatprep.subr.bf16.mxu0 %v12381_v34  ;;  %8123 = vmatprep.subr.bf16.mxu1 %v12382_v26  ;;  %v12392_v26 = vld [vmem:[#allocation17_spill] sm:$0xff] }
 0xd76   :  { %4484 = vmatmul.mubr.f32.vlgmr.msra.gmra.mrb[46].mxu0 %v4249_v8  ;;  %4555 = vmatmul.mubr.f32.vlgmr.msra.gmra.mrb[46].mxu1 %v4249_v8  ;;  %v12393_v8 = vld [vmem:[#allocation18_spill] sm:$0xff] }
 0xd77   :  { %8077 = vmatpush1.bf16.msra.mxu0 %v12383_v13  ;;  %8125 = vmatpush1.bf16.msra.mxu1 %v12384_v60  ;;  %v12394_v13 = vld [vmem:[#allocation19_spill] sm:$0xff]  ;;  %v12395_v60 = vld [vmem:[#allocation20_spill] sm:$0xff] }
 0xd78   :  { %8079 = vmatprep.subr.bf16.mxu0 %v12385_v1  ;;  %8127 = vmatprep.subr.bf16.mxu1 %v12386_v20  ;;  %v12396_v1 = vld [vmem:[#allocation21_spill] sm:$0xff]  ;;  %v12397_v20 = vld [vmem:[#allocation22_spill] sm:$0xff] }
 0xd7b   :  { %8081 = vmatpush1.bf16.msra.mxu0 %v12387_v22  ;;  %8129 = vmatpush1.bf16.msra.mxu1 %v12388_v31  ;;  %v12398_v22 = vld [vmem:[#allocation24_spill] sm:$0xff] }
 0xd7c   :  { %8083 = vmatprep.subr.bf16.mxu0 %v12389_v30  ;;  %8131 = vmatprep.subr.bf16.mxu1 %v12390_v27  ;;  %v12399_v31 = vld [vmem:[#allocation28_spill] sm:$0xff]  ;;  %v12400_v30 = vld [vmem:[#allocation29_spill] sm:$0xff]  ;;  %v12401_v27 = vld [vmem:[#allocation30_spill] sm:$0xff] }
 0xd7f   :  { %8085 = vmatpush1.bf16.msra.mxu0 %v12391_v42  ;;  %8133 = vmatpush1.bf16.msra.mxu1 %v12392_v26  ;;  %v12402_v42 = vld [vmem:[#allocation31_spill] sm:$0xff]  ;;  %v12403_v26 = vld [vmem:[#allocation32_spill] sm:$0xff] }
 0xd80   :  { %8087 = vmatprep.subr.bf16.mxu0 %v12393_v8  ;;  %8135 = vmatprep.subr.bf16.mxu1 %v12394_v13  ;;  %v12404_v8 = vld [vmem:[#allocation33_spill] sm:$0xff]  ;;  %v12405_v13 = vld [vmem:[#allocation34_spill] sm:$0xff] }
 0xd83   :  { %8089 = vmatpush1.bf16.msra.mxu0 %v12395_v60  ;;  %8137 = vmatpush1.bf16.msra.mxu1 %v12396_v1  ;;  %v12406_v60 = vld [vmem:[#allocation35_spill] sm:$0xff]  ;;  %v12407_v1 = vld [vmem:[#allocation36_spill] sm:$0xff] }
 0xd84   :  { %8091 = vmatprep.subr.bf16.mxu0 %v12397_v20  ;;  %8139 = vmatprep.subr.bf16.mxu1 %v12398_v22  ;;  %v12408_v20 = vld [vmem:[#allocation37_spill] sm:$0xff]  ;;  %v12409_v22 = vld [vmem:[#allocation38_spill] sm:$0xff] }
 0xd87   :  { %8093 = vmatpush1.bf16.msra.mxu0 %v12399_v31  ;;  %8141 = vmatpush1.bf16.msra.mxu1 %v12400_v30  ;;  %v12410_v31 = vld [vmem:[#allocation39_spill] sm:$0xff]  ;;  %v12411_v30 = vld [vmem:[#allocation40_spill] sm:$0xff] }
 0xd88   :  { %8095 = vmatprep.subr.bf16.mxu0 %v12401_v27  ;;  %8143 = vmatprep.subr.bf16.mxu1 %v12402_v42  ;;  %v12412_v27 = vld [vmem:[#allocation41_spill] sm:$0xff]  ;;  %v12413_v42 = vld [vmem:[#allocation42_spill] sm:$0xff] }
 0xd8b   :  { %8097 = vmatpush1.bf16.msra.mxu0 %v12403_v26  ;;  %8145 = vmatpush1.bf16.msra.mxu1 %v12404_v8  ;;  %v12414_v26 = vld [vmem:[#allocation43_spill] sm:$0xff]  ;;  %v12415_v8 = vld [vmem:[#allocation44_spill] sm:$0xff] }
 0xd8c   :  { %8099 = vmatprep.subr.bf16.mxu0 %v12405_v13  ;;  %8147 = vmatprep.subr.bf16.mxu1 %v12406_v60  ;;  %v12416_v13 = vld [vmem:[#allocation45_spill] sm:$0xff]  ;;  %v12417_v60 = vld [vmem:[#allocation46_spill] sm:$0xff] }
 0xd8f   :  { %8101 = vmatpush1.bf16.msra.mxu0 %v12407_v1  ;;  %8149 = vmatpush1.bf16.msra.mxu1 %v12408_v20  ;;  %v12418_v1 = vld [vmem:[#allocation47_spill] sm:$0xff]  ;;  %v12419_v20 = vld [vmem:[#allocation48_spill] sm:$0xff] }
 0xd90   :  { %8103 = vmatprep.subr.bf16.mxu0 %v12409_v22  ;;  %8151 = vmatprep.subr.bf16.mxu1 %v12410_v31  ;;  %v12420_v22 = vld [vmem:[#allocation49_spill] sm:$0xff]  ;;  %v12421_v31 = vld [vmem:[#allocation50_spill] sm:$0xff] }
 0xd93   :  { %8105 = vmatpush1.bf16.msra.mxu0 %v12411_v30  ;;  %8153 = vmatpush1.bf16.msra.mxu1 %v12412_v27  ;;  %v12422_v30 = vld [vmem:[#allocation51_spill] sm:$0xff]  ;;  %v12423_v27 = vld [vmem:[#allocation52_spill] sm:$0xff] }
 0xd94   :  { %8107 = vmatprep.subr.bf16.mxu0 %v12413_v42  ;;  %8155 = vmatprep.subr.bf16.mxu1 %v12414_v26  ;;  %v12424_v42 = vld [vmem:[#allocation53_spill] sm:$0xff]  ;;  %v12425_v26 = vld [vmem:[#allocation54_spill] sm:$0xff] }
 0xd97   :  { %8109 = vmatpush1.bf16.msra.mxu0 %v12415_v8  ;;  %8157 = vmatpush1.bf16.msra.mxu1 %v12416_v13  ;;  %v12426_v8 = vld [vmem:[#allocation55_spill] sm:$0xff]  ;;  %v12427_v13 = vld [vmem:[#allocation56_spill] sm:$0xff] }
 0xd98   :  { %8111 = vmatprep.subr.bf16.mxu0 %v12417_v60  ;;  %8159 = vmatprep.subr.bf16.mxu1 %v12418_v1  ;;  %v12428_v60 = vld [vmem:[#allocation57_spill] sm:$0xff]  ;;  %v12429_v1 = vld [vmem:[#allocation58_spill] sm:$0xff] }
 0xd9b   :  { %8113 = vmatpush1.bf16.msra.mxu0 %v12419_v20  ;;  %8161 = vmatpush1.bf16.msra.mxu1 %v12420_v22  ;;  %v12430_v20 = vld [vmem:[#allocation59_spill] sm:$0xff] }
 0xd9c   :  { %8115 = vmatprep.subr.bf16.mxu0 %v12421_v31  ;;  %8163 = vmatprep.subr.bf16.mxu1 %v12422_v30 }
 0xd9f   :  { %8117 = vmatpush1.bf16.msra.mxu0 %v12423_v27  ;;  %8165 = vmatpush1.bf16.msra.mxu1 %v12424_v42  ;;  %v12431_v27 = vld [vmem:[#allocation23_spill] sm:$0xff]  ;;  %v12432_v42 = vld [vmem:[#allocation26_spill] sm:$0xff] }
 0xda0   :  { %8119 = vmatprep.subr.bf16.mxu0 %v12425_v26  ;;  %8167 = vmatprep.subr.bf16.mxu1 %v12426_v8  ;;  %v4260_v9 = vmul.f32 %v4256_v62, %v12431_v27  ;;  %v4261_v59 = vmul.f32 %v4256_v62, %v12432_v42  ;;  %v12433_v26 = vld [vmem:[#allocation62_spill] sm:$0xff]  ;;  %v12434_v8 = vld [vmem:[#allocation63_spill] sm:$0xff] }
 0xda1   :  { %v4258_v29 = vmul.f32 %v4256_v62, %v12433_v26  ;;  %v4259_v10 = vmul.f32 %v4256_v62, %v12434_v8  ;;  %v12436_v8 = vld [vmem:[#allocation64_spill] sm:$0xff] }
 0xda2   :  { %v4262_v26 = vmul.f32 %v4256_v62, %v12436_v8 }
 0xda3   :  { %8121 = vmatpush1.bf16.msra.mxu0 %v12427_v13  ;;  %8169 = vmatpush1.bf16.msra.mxu1 %v12428_v60  ;;  %v4268_v13 = vadd.f32 %v4260_v9, %v11618_v36  ;;  %v12435_v60 = vld [vmem:[#allocation27_spill] sm:$0xff]  ;;  %v4267_v4 = vadd.f32 %v4259_v10, %v11695_v0  ;;  %v12440_v10 = vld [vmem:[#allocation70_spill] sm:$0xff] }
 0xda4   :  { %8171 = vmatprep.subr.bf16.mxu0 %v12429_v1  ;;  %8219 = vmatprep.subr.bf16.mxu1 %v12430_v20  ;;  %v4269_v50 = vadd.f32 %v4261_v59, %v12435_v60  ;;  %v4266_v1 = vadd.f32 %v4258_v29, %v11770_v45  ;;  %v12437_v9 = vld [vmem:[#allocation67_spill] sm:$0xff]  ;;  %v12438_v60 = vld [vmem:[#allocation69_spill] sm:$0xff] }
 0xda5   :  { %v4263_v59 = vmul.f32 %v4256_v62, %v12437_v9  ;;  %v4265_v29 = vmul.f32 %v4256_v62, %v12438_v60 }
 0xe19   :  { %v4343_v22 = vpop.f32.mrb[44].mxu0  ;;  %v4414_v31 = vpop.f32.mrb[44].mxu1 }
 0xe1a   :  { %v4345_v34 = vpop.f32.mrb[45].mxu0  ;;  %v4416_v30 = vpop.f32.mrb[45].mxu1  ;;  %v4563_v20 = vadd.f32 %v4414_v31, %v4268_v13  ;;  %v4561_v44 = vadd.f32 %v4343_v22, %v4266_v1  ;;  %v12439_v13 = vld [vmem:[#allocation68_spill] sm:$0xff] }
 0xe1b   :  { %v4564_v39 = vadd.f32 %v4416_v30, %v4269_v50  ;;  %v4562_v7 = vadd.f32 %v4345_v34, %v4267_v4  ;;  %v4264_v31 = vmul.f32 %v4256_v62, %v12439_v13  ;;  %v4270_v50 = vadd.f32 %v4262_v26, %v12440_v10  ;;  %v12441_v34 = vld [vmem:[#allocation71_spill] sm:$0xff] }
 0xe1c   :  { %v4577_v52 = vmul.f32 0.5, %v4563_v20  ;;  %v4569_v61 = vmul.f32 0.5, %v4561_v44 }
 0xe1d   :  { %v4578_v27 = vmul.f32 0.5, %v4564_v39  ;;  %v4570_v42 = vmul.f32 0.5, %v4562_v7  ;;  %v4271_v39 = vadd.f32 %v4263_v59, %v12441_v34  ;;  %v4272_v22 = vadd.f32 %v4264_v31, %v11628_v15 }
 0xe1e   :  { %8892 = vtanh.f32 %v4577_v52  ;;  %v12442_v52 = vld [vmem:[#allocation73_spill] sm:$0xff] }
 0xe1f   :  { %8894 = vtanh.f32 %v4578_v27  ;;  %v4273_v20 = vadd.f32 %v4265_v29, %v12442_v52 }
 0xe20   :  { %8896 = vtanh.f32 %v4569_v61 }
 0xe21   :  { %8898 = vtanh.f32 %v4570_v42 }
 0xe28   :  { %v8893_v27 = vpop.eup %8892 }
 0xe29   :  { %v8895_v60 = vpop.eup %8894  ;;  %v4581_v10 = vadd.f32 1.0, %v8893_v27 }
 0xe2a   :  { %v8897_v62 = vpop.eup %8896  ;;  %v4582_v13 = vadd.f32 1.0, %v8895_v60 }
 0xe2b   :  { %v8899_v26 = vpop.eup %8898  ;;  %v4573_v59 = vadd.f32 1.0, %v8897_v62  ;;  %v4583_v34 = vmul.f32 0.5, %v4581_v10  ;;  %v12444_v62 = vld [vmem:[#allocation111_spill] sm:$0xff] }
 0xe2c   :  { %v4584_v29 = vmul.f32 0.5, %v4582_v13 }
 0xe2d   :  { %v4575_v52 = vmul.f32 0.5, %v4573_v59  ;;  %v12446_v59 = vld [vmem:[#allocation113_spill] sm:$0xff] }
 0xe49   :  { %v4485_v1 = vpop.f32.mrb[46].mxu0  ;;  %v4556_v4 = vpop.f32.mrb[46].mxu1 }
 0xe4a   :  { %v4565_v44 = vadd.f32 %v4485_v1, %v4270_v50  ;;  %v4487_v7 = vpop.f32.mrb[47].mxu0  ;;  %v4558_v61 = vpop.f32.mrb[47].mxu1  ;;  %v4567_v9 = vadd.f32 %v4556_v4, %v4272_v22  ;;  %v4574_v1 = vadd.f32 1.0, %v8899_v26  ;;  %v12445_v26 = vld [vmem:[#allocation112_spill] sm:$0xff] }
 0xe4b   :  { %v4566_v30 = vadd.f32 %v4487_v7, %v4271_v39  ;;  %v4568_v42 = vadd.f32 %v4558_v61, %v4273_v20  ;;  %v4595_v7 = vmul.f32 %v4583_v34, %v10795_v5  ;;  %v4596_v20 = vmul.f32 %v4584_v29, %v10797_v2  ;;  %v12443_v2 = vld [vmem:[#allocation110_spill] sm:$0xff]  ;;  %v12449_v29 = vld [vmem:[#allocation116_spill] sm:$0xff] }
 0xe4c   :  { %8900 = vtanh.f32 %v4565_v44  ;;  %v4587_v50 = vmul.f32 0.5, %v4567_v9  ;;  %v4576_v39 = vmul.f32 0.5, %v4574_v1  ;;  %v12448_v1 = vld [vmem:[#allocation115_spill] sm:$0xff] }
 0xe4d   :  { %8902 = vtanh.f32 %v4566_v30  ;;  %v4588_v8 = vmul.f32 0.5, %v4568_v42 }
 0xe4f   :  { %8904 = vtanh.f32 %v4588_v8 }
 0xe50   :  { %8906 = vtanh.f32 %v4587_v50  ;;  %v12447_v50 = vld [vmem:[#allocation114_spill] sm:$0xff] }
 0xe56   :  { %v8901_v31 = vpop.eup %8900 }
 0xe57   :  { %v8903_v44 = vpop.eup %8902  ;;  %v4597_v4 = vmul.f32 %v8901_v31, %v4575_v52  ;;  %v12450_v31 = vld [vmem:[#allocation117_spill] sm:$0xff] }
 0xe58   :  { %v4598_v61 = vmul.f32 %v8903_v44, %v4576_v39  ;;  %v12451_v39 = vld [vmem:[#allocation118_spill] sm:$0xff]  ;;  %v12452_v44 = vld [vmem:[#allocation119_spill] sm:$0xff] }
 0xe59   :  { %v10919_v22 = vadd.f32 %v4597_v4, %v4595_v7  ;;  %v8905_v8 = vpop.eup %8904  ;;  %v12453_v7 = vld [vmem:[#allocation120_spill] sm:$0xff]  ;;  %v12454_v4 = vld [vmem:[#allocation121_spill] sm:$0xff] }
 0xe5a   :  { %v10921_v60 = vadd.f32 %v4598_v61, %v4596_v20  ;;  %v8907_v9 = vpop.eup %8906  ;;  %v4592_v13 = vadd.f32 1.0, %v8905_v8  ;;  %v12455_v20 = vld [vmem:[#allocation6_spill] sm:$0xff]  ;;  %v12456_v61 = vld [vmem:[#allocation7_spill] sm:$0xff]  ;;  %v12457_v8 = vld [vmem:[#allocation8_spill] sm:$0xff] }
 0xe5b   :  { %8908 = vtanh.f32 %v10919_v22  ;;  %v4591_v10 = vadd.f32 1.0, %v8907_v9  ;;  %v12458_v9 = vld [vmem:[#allocation9_spill] sm:$0xff] }
 0xe5c   :  { %8910 = vtanh.f32 %v10921_v60  ;;  %v4594_v27 = vmul.f32 0.5, %v4592_v13  ;;  %v12459_v13 = vld [vmem:[#allocation10_spill] sm:$0xff] }
 0xe5d   :  { %v4593_v5 = vmul.f32 0.5, %v4591_v10  ;;  %v12460_v10 = vld [vmem:[#allocation11_spill] sm:$0xff] }
 0xe65   :  { %v8909_v30 = vpop.eup %8908 }
 0xe66   :  { %v8911_v42 = vpop.eup %8910  ;;  %v4603_v52 = vmul.f32 %v8909_v30, %v4593_v5  ;;  %v12461_v30 = vld [vmem:[#allocation12_spill] sm:$0xff]  ;;  %v12464_v5 = vld [vmem:[#allocation15_spill] sm:$0xff] }
 0xe67   :  { %v4604_v34 = vmul.f32 %v8911_v42, %v4594_v27  ;;  %v12462_v27 = vld [vmem:[#allocation13_spill] sm:$0xff]  ;;  %v12463_v42 = vld [vmem:[#allocation14_spill] sm:$0xff] }
 0xe69   :  { %5756 = vmatprep.mubr.msk.f32.mxu0 %vm379_vm0, %v4604_v34  ;;  %5757 = vmatprep.mubr.msk.f32.mxu1 %vm379_vm0, %v4604_v34 }
 0xe6a   :  { %4696 = vmatmul.mubr.f32.vlgmr.msra.gmra.mrb[48].mxu0 %v4603_v52  ;;  %4767 = vmatmul.mubr.f32.vlgmr.msra.gmra.mrb[48].mxu1 %v4603_v52 }
 0xe6b   :  { %8173 = vmatpush1.bf16.msra.mxu0 %v11631_v25  ;;  %8221 = vmatpush1.bf16.msra.mxu1 %v11632_v24 }
 0xe6c   :  { %5758 = vmatprep.mubr.msk.f32.mxu0 %vm379_vm0, %v4604_v34  ;;  %5759 = vmatprep.mubr.msk.f32.mxu1 %vm379_vm0, %v4604_v34  ;;  %v12465_v34 = vld [vmem:[#allocation16_spill] sm:$0xff] }
 0xe6d   :  { %8175 = vmatprep.subr.bf16.mxu0 %v11633_v53  ;;  %8223 = vmatprep.subr.bf16.mxu1 %v11634_v43 }
 0xe6f   :  { %8177 = vmatpush1.bf16.msra.mxu0 %v11635_v3  ;;  %8225 = vmatpush1.bf16.msra.mxu1 %v11636_v58 }
 0xe70   :  { %8179 = vmatprep.subr.bf16.mxu0 %v11637_v57  ;;  %8227 = vmatprep.subr.bf16.mxu1 %v11638_v47 }
 0xe73   :  { %8181 = vmatpush1.bf16.msra.mxu0 %v11639_v14  ;;  %8229 = vmatpush1.bf16.msra.mxu1 %v11640_v35 }
 0xe74   :  { %8183 = vmatprep.subr.bf16.mxu0 %v11703_v33  ;;  %8231 = vmatprep.subr.bf16.mxu1 %v11704_v54 }
 0xe77   :  { %8185 = vmatpush1.bf16.msra.mxu0 %v11705_v40  ;;  %8233 = vmatpush1.bf16.msra.mxu1 %v11706_v41 }
 0xe78   :  { %8187 = vmatprep.subr.bf16.mxu0 %v11707_v32  ;;  %8235 = vmatprep.subr.bf16.mxu1 %v11708_v63 }
 0xe7b   :  { %8189 = vmatpush1.bf16.msra.mxu0 %v11709_v38  ;;  %8237 = vmatpush1.bf16.msra.mxu1 %v11710_v37 }
 0xe7c   :  { %8191 = vmatprep.subr.bf16.mxu0 %v11711_v23  ;;  %8239 = vmatprep.subr.bf16.mxu1 %v11712_v18 }
 0xe7f   :  { %8193 = vmatpush1.bf16.msra.mxu0 %v11713_v17  ;;  %8241 = vmatpush1.bf16.msra.mxu1 %v11714_v28 }
 0xe80   :  { %8195 = vmatprep.subr.bf16.mxu0 %v11715_v55  ;;  %8243 = vmatprep.subr.bf16.mxu1 %v11654_v16 }
 0xe83   :  { %8197 = vmatpush1.bf16.msra.mxu0 %v11655_v6  ;;  %8245 = vmatpush1.bf16.msra.mxu1 %v11656_v12 }
 0xe84   :  { %8199 = vmatprep.subr.bf16.mxu0 %v11657_v46  ;;  %8247 = vmatprep.subr.bf16.mxu1 %v11658_v48 }
 0xe87   :  { %8201 = vmatpush1.bf16.msra.mxu0 %v11659_v51  ;;  %8249 = vmatpush1.bf16.msra.mxu1 %v11660_v49 }
 0xe88   :  { %8203 = vmatprep.subr.bf16.mxu0 %v11661_v11  ;;  %8251 = vmatprep.subr.bf16.mxu1 %v11662_v56 }
 0xe8b   :  { %8205 = vmatpush1.bf16.msra.mxu0 %v11663_v19  ;;  %8253 = vmatpush1.bf16.msra.mxu1 %v11777_v21 }
 0xe8c   :  { %8207 = vmatprep.subr.bf16.mxu0 %v12443_v2  ;;  %8255 = vmatprep.subr.bf16.mxu1 %v12444_v62 }
 0xe8f   :  { %8209 = vmatpush1.bf16.msra.mxu0 %v12445_v26  ;;  %8257 = vmatpush1.bf16.msra.mxu1 %v12446_v59 }
 0xe90   :  { %8211 = vmatprep.subr.bf16.mxu0 %v12447_v50  ;;  %8259 = vmatprep.subr.bf16.mxu1 %v12448_v1 }
 0xe93   :  { %8213 = vmatpush1.bf16.msra.mxu0 %v12449_v29  ;;  %8261 = vmatpush1.bf16.msra.mxu1 %v12450_v31 }
 0xe94   :  { %8215 = vmatprep.subr.bf16.mxu0 %v12451_v39  ;;  %8263 = vmatprep.subr.bf16.mxu1 %v12452_v44 }
 0xe97   :  { %8217 = vmatpush1.bf16.msra.mxu0 %v12453_v7  ;;  %8265 = vmatpush1.bf16.msra.mxu1 %v12454_v4  ;;  %v4610_v4 = vpop.permute.xlu1 %4609 }
 0xe98   :  { %8267 = vmatprep.subr.bf16.mxu0 %v12455_v20  ;;  %8315 = vmatprep.subr.bf16.mxu1 %v12456_v61  ;;  %v12466_v61 = vld [vmem:[#allocation17_spill] sm:$0xff] }
 0xe9a   :  { %4838 = vmatmul.mubr.f32.vlgmr.msra.gmra.mrb[50].mxu0 %v4603_v52  ;;  %4909 = vmatmul.mubr.f32.vlgmr.msra.gmra.mrb[50].mxu1 %v4603_v52  ;;  %v12467_v52 = vld [vmem:[#allocation18_spill] sm:$0xff] }
 0xe9b   :  { %8269 = vmatpush1.bf16.msra.mxu0 %v12457_v8  ;;  %8317 = vmatpush1.bf16.msra.mxu1 %v12458_v9  ;;  %v12468_v8 = vld [vmem:[#allocation19_spill] sm:$0xff]  ;;  %v12469_v9 = vld [vmem:[#allocation20_spill] sm:$0xff] }
 0xe9c   :  { %8271 = vmatprep.subr.bf16.mxu0 %v12459_v13  ;;  %8319 = vmatprep.subr.bf16.mxu1 %v12460_v10  ;;  %v12470_v13 = vld [vmem:[#allocation21_spill] sm:$0xff]  ;;  %v12471_v10 = vld [vmem:[#allocation22_spill] sm:$0xff] }
 0xe9f   :  { %8273 = vmatpush1.bf16.msra.mxu0 %v12461_v30  ;;  %8321 = vmatpush1.bf16.msra.mxu1 %v12462_v27  ;;  %v12472_v30 = vld [vmem:[#allocation24_spill] sm:$0xff] }
 0xea0   :  { %8275 = vmatprep.subr.bf16.mxu0 %v12463_v42  ;;  %8323 = vmatprep.subr.bf16.mxu1 %v12464_v5  ;;  %v12473_v27 = vld [vmem:[#allocation28_spill] sm:$0xff]  ;;  %v12474_v42 = vld [vmem:[#allocation29_spill] sm:$0xff]  ;;  %v12475_v5 = vld [vmem:[#allocation30_spill] sm:$0xff] }
 0xea3   :  { %8277 = vmatpush1.bf16.msra.mxu0 %v12465_v34  ;;  %8325 = vmatpush1.bf16.msra.mxu1 %v12466_v61  ;;  %v12476_v34 = vld [vmem:[#allocation31_spill] sm:$0xff]  ;;  %v12477_v61 = vld [vmem:[#allocation32_spill] sm:$0xff] }
 0xea4   :  { %8279 = vmatprep.subr.bf16.mxu0 %v12467_v52  ;;  %8327 = vmatprep.subr.bf16.mxu1 %v12468_v8  ;;  %v12478_v52 = vld [vmem:[#allocation33_spill] sm:$0xff]  ;;  %v12479_v8 = vld [vmem:[#allocation34_spill] sm:$0xff] }
 0xea7   :  { %8281 = vmatpush1.bf16.msra.mxu0 %v12469_v9  ;;  %8329 = vmatpush1.bf16.msra.mxu1 %v12470_v13  ;;  %v12480_v9 = vld [vmem:[#allocation35_spill] sm:$0xff]  ;;  %v12481_v13 = vld [vmem:[#allocation36_spill] sm:$0xff] }
 0xea8   :  { %8283 = vmatprep.subr.bf16.mxu0 %v12471_v10  ;;  %8331 = vmatprep.subr.bf16.mxu1 %v12472_v30  ;;  %v12482_v10 = vld [vmem:[#allocation37_spill] sm:$0xff]  ;;  %v12483_v30 = vld [vmem:[#allocation38_spill] sm:$0xff] }
 0xeab   :  { %8285 = vmatpush1.bf16.msra.mxu0 %v12473_v27  ;;  %8333 = vmatpush1.bf16.msra.mxu1 %v12474_v42  ;;  %v12484_v27 = vld [vmem:[#allocation39_spill] sm:$0xff]  ;;  %v12485_v42 = vld [vmem:[#allocation40_spill] sm:$0xff] }
 0xeac   :  { %8287 = vmatprep.subr.bf16.mxu0 %v12475_v5  ;;  %8335 = vmatprep.subr.bf16.mxu1 %v12476_v34  ;;  %v12486_v5 = vld [vmem:[#allocation41_spill] sm:$0xff]  ;;  %v12487_v34 = vld [vmem:[#allocation42_spill] sm:$0xff] }
 0xeaf   :  { %8289 = vmatpush1.bf16.msra.mxu0 %v12477_v61  ;;  %8337 = vmatpush1.bf16.msra.mxu1 %v12478_v52  ;;  %v12488_v61 = vld [vmem:[#allocation43_spill] sm:$0xff]  ;;  %v12489_v52 = vld [vmem:[#allocation44_spill] sm:$0xff] }
 0xeb0   :  { %8291 = vmatprep.subr.bf16.mxu0 %v12479_v8  ;;  %8339 = vmatprep.subr.bf16.mxu1 %v12480_v9  ;;  %v12490_v8 = vld [vmem:[#allocation45_spill] sm:$0xff]  ;;  %v12491_v9 = vld [vmem:[#allocation46_spill] sm:$0xff] }
 0xeb3   :  { %8293 = vmatpush1.bf16.msra.mxu0 %v12481_v13  ;;  %8341 = vmatpush1.bf16.msra.mxu1 %v12482_v10  ;;  %v12492_v13 = vld [vmem:[#allocation47_spill] sm:$0xff]  ;;  %v12493_v10 = vld [vmem:[#allocation48_spill] sm:$0xff] }
 0xeb4   :  { %8295 = vmatprep.subr.bf16.mxu0 %v12483_v30  ;;  %8343 = vmatprep.subr.bf16.mxu1 %v12484_v27  ;;  %v12494_v30 = vld [vmem:[#allocation49_spill] sm:$0xff]  ;;  %v12495_v27 = vld [vmem:[#allocation50_spill] sm:$0xff] }
 0xeb7   :  { %8297 = vmatpush1.bf16.msra.mxu0 %v12485_v42  ;;  %8345 = vmatpush1.bf16.msra.mxu1 %v12486_v5  ;;  %v12496_v42 = vld [vmem:[#allocation51_spill] sm:$0xff]  ;;  %v12497_v5 = vld [vmem:[#allocation52_spill] sm:$0xff] }
 0xeb8   :  { %8299 = vmatprep.subr.bf16.mxu0 %v12487_v34  ;;  %8347 = vmatprep.subr.bf16.mxu1 %v12488_v61  ;;  %v12498_v34 = vld [vmem:[#allocation53_spill] sm:$0xff]  ;;  %v12499_v61 = vld [vmem:[#allocation54_spill] sm:$0xff] }
 0xebb   :  { %8301 = vmatpush1.bf16.msra.mxu0 %v12489_v52  ;;  %8349 = vmatpush1.bf16.msra.mxu1 %v12490_v8  ;;  %v12500_v52 = vld [vmem:[#allocation55_spill] sm:$0xff]  ;;  %v12501_v8 = vld [vmem:[#allocation56_spill] sm:$0xff] }
 0xebc   :  { %8303 = vmatprep.subr.bf16.mxu0 %v12491_v9  ;;  %8351 = vmatprep.subr.bf16.mxu1 %v12492_v13  ;;  %v12502_v9 = vld [vmem:[#allocation57_spill] sm:$0xff]  ;;  %v12503_v13 = vld [vmem:[#allocation58_spill] sm:$0xff] }
 0xebf   :  { %8305 = vmatpush1.bf16.msra.mxu0 %v12493_v10  ;;  %8353 = vmatpush1.bf16.msra.mxu1 %v12494_v30  ;;  %v12504_v10 = vld [vmem:[#allocation59_spill] sm:$0xff] }
 0xec0   :  { %8307 = vmatprep.subr.bf16.mxu0 %v12495_v27  ;;  %8355 = vmatprep.subr.bf16.mxu1 %v12496_v42 }
 0xec3   :  { %8309 = vmatpush1.bf16.msra.mxu0 %v12497_v5  ;;  %8357 = vmatpush1.bf16.msra.mxu1 %v12498_v34  ;;  %v12505_v5 = vld [vmem:[#allocation23_spill] sm:$0xff]  ;;  %v12506_v34 = vld [vmem:[#allocation26_spill] sm:$0xff] }
 0xec4   :  { %8311 = vmatprep.subr.bf16.mxu0 %v12499_v61  ;;  %8359 = vmatprep.subr.bf16.mxu1 %v12500_v52  ;;  %v4614_v7 = vmul.f32 %v4610_v4, %v12505_v5  ;;  %v4615_v44 = vmul.f32 %v4610_v4, %v12506_v34  ;;  %v12507_v61 = vld [vmem:[#allocation62_spill] sm:$0xff]  ;;  %v12508_v52 = vld [vmem:[#allocation63_spill] sm:$0xff] }
 0xec5   :  { %v4612_v39 = vmul.f32 %v4610_v4, %v12507_v61  ;;  %v4613_v31 = vmul.f32 %v4610_v4, %v12508_v52  ;;  %v12510_v52 = vld [vmem:[#allocation64_spill] sm:$0xff] }
 0xec6   :  { %v4616_v61 = vmul.f32 %v4610_v4, %v12510_v52 }
 0xec7   :  { %8313 = vmatpush1.bf16.msra.mxu0 %v12501_v8  ;;  %8361 = vmatpush1.bf16.msra.mxu1 %v12502_v9  ;;  %v4622_v8 = vadd.f32 %v4614_v7, %v11618_v36  ;;  %v12509_v9 = vld [vmem:[#allocation27_spill] sm:$0xff]  ;;  %v4621_v1 = vadd.f32 %v4613_v31, %v11695_v0  ;;  %v12514_v31 = vld [vmem:[#allocation70_spill] sm:$0xff] }
 0xec8   :  { %8363 = vmatprep.subr.bf16.mxu0 %v12503_v13  ;;  %8411 = vmatprep.subr.bf16.mxu1 %v12504_v10  ;;  %v4623_v29 = vadd.f32 %v4615_v44, %v12509_v9  ;;  %v4620_v13 = vadd.f32 %v4612_v39, %v11770_v45  ;;  %v12511_v7 = vld [vmem:[#allocation67_spill] sm:$0xff]  ;;  %v12512_v9 = vld [vmem:[#allocation69_spill] sm:$0xff] }
 0xec9   :  { %v4617_v44 = vmul.f32 %v4610_v4, %v12511_v7  ;;  %v4619_v39 = vmul.f32 %v4610_v4, %v12512_v9 }
 0xf3d   :  { %v4697_v30 = vpop.f32.mrb[48].mxu0  ;;  %v4768_v27 = vpop.f32.mrb[48].mxu1 }
 0xf3e   :  { %v4699_v20 = vpop.f32.mrb[49].mxu0  ;;  %v4770_v42 = vpop.f32.mrb[49].mxu1  ;;  %v4917_v10 = vadd.f32 %v4768_v27, %v4622_v8  ;;  %v4915_v59 = vadd.f32 %v4697_v30, %v4620_v13  ;;  %v12513_v8 = vld [vmem:[#allocation68_spill] sm:$0xff] }
 0xf3f   :  { %v4918_v50 = vadd.f32 %v4770_v42, %v4623_v29  ;;  %v4916_v26 = vadd.f32 %v4699_v20, %v4621_v1  ;;  %v4618_v27 = vmul.f32 %v4610_v4, %v12513_v8  ;;  %v4624_v29 = vadd.f32 %v4616_v61, %v12514_v31  ;;  %v12515_v20 = vld [vmem:[#allocation71_spill] sm:$0xff] }
 0xf40   :  { %v4931_v62 = vmul.f32 0.5, %v4917_v10  ;;  %v4923_v2 = vmul.f32 0.5, %v4915_v59 }
 0xf41   :  { %v4932_v5 = vmul.f32 0.5, %v4918_v50  ;;  %v4924_v34 = vmul.f32 0.5, %v4916_v26  ;;  %v4625_v50 = vadd.f32 %v4617_v44, %v12515_v20  ;;  %v4626_v30 = vadd.f32 %v4618_v27, %v11628_v15 }
 0xf42   :  { %8912 = vtanh.f32 %v4931_v62  ;;  %v12516_v62 = vld [vmem:[#allocation73_spill] sm:$0xff] }
 0xf43   :  { %8914 = vtanh.f32 %v4932_v5  ;;  %v4627_v10 = vadd.f32 %v4619_v39, %v12516_v62 }
 0xf44   :  { %8916 = vtanh.f32 %v4923_v2 }
 0xf45   :  { %8918 = vtanh.f32 %v4924_v34 }
 0xf4c   :  { %v8913_v5 = vpop.eup %8912 }
 0xf4d   :  { %v8915_v9 = vpop.eup %8914  ;;  %v4935_v31 = vadd.f32 1.0, %v8913_v5 }
 0xf4e   :  { %v8917_v4 = vpop.eup %8916  ;;  %v4936_v8 = vadd.f32 1.0, %v8915_v9 }
 0xf4f   :  { %v8919_v61 = vpop.eup %8918  ;;  %v4927_v44 = vadd.f32 1.0, %v8917_v4  ;;  %v4937_v20 = vmul.f32 0.5, %v4935_v31  ;;  %v12518_v4 = vld [vmem:[#allocation111_spill] sm:$0xff] }
 0xf50   :  { %v4938_v39 = vmul.f32 0.5, %v4936_v8 }
 0xf51   :  { %v4929_v62 = vmul.f32 0.5, %v4927_v44  ;;  %v12520_v44 = vld [vmem:[#allocation113_spill] sm:$0xff] }
 0xf6d   :  { %v4839_v13 = vpop.f32.mrb[50].mxu0  ;;  %v4910_v1 = vpop.f32.mrb[50].mxu1 }
 0xf6e   :  { %v4919_v59 = vadd.f32 %v4839_v13, %v4624_v29  ;;  %v4841_v26 = vpop.f32.mrb[51].mxu0  ;;  %v4912_v2 = vpop.f32.mrb[51].mxu1  ;;  %v4921_v7 = vadd.f32 %v4910_v1, %v4626_v30  ;;  %v4928_v13 = vadd.f32 1.0, %v8919_v61  ;;  %v12519_v61 = vld [vmem:[#allocation112_spill] sm:$0xff] }
 0xf6f   :  { %v4920_v42 = vadd.f32 %v4841_v26, %v4625_v50  ;;  %v4922_v34 = vadd.f32 %v4912_v2, %v4627_v10  ;;  %v4949_v26 = vmul.f32 %v4937_v20, %v10919_v22  ;;  %v4950_v10 = vmul.f32 %v4938_v39, %v10921_v60  ;;  %v12517_v60 = vld [vmem:[#allocation110_spill] sm:$0xff]  ;;  %v12523_v39 = vld [vmem:[#allocation116_spill] sm:$0xff] }
 0xf70   :  { %8920 = vtanh.f32 %v4919_v59  ;;  %v4941_v29 = vmul.f32 0.5, %v4921_v7  ;;  %v4930_v50 = vmul.f32 0.5, %v4928_v13  ;;  %v12522_v13 = vld [vmem:[#allocation115_spill] sm:$0xff] }
 0xf71   :  { %8922 = vtanh.f32 %v4920_v42  ;;  %v4942_v52 = vmul.f32 0.5, %v4922_v34 }
 0xf73   :  { %8924 = vtanh.f32 %v4942_v52 }
 0xf74   :  { %8926 = vtanh.f32 %v4941_v29  ;;  %v12521_v29 = vld [vmem:[#allocation114_spill] sm:$0xff] }
 0xf7a   :  { %v8921_v27 = vpop.eup %8920 }
 0xf7b   :  { %v8923_v59 = vpop.eup %8922  ;;  %v4951_v1 = vmul.f32 %v8921_v27, %v4929_v62  ;;  %v12524_v27 = vld [vmem:[#allocation117_spill] sm:$0xff] }
 0xf7c   :  { %v4952_v2 = vmul.f32 %v8923_v59, %v4930_v50  ;;  %v12525_v50 = vld [vmem:[#allocation118_spill] sm:$0xff]  ;;  %v12526_v59 = vld [vmem:[#allocation119_spill] sm:$0xff] }
 0xf7d   :  { %v11043_v30 = vadd.f32 %v4951_v1, %v4949_v26  ;;  %v8925_v52 = vpop.eup %8924  ;;  %v12527_v26 = vld [vmem:[#allocation120_spill] sm:$0xff]  ;;  %v12528_v1 = vld [vmem:[#allocation121_spill] sm:$0xff] }
 0xf7e   :  { %v11045_v9 = vadd.f32 %v4952_v2, %v4950_v10  ;;  %v8927_v7 = vpop.eup %8926  ;;  %v4946_v8 = vadd.f32 1.0, %v8925_v52  ;;  %v12529_v10 = vld [vmem:[#allocation6_spill] sm:$0xff]  ;;  %v12530_v2 = vld [vmem:[#allocation7_spill] sm:$0xff]  ;;  %v12531_v52 = vld [vmem:[#allocation8_spill] sm:$0xff] }
 0xf7f   :  { %8928 = vtanh.f32 %v11043_v30  ;;  %v4945_v31 = vadd.f32 1.0, %v8927_v7  ;;  %v12532_v7 = vld [vmem:[#allocation9_spill] sm:$0xff] }
 0xf80   :  { %8930 = vtanh.f32 %v11045_v9  ;;  %v4948_v5 = vmul.f32 0.5, %v4946_v8  ;;  %v12533_v8 = vld [vmem:[#allocation10_spill] sm:$0xff] }
 0xf81   :  { %v4947_v22 = vmul.f32 0.5, %v4945_v31  ;;  %v12534_v31 = vld [vmem:[#allocation11_spill] sm:$0xff] }
 0xf89   :  { %v8929_v42 = vpop.eup %8928 }
 0xf8a   :  { %v8931_v34 = vpop.eup %8930  ;;  %v4957_v62 = vmul.f32 %v8929_v42, %v4947_v22  ;;  %v12535_v42 = vld [vmem:[#allocation12_spill] sm:$0xff]  ;;  %v12538_v22 = vld [vmem:[#allocation15_spill] sm:$0xff] }
 0xf8b   :  { %v4958_v20 = vmul.f32 %v8931_v34, %v4948_v5  ;;  %v12536_v5 = vld [vmem:[#allocation13_spill] sm:$0xff]  ;;  %v12537_v34 = vld [vmem:[#allocation14_spill] sm:$0xff] }
 0xf8d   :  { %5761 = vmatprep.mubr.msk.f32.mxu0 %vm379_vm0, %v4958_v20  ;;  %5762 = vmatprep.mubr.msk.f32.mxu1 %vm379_vm0, %v4958_v20 }
 0xf8e   :  { %5050 = vmatmul.mubr.f32.vlgmr.msra.gmra.mrb[52].mxu0 %v4957_v62  ;;  %5121 = vmatmul.mubr.f32.vlgmr.msra.gmra.mrb[52].mxu1 %v4957_v62 }
 0xf8f   :  { %8365 = vmatpush1.bf16.msra.mxu0 %v11631_v25  ;;  %8413 = vmatpush1.bf16.msra.mxu1 %v11632_v24 }
 0xf90   :  { %5763 = vmatprep.mubr.msk.f32.mxu0 %vm379_vm0, %v4958_v20  ;;  %5764 = vmatprep.mubr.msk.f32.mxu1 %vm379_vm0, %v4958_v20  ;;  %v12539_v20 = vld [vmem:[#allocation16_spill] sm:$0xff] }
 0xf91   :  { %8367 = vmatprep.subr.bf16.mxu0 %v11633_v53  ;;  %8415 = vmatprep.subr.bf16.mxu1 %v11634_v43 }
 0xf93   :  { %8369 = vmatpush1.bf16.msra.mxu0 %v11635_v3  ;;  %8417 = vmatpush1.bf16.msra.mxu1 %v11636_v58 }
 0xf94   :  { %8371 = vmatprep.subr.bf16.mxu0 %v11637_v57  ;;  %8419 = vmatprep.subr.bf16.mxu1 %v11638_v47 }
 0xf97   :  { %8373 = vmatpush1.bf16.msra.mxu0 %v11639_v14  ;;  %8421 = vmatpush1.bf16.msra.mxu1 %v11640_v35 }
 0xf98   :  { %8375 = vmatprep.subr.bf16.mxu0 %v11703_v33  ;;  %8423 = vmatprep.subr.bf16.mxu1 %v11704_v54 }
 0xf9b   :  { %8377 = vmatpush1.bf16.msra.mxu0 %v11705_v40  ;;  %8425 = vmatpush1.bf16.msra.mxu1 %v11706_v41 }
 0xf9c   :  { %8379 = vmatprep.subr.bf16.mxu0 %v11707_v32  ;;  %8427 = vmatprep.subr.bf16.mxu1 %v11708_v63 }
 0xf9f   :  { %8381 = vmatpush1.bf16.msra.mxu0 %v11709_v38  ;;  %8429 = vmatpush1.bf16.msra.mxu1 %v11710_v37 }
 0xfa0   :  { %8383 = vmatprep.subr.bf16.mxu0 %v11711_v23  ;;  %8431 = vmatprep.subr.bf16.mxu1 %v11712_v18 }
 0xfa3   :  { %8385 = vmatpush1.bf16.msra.mxu0 %v11713_v17  ;;  %8433 = vmatpush1.bf16.msra.mxu1 %v11714_v28 }
 0xfa4   :  { %8387 = vmatprep.subr.bf16.mxu0 %v11715_v55  ;;  %8435 = vmatprep.subr.bf16.mxu1 %v11654_v16 }
 0xfa7   :  { %8389 = vmatpush1.bf16.msra.mxu0 %v11655_v6  ;;  %8437 = vmatpush1.bf16.msra.mxu1 %v11656_v12 }
 0xfa8   :  { %8391 = vmatprep.subr.bf16.mxu0 %v11657_v46  ;;  %8439 = vmatprep.subr.bf16.mxu1 %v11658_v48 }
 0xfab   :  { %8393 = vmatpush1.bf16.msra.mxu0 %v11659_v51  ;;  %8441 = vmatpush1.bf16.msra.mxu1 %v11660_v49 }
 0xfac   :  { %8395 = vmatprep.subr.bf16.mxu0 %v11661_v11  ;;  %8443 = vmatprep.subr.bf16.mxu1 %v11662_v56 }
 0xfaf   :  { %8397 = vmatpush1.bf16.msra.mxu0 %v11663_v19  ;;  %8445 = vmatpush1.bf16.msra.mxu1 %v11777_v21 }
 0xfb0   :  { %8399 = vmatprep.subr.bf16.mxu0 %v12517_v60  ;;  %8447 = vmatprep.subr.bf16.mxu1 %v12518_v4 }
 0xfb3   :  { %8401 = vmatpush1.bf16.msra.mxu0 %v12519_v61  ;;  %8449 = vmatpush1.bf16.msra.mxu1 %v12520_v44 }
 0xfb4   :  { %8403 = vmatprep.subr.bf16.mxu0 %v12521_v29  ;;  %8451 = vmatprep.subr.bf16.mxu1 %v12522_v13 }
 0xfb7   :  { %8405 = vmatpush1.bf16.msra.mxu0 %v12523_v39  ;;  %8453 = vmatpush1.bf16.msra.mxu1 %v12524_v27 }
 0xfb8   :  { %8407 = vmatprep.subr.bf16.mxu0 %v12525_v50  ;;  %8455 = vmatprep.subr.bf16.mxu1 %v12526_v59 }
 0xfbb   :  { %8409 = vmatpush1.bf16.msra.mxu0 %v12527_v26  ;;  %8457 = vmatpush1.bf16.msra.mxu1 %v12528_v1  ;;  %v4964_v1 = vpop.permute.xlu0 %4963 }
 0xfbc   :  { %8459 = vmatprep.subr.bf16.mxu0 %v12529_v10  ;;  %8507 = vmatprep.subr.bf16.mxu1 %v12530_v2  ;;  %v12540_v10 = vld [vmem:[#allocation17_spill] sm:$0xff]  ;;  %v12542_v2 = vld [vmem:[#allocation19_spill] sm:$0xff] }
 0xfbe   :  { %5192 = vmatmul.mubr.f32.vlgmr.msra.gmra.mrb[54].mxu0 %v4957_v62  ;;  %5263 = vmatmul.mubr.f32.vlgmr.msra.gmra.mrb[54].mxu1 %v4957_v62  ;;  %v12541_v62 = vld [vmem:[#allocation18_spill] sm:$0xff] }
 0xfbf   :  { %8461 = vmatpush1.bf16.msra.mxu0 %v12531_v52  ;;  %8509 = vmatpush1.bf16.msra.mxu1 %v12532_v7  ;;  %v12543_v52 = vld [vmem:[#allocation20_spill] sm:$0xff]  ;;  %v12544_v7 = vld [vmem:[#allocation21_spill] sm:$0xff] }
 0xfc0   :  { %8463 = vmatprep.subr.bf16.mxu0 %v12533_v8  ;;  %8511 = vmatprep.subr.bf16.mxu1 %v12534_v31  ;;  %v12545_v8 = vld [vmem:[#allocation22_spill] sm:$0xff]  ;;  %v12546_v31 = vld [vmem:[#allocation24_spill] sm:$0xff] }
 0xfc3   :  { %8465 = vmatpush1.bf16.msra.mxu0 %v12535_v42  ;;  %8513 = vmatpush1.bf16.msra.mxu1 %v12536_v5  ;;  %v12547_v42 = vld [vmem:[#allocation28_spill] sm:$0xff]  ;;  %v12548_v5 = vld [vmem:[#allocation29_spill] sm:$0xff] }
 0xfc4   :  { %8467 = vmatprep.subr.bf16.mxu0 %v12537_v34  ;;  %8515 = vmatprep.subr.bf16.mxu1 %v12538_v22  ;;  %v12549_v34 = vld [vmem:[#allocation30_spill] sm:$0xff]  ;;  %v12550_v22 = vld [vmem:[#allocation31_spill] sm:$0xff] }
 0xfc7   :  { %8469 = vmatpush1.bf16.msra.mxu0 %v12539_v20  ;;  %8517 = vmatpush1.bf16.msra.mxu1 %v12540_v10  ;;  %v12551_v20 = vld [vmem:[#allocation32_spill] sm:$0xff]  ;;  %v12552_v10 = vld [vmem:[#allocation33_spill] sm:$0xff] }
 0xfc8   :  { %8471 = vmatprep.subr.bf16.mxu0 %v12541_v62  ;;  %8519 = vmatprep.subr.bf16.mxu1 %v12542_v2  ;;  %v12553_v62 = vld [vmem:[#allocation34_spill] sm:$0xff]  ;;  %v12554_v2 = vld [vmem:[#allocation35_spill] sm:$0xff] }
 0xfcb   :  { %8473 = vmatpush1.bf16.msra.mxu0 %v12543_v52  ;;  %8521 = vmatpush1.bf16.msra.mxu1 %v12544_v7  ;;  %v12555_v52 = vld [vmem:[#allocation36_spill] sm:$0xff]  ;;  %v12556_v7 = vld [vmem:[#allocation37_spill] sm:$0xff] }
 0xfcc   :  { %8475 = vmatprep.subr.bf16.mxu0 %v12545_v8  ;;  %8523 = vmatprep.subr.bf16.mxu1 %v12546_v31  ;;  %v12557_v8 = vld [vmem:[#allocation38_spill] sm:$0xff]  ;;  %v12558_v31 = vld [vmem:[#allocation39_spill] sm:$0xff] }
 0xfcf   :  { %8477 = vmatpush1.bf16.msra.mxu0 %v12547_v42  ;;  %8525 = vmatpush1.bf16.msra.mxu1 %v12548_v5  ;;  %v12559_v42 = vld [vmem:[#allocation40_spill] sm:$0xff]  ;;  %v12560_v5 = vld [vmem:[#allocation41_spill] sm:$0xff] }
 0xfd0   :  { %8479 = vmatprep.subr.bf16.mxu0 %v12549_v34  ;;  %8527 = vmatprep.subr.bf16.mxu1 %v12550_v22  ;;  %v12561_v34 = vld [vmem:[#allocation42_spill] sm:$0xff]  ;;  %v12562_v22 = vld [vmem:[#allocation43_spill] sm:$0xff] }
 0xfd3   :  { %8481 = vmatpush1.bf16.msra.mxu0 %v12551_v20  ;;  %8529 = vmatpush1.bf16.msra.mxu1 %v12552_v10  ;;  %v12563_v20 = vld [vmem:[#allocation44_spill] sm:$0xff]  ;;  %v12564_v10 = vld [vmem:[#allocation45_spill] sm:$0xff] }
 0xfd4   :  { %8483 = vmatprep.subr.bf16.mxu0 %v12553_v62  ;;  %8531 = vmatprep.subr.bf16.mxu1 %v12554_v2  ;;  %v12565_v62 = vld [vmem:[#allocation46_spill] sm:$0xff]  ;;  %v12566_v2 = vld [vmem:[#allocation47_spill] sm:$0xff] }
 0xfd7   :  { %8485 = vmatpush1.bf16.msra.mxu0 %v12555_v52  ;;  %8533 = vmatpush1.bf16.msra.mxu1 %v12556_v7  ;;  %v12567_v52 = vld [vmem:[#allocation48_spill] sm:$0xff]  ;;  %v12568_v7 = vld [vmem:[#allocation49_spill] sm:$0xff] }
 0xfd8   :  { %8487 = vmatprep.subr.bf16.mxu0 %v12557_v8  ;;  %8535 = vmatprep.subr.bf16.mxu1 %v12558_v31  ;;  %v12569_v8 = vld [vmem:[#allocation50_spill] sm:$0xff]  ;;  %v12570_v31 = vld [vmem:[#allocation51_spill] sm:$0xff] }
 0xfdb   :  { %8489 = vmatpush1.bf16.msra.mxu0 %v12559_v42  ;;  %8537 = vmatpush1.bf16.msra.mxu1 %v12560_v5  ;;  %v12571_v42 = vld [vmem:[#allocation52_spill] sm:$0xff]  ;;  %v12572_v5 = vld [vmem:[#allocation53_spill] sm:$0xff] }
 0xfdc   :  { %8491 = vmatprep.subr.bf16.mxu0 %v12561_v34  ;;  %8539 = vmatprep.subr.bf16.mxu1 %v12562_v22  ;;  %v12573_v34 = vld [vmem:[#allocation54_spill] sm:$0xff]  ;;  %v12574_v22 = vld [vmem:[#allocation55_spill] sm:$0xff] }
 0xfdf   :  { %8493 = vmatpush1.bf16.msra.mxu0 %v12563_v20  ;;  %8541 = vmatpush1.bf16.msra.mxu1 %v12564_v10  ;;  %v12575_v20 = vld [vmem:[#allocation56_spill] sm:$0xff]  ;;  %v12576_v10 = vld [vmem:[#allocation57_spill] sm:$0xff] }
 0xfe0   :  { %8495 = vmatprep.subr.bf16.mxu0 %v12565_v62  ;;  %8543 = vmatprep.subr.bf16.mxu1 %v12566_v2  ;;  %v12577_v62 = vld [vmem:[#allocation58_spill] sm:$0xff]  ;;  %v12578_v2 = vld [vmem:[#allocation59_spill] sm:$0xff] }
 0xfe3   :  { %8497 = vmatpush1.bf16.msra.mxu0 %v12567_v52  ;;  %8545 = vmatpush1.bf16.msra.mxu1 %v12568_v7 }
 0xfe4   :  { %8499 = vmatprep.subr.bf16.mxu0 %v12569_v8  ;;  %8547 = vmatprep.subr.bf16.mxu1 %v12570_v31 }
 0xfe7   :  { %8501 = vmatpush1.bf16.msra.mxu0 %v12571_v42  ;;  %8549 = vmatpush1.bf16.msra.mxu1 %v12572_v5  ;;  %v12579_v42 = vld [vmem:[#allocation23_spill] sm:$0xff]  ;;  %v12580_v5 = vld [vmem:[#allocation26_spill] sm:$0xff] }
 0xfe8   :  { %8503 = vmatprep.subr.bf16.mxu0 %v12573_v34  ;;  %8551 = vmatprep.subr.bf16.mxu1 %v12574_v22  ;;  %v4968_v26 = vmul.f32 %v4964_v1, %v12579_v42  ;;  %v4969_v59 = vmul.f32 %v4964_v1, %v12580_v5  ;;  %v12581_v34 = vld [vmem:[#allocation62_spill] sm:$0xff]  ;;  %v12582_v22 = vld [vmem:[#allocation63_spill] sm:$0xff] }
 0xfe9   :  { %v4966_v50 = vmul.f32 %v4964_v1, %v12581_v34  ;;  %v4967_v27 = vmul.f32 %v4964_v1, %v12582_v22  ;;  %v12584_v22 = vld [vmem:[#allocation64_spill] sm:$0xff] }
 0xfea   :  { %v4970_v34 = vmul.f32 %v4964_v1, %v12584_v22 }
 0xfeb   :  { %8505 = vmatpush1.bf16.msra.mxu0 %v12575_v20  ;;  %8553 = vmatpush1.bf16.msra.mxu1 %v12576_v10  ;;  %v4976_v20 = vadd.f32 %v4968_v26, %v11618_v36  ;;  %v12583_v10 = vld [vmem:[#allocation27_spill] sm:$0xff]  ;;  %v4975_v13 = vadd.f32 %v4967_v27, %v11695_v0  ;;  %v12588_v27 = vld [vmem:[#allocation70_spill] sm:$0xff] }
 0xfec   :  { %8555 = vmatprep.subr.bf16.mxu0 %v12577_v62  ;;  %8603 = vmatprep.subr.bf16.mxu1 %v12578_v2  ;;  %v4977_v39 = vadd.f32 %v4969_v59, %v12583_v10  ;;  %v4974_v62 = vadd.f32 %v4966_v50, %v11770_v45  ;;  %v12585_v26 = vld [vmem:[#allocation67_spill] sm:$0xff]  ;;  %v12586_v10 = vld [vmem:[#allocation69_spill] sm:$0xff] }
 0xfed   :  { %v4971_v59 = vmul.f32 %v4964_v1, %v12585_v26  ;;  %v4973_v50 = vmul.f32 %v4964_v1, %v12586_v10 }
0x1061   :  { %v5051_v52 = vpop.f32.mrb[52].mxu0  ;;  %v5122_v7 = vpop.f32.mrb[52].mxu1 }
0x1062   :  { %v5053_v8 = vpop.f32.mrb[53].mxu0  ;;  %v5124_v31 = vpop.f32.mrb[53].mxu1  ;;  %v5271_v2 = vadd.f32 %v5122_v7, %v4976_v20  ;;  %v5269_v44 = vadd.f32 %v5051_v52, %v4974_v62  ;;  %v12587_v7 = vld [vmem:[#allocation68_spill] sm:$0xff] }
0x1063   :  { %v5272_v29 = vadd.f32 %v5124_v31, %v4977_v39  ;;  %v5270_v61 = vadd.f32 %v5053_v8, %v4975_v13  ;;  %v4972_v20 = vmul.f32 %v4964_v1, %v12587_v7  ;;  %v4978_v39 = vadd.f32 %v4970_v34, %v12588_v27  ;;  %v12589_v8 = vld [vmem:[#allocation71_spill] sm:$0xff] }
0x1064   :  { %v5285_v4 = vmul.f32 0.5, %v5271_v2  ;;  %v5277_v60 = vmul.f32 0.5, %v5269_v44 }
0x1065   :  { %v5286_v42 = vmul.f32 0.5, %v5272_v29  ;;  %v5278_v5 = vmul.f32 0.5, %v5270_v61  ;;  %v4979_v29 = vadd.f32 %v4971_v59, %v12589_v8 }
0x1066   :  { %8932 = vtanh.f32 %v5285_v4  ;;  %v12590_v4 = vld [vmem:[#allocation73_spill] sm:$0xff] }
0x1067   :  { %8934 = vtanh.f32 %v5286_v42  ;;  %v4981_v31 = vadd.f32 %v4973_v50, %v12590_v4  ;;  %v4980_v42 = vadd.f32 %v4972_v20, %v11628_v15 }
0x1068   :  { %8936 = vtanh.f32 %v5277_v60 }
0x1069   :  { %8938 = vtanh.f32 %v5278_v5 }
0x1070   :  { %v8933_v62 = vpop.eup %8932 }
0x1071   :  { %v8935_v10 = vpop.eup %8934  ;;  %v5289_v27 = vadd.f32 1.0, %v8933_v62 }
0x1072   :  { %v8937_v1 = vpop.eup %8936  ;;  %v5290_v7 = vadd.f32 1.0, %v8935_v10 }
0x1073   :  { %v8939_v34 = vpop.eup %8938  ;;  %v5281_v59 = vadd.f32 1.0, %v8937_v1  ;;  %v5291_v8 = vmul.f32 0.5, %v5289_v27 }
0x1074   :  { %v5292_v50 = vmul.f32 0.5, %v5290_v7 }
0x1075   :  { %v5283_v4 = vmul.f32 0.5, %v5281_v59 }
0x1091   :  { %v5193_v52 = vpop.f32.mrb[54].mxu0  ;;  %v5264_v13 = vpop.f32.mrb[54].mxu1 }
0x1092   :  { %v5273_v44 = vadd.f32 %v5193_v52, %v4978_v39  ;;  %v5195_v61 = vpop.f32.mrb[55].mxu0  ;;  %v5266_v60 = vpop.f32.mrb[55].mxu1  ;;  %v5275_v26 = vadd.f32 %v5264_v13, %v4980_v42  ;;  %v5282_v52 = vadd.f32 1.0, %v8939_v34 }
0x1093   :  { %v5274_v5 = vadd.f32 %v5195_v61, %v4979_v29  ;;  %v5276_v2 = vadd.f32 %v5266_v60, %v4981_v31  ;;  %v5303_v61 = vmul.f32 %v5291_v8, %v11043_v30  ;;  %v5304_v31 = vmul.f32 %v5292_v50, %v11045_v9 }
0x1094   :  { %8940 = vtanh.f32 %v5273_v44  ;;  %v5295_v39 = vmul.f32 0.5, %v5275_v26  ;;  %v5284_v29 = vmul.f32 0.5, %v5282_v52 }
0x1095   :  { %8942 = vtanh.f32 %v5274_v5  ;;  %v5296_v22 = vmul.f32 0.5, %v5276_v2 }
0x1097   :  { %8944 = vtanh.f32 %v5296_v22 }
0x1098   :  { %8946 = vtanh.f32 %v5295_v39  ;;  %v12608_v39 = vld [vmem:[#allocation64_spill] sm:$0xff] }
0x109e   :  { %v8941_v20 = vpop.eup %8940 }
0x109f   :  { %v8943_v44 = vpop.eup %8942  ;;  %v5305_v13 = vmul.f32 %v8941_v20, %v5283_v4  ;;  %v12610_v20 = vld [vmem:[#allocation67_spill] sm:$0xff] }
0x10a0   :  { %v5306_v60 = vmul.f32 %v8943_v44, %v5284_v29  ;;  %v12611_v29 = vld [vmem:[#allocation69_spill] sm:$0xff] }
0x10a1   :  { %v11167_v42 = vadd.f32 %v5305_v13, %v5303_v61  ;;  %v8945_v22 = vpop.eup %8944 }
0x10a2   :  { %v11169_v10 = vadd.f32 %v5306_v60, %v5304_v31  ;;  %v8947_v26 = vpop.eup %8946  ;;  %v5300_v7 = vadd.f32 1.0, %v8945_v22  ;;  %v12613_v22 = vld [vmem:[#allocation71_spill] sm:$0xff] }
0x10a3   :  { %8948 = vtanh.f32 %v11167_v42  ;;  %v5299_v27 = vadd.f32 1.0, %v8947_v26 }
0x10a4   :  { %8950 = vtanh.f32 %v11169_v10  ;;  %v5302_v62 = vmul.f32 0.5, %v5300_v7 }
0x10a5   :  { %v5301_v30 = vmul.f32 0.5, %v5299_v27 }
0x10ad   :  { %v8949_v5 = vpop.eup %8948 }
0x10ae   :  { %v8951_v2 = vpop.eup %8950  ;;  %v5311_v4 = vmul.f32 %v8949_v5, %v5301_v30  ;;  %v12614_v5 = vld [vmem:[#allocation73_spill] sm:$0xff] }
0x10af   :  { %v5312_v8 = vmul.f32 %v8951_v2, %v5302_v62 }
0x10b1   :  { %5766 = vmatprep.mubr.msk.f32.mxu0 %vm379_vm0, %v5312_v8  ;;  %5767 = vmatprep.mubr.msk.f32.mxu1 %vm379_vm0, %v5312_v8 }
0x10b2   :  { %5404 = vmatmul.mubr.f32.vlgmr.msra.gmra.mrb[56].mxu0 %v5311_v4  ;;  %5475 = vmatmul.mubr.f32.vlgmr.msra.gmra.mrb[56].mxu1 %v5311_v4 }
0x10b3   :  { %8557 = vmatpush1.bf16.msra.mxu0 %v11631_v25  ;;  %8605 = vmatpush1.bf16.msra.mxu1 %v11632_v24  ;;  %v12591_v25 = vld [vmem:[#allocation110_spill] sm:$0xff]  ;;  %v12592_v24 = vld [vmem:[#allocation111_spill] sm:$0xff] }
0x10b4   :  { %5768 = vmatprep.mubr.msk.f32.mxu0 %vm379_vm0, %v5312_v8  ;;  %5769 = vmatprep.mubr.msk.f32.mxu1 %vm379_vm0, %v5312_v8 }
0x10b5   :  { %8559 = vmatprep.subr.bf16.mxu0 %v11633_v53  ;;  %8607 = vmatprep.subr.bf16.mxu1 %v11634_v43  ;;  %v12593_v53 = vld [vmem:[#allocation112_spill] sm:$0xff]  ;;  %v12594_v43 = vld [vmem:[#allocation113_spill] sm:$0xff] }
0x10b7   :  { %8561 = vmatpush1.bf16.msra.mxu0 %v11635_v3  ;;  %8609 = vmatpush1.bf16.msra.mxu1 %v11636_v58  ;;  %v12595_v3 = vld [vmem:[#allocation114_spill] sm:$0xff]  ;;  %v12596_v58 = vld [vmem:[#allocation115_spill] sm:$0xff] }
0x10b8   :  { %8563 = vmatprep.subr.bf16.mxu0 %v11637_v57  ;;  %8611 = vmatprep.subr.bf16.mxu1 %v11638_v47  ;;  %v12597_v57 = vld [vmem:[#allocation116_spill] sm:$0xff]  ;;  %v12598_v47 = vld [vmem:[#allocation117_spill] sm:$0xff] }
0x10bb   :  { %8565 = vmatpush1.bf16.msra.mxu0 %v11639_v14  ;;  %8613 = vmatpush1.bf16.msra.mxu1 %v11640_v35  ;;  %v12599_v14 = vld [vmem:[#allocation118_spill] sm:$0xff]  ;;  %v12600_v35 = vld [vmem:[#allocation119_spill] sm:$0xff] }
0x10bc   :  { %8567 = vmatprep.subr.bf16.mxu0 %v11703_v33  ;;  %8615 = vmatprep.subr.bf16.mxu1 %v11704_v54  ;;  %v12605_v54 = vld [vmem:[#allocation62_spill] sm:$0xff] }
0x10bf   :  { %8569 = vmatpush1.bf16.msra.mxu0 %v11705_v40  ;;  %8617 = vmatpush1.bf16.msra.mxu1 %v11706_v41  ;;  %v12606_v41 = vld [vmem:[#allocation63_spill] sm:$0xff] }
0x10c0   :  { %8571 = vmatprep.subr.bf16.mxu0 %v11707_v32  ;;  %8619 = vmatprep.subr.bf16.mxu1 %v11708_v63 }
0x10c3   :  { %8573 = vmatpush1.bf16.msra.mxu0 %v11709_v38  ;;  %8621 = vmatpush1.bf16.msra.mxu1 %v11710_v37  ;;  %v12607_v38 = vld [vmem:[#allocation27_spill] sm:$0xff] }
0x10c4   :  { %8575 = vmatprep.subr.bf16.mxu0 %v11711_v23  ;;  %8623 = vmatprep.subr.bf16.mxu1 %v11712_v18 }
0x10c7   :  { %8577 = vmatpush1.bf16.msra.mxu0 %v11713_v17  ;;  %8625 = vmatpush1.bf16.msra.mxu1 %v11714_v28 }
0x10c8   :  { %8579 = vmatprep.subr.bf16.mxu0 %v11715_v55  ;;  %8627 = vmatprep.subr.bf16.mxu1 %v11654_v16  ;;  %v12602_v16 = vld [vmem:[#allocation121_spill] sm:$0xff] }
0x10cb   :  { %8581 = vmatpush1.bf16.msra.mxu0 %v11655_v6  ;;  %8629 = vmatpush1.bf16.msra.mxu1 %v11656_v12 }
0x10cc   :  { %8583 = vmatprep.subr.bf16.mxu0 %v11657_v46  ;;  %8631 = vmatprep.subr.bf16.mxu1 %v11658_v48 }
0x10cf   :  { %8585 = vmatpush1.bf16.msra.mxu0 %v11659_v51  ;;  %8633 = vmatpush1.bf16.msra.mxu1 %v11660_v49  ;;  %v5318_v51 = vpop.permute.xlu1 %5317  ;;  %v12603_v49 = vld [vmem:[#allocation23_spill] sm:$0xff] }
0x10d0   :  { %8587 = vmatprep.subr.bf16.mxu0 %v11661_v11  ;;  %8635 = vmatprep.subr.bf16.mxu1 %v11662_v56  ;;  %v5322_v11 = vmul.f32 %v5318_v51, %v12603_v49  ;;  %v12604_v56 = vld [vmem:[#allocation26_spill] sm:$0xff]  ;;  %v5320_v40 = vmul.f32 %v5318_v51, %v12605_v54  ;;  %v5321_v32 = vmul.f32 %v5318_v51, %v12606_v41 }
0x10d1   :  { %v5323_v33 = vmul.f32 %v5318_v51, %v12604_v56  ;;  %v5324_v52 = vmul.f32 %v5318_v51, %v12608_v39  ;;  %v5327_v44 = vmul.f32 %v5318_v51, %v12611_v29  ;;  %v5686_v39 = vstv %s11258_s5 }
0x10d2   :  { %v5330_v63 = vadd.f32 %v5322_v11, %v11618_v36  ;;  %v5328_v23 = vadd.f32 %v5320_v40, %v11770_v45  ;;  %v5329_v17 = vadd.f32 %v5321_v32, %v11695_v0  ;;  %v12609_v36 = vld [vmem:[#allocation68_spill] sm:$0xff]  ;;  %v5325_v45 = vmul.f32 %v5318_v51, %v12610_v20  ;;  %v12612_v0 = vld [vmem:[#allocation70_spill] sm:$0xff] }
0x10d3   :  { %8589 = vmatpush1.bf16.msra.mxu0 %v11663_v19  ;;  %8637 = vmatpush1.bf16.msra.mxu1 %v11777_v21  ;;  %v12601_v19 = vld [vmem:[#allocation120_spill] sm:$0xff]  ;;  %v5331_v37 = vadd.f32 %v5323_v33, %v12607_v38  ;;  %v5326_v50 = vmul.f32 %v5318_v51, %v12609_v36  ;;  %v5332_v61 = vadd.f32 %v5324_v52, %v12612_v0 }
0x10d4   :  { %8591 = vmatprep.subr.bf16.mxu0 %v12591_v25  ;;  %8639 = vmatprep.subr.bf16.mxu1 %v12592_v24  ;;  %v5333_v26 = vadd.f32 %v5325_v45, %v12613_v22  ;;  %v5335_v62 = vadd.f32 %v5327_v44, %v12614_v5 }
0x10d5   :  { %v5334_v31 = vadd.f32 %v5326_v50, %v11628_v15 }
0x10d7   :  { %8593 = vmatpush1.bf16.msra.mxu0 %v12593_v53  ;;  %8641 = vmatpush1.bf16.msra.mxu1 %v12594_v43 }
0x10d8   :  { %8595 = vmatprep.subr.bf16.mxu0 %v12595_v3  ;;  %8643 = vmatprep.subr.bf16.mxu1 %v12596_v58 }
0x10db   :  { %8597 = vmatpush1.bf16.msra.mxu0 %v12597_v57  ;;  %8645 = vmatpush1.bf16.msra.mxu1 %v12598_v47 }
0x10dc   :  { %8599 = vmatprep.subr.bf16.mxu0 %v12599_v14  ;;  %8647 = vmatprep.subr.bf16.mxu1 %v12600_v35 }
0x10df   :  { %8601 = vmatpush1.bf16.msra.mxu0 %v12601_v19  ;;  %8649 = vmatpush1.bf16.msra.mxu1 %v12602_v16 }
0x10e2   :  { %5546 = vmatmul.mubr.f32.vlgmr.msra.gmra.mrb[58].mxu0 %v5311_v4  ;;  %5617 = vmatmul.mubr.f32.vlgmr.msra.gmra.mrb[58].mxu1 %v5311_v4 }
0x1185   :  { %v5405_v6 = vpop.f32.mrb[56].mxu0  ;;  %v5476_v12 = vpop.f32.mrb[56].mxu1 }
0x1186   :  { %v5407_v46 = vpop.f32.mrb[57].mxu0  ;;  %v5478_v48 = vpop.f32.mrb[57].mxu1  ;;  %v5625_v18 = vadd.f32 %v5476_v12, %v5330_v63  ;;  %v5623_v55 = vadd.f32 %v5405_v6, %v5328_v23  ;;  %v5667_v63 = vld [vmem:[%s11257_s4] sm:$0x3] }
0x1187   :  { %v5626_v28 = vadd.f32 %v5478_v48, %v5331_v37  ;;  %v5624_v21 = vadd.f32 %v5407_v46, %v5329_v17 }
0x1188   :  { %v5639_v9 = vmul.f32 0.5, %v5625_v18  ;;  %v5631_v34 = vmul.f32 0.5, %v5623_v55 }
0x1189   :  { %v5640_v1 = vmul.f32 0.5, %v5626_v28  ;;  %v5632_v59 = vmul.f32 0.5, %v5624_v21  ;;  %v12616_v28 = vld [vmem:[#allocation60_spill] sm:$0xff] }
0x118a   :  { %8952 = vtanh.f32 %v5639_v9  ;;  %v5672_v55 = vrot.slane %v5667_v63, %v12616_v28 }
0x118b   :  { %8954 = vtanh.f32 %v5640_v1 }
0x118c   :  { %8956 = vtanh.f32 %v5631_v34 }
0x118d   :  { %8958 = vtanh.f32 %v5632_v59 }
0x1194   :  { %v8953_v4 = vpop.eup %8952 }
0x1195   :  { %v8955_v24 = vpop.eup %8954  ;;  %v5643_v3 = vadd.f32 1.0, %v8953_v4 }
0x1196   :  { %v8957_v53 = vpop.eup %8956  ;;  %v5644_v15 = vadd.f32 1.0, %v8955_v24 }
0x1197   :  { %v8959_v43 = vpop.eup %8958  ;;  %v5635_v47 = vadd.f32 1.0, %v8957_v53  ;;  %v5645_v35 = vmul.f32 0.5, %v5643_v3 }
0x1198   :  { %v5636_v14 = vadd.f32 1.0, %v8959_v43  ;;  %v5646_v19 = vmul.f32 0.5, %v5644_v15 }
0x1199   :  { %v5637_v16 = vmul.f32 0.5, %v5635_v47  ;;  %v5657_v48 = vmul.f32 %v5645_v35, %v11167_v42  ;;  %v12615_v42 = vld [vmem:[#allocation61_spill] sm:$0xff] }
0x119a   :  { %v5638_v12 = vmul.f32 0.5, %v5636_v14  ;;  %v5658_v49 = vmul.f32 %v5646_v19, %v11169_v10  ;;  %v5676_v18 = vrot.slane %v5667_v63, %v12615_v42 }
0x11b5   :  { %v5547_v13 = vpop.f32.mrb[58].mxu0  ;;  %v5618_v60 = vpop.f32.mrb[58].mxu1 }
0x11b6   :  { %v5627_v7 = vadd.f32 %v5547_v13, %v5332_v61  ;;  %v5549_v27 = vpop.f32.mrb[59].mxu0  ;;  %v5620_v2 = vpop.f32.mrb[59].mxu1  ;;  %v5629_v30 = vadd.f32 %v5618_v60, %v5334_v31 }
0x11b7   :  { %v5628_v8 = vadd.f32 %v5549_v27, %v5333_v26  ;;  %v5630_v25 = vadd.f32 %v5620_v2, %v5335_v62 }
0x11b8   :  { %8960 = vtanh.f32 %v5627_v7  ;;  %v5649_v58 = vmul.f32 0.5, %v5629_v30 }
0x11b9   :  { %8962 = vtanh.f32 %v5628_v8  ;;  %v5650_v57 = vmul.f32 0.5, %v5630_v25 }
0x11ba   :  { %8964 = vtanh.f32 %v5649_v58 }
0x11bb   :  { %8966 = vtanh.f32 %v5650_v57 }
0x11c2   :  { %v8961_v6 = vpop.eup %8960 }
0x11c3   :  { %v8963_v46 = vpop.eup %8962  ;;  %v5659_v51 = vmul.f32 %v8961_v6, %v5637_v16 }
0x11c4   :  { %v5660_v11 = vmul.f32 %v8963_v46, %v5638_v12  ;;  %v8965_v54 = vpop.eup %8964 }
0x11c5   :  { %v5661_v56 = vadd.f32 %v5659_v51, %v5657_v48  ;;  %v8967_v40 = vpop.eup %8966  ;;  %v5653_v41 = vadd.f32 1.0, %v8965_v54 }
0x11c6   :  { %v5662_v33 = vadd.f32 %v5660_v11, %v5658_v49  ;;  %v5654_v32 = vadd.f32 1.0, %v8967_v40 }
0x11c7   :  { %8968 = vtanh.f32 %v5661_v56  ;;  %v5655_v38 = vmul.f32 0.5, %v5653_v41 }
0x11c8   :  { %8970 = vtanh.f32 %v5662_v33  ;;  %v5656_v23 = vmul.f32 0.5, %v5654_v32 }
0x11d1   :  { %v8969_v37 = vpop.eup %8968 }
0x11d2   :  { %v8971_v17 = vpop.eup %8970  ;;  %v5665_v10 = vmul.f32 %v8969_v37, %v5655_v38 }
0x11d3   :  { %v5666_v21 = vmul.f32 %v8971_v17, %v5656_v23 }
0x11d4   :  { %v5679_v1 = vmul.f32 %v5672_v55, %v5665_v10 }
0x11d5   :  { %v5680_v9 = vmul.f32 %v5676_v18, %v5666_v21 }
0x11d7   :  { %v5681_v34 = vsel %vm379_vm0, %v5680_v9, 0.0 }
0x11d8   :  { %v5682_v59 = vadd.f32 %v5681_v34, %v5679_v1 }
0x11da   :  { %5683 = vadd.xlane.f32.xlu0 %v5682_v59 }
0x1267   :  { %v5684_v52 = vpop.xlane.xlu0 %5683 }
0x1268   :  { %v5687_v36 = vadd.f32 %v5686_v39, %v5684_v52 }
0x126a   :  { %5689 = vst.msk [vmem:[%s11259_s6] sm:$0xff] %vm5688_vm1, %v5687_v36 }
0x126b   :  { %5694 = vsyncpa [#allocation4], 1 }

</bundles_post_ra>
